<compile_context>
chip_gen: v5e
topology: v5e:2x2
jax: 0.10.0
libtpu: 0.0.40
codegen_flags: <defaults>
</compile_context>

<pallas_src>
import jax
import jax.numpy as jnp
from jax.experimental import pallas as pl
from jax.experimental.pallas import tpu as pltpu

PAD_ID = 1
VOCAB = 32
D_MODEL = 32
N_HEADS = 4
HEAD_DIM = D_MODEL // N_HEADS
FFN_DIM = 64
N_ENC_LAYERS = 2
N_DEC_LAYERS = 2

_ENC_NAMES = ["wqkv", "bqkv", "wo", "bo", "ln1_g", "ln1_b",
              "fc1_w", "fc1_b", "fc2_w", "fc2_b", "ln2_g", "ln2_b"]
_DEC_NAMES = ["s_wqkv", "s_bqkv", "s_wo", "s_bo", "ln1_g", "ln1_b",
              "c_wqkv", "c_bqkv", "c_wo", "c_bo", "ln2_g", "ln2_b",
              "fc1_w", "fc1_b", "fc2_w", "fc2_b", "ln3_g", "ln3_b"]


# ----------------------------- Host-side parameter packing -----------------------------

def _flatten_params(params, one_hot_enc, one_hot_dec, pos_enc, pos_dec):
    """Canonical ordered list of (name, 2-D f32 array) to pack into slabs."""
    q_scale = 1.0 / float(HEAD_DIM) ** 0.5
    # Fold 1/sqrt(head_dim) into the Q columns of every fused QKV projection.
    qkv_col_scale = jnp.concatenate(
        [jnp.full((1, D_MODEL), q_scale, jnp.float32),
         jnp.ones((1, 2 * D_MODEL), jnp.float32)], axis=1)

    def fold(name, a):
        if name.endswith("wqkv") or name.endswith("bqkv"):
            return a * qkv_col_scale
        return a

    items = [
        ("one_hot_enc", one_hot_enc),          # (B*S, V), already * sqrt(d_model)
        ("one_hot_dec", one_hot_dec),          # (B*T, V)
        ("pos_enc", pos_enc),                  # (B*S, D)
        ("pos_dec", pos_dec),                  # (B*T, D)
        ("enc_emb", params["enc_emb"]),        # (V, D)
        ("dec_emb", params["dec_emb"]),        # (V, D)
        ("dec_emb_T", params["dec_emb"].T),    # (D, V) pre-transposed tied projection
    ]
    for li, lp in enumerate(params["enc_layers"]):
        assert len(lp) == len(_ENC_NAMES)
        for n, a in zip(_ENC_NAMES, lp):
            items.append((f"enc{li}_{n}", fold(n, a)))
    for li, lp in enumerate(params["dec_layers"]):
        assert len(lp) == len(_DEC_NAMES)
        for n, a in zip(_DEC_NAMES, lp):
            items.append((f"dec{li}_{n}", fold(n, a)))
    return items


def _pack_by_width(items):
    """Pack 2-D arrays into one slab per distinct column width (row-concatenated)."""
    widths = sorted({int(a.shape[1]) for _, a in items}, reverse=True)
    slabs, layout = [], {}
    for si, w in enumerate(widths):
        rows, off = [], 0
        for name, a in items:
            if int(a.shape[1]) != w:
                continue
            layout[name] = (si, off, int(a.shape[0]))
            rows.append(a.astype(jnp.float32))
            off += int(a.shape[0])
        slabs.append(jnp.concatenate(rows, axis=0))
    return slabs, layout


# ----------------------------- Fused whole-model Pallas kernel -----------------------------

def _build_fused_kernel(B, S, T, layout, n_slabs):
    """Entire FSMT forward as one Pallas kernel (single invocation, VMEM-resident)."""
    D, H, Dh = D_MODEL, N_HEADS, HEAD_DIM

    def kernel(*refs):
        slab_refs = refs[:n_slabs]
        bias_ref = refs[n_slabs]                                   # (B, T, T)
        logits_ref, enc_attn_ref, dec_attn_ref, cross_attn_ref = refs[n_slabs + 1:]

        def P(name):
            si, off, rows = layout[name]
            return slab_refs[si][off:off + rows, :]

        def linear(x, w, b):
            return jnp.dot(x, w, preferred_element_type=jnp.float32) + b

        def layer_norm(x, g, b, eps=1e-5):
            mu = jnp.mean(x, axis=-1, keepdims=True)
            var = jnp.mean(jnp.square(x - mu), axis=-1, keepdims=True)
            return (x - mu) * jax.lax.rsqrt(var + eps) * g + b

        def split_heads(z2, Tz):
            # (B*Tz, D) -> (H*B, Tz, Dh) with batch index n = h*B + b.
            # Only a leading-dim split reshape, static lane slices and a leading-axis
            # concat (no lane-dim reshuffles, no 4-D transposes).
            z3 = z2.reshape(B, Tz, D)
            return jnp.concatenate(
                [z3[:, :, h * Dh:(h + 1) * Dh] for h in range(H)], axis=0)

        def mha(x_q, x_kv, Tq, Tk, pfx, bias_nqk, attn_ref, layer_idx, is_self):
            wqkv, bqkv = P(pfx + "wqkv"), P(pfx + "bqkv")
            wo, bo = P(pfx + "wo"), P(pfx + "bo")
            if is_self:
                qkv = linear(x_q, wqkv, bqkv)                      # fused (D, 3D) matmul
                q, k, v = qkv[:, :D], qkv[:, D:2 * D], qkv[:, 2 * D:]
            else:
                q = linear(x_q, wqkv[:, :D], bqkv[:, :D])
                kv = linear(x_kv, wqkv[:, D:], bqkv[:, D:])
                k, v = kv[:, :D], kv[:, D:]
            q3, k3, v3 = split_heads(q, Tq), split_heads(k, Tk), split_heads(v, Tk)
            # (H*B,Tq,Dh) x (H*B,Tk,Dh) -> (H*B,Tq,Tk); 1/sqrt(Dh) already folded into wqkv.
            s = jax.lax.dot_general(q3, k3, (((2,), (2,)), ((0,), (0,))),
                                    preferred_element_type=jnp.float32)
            if bias_nqk is not None:
                s = s + bias_nqk
            m = jnp.max(s, axis=-1, keepdims=True)
            e = jnp.exp(s - m)
            p = e / jnp.sum(e, axis=-1, keepdims=True)
            attn_ref[layer_idx] = p                                # one full-tensor store
            ctx = jax.lax.dot_general(p, v3, (((2,), (1,)), ((0,), (0,))),
                                      preferred_element_type=jnp.float32)  # (H*B,Tq,Dh)
            # Head-merge folded into the output projection:
            #   concat_h(ctx_h) @ Wo == sum_h ctx_h @ Wo[h*Dh:(h+1)*Dh]
            out = None
            for h in range(H):
                ctx_h = ctx[h * B:(h + 1) * B].reshape(B * Tq, Dh)
                t = jnp.dot(ctx_h, wo[h * Dh:(h + 1) * Dh, :],
                            preferred_element_type=jnp.float32)
                out = t if out is None else out + t
            return out + bo

        # ---- encoder (attention_mask is None in Fairseq.forward -> no padding mask) ----
        x = jnp.dot(P("one_hot_enc"), P("enc_emb"),
                    preferred_element_type=jnp.float32) + P("pos_enc")
        for li in range(N_ENC_LAYERS):
            pfx = f"enc{li}_"
            x = layer_norm(x + mha(x, x, S, S, pfx, None, enc_attn_ref, li, True),
                           P(pfx + "ln1_g"), P(pfx + "ln1_b"))
            h1 = jnp.maximum(linear(x, P(pfx + "fc1_w"), P(pfx + "fc1_b")), 0.0)
            x = layer_norm(x + linear(h1, P(pfx + "fc2_w"), P(pfx + "fc2_b")),
                           P(pfx + "ln2_g"), P(pfx + "ln2_b"))
        enc_out = x

        # ---- decoder: causal + label-pad bias, broadcast once over heads ----
        bias_nqk = jnp.concatenate([bias_ref[...]] * H, axis=0)    # (H*B, T, T), n = h*B + b
        y = jnp.dot(P("one_hot_dec"), P("dec_emb"),
                    preferred_element_type=jnp.float32) + P("pos_dec")
        for li in range(N_DEC_LAYERS):
            pfx = f"dec{li}_"
            y = layer_norm(
                y + mha(y, y, T, T, pfx + "s_", bias_nqk, dec_attn_ref, li, True),
                P(pfx + "ln1_g"), P(pfx + "ln1_b"))
            y = layer_norm(
                y + mha(y, enc_out, T, S, pfx + "c_", None, cross_attn_ref, li, False),
                P(pfx + "ln2_g"), P(pfx + "ln2_b"))
            h1 = jnp.maximum(linear(y, P(pfx + "fc1_w"), P(pfx + "fc1_b")), 0.0)
            y = layer_norm(y + linear(h1, P(pfx + "fc2_w"), P(pfx + "fc2_b")),
                           P(pfx + "ln3_g"), P(pfx + "ln3_b"))

        # ---- tied output projection against the pre-transposed (D, V) embedding ----
        logits_ref[...] = jnp.dot(y, P("dec_emb_T"), preferred_element_type=jnp.float32)

    return kernel


# ----------------------------- Model glue (thin JAX wrapper) -----------------------------

def make_label(tokens):
    # labels[:, 1:] = tokens[:, :-1]; labels[:, 0] = tokens[:, -1]; mask = (labels != 1)
    labels = jnp.concatenate([tokens[:, -1:], tokens[:, :-1]], axis=1)
    mask = (labels != PAD_ID).astype(jnp.int32)
    return labels, mask


def sinusoidal_positions(seq_len, dim):
    # TODO(synk): FSMT's SinusoidalPositionalEmbedding is pad-aware; plain 0..T-1 used here.
    pos = jnp.arange(seq_len, dtype=jnp.float32)[:, None]
    half = dim // 2
    inv = jnp.exp(-jnp.log(10000.0) * jnp.arange(half, dtype=jnp.float32) / half)
    ang = pos * inv[None, :]
    return jnp.concatenate([jnp.sin(ang), jnp.cos(ang)], axis=-1)


def fairseq_forward(params, input_ids, labels_in):
    """Fairseq.forward(input_ids, labels) -> logits + all attention maps (one fused kernel)."""
    B, S = input_ids.shape
    T = labels_in.shape[1]
    H = N_HEADS
    embed_scale = float(D_MODEL) ** 0.5

    # Fairseq.forward: shift labels & build decoder_attention_mask, use_cache=False.
    dec_ids, dec_mask = make_label(labels_in)

    # Tiny host-side prep; everything below rides in on the packed slabs (4 DMAs total).
    one_hot_enc = jax.nn.one_hot(input_ids.reshape(-1), VOCAB, dtype=jnp.float32) * embed_scale
    one_hot_dec = jax.nn.one_hot(dec_ids.reshape(-1), VOCAB, dtype=jnp.float32) * embed_scale
    pos_enc = jnp.tile(sinusoidal_positions(S, D_MODEL), (B, 1))        # (B*S, D)
    pos_dec = jnp.tile(sinusoidal_positions(T, D_MODEL), (B, 1))        # (B*T, D)
    causal = jnp.tril(jnp.ones((T, T), dtype=bool))
    allowed = causal[None, :, :] & dec_mask.astype(bool)[:, None, :]
    # TODO(synk): additive -1e9 mask (not -inf); fully-padded rows give a uniform softmax row.
    self_bias = jnp.where(allowed, 0.0, -1e9).astype(jnp.float32)       # (B, T, T)

    items = _flatten_params(params, one_hot_enc, one_hot_dec, pos_enc, pos_dec)
    slabs, layout = _pack_by_width(items)

    out_shape = (
        jax.ShapeDtypeStruct((B * T, VOCAB), jnp.float32),                        # logits
        jax.ShapeDtypeStruct((N_ENC_LAYERS, H * B, S, S), jnp.float32),           # enc attn
        jax.ShapeDtypeStruct((N_DEC_LAYERS, H * B, T, T), jnp.float32),           # dec self
        jax.ShapeDtypeStruct((N_DEC_LAYERS, H * B, T, S), jnp.float32),           # cross
    )

    # Single invocation, no grid: every input/output is a whole-array VMEM-resident block.
    # Total footprint ~0.7 MiB; fits the scoped default on v5e/v6e/v7x with wide margin.
    outs = pl.pallas_call(
        _build_fused_kernel(B, S, T, layout, len(slabs)),
        out_shape=out_shape,
        compiler_params=pltpu.CompilerParams(vmem_limit_bytes=32 * 1024 * 1024),
    )(*slabs, self_bias)

    logits = outs[0].reshape(B, T, VOCAB)

    def unpack(a, Tq, Tk):
        # kernel batch order is n = h*B + b  ->  (H, B, Tq, Tk) -> (B, H, Tq, Tk)
        return a.reshape(H, B, Tq, Tk).transpose(1, 0, 2, 3)

    enc_attns = tuple(unpack(outs[1][li], S, S) for li in range(N_ENC_LAYERS))
    dec_attns = tuple(unpack(outs[2][li], T, T) for li in range(N_DEC_LAYERS))
    cross_attns = tuple(unpack(outs[3][li], T, S) for li in range(N_DEC_LAYERS))
    return {
        "logits": logits,
        "encoder_attentions": enc_attns,
        "decoder_attentions": dec_attns,
        "cross_attentions": cross_attns,
    }


# ----------------------------- Deterministic parameter init -----------------------------

def init_params(key):
    keys = iter(jax.random.split(key, 64))

    def dense(fan_in, fan_out):
        w = jax.random.normal(next(keys), (fan_in, fan_out), jnp.float32) * (1.0 / fan_in ** 0.5)
        return w, jnp.zeros((1, fan_out), jnp.float32)

    def ln():
        return [jnp.ones((1, D_MODEL), jnp.float32), jnp.zeros((1, D_MODEL), jnp.float32)]

    def attn():
        wqkv, bqkv = dense(D_MODEL, 3 * D_MODEL)     # fused Q|K|V projection
        wo, bo = dense(D_MODEL, D_MODEL)
        return [wqkv, bqkv, wo, bo]

    def ffn():
        w1, b1 = dense(D_MODEL, FFN_DIM)
        w2, b2 = dense(FFN_DIM, D_MODEL)
        return [w1, b1, w2, b2]

    def enc_layer():
        return attn() + ln() + ffn() + ln()                    # 12 arrays

    def dec_layer():
        return attn() + ln() + attn() + ln() + ffn() + ln()    # 18 arrays

    return {
        "enc_emb": jax.random.normal(next(keys), (VOCAB, D_MODEL), jnp.float32) * 0.02,
        "dec_emb": jax.random.normal(next(keys), (VOCAB, D_MODEL), jnp.float32) * 0.02,
        "enc_layers": [enc_layer() for _ in range(N_ENC_LAYERS)],
        "dec_layers": [dec_layer() for _ in range(N_DEC_LAYERS)],
    }


# ----------------------------- Main -----------------------------

if __name__ == "__main__":
    key = jax.random.PRNGKey(0)
    pkey, ikey, lkey = jax.random.split(key, 3)
    params = init_params(pkey)
    assert len(params["enc_layers"][0]) == len(_ENC_NAMES)
    assert len(params["dec_layers"][0]) == len(_DEC_NAMES)

    B, S, T = 2, 8, 8
    input_ids = jax.random.randint(ikey, (B, S), 2, VOCAB, dtype=jnp.int32)
    tokens = jax.random.randint(lkey, (B, T), 2, VOCAB, dtype=jnp.int32)
    tokens = tokens.at[1, 6:].set(PAD_ID)   # padded tail -> exercises the label/key mask

    out = jax.jit(fairseq_forward)(params, input_ids, tokens)
    jax.block_until_ready(out)

    assert out["logits"].shape == (B, T, VOCAB)
    assert out["encoder_attentions"][0].shape == (B, N_HEADS, S, S)
    assert out["decoder_attentions"][0].shape == (B, N_HEADS, T, T)
    assert out["cross_attentions"][0].shape == (B, N_HEADS, T, S)
    assert bool(jnp.all(jnp.isfinite(out["logits"])))
    print("KERNEL_OK")
</pallas_src>

<mosaic_0001>
module attributes {stable_mosaic.version = 11 : i64} {
  func.func @kernel(%arg0: memref<198x96xf32, #tpu.memory_space<vmem>>, %arg1: memref<132x64xf32, #tpu.memory_space<vmem>>, %arg2: memref<638x32xf32, #tpu.memory_space<vmem>>, %arg3: memref<2x8x8xf32, #tpu.memory_space<vmem>>, %arg4: memref<16x32xf32, #tpu.memory_space<vmem>>, %arg5: memref<2x8x8x8xf32, #tpu.memory_space<vmem>>, %arg6: memref<2x8x8x8xf32, #tpu.memory_space<vmem>>, %arg7: memref<2x8x8x8xf32, #tpu.memory_space<vmem>>) attributes {dimension_semantics = [], scalar_prefetch = 0 : i64, scratch_operands = 0 : i64, tpu.core_type = #tpu.core_type<tc>} {
    %c0 = arith.constant 0 : index
    %c0_0 = arith.constant 0 : index
    %0 = vector.load %arg2[%c0, %c0_0] : memref<638x32xf32, #tpu.memory_space<vmem>>, vector<16x32xf32>
    %c64 = arith.constant 64 : index
    %c0_1 = arith.constant 0 : index
    %1 = vector.load %arg2[%c64, %c0_1] : memref<638x32xf32, #tpu.memory_space<vmem>>, vector<32x32xf32>
    %cst = arith.constant dense<0.000000e+00> : vector<16x32xf32>
    %2 = tpu.matmul %0, %1, %cst {dimension_numbers = #tpu.dot_dimension_numbers<[1], [0], [0], [1], [0, 0, 1, 1], [], []>} : vector<16x32xf32>, vector<32x32xf32>, vector<16x32xf32> -> vector<16x32xf32>
    %c32 = arith.constant 32 : index
    %c0_2 = arith.constant 0 : index
    %3 = vector.load %arg2[%c32, %c0_2] : memref<638x32xf32, #tpu.memory_space<vmem>>, vector<16x32xf32>
    %4 = arith.addf %2, %3 : vector<16x32xf32>
    %c0_3 = arith.constant 0 : index
    %c0_4 = arith.constant 0 : index
    %5 = vector.load %arg0[%c0_3, %c0_4] : memref<198x96xf32, #tpu.memory_space<vmem>>, vector<32x96xf32>
    %c32_5 = arith.constant 32 : index
    %c0_6 = arith.constant 0 : index
    %6 = vector.load %arg0[%c32_5, %c0_6] : memref<198x96xf32, #tpu.memory_space<vmem>>, vector<1x96xf32>
    %c160 = arith.constant 160 : index
    %c0_7 = arith.constant 0 : index
    %7 = vector.load %arg2[%c160, %c0_7] : memref<638x32xf32, #tpu.memory_space<vmem>>, vector<32x32xf32>
    %c192 = arith.constant 192 : index
    %c0_8 = arith.constant 0 : index
    %8 = vector.load %arg2[%c192, %c0_8] : memref<638x32xf32, #tpu.memory_space<vmem>>, vector<1x32xf32>
    %cst_9 = arith.constant dense<0.000000e+00> : vector<16x96xf32>
    %9 = tpu.matmul %4, %5, %cst_9 {dimension_numbers = #tpu.dot_dimension_numbers<[1], [0], [0], [1], [0, 0, 1, 1], [], []>} : vector<16x32xf32>, vector<32x96xf32>, vector<16x96xf32> -> vector<16x96xf32>
    %10 = vector.broadcast %6 : vector<1x96xf32> to vector<16x96xf32>
    %11 = arith.addf %9, %10 : vector<16x96xf32>
    %12 = vector.extract_strided_slice %11 {offsets = [0, 0], sizes = [16, 32], strides = [1, 1]} : vector<16x96xf32> to vector<16x32xf32>
    %13 = vector.extract_strided_slice %11 {offsets = [0, 32], sizes = [16, 32], strides = [1, 1]} : vector<16x96xf32> to vector<16x32xf32>
    %14 = vector.extract_strided_slice %11 {offsets = [0, 64], sizes = [16, 32], strides = [1, 1]} : vector<16x96xf32> to vector<16x32xf32>
    %15 = vector.shape_cast %12 : vector<16x32xf32> to vector<2x8x32xf32>
    %16 = vector.extract_strided_slice %15 {offsets = [0, 0, 0], sizes = [2, 8, 8], strides = [1, 1, 1]} : vector<2x8x32xf32> to vector<2x8x8xf32>
    %17 = vector.extract_strided_slice %15 {offsets = [0, 0, 8], sizes = [2, 8, 8], strides = [1, 1, 1]} : vector<2x8x32xf32> to vector<2x8x8xf32>
    %18 = vector.extract_strided_slice %15 {offsets = [0, 0, 16], sizes = [2, 8, 8], strides = [1, 1, 1]} : vector<2x8x32xf32> to vector<2x8x8xf32>
    %19 = vector.extract_strided_slice %15 {offsets = [0, 0, 24], sizes = [2, 8, 8], strides = [1, 1, 1]} : vector<2x8x32xf32> to vector<2x8x8xf32>
    %20 = tpu.concatenate %16, %17, %18, %19 in 0 : vector<2x8x8xf32>, vector<2x8x8xf32>, vector<2x8x8xf32>, vector<2x8x8xf32> -> vector<8x8x8xf32>
    %21 = vector.shape_cast %13 : vector<16x32xf32> to vector<2x8x32xf32>
    %22 = vector.extract_strided_slice %21 {offsets = [0, 0, 0], sizes = [2, 8, 8], strides = [1, 1, 1]} : vector<2x8x32xf32> to vector<2x8x8xf32>
    %23 = vector.extract_strided_slice %21 {offsets = [0, 0, 8], sizes = [2, 8, 8], strides = [1, 1, 1]} : vector<2x8x32xf32> to vector<2x8x8xf32>
    %24 = vector.extract_strided_slice %21 {offsets = [0, 0, 16], sizes = [2, 8, 8], strides = [1, 1, 1]} : vector<2x8x32xf32> to vector<2x8x8xf32>
    %25 = vector.extract_strided_slice %21 {offsets = [0, 0, 24], sizes = [2, 8, 8], strides = [1, 1, 1]} : vector<2x8x32xf32> to vector<2x8x8xf32>
    %26 = tpu.concatenate %22, %23, %24, %25 in 0 : vector<2x8x8xf32>, vector<2x8x8xf32>, vector<2x8x8xf32>, vector<2x8x8xf32> -> vector<8x8x8xf32>
    %27 = vector.shape_cast %14 : vector<16x32xf32> to vector<2x8x32xf32>
    %28 = vector.extract_strided_slice %27 {offsets = [0, 0, 0], sizes = [2, 8, 8], strides = [1, 1, 1]} : vector<2x8x32xf32> to vector<2x8x8xf32>
    %29 = vector.extract_strided_slice %27 {offsets = [0, 0, 8], sizes = [2, 8, 8], strides = [1, 1, 1]} : vector<2x8x32xf32> to vector<2x8x8xf32>
    %30 = vector.extract_strided_slice %27 {offsets = [0, 0, 16], sizes = [2, 8, 8], strides = [1, 1, 1]} : vector<2x8x32xf32> to vector<2x8x8xf32>
    %31 = vector.extract_strided_slice %27 {offsets = [0, 0, 24], sizes = [2, 8, 8], strides = [1, 1, 1]} : vector<2x8x32xf32> to vector<2x8x8xf32>
    %32 = tpu.concatenate %28, %29, %30, %31 in 0 : vector<2x8x8xf32>, vector<2x8x8xf32>, vector<2x8x8xf32>, vector<2x8x8xf32> -> vector<8x8x8xf32>
    %cst_10 = arith.constant dense<0.000000e+00> : vector<8x8x8xf32>
    %33 = tpu.matmul %20, %26, %cst_10 {dimension_numbers = #tpu.dot_dimension_numbers<[2], [2], [1], [1], [0, 0, 0, 1, 1, 1], [0], [0]>} : vector<8x8x8xf32>, vector<8x8x8xf32>, vector<8x8x8xf32> -> vector<8x8x8xf32>
    %cst_11 = arith.constant dense<0xFF800000> : vector<8x8xf32>
    %34 = vector.multi_reduction <maximumf>, %33, %cst_11 [2] : vector<8x8x8xf32> to vector<8x8xf32>
    %35 = vector.shape_cast %34 : vector<8x8xf32> to vector<8x8x1xf32>
    %36 = vector.broadcast %35 : vector<8x8x1xf32> to vector<8x8x8xf32>
    %37 = arith.subf %33, %36 : vector<8x8x8xf32>
    %38 = math.exp %37 : vector<8x8x8xf32>
    %cst_12 = arith.constant dense<0.000000e+00> : vector<8x8xf32>
    %39 = vector.multi_reduction <add>, %38, %cst_12 [2] : vector<8x8x8xf32> to vector<8x8xf32>
    %40 = vector.shape_cast %39 : vector<8x8xf32> to vector<8x8x1xf32>
    %41 = vector.broadcast %40 : vector<8x8x1xf32> to vector<8x8x8xf32>
    %42 = arith.divf %38, %41 : vector<8x8x8xf32>
    %c0_13 = arith.constant 0 : index
    %c0_14 = arith.constant 0 : index
    %c0_15 = arith.constant 0 : index
    %c0_16 = arith.constant 0 : index
    %43 = vector.load %arg5[%c0_13, %c0_14, %c0_15, %c0_16] : memref<2x8x8x8xf32, #tpu.memory_space<vmem>>, vector<1x8x8x8xf32>
    %44 = vector.shape_cast %43 : vector<1x8x8x8xf32> to vector<8x8x8xf32>
    %45 = vector.shape_cast %42 : vector<8x8x8xf32> to vector<1x8x8x8xf32>
    tpu.vector_store %arg5[%c0_13, %c0_14, %c0_15, %c0_16], %45 {strides = array<i32>} : memref<2x8x8x8xf32, #tpu.memory_space<vmem>>, vector<1x8x8x8xf32>,
    %cst_17 = arith.constant dense<0.000000e+00> : vector<8x8x8xf32>
    %46 = tpu.matmul %42, %32, %cst_17 {dimension_numbers = #tpu.dot_dimension_numbers<[2], [1], [1], [2], [0, 0, 0, 1, 1, 2], [0], [0]>} : vector<8x8x8xf32>, vector<8x8x8xf32>, vector<8x8x8xf32> -> vector<8x8x8xf32>
    %47 = vector.extract_strided_slice %46 {offsets = [0, 0, 0], sizes = [2, 8, 8], strides = [1, 1, 1]} : vector<8x8x8xf32> to vector<2x8x8xf32>
    %48 = vector.shape_cast %47 : vector<2x8x8xf32> to vector<16x8xf32>
    %49 = vector.extract_strided_slice %7 {offsets = [0, 0], sizes = [8, 32], strides = [1, 1]} : vector<32x32xf32> to vector<8x32xf32>
    %cst_18 = arith.constant dense<0.000000e+00> : vector<16x32xf32>
    %50 = tpu.matmul %48, %49, %cst_18 {dimension_numbers = #tpu.dot_dimension_numbers<[1], [0], [0], [1], [0, 0, 1, 1], [], []>} : vector<16x8xf32>, vector<8x32xf32>, vector<16x32xf32> -> vector<16x32xf32>
    %51 = vector.extract_strided_slice %46 {offsets = [2, 0, 0], sizes = [2, 8, 8], strides = [1, 1, 1]} : vector<8x8x8xf32> to vector<2x8x8xf32>
    %52 = vector.shape_cast %51 : vector<2x8x8xf32> to vector<16x8xf32>
    %53 = vector.extract_strided_slice %7 {offsets = [8, 0], sizes = [8, 32], strides = [1, 1]} : vector<32x32xf32> to vector<8x32xf32>
    %cst_19 = arith.constant dense<0.000000e+00> : vector<16x32xf32>
    %54 = tpu.matmul %52, %53, %cst_19 {dimension_numbers = #tpu.dot_dimension_numbers<[1], [0], [0], [1], [0, 0, 1, 1], [], []>} : vector<16x8xf32>, vector<8x32xf32>, vector<16x32xf32> -> vector<16x32xf32>
    %55 = arith.addf %50, %54 : vector<16x32xf32>
    %56 = vector.extract_strided_slice %46 {offsets = [4, 0, 0], sizes = [2, 8, 8], strides = [1, 1, 1]} : vector<8x8x8xf32> to vector<2x8x8xf32>
    %57 = vector.shape_cast %56 : vector<2x8x8xf32> to vector<16x8xf32>
    %58 = vector.extract_strided_slice %7 {offsets = [16, 0], sizes = [8, 32], strides = [1, 1]} : vector<32x32xf32> to vector<8x32xf32>
    %cst_20 = arith.constant dense<0.000000e+00> : vector<16x32xf32>
    %59 = tpu.matmul %57, %58, %cst_20 {dimension_numbers = #tpu.dot_dimension_numbers<[1], [0], [0], [1], [0, 0, 1, 1], [], []>} : vector<16x8xf32>, vector<8x32xf32>, vector<16x32xf32> -> vector<16x32xf32>
    %60 = arith.addf %55, %59 : vector<16x32xf32>
    %61 = vector.extract_strided_slice %46 {offsets = [6, 0, 0], sizes = [2, 8, 8], strides = [1, 1, 1]} : vector<8x8x8xf32> to vector<2x8x8xf32>
    %62 = vector.shape_cast %61 : vector<2x8x8xf32> to vector<16x8xf32>
    %63 = vector.extract_strided_slice %7 {offsets = [24, 0], sizes = [8, 32], strides = [1, 1]} : vector<32x32xf32> to vector<8x32xf32>
    %cst_21 = arith.constant dense<0.000000e+00> : vector<16x32xf32>
    %64 = tpu.matmul %62, %63, %cst_21 {dimension_numbers = #tpu.dot_dimension_numbers<[1], [0], [0], [1], [0, 0, 1, 1], [], []>} : vector<16x8xf32>, vector<8x32xf32>, vector<16x32xf32> -> vector<16x32xf32>
    %65 = arith.addf %60, %64 : vector<16x32xf32>
    %66 = vector.broadcast %8 : vector<1x32xf32> to vector<16x32xf32>
    %67 = arith.addf %65, %66 : vector<16x32xf32>
    %68 = arith.addf %4, %67 : vector<16x32xf32>
    %c193 = arith.constant 193 : index
    %c0_22 = arith.constant 0 : index
    %69 = vector.load %arg2[%c193, %c0_22] : memref<638x32xf32, #tpu.memory_space<vmem>>, vector<1x32xf32>
    %c194 = arith.constant 194 : index
    %c0_23 = arith.constant 0 : index
    %70 = vector.load %arg2[%c194, %c0_23] : memref<638x32xf32, #tpu.memory_space<vmem>>, vector<1x32xf32>
    %cst_24 = arith.constant dense<0.000000e+00> : vector<16xf32>
    %71 = vector.multi_reduction <add>, %68, %cst_24 [1] : vector<16x32xf32> to vector<16xf32>
    %72 = vector.shape_cast %71 : vector<16xf32> to vector<16x1xf32>
    %cst_25 = arith.constant 3.200000e+01 : f32
    %73 = vector.broadcast %cst_25 : f32 to vector<16x1xf32>
    %74 = arith.divf %72, %73 : vector<16x1xf32>
    %75 = vector.broadcast %74 : vector<16x1xf32> to vector<16x32xf32>
    %76 = arith.subf %68, %75 : vector<16x32xf32>
    %77 = arith.mulf %76, %76 : vector<16x32xf32>
    %cst_26 = arith.constant dense<0.000000e+00> : vector<16xf32>
    %78 = vector.multi_reduction <add>, %77, %cst_26 [1] : vector<16x32xf32> to vector<16xf32>
    %79 = vector.shape_cast %78 : vector<16xf32> to vector<16x1xf32>
    %cst_27 = arith.constant 3.200000e+01 : f32
    %80 = vector.broadcast %cst_27 : f32 to vector<16x1xf32>
    %81 = arith.divf %79, %80 : vector<16x1xf32>
    %82 = vector.broadcast %74 : vector<16x1xf32> to vector<16x32xf32>
    %83 = arith.subf %68, %82 : vector<16x32xf32>
    %cst_28 = arith.constant 9.99999974E-6 : f32
    %84 = vector.broadcast %cst_28 : f32 to vector<16x1xf32>
    %85 = arith.addf %81, %84 : vector<16x1xf32>
    %86 = math.rsqrt %85 : vector<16x1xf32>
    %87 = vector.broadcast %86 : vector<16x1xf32> to vector<16x32xf32>
    %88 = arith.mulf %83, %87 : vector<16x32xf32>
    %89 = vector.broadcast %69 : vector<1x32xf32> to vector<16x32xf32>
    %90 = arith.mulf %88, %89 : vector<16x32xf32>
    %91 = vector.broadcast %70 : vector<1x32xf32> to vector<16x32xf32>
    %92 = arith.addf %90, %91 : vector<16x32xf32>
    %c0_29 = arith.constant 0 : index
    %c0_30 = arith.constant 0 : index
    %93 = vector.load %arg1[%c0_29, %c0_30] : memref<132x64xf32, #tpu.memory_space<vmem>>, vector<32x64xf32>
    %c32_31 = arith.constant 32 : index
    %c0_32 = arith.constant 0 : index
    %94 = vector.load %arg1[%c32_31, %c0_32] : memref<132x64xf32, #tpu.memory_space<vmem>>, vector<1x64xf32>
    %cst_33 = arith.constant dense<0.000000e+00> : vector<16x64xf32>
    %95 = tpu.matmul %92, %93, %cst_33 {dimension_numbers = #tpu.dot_dimension_numbers<[1], [0], [0], [1], [0, 0, 1, 1], [], []>} : vector<16x32xf32>, vector<32x64xf32>, vector<16x64xf32> -> vector<16x64xf32>
    %96 = vector.broadcast %94 : vector<1x64xf32> to vector<16x64xf32>
    %97 = arith.addf %95, %96 : vector<16x64xf32>
    %cst_34 = arith.constant 0.000000e+00 : f32
    %98 = vector.broadcast %cst_34 : f32 to vector<16x64xf32>
    %99 = arith.maximumf %97, %98 : vector<16x64xf32>
    %c195 = arith.constant 195 : index
    %c0_35 = arith.constant 0 : index
    %100 = vector.load %arg2[%c195, %c0_35] : memref<638x32xf32, #tpu.memory_space<vmem>>, vector<64x32xf32>
    %c259 = arith.constant 259 : index
    %c0_36 = arith.constant 0 : index
    %101 = vector.load %arg2[%c259, %c0_36] : memref<638x32xf32, #tpu.memory_space<vmem>>, vector<1x32xf32>
    %cst_37 = arith.constant dense<0.000000e+00> : vector<16x32xf32>
    %102 = tpu.matmul %99, %100, %cst_37 {dimension_numbers = #tpu.dot_dimension_numbers<[1], [0], [0], [1], [0, 0, 1, 1], [], []>} : vector<16x64xf32>, vector<64x32xf32>, vector<16x32xf32> -> vector<16x32xf32>
    %103 = vector.broadcast %101 : vector<1x32xf32> to vector<16x32xf32>
    %104 = arith.addf %102, %103 : vector<16x32xf32>
    %105 = arith.addf %92, %104 : vector<16x32xf32>
    %c260 = arith.constant 260 : index
    %c0_38 = arith.constant 0 : index
    %106 = vector.load %arg2[%c260, %c0_38] : memref<638x32xf32, #tpu.memory_space<vmem>>, vector<1x32xf32>
    %c261 = arith.constant 261 : index
    %c0_39 = arith.constant 0 : index
    %107 = vector.load %arg2[%c261, %c0_39] : memref<638x32xf32, #tpu.memory_space<vmem>>, vector<1x32xf32>
    %cst_40 = arith.constant dense<0.000000e+00> : vector<16xf32>
    %108 = vector.multi_reduction <add>, %105, %cst_40 [1] : vector<16x32xf32> to vector<16xf32>
    %109 = vector.shape_cast %108 : vector<16xf32> to vector<16x1xf32>
    %cst_41 = arith.constant 3.200000e+01 : f32
    %110 = vector.broadcast %cst_41 : f32 to vector<16x1xf32>
    %111 = arith.divf %109, %110 : vector<16x1xf32>
    %112 = vector.broadcast %111 : vector<16x1xf32> to vector<16x32xf32>
    %113 = arith.subf %105, %112 : vector<16x32xf32>
    %114 = arith.mulf %113, %113 : vector<16x32xf32>
    %cst_42 = arith.constant dense<0.000000e+00> : vector<16xf32>
    %115 = vector.multi_reduction <add>, %114, %cst_42 [1] : vector<16x32xf32> to vector<16xf32>
    %116 = vector.shape_cast %115 : vector<16xf32> to vector<16x1xf32>
    %cst_43 = arith.constant 3.200000e+01 : f32
    %117 = vector.broadcast %cst_43 : f32 to vector<16x1xf32>
    %118 = arith.divf %116, %117 : vector<16x1xf32>
    %119 = vector.broadcast %111 : vector<16x1xf32> to vector<16x32xf32>
    %120 = arith.subf %105, %119 : vector<16x32xf32>
    %cst_44 = arith.constant 9.99999974E-6 : f32
    %121 = vector.broadcast %cst_44 : f32 to vector<16x1xf32>
    %122 = arith.addf %118, %121 : vector<16x1xf32>
    %123 = math.rsqrt %122 : vector<16x1xf32>
    %124 = vector.broadcast %123 : vector<16x1xf32> to vector<16x32xf32>
    %125 = arith.mulf %120, %124 : vector<16x32xf32>
    %126 = vector.broadcast %106 : vector<1x32xf32> to vector<16x32xf32>
    %127 = arith.mulf %125, %126 : vector<16x32xf32>
    %128 = vector.broadcast %107 : vector<1x32xf32> to vector<16x32xf32>
    %129 = arith.addf %127, %128 : vector<16x32xf32>
    %c33 = arith.constant 33 : index
    %c0_45 = arith.constant 0 : index
    %130 = vector.load %arg0[%c33, %c0_45] : memref<198x96xf32, #tpu.memory_space<vmem>>, vector<32x96xf32>
    %c65 = arith.constant 65 : index
    %c0_46 = arith.constant 0 : index
    %131 = vector.load %arg0[%c65, %c0_46] : memref<198x96xf32, #tpu.memory_space<vmem>>, vector<1x96xf32>
    %c262 = arith.constant 262 : index
    %c0_47 = arith.constant 0 : index
    %132 = vector.load %arg2[%c262, %c0_47] : memref<638x32xf32, #tpu.memory_space<vmem>>, vector<32x32xf32>
    %c294 = arith.constant 294 : index
    %c0_48 = arith.constant 0 : index
    %133 = vector.load %arg2[%c294, %c0_48] : memref<638x32xf32, #tpu.memory_space<vmem>>, vector<1x32xf32>
    %cst_49 = arith.constant dense<0.000000e+00> : vector<16x96xf32>
    %134 = tpu.matmul %129, %130, %cst_49 {dimension_numbers = #tpu.dot_dimension_numbers<[1], [0], [0], [1], [0, 0, 1, 1], [], []>} : vector<16x32xf32>, vector<32x96xf32>, vector<16x96xf32> -> vector<16x96xf32>
    %135 = vector.broadcast %131 : vector<1x96xf32> to vector<16x96xf32>
    %136 = arith.addf %134, %135 : vector<16x96xf32>
    %137 = vector.extract_strided_slice %136 {offsets = [0, 0], sizes = [16, 32], strides = [1, 1]} : vector<16x96xf32> to vector<16x32xf32>
    %138 = vector.extract_strided_slice %136 {offsets = [0, 32], sizes = [16, 32], strides = [1, 1]} : vector<16x96xf32> to vector<16x32xf32>
    %139 = vector.extract_strided_slice %136 {offsets = [0, 64], sizes = [16, 32], strides = [1, 1]} : vector<16x96xf32> to vector<16x32xf32>
    %140 = vector.shape_cast %137 : vector<16x32xf32> to vector<2x8x32xf32>
    %141 = vector.extract_strided_slice %140 {offsets = [0, 0, 0], sizes = [2, 8, 8], strides = [1, 1, 1]} : vector<2x8x32xf32> to vector<2x8x8xf32>
    %142 = vector.extract_strided_slice %140 {offsets = [0, 0, 8], sizes = [2, 8, 8], strides = [1, 1, 1]} : vector<2x8x32xf32> to vector<2x8x8xf32>
    %143 = vector.extract_strided_slice %140 {offsets = [0, 0, 16], sizes = [2, 8, 8], strides = [1, 1, 1]} : vector<2x8x32xf32> to vector<2x8x8xf32>
    %144 = vector.extract_strided_slice %140 {offsets = [0, 0, 24], sizes = [2, 8, 8], strides = [1, 1, 1]} : vector<2x8x32xf32> to vector<2x8x8xf32>
    %145 = tpu.concatenate %141, %142, %143, %144 in 0 : vector<2x8x8xf32>, vector<2x8x8xf32>, vector<2x8x8xf32>, vector<2x8x8xf32> -> vector<8x8x8xf32>
    %146 = vector.shape_cast %138 : vector<16x32xf32> to vector<2x8x32xf32>
    %147 = vector.extract_strided_slice %146 {offsets = [0, 0, 0], sizes = [2, 8, 8], strides = [1, 1, 1]} : vector<2x8x32xf32> to vector<2x8x8xf32>
    %148 = vector.extract_strided_slice %146 {offsets = [0, 0, 8], sizes = [2, 8, 8], strides = [1, 1, 1]} : vector<2x8x32xf32> to vector<2x8x8xf32>
    %149 = vector.extract_strided_slice %146 {offsets = [0, 0, 16], sizes = [2, 8, 8], strides = [1, 1, 1]} : vector<2x8x32xf32> to vector<2x8x8xf32>
    %150 = vector.extract_strided_slice %146 {offsets = [0, 0, 24], sizes = [2, 8, 8], strides = [1, 1, 1]} : vector<2x8x32xf32> to vector<2x8x8xf32>
    %151 = tpu.concatenate %147, %148, %149, %150 in 0 : vector<2x8x8xf32>, vector<2x8x8xf32>, vector<2x8x8xf32>, vector<2x8x8xf32> -> vector<8x8x8xf32>
    %152 = vector.shape_cast %139 : vector<16x32xf32> to vector<2x8x32xf32>
    %153 = vector.extract_strided_slice %152 {offsets = [0, 0, 0], sizes = [2, 8, 8], strides = [1, 1, 1]} : vector<2x8x32xf32> to vector<2x8x8xf32>
    %154 = vector.extract_strided_slice %152 {offsets = [0, 0, 8], sizes = [2, 8, 8], strides = [1, 1, 1]} : vector<2x8x32xf32> to vector<2x8x8xf32>
    %155 = vector.extract_strided_slice %152 {offsets = [0, 0, 16], sizes = [2, 8, 8], strides = [1, 1, 1]} : vector<2x8x32xf32> to vector<2x8x8xf32>
    %156 = vector.extract_strided_slice %152 {offsets = [0, 0, 24], sizes = [2, 8, 8], strides = [1, 1, 1]} : vector<2x8x32xf32> to vector<2x8x8xf32>
    %157 = tpu.concatenate %153, %154, %155, %156 in 0 : vector<2x8x8xf32>, vector<2x8x8xf32>, vector<2x8x8xf32>, vector<2x8x8xf32> -> vector<8x8x8xf32>
    %cst_50 = arith.constant dense<0.000000e+00> : vector<8x8x8xf32>
    %158 = tpu.matmul %145, %151, %cst_50 {dimension_numbers = #tpu.dot_dimension_numbers<[2], [2], [1], [1], [0, 0, 0, 1, 1, 1], [0], [0]>} : vector<8x8x8xf32>, vector<8x8x8xf32>, vector<8x8x8xf32> -> vector<8x8x8xf32>
    %cst_51 = arith.constant dense<0xFF800000> : vector<8x8xf32>
    %159 = vector.multi_reduction <maximumf>, %158, %cst_51 [2] : vector<8x8x8xf32> to vector<8x8xf32>
    %160 = vector.shape_cast %159 : vector<8x8xf32> to vector<8x8x1xf32>
    %161 = vector.broadcast %160 : vector<8x8x1xf32> to vector<8x8x8xf32>
    %162 = arith.subf %158, %161 : vector<8x8x8xf32>
    %163 = math.exp %162 : vector<8x8x8xf32>
    %cst_52 = arith.constant dense<0.000000e+00> : vector<8x8xf32>
    %164 = vector.multi_reduction <add>, %163, %cst_52 [2] : vector<8x8x8xf32> to vector<8x8xf32>
    %165 = vector.shape_cast %164 : vector<8x8xf32> to vector<8x8x1xf32>
    %166 = vector.broadcast %165 : vector<8x8x1xf32> to vector<8x8x8xf32>
    %167 = arith.divf %163, %166 : vector<8x8x8xf32>
    %c1 = arith.constant 1 : index
    %c0_53 = arith.constant 0 : index
    %c0_54 = arith.constant 0 : index
    %c0_55 = arith.constant 0 : index
    %168 = vector.load %arg5[%c1, %c0_53, %c0_54, %c0_55] : memref<2x8x8x8xf32, #tpu.memory_space<vmem>>, vector<1x8x8x8xf32>
    %169 = vector.shape_cast %168 : vector<1x8x8x8xf32> to vector<8x8x8xf32>
    %170 = vector.shape_cast %167 : vector<8x8x8xf32> to vector<1x8x8x8xf32>
    tpu.vector_store %arg5[%c1, %c0_53, %c0_54, %c0_55], %170 {strides = array<i32>} : memref<2x8x8x8xf32, #tpu.memory_space<vmem>>, vector<1x8x8x8xf32>,
    %cst_56 = arith.constant dense<0.000000e+00> : vector<8x8x8xf32>
    %171 = tpu.matmul %167, %157, %cst_56 {dimension_numbers = #tpu.dot_dimension_numbers<[2], [1], [1], [2], [0, 0, 0, 1, 1, 2], [0], [0]>} : vector<8x8x8xf32>, vector<8x8x8xf32>, vector<8x8x8xf32> -> vector<8x8x8xf32>
    %172 = vector.extract_strided_slice %171 {offsets = [0, 0, 0], sizes = [2, 8, 8], strides = [1, 1, 1]} : vector<8x8x8xf32> to vector<2x8x8xf32>
    %173 = vector.shape_cast %172 : vector<2x8x8xf32> to vector<16x8xf32>
    %174 = vector.extract_strided_slice %132 {offsets = [0, 0], sizes = [8, 32], strides = [1, 1]} : vector<32x32xf32> to vector<8x32xf32>
    %cst_57 = arith.constant dense<0.000000e+00> : vector<16x32xf32>
    %175 = tpu.matmul %173, %174, %cst_57 {dimension_numbers = #tpu.dot_dimension_numbers<[1], [0], [0], [1], [0, 0, 1, 1], [], []>} : vector<16x8xf32>, vector<8x32xf32>, vector<16x32xf32> -> vector<16x32xf32>
    %176 = vector.extract_strided_slice %171 {offsets = [2, 0, 0], sizes = [2, 8, 8], strides = [1, 1, 1]} : vector<8x8x8xf32> to vector<2x8x8xf32>
    %177 = vector.shape_cast %176 : vector<2x8x8xf32> to vector<16x8xf32>
    %178 = vector.extract_strided_slice %132 {offsets = [8, 0], sizes = [8, 32], strides = [1, 1]} : vector<32x32xf32> to vector<8x32xf32>
    %cst_58 = arith.constant dense<0.000000e+00> : vector<16x32xf32>
    %179 = tpu.matmul %177, %178, %cst_58 {dimension_numbers = #tpu.dot_dimension_numbers<[1], [0], [0], [1], [0, 0, 1, 1], [], []>} : vector<16x8xf32>, vector<8x32xf32>, vector<16x32xf32> -> vector<16x32xf32>
    %180 = arith.addf %175, %179 : vector<16x32xf32>
    %181 = vector.extract_strided_slice %171 {offsets = [4, 0, 0], sizes = [2, 8, 8], strides = [1, 1, 1]} : vector<8x8x8xf32> to vector<2x8x8xf32>
    %182 = vector.shape_cast %181 : vector<2x8x8xf32> to vector<16x8xf32>
    %183 = vector.extract_strided_slice %132 {offsets = [16, 0], sizes = [8, 32], strides = [1, 1]} : vector<32x32xf32> to vector<8x32xf32>
    %cst_59 = arith.constant dense<0.000000e+00> : vector<16x32xf32>
    %184 = tpu.matmul %182, %183, %cst_59 {dimension_numbers = #tpu.dot_dimension_numbers<[1], [0], [0], [1], [0, 0, 1, 1], [], []>} : vector<16x8xf32>, vector<8x32xf32>, vector<16x32xf32> -> vector<16x32xf32>
    %185 = arith.addf %180, %184 : vector<16x32xf32>
    %186 = vector.extract_strided_slice %171 {offsets = [6, 0, 0], sizes = [2, 8, 8], strides = [1, 1, 1]} : vector<8x8x8xf32> to vector<2x8x8xf32>
    %187 = vector.shape_cast %186 : vector<2x8x8xf32> to vector<16x8xf32>
    %188 = vector.extract_strided_slice %132 {offsets = [24, 0], sizes = [8, 32], strides = [1, 1]} : vector<32x32xf32> to vector<8x32xf32>
    %cst_60 = arith.constant dense<0.000000e+00> : vector<16x32xf32>
    %189 = tpu.matmul %187, %188, %cst_60 {dimension_numbers = #tpu.dot_dimension_numbers<[1], [0], [0], [1], [0, 0, 1, 1], [], []>} : vector<16x8xf32>, vector<8x32xf32>, vector<16x32xf32> -> vector<16x32xf32>
    %190 = arith.addf %185, %189 : vector<16x32xf32>
    %191 = vector.broadcast %133 : vector<1x32xf32> to vector<16x32xf32>
    %192 = arith.addf %190, %191 : vector<16x32xf32>
    %193 = arith.addf %129, %192 : vector<16x32xf32>
    %c295 = arith.constant 295 : index
    %c0_61 = arith.constant 0 : index
    %194 = vector.load %arg2[%c295, %c0_61] : memref<638x32xf32, #tpu.memory_space<vmem>>, vector<1x32xf32>
    %c296 = arith.constant 296 : index
    %c0_62 = arith.constant 0 : index
    %195 = vector.load %arg2[%c296, %c0_62] : memref<638x32xf32, #tpu.memory_space<vmem>>, vector<1x32xf32>
    %cst_63 = arith.constant dense<0.000000e+00> : vector<16xf32>
    %196 = vector.multi_reduction <add>, %193, %cst_63 [1] : vector<16x32xf32> to vector<16xf32>
    %197 = vector.shape_cast %196 : vector<16xf32> to vector<16x1xf32>
    %cst_64 = arith.constant 3.200000e+01 : f32
    %198 = vector.broadcast %cst_64 : f32 to vector<16x1xf32>
    %199 = arith.divf %197, %198 : vector<16x1xf32>
    %200 = vector.broadcast %199 : vector<16x1xf32> to vector<16x32xf32>
    %201 = arith.subf %193, %200 : vector<16x32xf32>
    %202 = arith.mulf %201, %201 : vector<16x32xf32>
    %cst_65 = arith.constant dense<0.000000e+00> : vector<16xf32>
    %203 = vector.multi_reduction <add>, %202, %cst_65 [1] : vector<16x32xf32> to vector<16xf32>
    %204 = vector.shape_cast %203 : vector<16xf32> to vector<16x1xf32>
    %cst_66 = arith.constant 3.200000e+01 : f32
    %205 = vector.broadcast %cst_66 : f32 to vector<16x1xf32>
    %206 = arith.divf %204, %205 : vector<16x1xf32>
    %207 = vector.broadcast %199 : vector<16x1xf32> to vector<16x32xf32>
    %208 = arith.subf %193, %207 : vector<16x32xf32>
    %cst_67 = arith.constant 9.99999974E-6 : f32
    %209 = vector.broadcast %cst_67 : f32 to vector<16x1xf32>
    %210 = arith.addf %206, %209 : vector<16x1xf32>
    %211 = math.rsqrt %210 : vector<16x1xf32>
    %212 = vector.broadcast %211 : vector<16x1xf32> to vector<16x32xf32>
    %213 = arith.mulf %208, %212 : vector<16x32xf32>
    %214 = vector.broadcast %194 : vector<1x32xf32> to vector<16x32xf32>
    %215 = arith.mulf %213, %214 : vector<16x32xf32>
    %216 = vector.broadcast %195 : vector<1x32xf32> to vector<16x32xf32>
    %217 = arith.addf %215, %216 : vector<16x32xf32>
    %c33_68 = arith.constant 33 : index
    %c0_69 = arith.constant 0 : index
    %218 = vector.load %arg1[%c33_68, %c0_69] : memref<132x64xf32, #tpu.memory_space<vmem>>, vector<32x64xf32>
    %c65_70 = arith.constant 65 : index
    %c0_71 = arith.constant 0 : index
    %219 = vector.load %arg1[%c65_70, %c0_71] : memref<132x64xf32, #tpu.memory_space<vmem>>, vector<1x64xf32>
    %cst_72 = arith.constant dense<0.000000e+00> : vector<16x64xf32>
    %220 = tpu.matmul %217, %218, %cst_72 {dimension_numbers = #tpu.dot_dimension_numbers<[1], [0], [0], [1], [0, 0, 1, 1], [], []>} : vector<16x32xf32>, vector<32x64xf32>, vector<16x64xf32> -> vector<16x64xf32>
    %221 = vector.broadcast %219 : vector<1x64xf32> to vector<16x64xf32>
    %222 = arith.addf %220, %221 : vector<16x64xf32>
    %cst_73 = arith.constant 0.000000e+00 : f32
    %223 = vector.broadcast %cst_73 : f32 to vector<16x64xf32>
    %224 = arith.maximumf %222, %223 : vector<16x64xf32>
    %c297 = arith.constant 297 : index
    %c0_74 = arith.constant 0 : index
    %225 = vector.load %arg2[%c297, %c0_74] : memref<638x32xf32, #tpu.memory_space<vmem>>, vector<64x32xf32>
    %c361 = arith.constant 361 : index
    %c0_75 = arith.constant 0 : index
    %226 = vector.load %arg2[%c361, %c0_75] : memref<638x32xf32, #tpu.memory_space<vmem>>, vector<1x32xf32>
    %cst_76 = arith.constant dense<0.000000e+00> : vector<16x32xf32>
    %227 = tpu.matmul %224, %225, %cst_76 {dimension_numbers = #tpu.dot_dimension_numbers<[1], [0], [0], [1], [0, 0, 1, 1], [], []>} : vector<16x64xf32>, vector<64x32xf32>, vector<16x32xf32> -> vector<16x32xf32>
    %228 = vector.broadcast %226 : vector<1x32xf32> to vector<16x32xf32>
    %229 = arith.addf %227, %228 : vector<16x32xf32>
    %230 = arith.addf %217, %229 : vector<16x32xf32>
    %c362 = arith.constant 362 : index
    %c0_77 = arith.constant 0 : index
    %231 = vector.load %arg2[%c362, %c0_77] : memref<638x32xf32, #tpu.memory_space<vmem>>, vector<1x32xf32>
    %c363 = arith.constant 363 : index
    %c0_78 = arith.constant 0 : index
    %232 = vector.load %arg2[%c363, %c0_78] : memref<638x32xf32, #tpu.memory_space<vmem>>, vector<1x32xf32>
    %cst_79 = arith.constant dense<0.000000e+00> : vector<16xf32>
    %233 = vector.multi_reduction <add>, %230, %cst_79 [1] : vector<16x32xf32> to vector<16xf32>
    %234 = vector.shape_cast %233 : vector<16xf32> to vector<16x1xf32>
    %cst_80 = arith.constant 3.200000e+01 : f32
    %235 = vector.broadcast %cst_80 : f32 to vector<16x1xf32>
    %236 = arith.divf %234, %235 : vector<16x1xf32>
    %237 = vector.broadcast %236 : vector<16x1xf32> to vector<16x32xf32>
    %238 = arith.subf %230, %237 : vector<16x32xf32>
    %239 = arith.mulf %238, %238 : vector<16x32xf32>
    %cst_81 = arith.constant dense<0.000000e+00> : vector<16xf32>
    %240 = vector.multi_reduction <add>, %239, %cst_81 [1] : vector<16x32xf32> to vector<16xf32>
    %241 = vector.shape_cast %240 : vector<16xf32> to vector<16x1xf32>
    %cst_82 = arith.constant 3.200000e+01 : f32
    %242 = vector.broadcast %cst_82 : f32 to vector<16x1xf32>
    %243 = arith.divf %241, %242 : vector<16x1xf32>
    %244 = vector.broadcast %236 : vector<16x1xf32> to vector<16x32xf32>
    %245 = arith.subf %230, %244 : vector<16x32xf32>
    %cst_83 = arith.constant 9.99999974E-6 : f32
    %246 = vector.broadcast %cst_83 : f32 to vector<16x1xf32>
    %247 = arith.addf %243, %246 : vector<16x1xf32>
    %248 = math.rsqrt %247 : vector<16x1xf32>
    %249 = vector.broadcast %248 : vector<16x1xf32> to vector<16x32xf32>
    %250 = arith.mulf %245, %249 : vector<16x32xf32>
    %251 = vector.broadcast %231 : vector<1x32xf32> to vector<16x32xf32>
    %252 = arith.mulf %250, %251 : vector<16x32xf32>
    %253 = vector.broadcast %232 : vector<1x32xf32> to vector<16x32xf32>
    %254 = arith.addf %252, %253 : vector<16x32xf32>
    %c0_84 = arith.constant 0 : index
    %c0_85 = arith.constant 0 : index
    %c0_86 = arith.constant 0 : index
    %255 = vector.load %arg3[%c0_84, %c0_85, %c0_86] : memref<2x8x8xf32, #tpu.memory_space<vmem>>, vector<2x8x8xf32>
    %256 = tpu.concatenate %255, %255, %255, %255 in 0 : vector<2x8x8xf32>, vector<2x8x8xf32>, vector<2x8x8xf32>, vector<2x8x8xf32> -> vector<8x8x8xf32>
    %c16 = arith.constant 16 : index
    %c0_87 = arith.constant 0 : index
    %257 = vector.load %arg2[%c16, %c0_87] : memref<638x32xf32, #tpu.memory_space<vmem>>, vector<16x32xf32>
    %c96 = arith.constant 96 : index
    %c0_88 = arith.constant 0 : index
    %258 = vector.load %arg2[%c96, %c0_88] : memref<638x32xf32, #tpu.memory_space<vmem>>, vector<32x32xf32>
    %cst_89 = arith.constant dense<0.000000e+00> : vector<16x32xf32>
    %259 = tpu.matmul %257, %258, %cst_89 {dimension_numbers = #tpu.dot_dimension_numbers<[1], [0], [0], [1], [0, 0, 1, 1], [], []>} : vector<16x32xf32>, vector<32x32xf32>, vector<16x32xf32> -> vector<16x32xf32>
    %c48 = arith.constant 48 : index
    %c0_90 = arith.constant 0 : index
    %260 = vector.load %arg2[%c48, %c0_90] : memref<638x32xf32, #tpu.memory_space<vmem>>, vector<16x32xf32>
    %261 = arith.addf %259, %260 : vector<16x32xf32>
    %c66 = arith.constant 66 : index
    %c0_91 = arith.constant 0 : index
    %262 = vector.load %arg0[%c66, %c0_91] : memref<198x96xf32, #tpu.memory_space<vmem>>, vector<32x96xf32>
    %c98 = arith.constant 98 : index
    %c0_92 = arith.constant 0 : index
    %263 = vector.load %arg0[%c98, %c0_92] : memref<198x96xf32, #tpu.memory_space<vmem>>, vector<1x96xf32>
    %c364 = arith.constant 364 : index
    %c0_93 = arith.constant 0 : index
    %264 = vector.load %arg2[%c364, %c0_93] : memref<638x32xf32, #tpu.memory_space<vmem>>, vector<32x32xf32>
    %c396 = arith.constant 396 : index
    %c0_94 = arith.constant 0 : index
    %265 = vector.load %arg2[%c396, %c0_94] : memref<638x32xf32, #tpu.memory_space<vmem>>, vector<1x32xf32>
    %cst_95 = arith.constant dense<0.000000e+00> : vector<16x96xf32>
    %266 = tpu.matmul %261, %262, %cst_95 {dimension_numbers = #tpu.dot_dimension_numbers<[1], [0], [0], [1], [0, 0, 1, 1], [], []>} : vector<16x32xf32>, vector<32x96xf32>, vector<16x96xf32> -> vector<16x96xf32>
    %267 = vector.broadcast %263 : vector<1x96xf32> to vector<16x96xf32>
    %268 = arith.addf %266, %267 : vector<16x96xf32>
    %269 = vector.extract_strided_slice %268 {offsets = [0, 0], sizes = [16, 32], strides = [1, 1]} : vector<16x96xf32> to vector<16x32xf32>
    %270 = vector.extract_strided_slice %268 {offsets = [0, 32], sizes = [16, 32], strides = [1, 1]} : vector<16x96xf32> to vector<16x32xf32>
    %271 = vector.extract_strided_slice %268 {offsets = [0, 64], sizes = [16, 32], strides = [1, 1]} : vector<16x96xf32> to vector<16x32xf32>
    %272 = vector.shape_cast %269 : vector<16x32xf32> to vector<2x8x32xf32>
    %273 = vector.extract_strided_slice %272 {offsets = [0, 0, 0], sizes = [2, 8, 8], strides = [1, 1, 1]} : vector<2x8x32xf32> to vector<2x8x8xf32>
    %274 = vector.extract_strided_slice %272 {offsets = [0, 0, 8], sizes = [2, 8, 8], strides = [1, 1, 1]} : vector<2x8x32xf32> to vector<2x8x8xf32>
    %275 = vector.extract_strided_slice %272 {offsets = [0, 0, 16], sizes = [2, 8, 8], strides = [1, 1, 1]} : vector<2x8x32xf32> to vector<2x8x8xf32>
    %276 = vector.extract_strided_slice %272 {offsets = [0, 0, 24], sizes = [2, 8, 8], strides = [1, 1, 1]} : vector<2x8x32xf32> to vector<2x8x8xf32>
    %277 = tpu.concatenate %273, %274, %275, %276 in 0 : vector<2x8x8xf32>, vector<2x8x8xf32>, vector<2x8x8xf32>, vector<2x8x8xf32> -> vector<8x8x8xf32>
    %278 = vector.shape_cast %270 : vector<16x32xf32> to vector<2x8x32xf32>
    %279 = vector.extract_strided_slice %278 {offsets = [0, 0, 0], sizes = [2, 8, 8], strides = [1, 1, 1]} : vector<2x8x32xf32> to vector<2x8x8xf32>
    %280 = vector.extract_strided_slice %278 {offsets = [0, 0, 8], sizes = [2, 8, 8], strides = [1, 1, 1]} : vector<2x8x32xf32> to vector<2x8x8xf32>
    %281 = vector.extract_strided_slice %278 {offsets = [0, 0, 16], sizes = [2, 8, 8], strides = [1, 1, 1]} : vector<2x8x32xf32> to vector<2x8x8xf32>
    %282 = vector.extract_strided_slice %278 {offsets = [0, 0, 24], sizes = [2, 8, 8], strides = [1, 1, 1]} : vector<2x8x32xf32> to vector<2x8x8xf32>
    %283 = tpu.concatenate %279, %280, %281, %282 in 0 : vector<2x8x8xf32>, vector<2x8x8xf32>, vector<2x8x8xf32>, vector<2x8x8xf32> -> vector<8x8x8xf32>
    %284 = vector.shape_cast %271 : vector<16x32xf32> to vector<2x8x32xf32>
    %285 = vector.extract_strided_slice %284 {offsets = [0, 0, 0], sizes = [2, 8, 8], strides = [1, 1, 1]} : vector<2x8x32xf32> to vector<2x8x8xf32>
    %286 = vector.extract_strided_slice %284 {offsets = [0, 0, 8], sizes = [2, 8, 8], strides = [1, 1, 1]} : vector<2x8x32xf32> to vector<2x8x8xf32>
    %287 = vector.extract_strided_slice %284 {offsets = [0, 0, 16], sizes = [2, 8, 8], strides = [1, 1, 1]} : vector<2x8x32xf32> to vector<2x8x8xf32>
    %288 = vector.extract_strided_slice %284 {offsets = [0, 0, 24], sizes = [2, 8, 8], strides = [1, 1, 1]} : vector<2x8x32xf32> to vector<2x8x8xf32>
    %289 = tpu.concatenate %285, %286, %287, %288 in 0 : vector<2x8x8xf32>, vector<2x8x8xf32>, vector<2x8x8xf32>, vector<2x8x8xf32> -> vector<8x8x8xf32>
    %cst_96 = arith.constant dense<0.000000e+00> : vector<8x8x8xf32>
    %290 = tpu.matmul %277, %283, %cst_96 {dimension_numbers = #tpu.dot_dimension_numbers<[2], [2], [1], [1], [0, 0, 0, 1, 1, 1], [0], [0]>} : vector<8x8x8xf32>, vector<8x8x8xf32>, vector<8x8x8xf32> -> vector<8x8x8xf32>
    %291 = arith.addf %290, %256 : vector<8x8x8xf32>
    %cst_97 = arith.constant dense<0xFF800000> : vector<8x8xf32>
    %292 = vector.multi_reduction <maximumf>, %291, %cst_97 [2] : vector<8x8x8xf32> to vector<8x8xf32>
    %293 = vector.shape_cast %292 : vector<8x8xf32> to vector<8x8x1xf32>
    %294 = vector.broadcast %293 : vector<8x8x1xf32> to vector<8x8x8xf32>
    %295 = arith.subf %291, %294 : vector<8x8x8xf32>
    %296 = math.exp %295 : vector<8x8x8xf32>
    %cst_98 = arith.constant dense<0.000000e+00> : vector<8x8xf32>
    %297 = vector.multi_reduction <add>, %296, %cst_98 [2] : vector<8x8x8xf32> to vector<8x8xf32>
    %298 = vector.shape_cast %297 : vector<8x8xf32> to vector<8x8x1xf32>
    %299 = vector.broadcast %298 : vector<8x8x1xf32> to vector<8x8x8xf32>
    %300 = arith.divf %296, %299 : vector<8x8x8xf32>
    %c0_99 = arith.constant 0 : index
    %c0_100 = arith.constant 0 : index
    %c0_101 = arith.constant 0 : index
    %c0_102 = arith.constant 0 : index
    %301 = vector.load %arg6[%c0_99, %c0_100, %c0_101, %c0_102] : memref<2x8x8x8xf32, #tpu.memory_space<vmem>>, vector<1x8x8x8xf32>
    %302 = vector.shape_cast %301 : vector<1x8x8x8xf32> to vector<8x8x8xf32>
    %303 = vector.shape_cast %300 : vector<8x8x8xf32> to vector<1x8x8x8xf32>
    tpu.vector_store %arg6[%c0_99, %c0_100, %c0_101, %c0_102], %303 {strides = array<i32>} : memref<2x8x8x8xf32, #tpu.memory_space<vmem>>, vector<1x8x8x8xf32>,
    %cst_103 = arith.constant dense<0.000000e+00> : vector<8x8x8xf32>
    %304 = tpu.matmul %300, %289, %cst_103 {dimension_numbers = #tpu.dot_dimension_numbers<[2], [1], [1], [2], [0, 0, 0, 1, 1, 2], [0], [0]>} : vector<8x8x8xf32>, vector<8x8x8xf32>, vector<8x8x8xf32> -> vector<8x8x8xf32>
    %305 = vector.extract_strided_slice %304 {offsets = [0, 0, 0], sizes = [2, 8, 8], strides = [1, 1, 1]} : vector<8x8x8xf32> to vector<2x8x8xf32>
    %306 = vector.shape_cast %305 : vector<2x8x8xf32> to vector<16x8xf32>
    %307 = vector.extract_strided_slice %264 {offsets = [0, 0], sizes = [8, 32], strides = [1, 1]} : vector<32x32xf32> to vector<8x32xf32>
    %cst_104 = arith.constant dense<0.000000e+00> : vector<16x32xf32>
    %308 = tpu.matmul %306, %307, %cst_104 {dimension_numbers = #tpu.dot_dimension_numbers<[1], [0], [0], [1], [0, 0, 1, 1], [], []>} : vector<16x8xf32>, vector<8x32xf32>, vector<16x32xf32> -> vector<16x32xf32>
    %309 = vector.extract_strided_slice %304 {offsets = [2, 0, 0], sizes = [2, 8, 8], strides = [1, 1, 1]} : vector<8x8x8xf32> to vector<2x8x8xf32>
    %310 = vector.shape_cast %309 : vector<2x8x8xf32> to vector<16x8xf32>
    %311 = vector.extract_strided_slice %264 {offsets = [8, 0], sizes = [8, 32], strides = [1, 1]} : vector<32x32xf32> to vector<8x32xf32>
    %cst_105 = arith.constant dense<0.000000e+00> : vector<16x32xf32>
    %312 = tpu.matmul %310, %311, %cst_105 {dimension_numbers = #tpu.dot_dimension_numbers<[1], [0], [0], [1], [0, 0, 1, 1], [], []>} : vector<16x8xf32>, vector<8x32xf32>, vector<16x32xf32> -> vector<16x32xf32>
    %313 = arith.addf %308, %312 : vector<16x32xf32>
    %314 = vector.extract_strided_slice %304 {offsets = [4, 0, 0], sizes = [2, 8, 8], strides = [1, 1, 1]} : vector<8x8x8xf32> to vector<2x8x8xf32>
    %315 = vector.shape_cast %314 : vector<2x8x8xf32> to vector<16x8xf32>
    %316 = vector.extract_strided_slice %264 {offsets = [16, 0], sizes = [8, 32], strides = [1, 1]} : vector<32x32xf32> to vector<8x32xf32>
    %cst_106 = arith.constant dense<0.000000e+00> : vector<16x32xf32>
    %317 = tpu.matmul %315, %316, %cst_106 {dimension_numbers = #tpu.dot_dimension_numbers<[1], [0], [0], [1], [0, 0, 1, 1], [], []>} : vector<16x8xf32>, vector<8x32xf32>, vector<16x32xf32> -> vector<16x32xf32>
    %318 = arith.addf %313, %317 : vector<16x32xf32>
    %319 = vector.extract_strided_slice %304 {offsets = [6, 0, 0], sizes = [2, 8, 8], strides = [1, 1, 1]} : vector<8x8x8xf32> to vector<2x8x8xf32>
    %320 = vector.shape_cast %319 : vector<2x8x8xf32> to vector<16x8xf32>
    %321 = vector.extract_strided_slice %264 {offsets = [24, 0], sizes = [8, 32], strides = [1, 1]} : vector<32x32xf32> to vector<8x32xf32>
    %cst_107 = arith.constant dense<0.000000e+00> : vector<16x32xf32>
    %322 = tpu.matmul %320, %321, %cst_107 {dimension_numbers = #tpu.dot_dimension_numbers<[1], [0], [0], [1], [0, 0, 1, 1], [], []>} : vector<16x8xf32>, vector<8x32xf32>, vector<16x32xf32> -> vector<16x32xf32>
    %323 = arith.addf %318, %322 : vector<16x32xf32>
    %324 = vector.broadcast %265 : vector<1x32xf32> to vector<16x32xf32>
    %325 = arith.addf %323, %324 : vector<16x32xf32>
    %326 = arith.addf %261, %325 : vector<16x32xf32>
    %c397 = arith.constant 397 : index
    %c0_108 = arith.constant 0 : index
    %327 = vector.load %arg2[%c397, %c0_108] : memref<638x32xf32, #tpu.memory_space<vmem>>, vector<1x32xf32>
    %c398 = arith.constant 398 : index
    %c0_109 = arith.constant 0 : index
    %328 = vector.load %arg2[%c398, %c0_109] : memref<638x32xf32, #tpu.memory_space<vmem>>, vector<1x32xf32>
    %cst_110 = arith.constant dense<0.000000e+00> : vector<16xf32>
    %329 = vector.multi_reduction <add>, %326, %cst_110 [1] : vector<16x32xf32> to vector<16xf32>
    %330 = vector.shape_cast %329 : vector<16xf32> to vector<16x1xf32>
    %cst_111 = arith.constant 3.200000e+01 : f32
    %331 = vector.broadcast %cst_111 : f32 to vector<16x1xf32>
    %332 = arith.divf %330, %331 : vector<16x1xf32>
    %333 = vector.broadcast %332 : vector<16x1xf32> to vector<16x32xf32>
    %334 = arith.subf %326, %333 : vector<16x32xf32>
    %335 = arith.mulf %334, %334 : vector<16x32xf32>
    %cst_112 = arith.constant dense<0.000000e+00> : vector<16xf32>
    %336 = vector.multi_reduction <add>, %335, %cst_112 [1] : vector<16x32xf32> to vector<16xf32>
    %337 = vector.shape_cast %336 : vector<16xf32> to vector<16x1xf32>
    %cst_113 = arith.constant 3.200000e+01 : f32
    %338 = vector.broadcast %cst_113 : f32 to vector<16x1xf32>
    %339 = arith.divf %337, %338 : vector<16x1xf32>
    %340 = vector.broadcast %332 : vector<16x1xf32> to vector<16x32xf32>
    %341 = arith.subf %326, %340 : vector<16x32xf32>
    %cst_114 = arith.constant 9.99999974E-6 : f32
    %342 = vector.broadcast %cst_114 : f32 to vector<16x1xf32>
    %343 = arith.addf %339, %342 : vector<16x1xf32>
    %344 = math.rsqrt %343 : vector<16x1xf32>
    %345 = vector.broadcast %344 : vector<16x1xf32> to vector<16x32xf32>
    %346 = arith.mulf %341, %345 : vector<16x32xf32>
    %347 = vector.broadcast %327 : vector<1x32xf32> to vector<16x32xf32>
    %348 = arith.mulf %346, %347 : vector<16x32xf32>
    %349 = vector.broadcast %328 : vector<1x32xf32> to vector<16x32xf32>
    %350 = arith.addf %348, %349 : vector<16x32xf32>
    %c99 = arith.constant 99 : index
    %c0_115 = arith.constant 0 : index
    %351 = vector.load %arg0[%c99, %c0_115] : memref<198x96xf32, #tpu.memory_space<vmem>>, vector<32x96xf32>
    %c131 = arith.constant 131 : index
    %c0_116 = arith.constant 0 : index
    %352 = vector.load %arg0[%c131, %c0_116] : memref<198x96xf32, #tpu.memory_space<vmem>>, vector<1x96xf32>
    %c399 = arith.constant 399 : index
    %c0_117 = arith.constant 0 : index
    %353 = vector.load %arg2[%c399, %c0_117] : memref<638x32xf32, #tpu.memory_space<vmem>>, vector<32x32xf32>
    %c431 = arith.constant 431 : index
    %c0_118 = arith.constant 0 : index
    %354 = vector.load %arg2[%c431, %c0_118] : memref<638x32xf32, #tpu.memory_space<vmem>>, vector<1x32xf32>
    %355 = vector.extract_strided_slice %351 {offsets = [0, 0], sizes = [32, 32], strides = [1, 1]} : vector<32x96xf32> to vector<32x32xf32>
    %356 = vector.extract_strided_slice %352 {offsets = [0, 0], sizes = [1, 32], strides = [1, 1]} : vector<1x96xf32> to vector<1x32xf32>
    %cst_119 = arith.constant dense<0.000000e+00> : vector<16x32xf32>
    %357 = tpu.matmul %350, %355, %cst_119 {dimension_numbers = #tpu.dot_dimension_numbers<[1], [0], [0], [1], [0, 0, 1, 1], [], []>} : vector<16x32xf32>, vector<32x32xf32>, vector<16x32xf32> -> vector<16x32xf32>
    %358 = vector.broadcast %356 : vector<1x32xf32> to vector<16x32xf32>
    %359 = arith.addf %357, %358 : vector<16x32xf32>
    %360 = vector.extract_strided_slice %351 {offsets = [0, 32], sizes = [32, 64], strides = [1, 1]} : vector<32x96xf32> to vector<32x64xf32>
    %361 = vector.extract_strided_slice %352 {offsets = [0, 32], sizes = [1, 64], strides = [1, 1]} : vector<1x96xf32> to vector<1x64xf32>
    %cst_120 = arith.constant dense<0.000000e+00> : vector<16x64xf32>
    %362 = tpu.matmul %254, %360, %cst_120 {dimension_numbers = #tpu.dot_dimension_numbers<[1], [0], [0], [1], [0, 0, 1, 1], [], []>} : vector<16x32xf32>, vector<32x64xf32>, vector<16x64xf32> -> vector<16x64xf32>
    %363 = vector.broadcast %361 : vector<1x64xf32> to vector<16x64xf32>
    %364 = arith.addf %362, %363 : vector<16x64xf32>
    %365 = vector.extract_strided_slice %364 {offsets = [0, 0], sizes = [16, 32], strides = [1, 1]} : vector<16x64xf32> to vector<16x32xf32>
    %366 = vector.extract_strided_slice %364 {offsets = [0, 32], sizes = [16, 32], strides = [1, 1]} : vector<16x64xf32> to vector<16x32xf32>
    %367 = vector.shape_cast %359 : vector<16x32xf32> to vector<2x8x32xf32>
    %368 = vector.extract_strided_slice %367 {offsets = [0, 0, 0], sizes = [2, 8, 8], strides = [1, 1, 1]} : vector<2x8x32xf32> to vector<2x8x8xf32>
    %369 = vector.extract_strided_slice %367 {offsets = [0, 0, 8], sizes = [2, 8, 8], strides = [1, 1, 1]} : vector<2x8x32xf32> to vector<2x8x8xf32>
    %370 = vector.extract_strided_slice %367 {offsets = [0, 0, 16], sizes = [2, 8, 8], strides = [1, 1, 1]} : vector<2x8x32xf32> to vector<2x8x8xf32>
    %371 = vector.extract_strided_slice %367 {offsets = [0, 0, 24], sizes = [2, 8, 8], strides = [1, 1, 1]} : vector<2x8x32xf32> to vector<2x8x8xf32>
    %372 = tpu.concatenate %368, %369, %370, %371 in 0 : vector<2x8x8xf32>, vector<2x8x8xf32>, vector<2x8x8xf32>, vector<2x8x8xf32> -> vector<8x8x8xf32>
    %373 = vector.shape_cast %365 : vector<16x32xf32> to vector<2x8x32xf32>
    %374 = vector.extract_strided_slice %373 {offsets = [0, 0, 0], sizes = [2, 8, 8], strides = [1, 1, 1]} : vector<2x8x32xf32> to vector<2x8x8xf32>
    %375 = vector.extract_strided_slice %373 {offsets = [0, 0, 8], sizes = [2, 8, 8], strides = [1, 1, 1]} : vector<2x8x32xf32> to vector<2x8x8xf32>
    %376 = vector.extract_strided_slice %373 {offsets = [0, 0, 16], sizes = [2, 8, 8], strides = [1, 1, 1]} : vector<2x8x32xf32> to vector<2x8x8xf32>
    %377 = vector.extract_strided_slice %373 {offsets = [0, 0, 24], sizes = [2, 8, 8], strides = [1, 1, 1]} : vector<2x8x32xf32> to vector<2x8x8xf32>
    %378 = tpu.concatenate %374, %375, %376, %377 in 0 : vector<2x8x8xf32>, vector<2x8x8xf32>, vector<2x8x8xf32>, vector<2x8x8xf32> -> vector<8x8x8xf32>
    %379 = vector.shape_cast %366 : vector<16x32xf32> to vector<2x8x32xf32>
    %380 = vector.extract_strided_slice %379 {offsets = [0, 0, 0], sizes = [2, 8, 8], strides = [1, 1, 1]} : vector<2x8x32xf32> to vector<2x8x8xf32>
    %381 = vector.extract_strided_slice %379 {offsets = [0, 0, 8], sizes = [2, 8, 8], strides = [1, 1, 1]} : vector<2x8x32xf32> to vector<2x8x8xf32>
    %382 = vector.extract_strided_slice %379 {offsets = [0, 0, 16], sizes = [2, 8, 8], strides = [1, 1, 1]} : vector<2x8x32xf32> to vector<2x8x8xf32>
    %383 = vector.extract_strided_slice %379 {offsets = [0, 0, 24], sizes = [2, 8, 8], strides = [1, 1, 1]} : vector<2x8x32xf32> to vector<2x8x8xf32>
    %384 = tpu.concatenate %380, %381, %382, %383 in 0 : vector<2x8x8xf32>, vector<2x8x8xf32>, vector<2x8x8xf32>, vector<2x8x8xf32> -> vector<8x8x8xf32>
    %cst_121 = arith.constant dense<0.000000e+00> : vector<8x8x8xf32>
    %385 = tpu.matmul %372, %378, %cst_121 {dimension_numbers = #tpu.dot_dimension_numbers<[2], [2], [1], [1], [0, 0, 0, 1, 1, 1], [0], [0]>} : vector<8x8x8xf32>, vector<8x8x8xf32>, vector<8x8x8xf32> -> vector<8x8x8xf32>
    %cst_122 = arith.constant dense<0xFF800000> : vector<8x8xf32>
    %386 = vector.multi_reduction <maximumf>, %385, %cst_122 [2] : vector<8x8x8xf32> to vector<8x8xf32>
    %387 = vector.shape_cast %386 : vector<8x8xf32> to vector<8x8x1xf32>
    %388 = vector.broadcast %387 : vector<8x8x1xf32> to vector<8x8x8xf32>
    %389 = arith.subf %385, %388 : vector<8x8x8xf32>
    %390 = math.exp %389 : vector<8x8x8xf32>
    %cst_123 = arith.constant dense<0.000000e+00> : vector<8x8xf32>
    %391 = vector.multi_reduction <add>, %390, %cst_123 [2] : vector<8x8x8xf32> to vector<8x8xf32>
    %392 = vector.shape_cast %391 : vector<8x8xf32> to vector<8x8x1xf32>
    %393 = vector.broadcast %392 : vector<8x8x1xf32> to vector<8x8x8xf32>
    %394 = arith.divf %390, %393 : vector<8x8x8xf32>
    %c0_124 = arith.constant 0 : index
    %c0_125 = arith.constant 0 : index
    %c0_126 = arith.constant 0 : index
    %c0_127 = arith.constant 0 : index
    %395 = vector.load %arg7[%c0_124, %c0_125, %c0_126, %c0_127] : memref<2x8x8x8xf32, #tpu.memory_space<vmem>>, vector<1x8x8x8xf32>
    %396 = vector.shape_cast %395 : vector<1x8x8x8xf32> to vector<8x8x8xf32>
    %397 = vector.shape_cast %394 : vector<8x8x8xf32> to vector<1x8x8x8xf32>
    tpu.vector_store %arg7[%c0_124, %c0_125, %c0_126, %c0_127], %397 {strides = array<i32>} : memref<2x8x8x8xf32, #tpu.memory_space<vmem>>, vector<1x8x8x8xf32>,
    %cst_128 = arith.constant dense<0.000000e+00> : vector<8x8x8xf32>
    %398 = tpu.matmul %394, %384, %cst_128 {dimension_numbers = #tpu.dot_dimension_numbers<[2], [1], [1], [2], [0, 0, 0, 1, 1, 2], [0], [0]>} : vector<8x8x8xf32>, vector<8x8x8xf32>, vector<8x8x8xf32> -> vector<8x8x8xf32>
    %399 = vector.extract_strided_slice %398 {offsets = [0, 0, 0], sizes = [2, 8, 8], strides = [1, 1, 1]} : vector<8x8x8xf32> to vector<2x8x8xf32>
    %400 = vector.shape_cast %399 : vector<2x8x8xf32> to vector<16x8xf32>
    %401 = vector.extract_strided_slice %353 {offsets = [0, 0], sizes = [8, 32], strides = [1, 1]} : vector<32x32xf32> to vector<8x32xf32>
    %cst_129 = arith.constant dense<0.000000e+00> : vector<16x32xf32>
    %402 = tpu.matmul %400, %401, %cst_129 {dimension_numbers = #tpu.dot_dimension_numbers<[1], [0], [0], [1], [0, 0, 1, 1], [], []>} : vector<16x8xf32>, vector<8x32xf32>, vector<16x32xf32> -> vector<16x32xf32>
    %403 = vector.extract_strided_slice %398 {offsets = [2, 0, 0], sizes = [2, 8, 8], strides = [1, 1, 1]} : vector<8x8x8xf32> to vector<2x8x8xf32>
    %404 = vector.shape_cast %403 : vector<2x8x8xf32> to vector<16x8xf32>
    %405 = vector.extract_strided_slice %353 {offsets = [8, 0], sizes = [8, 32], strides = [1, 1]} : vector<32x32xf32> to vector<8x32xf32>
    %cst_130 = arith.constant dense<0.000000e+00> : vector<16x32xf32>
    %406 = tpu.matmul %404, %405, %cst_130 {dimension_numbers = #tpu.dot_dimension_numbers<[1], [0], [0], [1], [0, 0, 1, 1], [], []>} : vector<16x8xf32>, vector<8x32xf32>, vector<16x32xf32> -> vector<16x32xf32>
    %407 = arith.addf %402, %406 : vector<16x32xf32>
    %408 = vector.extract_strided_slice %398 {offsets = [4, 0, 0], sizes = [2, 8, 8], strides = [1, 1, 1]} : vector<8x8x8xf32> to vector<2x8x8xf32>
    %409 = vector.shape_cast %408 : vector<2x8x8xf32> to vector<16x8xf32>
    %410 = vector.extract_strided_slice %353 {offsets = [16, 0], sizes = [8, 32], strides = [1, 1]} : vector<32x32xf32> to vector<8x32xf32>
    %cst_131 = arith.constant dense<0.000000e+00> : vector<16x32xf32>
    %411 = tpu.matmul %409, %410, %cst_131 {dimension_numbers = #tpu.dot_dimension_numbers<[1], [0], [0], [1], [0, 0, 1, 1], [], []>} : vector<16x8xf32>, vector<8x32xf32>, vector<16x32xf32> -> vector<16x32xf32>
    %412 = arith.addf %407, %411 : vector<16x32xf32>
    %413 = vector.extract_strided_slice %398 {offsets = [6, 0, 0], sizes = [2, 8, 8], strides = [1, 1, 1]} : vector<8x8x8xf32> to vector<2x8x8xf32>
    %414 = vector.shape_cast %413 : vector<2x8x8xf32> to vector<16x8xf32>
    %415 = vector.extract_strided_slice %353 {offsets = [24, 0], sizes = [8, 32], strides = [1, 1]} : vector<32x32xf32> to vector<8x32xf32>
    %cst_132 = arith.constant dense<0.000000e+00> : vector<16x32xf32>
    %416 = tpu.matmul %414, %415, %cst_132 {dimension_numbers = #tpu.dot_dimension_numbers<[1], [0], [0], [1], [0, 0, 1, 1], [], []>} : vector<16x8xf32>, vector<8x32xf32>, vector<16x32xf32> -> vector<16x32xf32>
    %417 = arith.addf %412, %416 : vector<16x32xf32>
    %418 = vector.broadcast %354 : vector<1x32xf32> to vector<16x32xf32>
    %419 = arith.addf %417, %418 : vector<16x32xf32>
    %420 = arith.addf %350, %419 : vector<16x32xf32>
    %c432 = arith.constant 432 : index
    %c0_133 = arith.constant 0 : index
    %421 = vector.load %arg2[%c432, %c0_133] : memref<638x32xf32, #tpu.memory_space<vmem>>, vector<1x32xf32>
    %c433 = arith.constant 433 : index
    %c0_134 = arith.constant 0 : index
    %422 = vector.load %arg2[%c433, %c0_134] : memref<638x32xf32, #tpu.memory_space<vmem>>, vector<1x32xf32>
    %cst_135 = arith.constant dense<0.000000e+00> : vector<16xf32>
    %423 = vector.multi_reduction <add>, %420, %cst_135 [1] : vector<16x32xf32> to vector<16xf32>
    %424 = vector.shape_cast %423 : vector<16xf32> to vector<16x1xf32>
    %cst_136 = arith.constant 3.200000e+01 : f32
    %425 = vector.broadcast %cst_136 : f32 to vector<16x1xf32>
    %426 = arith.divf %424, %425 : vector<16x1xf32>
    %427 = vector.broadcast %426 : vector<16x1xf32> to vector<16x32xf32>
    %428 = arith.subf %420, %427 : vector<16x32xf32>
    %429 = arith.mulf %428, %428 : vector<16x32xf32>
    %cst_137 = arith.constant dense<0.000000e+00> : vector<16xf32>
    %430 = vector.multi_reduction <add>, %429, %cst_137 [1] : vector<16x32xf32> to vector<16xf32>
    %431 = vector.shape_cast %430 : vector<16xf32> to vector<16x1xf32>
    %cst_138 = arith.constant 3.200000e+01 : f32
    %432 = vector.broadcast %cst_138 : f32 to vector<16x1xf32>
    %433 = arith.divf %431, %432 : vector<16x1xf32>
    %434 = vector.broadcast %426 : vector<16x1xf32> to vector<16x32xf32>
    %435 = arith.subf %420, %434 : vector<16x32xf32>
    %cst_139 = arith.constant 9.99999974E-6 : f32
    %436 = vector.broadcast %cst_139 : f32 to vector<16x1xf32>
    %437 = arith.addf %433, %436 : vector<16x1xf32>
    %438 = math.rsqrt %437 : vector<16x1xf32>
    %439 = vector.broadcast %438 : vector<16x1xf32> to vector<16x32xf32>
    %440 = arith.mulf %435, %439 : vector<16x32xf32>
    %441 = vector.broadcast %421 : vector<1x32xf32> to vector<16x32xf32>
    %442 = arith.mulf %440, %441 : vector<16x32xf32>
    %443 = vector.broadcast %422 : vector<1x32xf32> to vector<16x32xf32>
    %444 = arith.addf %442, %443 : vector<16x32xf32>
    %c66_140 = arith.constant 66 : index
    %c0_141 = arith.constant 0 : index
    %445 = vector.load %arg1[%c66_140, %c0_141] : memref<132x64xf32, #tpu.memory_space<vmem>>, vector<32x64xf32>
    %c98_142 = arith.constant 98 : index
    %c0_143 = arith.constant 0 : index
    %446 = vector.load %arg1[%c98_142, %c0_143] : memref<132x64xf32, #tpu.memory_space<vmem>>, vector<1x64xf32>
    %cst_144 = arith.constant dense<0.000000e+00> : vector<16x64xf32>
    %447 = tpu.matmul %444, %445, %cst_144 {dimension_numbers = #tpu.dot_dimension_numbers<[1], [0], [0], [1], [0, 0, 1, 1], [], []>} : vector<16x32xf32>, vector<32x64xf32>, vector<16x64xf32> -> vector<16x64xf32>
    %448 = vector.broadcast %446 : vector<1x64xf32> to vector<16x64xf32>
    %449 = arith.addf %447, %448 : vector<16x64xf32>
    %cst_145 = arith.constant 0.000000e+00 : f32
    %450 = vector.broadcast %cst_145 : f32 to vector<16x64xf32>
    %451 = arith.maximumf %449, %450 : vector<16x64xf32>
    %c434 = arith.constant 434 : index
    %c0_146 = arith.constant 0 : index
    %452 = vector.load %arg2[%c434, %c0_146] : memref<638x32xf32, #tpu.memory_space<vmem>>, vector<64x32xf32>
    %c498 = arith.constant 498 : index
    %c0_147 = arith.constant 0 : index
    %453 = vector.load %arg2[%c498, %c0_147] : memref<638x32xf32, #tpu.memory_space<vmem>>, vector<1x32xf32>
    %cst_148 = arith.constant dense<0.000000e+00> : vector<16x32xf32>
    %454 = tpu.matmul %451, %452, %cst_148 {dimension_numbers = #tpu.dot_dimension_numbers<[1], [0], [0], [1], [0, 0, 1, 1], [], []>} : vector<16x64xf32>, vector<64x32xf32>, vector<16x32xf32> -> vector<16x32xf32>
    %455 = vector.broadcast %453 : vector<1x32xf32> to vector<16x32xf32>
    %456 = arith.addf %454, %455 : vector<16x32xf32>
    %457 = arith.addf %444, %456 : vector<16x32xf32>
    %c499 = arith.constant 499 : index
    %c0_149 = arith.constant 0 : index
    %458 = vector.load %arg2[%c499, %c0_149] : memref<638x32xf32, #tpu.memory_space<vmem>>, vector<1x32xf32>
    %c500 = arith.constant 500 : index
    %c0_150 = arith.constant 0 : index
    %459 = vector.load %arg2[%c500, %c0_150] : memref<638x32xf32, #tpu.memory_space<vmem>>, vector<1x32xf32>
    %cst_151 = arith.constant dense<0.000000e+00> : vector<16xf32>
    %460 = vector.multi_reduction <add>, %457, %cst_151 [1] : vector<16x32xf32> to vector<16xf32>
    %461 = vector.shape_cast %460 : vector<16xf32> to vector<16x1xf32>
    %cst_152 = arith.constant 3.200000e+01 : f32
    %462 = vector.broadcast %cst_152 : f32 to vector<16x1xf32>
    %463 = arith.divf %461, %462 : vector<16x1xf32>
    %464 = vector.broadcast %463 : vector<16x1xf32> to vector<16x32xf32>
    %465 = arith.subf %457, %464 : vector<16x32xf32>
    %466 = arith.mulf %465, %465 : vector<16x32xf32>
    %cst_153 = arith.constant dense<0.000000e+00> : vector<16xf32>
    %467 = vector.multi_reduction <add>, %466, %cst_153 [1] : vector<16x32xf32> to vector<16xf32>
    %468 = vector.shape_cast %467 : vector<16xf32> to vector<16x1xf32>
    %cst_154 = arith.constant 3.200000e+01 : f32
    %469 = vector.broadcast %cst_154 : f32 to vector<16x1xf32>
    %470 = arith.divf %468, %469 : vector<16x1xf32>
    %471 = vector.broadcast %463 : vector<16x1xf32> to vector<16x32xf32>
    %472 = arith.subf %457, %471 : vector<16x32xf32>
    %cst_155 = arith.constant 9.99999974E-6 : f32
    %473 = vector.broadcast %cst_155 : f32 to vector<16x1xf32>
    %474 = arith.addf %470, %473 : vector<16x1xf32>
    %475 = math.rsqrt %474 : vector<16x1xf32>
    %476 = vector.broadcast %475 : vector<16x1xf32> to vector<16x32xf32>
    %477 = arith.mulf %472, %476 : vector<16x32xf32>
    %478 = vector.broadcast %458 : vector<1x32xf32> to vector<16x32xf32>
    %479 = arith.mulf %477, %478 : vector<16x32xf32>
    %480 = vector.broadcast %459 : vector<1x32xf32> to vector<16x32xf32>
    %481 = arith.addf %479, %480 : vector<16x32xf32>
    %c132 = arith.constant 132 : index
    %c0_156 = arith.constant 0 : index
    %482 = vector.load %arg0[%c132, %c0_156] : memref<198x96xf32, #tpu.memory_space<vmem>>, vector<32x96xf32>
    %c164 = arith.constant 164 : index
    %c0_157 = arith.constant 0 : index
    %483 = vector.load %arg0[%c164, %c0_157] : memref<198x96xf32, #tpu.memory_space<vmem>>, vector<1x96xf32>
    %c501 = arith.constant 501 : index
    %c0_158 = arith.constant 0 : index
    %484 = vector.load %arg2[%c501, %c0_158] : memref<638x32xf32, #tpu.memory_space<vmem>>, vector<32x32xf32>
    %c533 = arith.constant 533 : index
    %c0_159 = arith.constant 0 : index
    %485 = vector.load %arg2[%c533, %c0_159] : memref<638x32xf32, #tpu.memory_space<vmem>>, vector<1x32xf32>
    %cst_160 = arith.constant dense<0.000000e+00> : vector<16x96xf32>
    %486 = tpu.matmul %481, %482, %cst_160 {dimension_numbers = #tpu.dot_dimension_numbers<[1], [0], [0], [1], [0, 0, 1, 1], [], []>} : vector<16x32xf32>, vector<32x96xf32>, vector<16x96xf32> -> vector<16x96xf32>
    %487 = vector.broadcast %483 : vector<1x96xf32> to vector<16x96xf32>
    %488 = arith.addf %486, %487 : vector<16x96xf32>
    %489 = vector.extract_strided_slice %488 {offsets = [0, 0], sizes = [16, 32], strides = [1, 1]} : vector<16x96xf32> to vector<16x32xf32>
    %490 = vector.extract_strided_slice %488 {offsets = [0, 32], sizes = [16, 32], strides = [1, 1]} : vector<16x96xf32> to vector<16x32xf32>
    %491 = vector.extract_strided_slice %488 {offsets = [0, 64], sizes = [16, 32], strides = [1, 1]} : vector<16x96xf32> to vector<16x32xf32>
    %492 = vector.shape_cast %489 : vector<16x32xf32> to vector<2x8x32xf32>
    %493 = vector.extract_strided_slice %492 {offsets = [0, 0, 0], sizes = [2, 8, 8], strides = [1, 1, 1]} : vector<2x8x32xf32> to vector<2x8x8xf32>
    %494 = vector.extract_strided_slice %492 {offsets = [0, 0, 8], sizes = [2, 8, 8], strides = [1, 1, 1]} : vector<2x8x32xf32> to vector<2x8x8xf32>
    %495 = vector.extract_strided_slice %492 {offsets = [0, 0, 16], sizes = [2, 8, 8], strides = [1, 1, 1]} : vector<2x8x32xf32> to vector<2x8x8xf32>
    %496 = vector.extract_strided_slice %492 {offsets = [0, 0, 24], sizes = [2, 8, 8], strides = [1, 1, 1]} : vector<2x8x32xf32> to vector<2x8x8xf32>
    %497 = tpu.concatenate %493, %494, %495, %496 in 0 : vector<2x8x8xf32>, vector<2x8x8xf32>, vector<2x8x8xf32>, vector<2x8x8xf32> -> vector<8x8x8xf32>
    %498 = vector.shape_cast %490 : vector<16x32xf32> to vector<2x8x32xf32>
    %499 = vector.extract_strided_slice %498 {offsets = [0, 0, 0], sizes = [2, 8, 8], strides = [1, 1, 1]} : vector<2x8x32xf32> to vector<2x8x8xf32>
    %500 = vector.extract_strided_slice %498 {offsets = [0, 0, 8], sizes = [2, 8, 8], strides = [1, 1, 1]} : vector<2x8x32xf32> to vector<2x8x8xf32>
    %501 = vector.extract_strided_slice %498 {offsets = [0, 0, 16], sizes = [2, 8, 8], strides = [1, 1, 1]} : vector<2x8x32xf32> to vector<2x8x8xf32>
    %502 = vector.extract_strided_slice %498 {offsets = [0, 0, 24], sizes = [2, 8, 8], strides = [1, 1, 1]} : vector<2x8x32xf32> to vector<2x8x8xf32>
    %503 = tpu.concatenate %499, %500, %501, %502 in 0 : vector<2x8x8xf32>, vector<2x8x8xf32>, vector<2x8x8xf32>, vector<2x8x8xf32> -> vector<8x8x8xf32>
    %504 = vector.shape_cast %491 : vector<16x32xf32> to vector<2x8x32xf32>
    %505 = vector.extract_strided_slice %504 {offsets = [0, 0, 0], sizes = [2, 8, 8], strides = [1, 1, 1]} : vector<2x8x32xf32> to vector<2x8x8xf32>
    %506 = vector.extract_strided_slice %504 {offsets = [0, 0, 8], sizes = [2, 8, 8], strides = [1, 1, 1]} : vector<2x8x32xf32> to vector<2x8x8xf32>
    %507 = vector.extract_strided_slice %504 {offsets = [0, 0, 16], sizes = [2, 8, 8], strides = [1, 1, 1]} : vector<2x8x32xf32> to vector<2x8x8xf32>
    %508 = vector.extract_strided_slice %504 {offsets = [0, 0, 24], sizes = [2, 8, 8], strides = [1, 1, 1]} : vector<2x8x32xf32> to vector<2x8x8xf32>
    %509 = tpu.concatenate %505, %506, %507, %508 in 0 : vector<2x8x8xf32>, vector<2x8x8xf32>, vector<2x8x8xf32>, vector<2x8x8xf32> -> vector<8x8x8xf32>
    %cst_161 = arith.constant dense<0.000000e+00> : vector<8x8x8xf32>
    %510 = tpu.matmul %497, %503, %cst_161 {dimension_numbers = #tpu.dot_dimension_numbers<[2], [2], [1], [1], [0, 0, 0, 1, 1, 1], [0], [0]>} : vector<8x8x8xf32>, vector<8x8x8xf32>, vector<8x8x8xf32> -> vector<8x8x8xf32>
    %511 = arith.addf %510, %256 : vector<8x8x8xf32>
    %cst_162 = arith.constant dense<0xFF800000> : vector<8x8xf32>
    %512 = vector.multi_reduction <maximumf>, %511, %cst_162 [2] : vector<8x8x8xf32> to vector<8x8xf32>
    %513 = vector.shape_cast %512 : vector<8x8xf32> to vector<8x8x1xf32>
    %514 = vector.broadcast %513 : vector<8x8x1xf32> to vector<8x8x8xf32>
    %515 = arith.subf %511, %514 : vector<8x8x8xf32>
    %516 = math.exp %515 : vector<8x8x8xf32>
    %cst_163 = arith.constant dense<0.000000e+00> : vector<8x8xf32>
    %517 = vector.multi_reduction <add>, %516, %cst_163 [2] : vector<8x8x8xf32> to vector<8x8xf32>
    %518 = vector.shape_cast %517 : vector<8x8xf32> to vector<8x8x1xf32>
    %519 = vector.broadcast %518 : vector<8x8x1xf32> to vector<8x8x8xf32>
    %520 = arith.divf %516, %519 : vector<8x8x8xf32>
    %c1_164 = arith.constant 1 : index
    %c0_165 = arith.constant 0 : index
    %c0_166 = arith.constant 0 : index
    %c0_167 = arith.constant 0 : index
    %521 = vector.load %arg6[%c1_164, %c0_165, %c0_166, %c0_167] : memref<2x8x8x8xf32, #tpu.memory_space<vmem>>, vector<1x8x8x8xf32>
    %522 = vector.shape_cast %521 : vector<1x8x8x8xf32> to vector<8x8x8xf32>
    %523 = vector.shape_cast %520 : vector<8x8x8xf32> to vector<1x8x8x8xf32>
    tpu.vector_store %arg6[%c1_164, %c0_165, %c0_166, %c0_167], %523 {strides = array<i32>} : memref<2x8x8x8xf32, #tpu.memory_space<vmem>>, vector<1x8x8x8xf32>,
    %cst_168 = arith.constant dense<0.000000e+00> : vector<8x8x8xf32>
    %524 = tpu.matmul %520, %509, %cst_168 {dimension_numbers = #tpu.dot_dimension_numbers<[2], [1], [1], [2], [0, 0, 0, 1, 1, 2], [0], [0]>} : vector<8x8x8xf32>, vector<8x8x8xf32>, vector<8x8x8xf32> -> vector<8x8x8xf32>
    %525 = vector.extract_strided_slice %524 {offsets = [0, 0, 0], sizes = [2, 8, 8], strides = [1, 1, 1]} : vector<8x8x8xf32> to vector<2x8x8xf32>
    %526 = vector.shape_cast %525 : vector<2x8x8xf32> to vector<16x8xf32>
    %527 = vector.extract_strided_slice %484 {offsets = [0, 0], sizes = [8, 32], strides = [1, 1]} : vector<32x32xf32> to vector<8x32xf32>
    %cst_169 = arith.constant dense<0.000000e+00> : vector<16x32xf32>
    %528 = tpu.matmul %526, %527, %cst_169 {dimension_numbers = #tpu.dot_dimension_numbers<[1], [0], [0], [1], [0, 0, 1, 1], [], []>} : vector<16x8xf32>, vector<8x32xf32>, vector<16x32xf32> -> vector<16x32xf32>
    %529 = vector.extract_strided_slice %524 {offsets = [2, 0, 0], sizes = [2, 8, 8], strides = [1, 1, 1]} : vector<8x8x8xf32> to vector<2x8x8xf32>
    %530 = vector.shape_cast %529 : vector<2x8x8xf32> to vector<16x8xf32>
    %531 = vector.extract_strided_slice %484 {offsets = [8, 0], sizes = [8, 32], strides = [1, 1]} : vector<32x32xf32> to vector<8x32xf32>
    %cst_170 = arith.constant dense<0.000000e+00> : vector<16x32xf32>
    %532 = tpu.matmul %530, %531, %cst_170 {dimension_numbers = #tpu.dot_dimension_numbers<[1], [0], [0], [1], [0, 0, 1, 1], [], []>} : vector<16x8xf32>, vector<8x32xf32>, vector<16x32xf32> -> vector<16x32xf32>
    %533 = arith.addf %528, %532 : vector<16x32xf32>
    %534 = vector.extract_strided_slice %524 {offsets = [4, 0, 0], sizes = [2, 8, 8], strides = [1, 1, 1]} : vector<8x8x8xf32> to vector<2x8x8xf32>
    %535 = vector.shape_cast %534 : vector<2x8x8xf32> to vector<16x8xf32>
    %536 = vector.extract_strided_slice %484 {offsets = [16, 0], sizes = [8, 32], strides = [1, 1]} : vector<32x32xf32> to vector<8x32xf32>
    %cst_171 = arith.constant dense<0.000000e+00> : vector<16x32xf32>
    %537 = tpu.matmul %535, %536, %cst_171 {dimension_numbers = #tpu.dot_dimension_numbers<[1], [0], [0], [1], [0, 0, 1, 1], [], []>} : vector<16x8xf32>, vector<8x32xf32>, vector<16x32xf32> -> vector<16x32xf32>
    %538 = arith.addf %533, %537 : vector<16x32xf32>
    %539 = vector.extract_strided_slice %524 {offsets = [6, 0, 0], sizes = [2, 8, 8], strides = [1, 1, 1]} : vector<8x8x8xf32> to vector<2x8x8xf32>
    %540 = vector.shape_cast %539 : vector<2x8x8xf32> to vector<16x8xf32>
    %541 = vector.extract_strided_slice %484 {offsets = [24, 0], sizes = [8, 32], strides = [1, 1]} : vector<32x32xf32> to vector<8x32xf32>
    %cst_172 = arith.constant dense<0.000000e+00> : vector<16x32xf32>
    %542 = tpu.matmul %540, %541, %cst_172 {dimension_numbers = #tpu.dot_dimension_numbers<[1], [0], [0], [1], [0, 0, 1, 1], [], []>} : vector<16x8xf32>, vector<8x32xf32>, vector<16x32xf32> -> vector<16x32xf32>
    %543 = arith.addf %538, %542 : vector<16x32xf32>
    %544 = vector.broadcast %485 : vector<1x32xf32> to vector<16x32xf32>
    %545 = arith.addf %543, %544 : vector<16x32xf32>
    %546 = arith.addf %481, %545 : vector<16x32xf32>
    %c534 = arith.constant 534 : index
    %c0_173 = arith.constant 0 : index
    %547 = vector.load %arg2[%c534, %c0_173] : memref<638x32xf32, #tpu.memory_space<vmem>>, vector<1x32xf32>
    %c535 = arith.constant 535 : index
    %c0_174 = arith.constant 0 : index
    %548 = vector.load %arg2[%c535, %c0_174] : memref<638x32xf32, #tpu.memory_space<vmem>>, vector<1x32xf32>
    %cst_175 = arith.constant dense<0.000000e+00> : vector<16xf32>
    %549 = vector.multi_reduction <add>, %546, %cst_175 [1] : vector<16x32xf32> to vector<16xf32>
    %550 = vector.shape_cast %549 : vector<16xf32> to vector<16x1xf32>
    %cst_176 = arith.constant 3.200000e+01 : f32
    %551 = vector.broadcast %cst_176 : f32 to vector<16x1xf32>
    %552 = arith.divf %550, %551 : vector<16x1xf32>
    %553 = vector.broadcast %552 : vector<16x1xf32> to vector<16x32xf32>
    %554 = arith.subf %546, %553 : vector<16x32xf32>
    %555 = arith.mulf %554, %554 : vector<16x32xf32>
    %cst_177 = arith.constant dense<0.000000e+00> : vector<16xf32>
    %556 = vector.multi_reduction <add>, %555, %cst_177 [1] : vector<16x32xf32> to vector<16xf32>
    %557 = vector.shape_cast %556 : vector<16xf32> to vector<16x1xf32>
    %cst_178 = arith.constant 3.200000e+01 : f32
    %558 = vector.broadcast %cst_178 : f32 to vector<16x1xf32>
    %559 = arith.divf %557, %558 : vector<16x1xf32>
    %560 = vector.broadcast %552 : vector<16x1xf32> to vector<16x32xf32>
    %561 = arith.subf %546, %560 : vector<16x32xf32>
    %cst_179 = arith.constant 9.99999974E-6 : f32
    %562 = vector.broadcast %cst_179 : f32 to vector<16x1xf32>
    %563 = arith.addf %559, %562 : vector<16x1xf32>
    %564 = math.rsqrt %563 : vector<16x1xf32>
    %565 = vector.broadcast %564 : vector<16x1xf32> to vector<16x32xf32>
    %566 = arith.mulf %561, %565 : vector<16x32xf32>
    %567 = vector.broadcast %547 : vector<1x32xf32> to vector<16x32xf32>
    %568 = arith.mulf %566, %567 : vector<16x32xf32>
    %569 = vector.broadcast %548 : vector<1x32xf32> to vector<16x32xf32>
    %570 = arith.addf %568, %569 : vector<16x32xf32>
    %c165 = arith.constant 165 : index
    %c0_180 = arith.constant 0 : index
    %571 = vector.load %arg0[%c165, %c0_180] : memref<198x96xf32, #tpu.memory_space<vmem>>, vector<32x96xf32>
    %c197 = arith.constant 197 : index
    %c0_181 = arith.constant 0 : index
    %572 = vector.load %arg0[%c197, %c0_181] : memref<198x96xf32, #tpu.memory_space<vmem>>, vector<1x96xf32>
    %c536 = arith.constant 536 : index
    %c0_182 = arith.constant 0 : index
    %573 = vector.load %arg2[%c536, %c0_182] : memref<638x32xf32, #tpu.memory_space<vmem>>, vector<32x32xf32>
    %c568 = arith.constant 568 : index
    %c0_183 = arith.constant 0 : index
    %574 = vector.load %arg2[%c568, %c0_183] : memref<638x32xf32, #tpu.memory_space<vmem>>, vector<1x32xf32>
    %575 = vector.extract_strided_slice %571 {offsets = [0, 0], sizes = [32, 32], strides = [1, 1]} : vector<32x96xf32> to vector<32x32xf32>
    %576 = vector.extract_strided_slice %572 {offsets = [0, 0], sizes = [1, 32], strides = [1, 1]} : vector<1x96xf32> to vector<1x32xf32>
    %cst_184 = arith.constant dense<0.000000e+00> : vector<16x32xf32>
    %577 = tpu.matmul %570, %575, %cst_184 {dimension_numbers = #tpu.dot_dimension_numbers<[1], [0], [0], [1], [0, 0, 1, 1], [], []>} : vector<16x32xf32>, vector<32x32xf32>, vector<16x32xf32> -> vector<16x32xf32>
    %578 = vector.broadcast %576 : vector<1x32xf32> to vector<16x32xf32>
    %579 = arith.addf %577, %578 : vector<16x32xf32>
    %580 = vector.extract_strided_slice %571 {offsets = [0, 32], sizes = [32, 64], strides = [1, 1]} : vector<32x96xf32> to vector<32x64xf32>
    %581 = vector.extract_strided_slice %572 {offsets = [0, 32], sizes = [1, 64], strides = [1, 1]} : vector<1x96xf32> to vector<1x64xf32>
    %cst_185 = arith.constant dense<0.000000e+00> : vector<16x64xf32>
    %582 = tpu.matmul %254, %580, %cst_185 {dimension_numbers = #tpu.dot_dimension_numbers<[1], [0], [0], [1], [0, 0, 1, 1], [], []>} : vector<16x32xf32>, vector<32x64xf32>, vector<16x64xf32> -> vector<16x64xf32>
    %583 = vector.broadcast %581 : vector<1x64xf32> to vector<16x64xf32>
    %584 = arith.addf %582, %583 : vector<16x64xf32>
    %585 = vector.extract_strided_slice %584 {offsets = [0, 0], sizes = [16, 32], strides = [1, 1]} : vector<16x64xf32> to vector<16x32xf32>
    %586 = vector.extract_strided_slice %584 {offsets = [0, 32], sizes = [16, 32], strides = [1, 1]} : vector<16x64xf32> to vector<16x32xf32>
    %587 = vector.shape_cast %579 : vector<16x32xf32> to vector<2x8x32xf32>
    %588 = vector.extract_strided_slice %587 {offsets = [0, 0, 0], sizes = [2, 8, 8], strides = [1, 1, 1]} : vector<2x8x32xf32> to vector<2x8x8xf32>
    %589 = vector.extract_strided_slice %587 {offsets = [0, 0, 8], sizes = [2, 8, 8], strides = [1, 1, 1]} : vector<2x8x32xf32> to vector<2x8x8xf32>
    %590 = vector.extract_strided_slice %587 {offsets = [0, 0, 16], sizes = [2, 8, 8], strides = [1, 1, 1]} : vector<2x8x32xf32> to vector<2x8x8xf32>
    %591 = vector.extract_strided_slice %587 {offsets = [0, 0, 24], sizes = [2, 8, 8], strides = [1, 1, 1]} : vector<2x8x32xf32> to vector<2x8x8xf32>
    %592 = tpu.concatenate %588, %589, %590, %591 in 0 : vector<2x8x8xf32>, vector<2x8x8xf32>, vector<2x8x8xf32>, vector<2x8x8xf32> -> vector<8x8x8xf32>
    %593 = vector.shape_cast %585 : vector<16x32xf32> to vector<2x8x32xf32>
    %594 = vector.extract_strided_slice %593 {offsets = [0, 0, 0], sizes = [2, 8, 8], strides = [1, 1, 1]} : vector<2x8x32xf32> to vector<2x8x8xf32>
    %595 = vector.extract_strided_slice %593 {offsets = [0, 0, 8], sizes = [2, 8, 8], strides = [1, 1, 1]} : vector<2x8x32xf32> to vector<2x8x8xf32>
    %596 = vector.extract_strided_slice %593 {offsets = [0, 0, 16], sizes = [2, 8, 8], strides = [1, 1, 1]} : vector<2x8x32xf32> to vector<2x8x8xf32>
    %597 = vector.extract_strided_slice %593 {offsets = [0, 0, 24], sizes = [2, 8, 8], strides = [1, 1, 1]} : vector<2x8x32xf32> to vector<2x8x8xf32>
    %598 = tpu.concatenate %594, %595, %596, %597 in 0 : vector<2x8x8xf32>, vector<2x8x8xf32>, vector<2x8x8xf32>, vector<2x8x8xf32> -> vector<8x8x8xf32>
    %599 = vector.shape_cast %586 : vector<16x32xf32> to vector<2x8x32xf32>
    %600 = vector.extract_strided_slice %599 {offsets = [0, 0, 0], sizes = [2, 8, 8], strides = [1, 1, 1]} : vector<2x8x32xf32> to vector<2x8x8xf32>
    %601 = vector.extract_strided_slice %599 {offsets = [0, 0, 8], sizes = [2, 8, 8], strides = [1, 1, 1]} : vector<2x8x32xf32> to vector<2x8x8xf32>
    %602 = vector.extract_strided_slice %599 {offsets = [0, 0, 16], sizes = [2, 8, 8], strides = [1, 1, 1]} : vector<2x8x32xf32> to vector<2x8x8xf32>
    %603 = vector.extract_strided_slice %599 {offsets = [0, 0, 24], sizes = [2, 8, 8], strides = [1, 1, 1]} : vector<2x8x32xf32> to vector<2x8x8xf32>
    %604 = tpu.concatenate %600, %601, %602, %603 in 0 : vector<2x8x8xf32>, vector<2x8x8xf32>, vector<2x8x8xf32>, vector<2x8x8xf32> -> vector<8x8x8xf32>
    %cst_186 = arith.constant dense<0.000000e+00> : vector<8x8x8xf32>
    %605 = tpu.matmul %592, %598, %cst_186 {dimension_numbers = #tpu.dot_dimension_numbers<[2], [2], [1], [1], [0, 0, 0, 1, 1, 1], [0], [0]>} : vector<8x8x8xf32>, vector<8x8x8xf32>, vector<8x8x8xf32> -> vector<8x8x8xf32>
    %cst_187 = arith.constant dense<0xFF800000> : vector<8x8xf32>
    %606 = vector.multi_reduction <maximumf>, %605, %cst_187 [2] : vector<8x8x8xf32> to vector<8x8xf32>
    %607 = vector.shape_cast %606 : vector<8x8xf32> to vector<8x8x1xf32>
    %608 = vector.broadcast %607 : vector<8x8x1xf32> to vector<8x8x8xf32>
    %609 = arith.subf %605, %608 : vector<8x8x8xf32>
    %610 = math.exp %609 : vector<8x8x8xf32>
    %cst_188 = arith.constant dense<0.000000e+00> : vector<8x8xf32>
    %611 = vector.multi_reduction <add>, %610, %cst_188 [2] : vector<8x8x8xf32> to vector<8x8xf32>
    %612 = vector.shape_cast %611 : vector<8x8xf32> to vector<8x8x1xf32>
    %613 = vector.broadcast %612 : vector<8x8x1xf32> to vector<8x8x8xf32>
    %614 = arith.divf %610, %613 : vector<8x8x8xf32>
    %c1_189 = arith.constant 1 : index
    %c0_190 = arith.constant 0 : index
    %c0_191 = arith.constant 0 : index
    %c0_192 = arith.constant 0 : index
    %615 = vector.load %arg7[%c1_189, %c0_190, %c0_191, %c0_192] : memref<2x8x8x8xf32, #tpu.memory_space<vmem>>, vector<1x8x8x8xf32>
    %616 = vector.shape_cast %615 : vector<1x8x8x8xf32> to vector<8x8x8xf32>
    %617 = vector.shape_cast %614 : vector<8x8x8xf32> to vector<1x8x8x8xf32>
    tpu.vector_store %arg7[%c1_189, %c0_190, %c0_191, %c0_192], %617 {strides = array<i32>} : memref<2x8x8x8xf32, #tpu.memory_space<vmem>>, vector<1x8x8x8xf32>,
    %cst_193 = arith.constant dense<0.000000e+00> : vector<8x8x8xf32>
    %618 = tpu.matmul %614, %604, %cst_193 {dimension_numbers = #tpu.dot_dimension_numbers<[2], [1], [1], [2], [0, 0, 0, 1, 1, 2], [0], [0]>} : vector<8x8x8xf32>, vector<8x8x8xf32>, vector<8x8x8xf32> -> vector<8x8x8xf32>
    %619 = vector.extract_strided_slice %618 {offsets = [0, 0, 0], sizes = [2, 8, 8], strides = [1, 1, 1]} : vector<8x8x8xf32> to vector<2x8x8xf32>
    %620 = vector.shape_cast %619 : vector<2x8x8xf32> to vector<16x8xf32>
    %621 = vector.extract_strided_slice %573 {offsets = [0, 0], sizes = [8, 32], strides = [1, 1]} : vector<32x32xf32> to vector<8x32xf32>
    %cst_194 = arith.constant dense<0.000000e+00> : vector<16x32xf32>
    %622 = tpu.matmul %620, %621, %cst_194 {dimension_numbers = #tpu.dot_dimension_numbers<[1], [0], [0], [1], [0, 0, 1, 1], [], []>} : vector<16x8xf32>, vector<8x32xf32>, vector<16x32xf32> -> vector<16x32xf32>
    %623 = vector.extract_strided_slice %618 {offsets = [2, 0, 0], sizes = [2, 8, 8], strides = [1, 1, 1]} : vector<8x8x8xf32> to vector<2x8x8xf32>
    %624 = vector.shape_cast %623 : vector<2x8x8xf32> to vector<16x8xf32>
    %625 = vector.extract_strided_slice %573 {offsets = [8, 0], sizes = [8, 32], strides = [1, 1]} : vector<32x32xf32> to vector<8x32xf32>
    %cst_195 = arith.constant dense<0.000000e+00> : vector<16x32xf32>
    %626 = tpu.matmul %624, %625, %cst_195 {dimension_numbers = #tpu.dot_dimension_numbers<[1], [0], [0], [1], [0, 0, 1, 1], [], []>} : vector<16x8xf32>, vector<8x32xf32>, vector<16x32xf32> -> vector<16x32xf32>
    %627 = arith.addf %622, %626 : vector<16x32xf32>
    %628 = vector.extract_strided_slice %618 {offsets = [4, 0, 0], sizes = [2, 8, 8], strides = [1, 1, 1]} : vector<8x8x8xf32> to vector<2x8x8xf32>
    %629 = vector.shape_cast %628 : vector<2x8x8xf32> to vector<16x8xf32>
    %630 = vector.extract_strided_slice %573 {offsets = [16, 0], sizes = [8, 32], strides = [1, 1]} : vector<32x32xf32> to vector<8x32xf32>
    %cst_196 = arith.constant dense<0.000000e+00> : vector<16x32xf32>
    %631 = tpu.matmul %629, %630, %cst_196 {dimension_numbers = #tpu.dot_dimension_numbers<[1], [0], [0], [1], [0, 0, 1, 1], [], []>} : vector<16x8xf32>, vector<8x32xf32>, vector<16x32xf32> -> vector<16x32xf32>
    %632 = arith.addf %627, %631 : vector<16x32xf32>
    %633 = vector.extract_strided_slice %618 {offsets = [6, 0, 0], sizes = [2, 8, 8], strides = [1, 1, 1]} : vector<8x8x8xf32> to vector<2x8x8xf32>
    %634 = vector.shape_cast %633 : vector<2x8x8xf32> to vector<16x8xf32>
    %635 = vector.extract_strided_slice %573 {offsets = [24, 0], sizes = [8, 32], strides = [1, 1]} : vector<32x32xf32> to vector<8x32xf32>
    %cst_197 = arith.constant dense<0.000000e+00> : vector<16x32xf32>
    %636 = tpu.matmul %634, %635, %cst_197 {dimension_numbers = #tpu.dot_dimension_numbers<[1], [0], [0], [1], [0, 0, 1, 1], [], []>} : vector<16x8xf32>, vector<8x32xf32>, vector<16x32xf32> -> vector<16x32xf32>
    %637 = arith.addf %632, %636 : vector<16x32xf32>
    %638 = vector.broadcast %574 : vector<1x32xf32> to vector<16x32xf32>
    %639 = arith.addf %637, %638 : vector<16x32xf32>
    %640 = arith.addf %570, %639 : vector<16x32xf32>
    %c569 = arith.constant 569 : index
    %c0_198 = arith.constant 0 : index
    %641 = vector.load %arg2[%c569, %c0_198] : memref<638x32xf32, #tpu.memory_space<vmem>>, vector<1x32xf32>
    %c570 = arith.constant 570 : index
    %c0_199 = arith.constant 0 : index
    %642 = vector.load %arg2[%c570, %c0_199] : memref<638x32xf32, #tpu.memory_space<vmem>>, vector<1x32xf32>
    %cst_200 = arith.constant dense<0.000000e+00> : vector<16xf32>
    %643 = vector.multi_reduction <add>, %640, %cst_200 [1] : vector<16x32xf32> to vector<16xf32>
    %644 = vector.shape_cast %643 : vector<16xf32> to vector<16x1xf32>
    %cst_201 = arith.constant 3.200000e+01 : f32
    %645 = vector.broadcast %cst_201 : f32 to vector<16x1xf32>
    %646 = arith.divf %644, %645 : vector<16x1xf32>
    %647 = vector.broadcast %646 : vector<16x1xf32> to vector<16x32xf32>
    %648 = arith.subf %640, %647 : vector<16x32xf32>
    %649 = arith.mulf %648, %648 : vector<16x32xf32>
    %cst_202 = arith.constant dense<0.000000e+00> : vector<16xf32>
    %650 = vector.multi_reduction <add>, %649, %cst_202 [1] : vector<16x32xf32> to vector<16xf32>
    %651 = vector.shape_cast %650 : vector<16xf32> to vector<16x1xf32>
    %cst_203 = arith.constant 3.200000e+01 : f32
    %652 = vector.broadcast %cst_203 : f32 to vector<16x1xf32>
    %653 = arith.divf %651, %652 : vector<16x1xf32>
    %654 = vector.broadcast %646 : vector<16x1xf32> to vector<16x32xf32>
    %655 = arith.subf %640, %654 : vector<16x32xf32>
    %cst_204 = arith.constant 9.99999974E-6 : f32
    %656 = vector.broadcast %cst_204 : f32 to vector<16x1xf32>
    %657 = arith.addf %653, %656 : vector<16x1xf32>
    %658 = math.rsqrt %657 : vector<16x1xf32>
    %659 = vector.broadcast %658 : vector<16x1xf32> to vector<16x32xf32>
    %660 = arith.mulf %655, %659 : vector<16x32xf32>
    %661 = vector.broadcast %641 : vector<1x32xf32> to vector<16x32xf32>
    %662 = arith.mulf %660, %661 : vector<16x32xf32>
    %663 = vector.broadcast %642 : vector<1x32xf32> to vector<16x32xf32>
    %664 = arith.addf %662, %663 : vector<16x32xf32>
    %c99_205 = arith.constant 99 : index
    %c0_206 = arith.constant 0 : index
    %665 = vector.load %arg1[%c99_205, %c0_206] : memref<132x64xf32, #tpu.memory_space<vmem>>, vector<32x64xf32>
    %c131_207 = arith.constant 131 : index
    %c0_208 = arith.constant 0 : index
    %666 = vector.load %arg1[%c131_207, %c0_208] : memref<132x64xf32, #tpu.memory_space<vmem>>, vector<1x64xf32>
    %cst_209 = arith.constant dense<0.000000e+00> : vector<16x64xf32>
    %667 = tpu.matmul %664, %665, %cst_209 {dimension_numbers = #tpu.dot_dimension_numbers<[1], [0], [0], [1], [0, 0, 1, 1], [], []>} : vector<16x32xf32>, vector<32x64xf32>, vector<16x64xf32> -> vector<16x64xf32>
    %668 = vector.broadcast %666 : vector<1x64xf32> to vector<16x64xf32>
    %669 = arith.addf %667, %668 : vector<16x64xf32>
    %cst_210 = arith.constant 0.000000e+00 : f32
    %670 = vector.broadcast %cst_210 : f32 to vector<16x64xf32>
    %671 = arith.maximumf %669, %670 : vector<16x64xf32>
    %c571 = arith.constant 571 : index
    %c0_211 = arith.constant 0 : index
    %672 = vector.load %arg2[%c571, %c0_211] : memref<638x32xf32, #tpu.memory_space<vmem>>, vector<64x32xf32>
    %c635 = arith.constant 635 : index
    %c0_212 = arith.constant 0 : index
    %673 = vector.load %arg2[%c635, %c0_212] : memref<638x32xf32, #tpu.memory_space<vmem>>, vector<1x32xf32>
    %cst_213 = arith.constant dense<0.000000e+00> : vector<16x32xf32>
    %674 = tpu.matmul %671, %672, %cst_213 {dimension_numbers = #tpu.dot_dimension_numbers<[1], [0], [0], [1], [0, 0, 1, 1], [], []>} : vector<16x64xf32>, vector<64x32xf32>, vector<16x32xf32> -> vector<16x32xf32>
    %675 = vector.broadcast %673 : vector<1x32xf32> to vector<16x32xf32>
    %676 = arith.addf %674, %675 : vector<16x32xf32>
    %677 = arith.addf %664, %676 : vector<16x32xf32>
    %c636 = arith.constant 636 : index
    %c0_214 = arith.constant 0 : index
    %678 = vector.load %arg2[%c636, %c0_214] : memref<638x32xf32, #tpu.memory_space<vmem>>, vector<1x32xf32>
    %c637 = arith.constant 637 : index
    %c0_215 = arith.constant 0 : index
    %679 = vector.load %arg2[%c637, %c0_215] : memref<638x32xf32, #tpu.memory_space<vmem>>, vector<1x32xf32>
    %cst_216 = arith.constant dense<0.000000e+00> : vector<16xf32>
    %680 = vector.multi_reduction <add>, %677, %cst_216 [1] : vector<16x32xf32> to vector<16xf32>
    %681 = vector.shape_cast %680 : vector<16xf32> to vector<16x1xf32>
    %cst_217 = arith.constant 3.200000e+01 : f32
    %682 = vector.broadcast %cst_217 : f32 to vector<16x1xf32>
    %683 = arith.divf %681, %682 : vector<16x1xf32>
    %684 = vector.broadcast %683 : vector<16x1xf32> to vector<16x32xf32>
    %685 = arith.subf %677, %684 : vector<16x32xf32>
    %686 = arith.mulf %685, %685 : vector<16x32xf32>
    %cst_218 = arith.constant dense<0.000000e+00> : vector<16xf32>
    %687 = vector.multi_reduction <add>, %686, %cst_218 [1] : vector<16x32xf32> to vector<16xf32>
    %688 = vector.shape_cast %687 : vector<16xf32> to vector<16x1xf32>
    %cst_219 = arith.constant 3.200000e+01 : f32
    %689 = vector.broadcast %cst_219 : f32 to vector<16x1xf32>
    %690 = arith.divf %688, %689 : vector<16x1xf32>
    %691 = vector.broadcast %683 : vector<16x1xf32> to vector<16x32xf32>
    %692 = arith.subf %677, %691 : vector<16x32xf32>
    %cst_220 = arith.constant 9.99999974E-6 : f32
    %693 = vector.broadcast %cst_220 : f32 to vector<16x1xf32>
    %694 = arith.addf %690, %693 : vector<16x1xf32>
    %695 = math.rsqrt %694 : vector<16x1xf32>
    %696 = vector.broadcast %695 : vector<16x1xf32> to vector<16x32xf32>
    %697 = arith.mulf %692, %696 : vector<16x32xf32>
    %698 = vector.broadcast %678 : vector<1x32xf32> to vector<16x32xf32>
    %699 = arith.mulf %697, %698 : vector<16x32xf32>
    %700 = vector.broadcast %679 : vector<1x32xf32> to vector<16x32xf32>
    %701 = arith.addf %699, %700 : vector<16x32xf32>
    %c128 = arith.constant 128 : index
    %c0_221 = arith.constant 0 : index
    %702 = vector.load %arg2[%c128, %c0_221] : memref<638x32xf32, #tpu.memory_space<vmem>>, vector<32x32xf32>
    %cst_222 = arith.constant dense<0.000000e+00> : vector<16x32xf32>
    %703 = tpu.matmul %701, %702, %cst_222 {dimension_numbers = #tpu.dot_dimension_numbers<[1], [0], [0], [1], [0, 0, 1, 1], [], []>} : vector<16x32xf32>, vector<32x32xf32>, vector<16x32xf32> -> vector<16x32xf32>
    %c0_223 = arith.constant 0 : index
    %c0_224 = arith.constant 0 : index
    %704 = vector.load %arg4[%c0_223, %c0_224] : memref<16x32xf32, #tpu.memory_space<vmem>>, vector<16x32xf32>
    tpu.vector_store %arg4[%c0_223, %c0_224], %703 {strides = array<i32>} : memref<16x32xf32, #tpu.memory_space<vmem>>, vector<16x32xf32>,
    return
  }
}

</mosaic_0001>

<bundles_post_ra>
// kernel: eq.1
= control target key start
LH: loop header
LB: loop body
LE: loop exit
PB: predicated region body
PF: predicated region fallthrough
CT: control target
= control target key end

     0   :  { %vm7_vm0 = vcmask 64512   ;;  %vm13_vm1 = vcmask 130112   ;;  %s39_s0 = inlined_call_operand.vmem [shape: s32[2,8], index: 0, kind: input, shape index: {}]   ;;  %s40_s1 = inlined_call_operand.vmem [shape: s32[16], index: 1, kind: output, shape index: {}]  }
   0x1   :  { %v4_v0 = vld [vmem:[%s39_s0] sm:$0x3]  ;;  %s22_s0 = smov 8  }
   0x2   :  { %5 = vst [vmem:[#allocation1] sm:$0x3] %v4_v0 }
   0x9   :  { %v10_v1 = vld [vmem:[#allocation1 + $0x1] sm:$0x1]   ;;  %v6_v2 = vld [vmem:[#allocation1] sm:$0x1]  }
   0xa   :  { %11 = vrot.lane.b32.xlu0 %v10_v1, %s22_s0  ;;  %8 = vst.msk [vmem:[#allocation0] sm:$0x1] %vm7_vm0, %v6_v2  }
  0x7c   :  { %v12_v3 = vpop.permute.xlu0 %11  }
  0x7d   :  { %14 = vst.msk [vmem:[#allocation0] sm:$0x1] %vm13_vm1, %v12_v3  }
  0x84   :  { %v17_v4 = vld [vmem:[#allocation0] sm:$0x1] }
  0x85   :  { %20 = vst [vmem:[%s40_s1] sm:$0x1] %v17_v4 }

// kernel: fairseq_forward.1
= control target key start
LH: loop header
LB: loop body
LE: loop exit
PB: predicated region body
PF: predicated region fallthrough
CT: control target
= control target key end

     0   :  { %vm30_vm0 = vcmask 261120   ;;  %s8389_s0 = inlined_call_operand.vmem [shape: f32[198,96], index: 0, kind: input, shape index: {}]   ;;  %s8390_s1 = inlined_call_operand.vmem [shape: f32[132,64], index: 1, kind: input, shape index: {}]   ;;  %s8391_s2 = inlined_call_operand.vmem [shape: f32[638,32], index: 2, kind: input, shape index: {}]   ;;  %s8392_s3 = inlined_call_operand.vmem [shape: f32[2,8,8], index: 3, kind: input, shape index: {}]   ;;  %s8393_s4 = inlined_call_operand.hbm [shape: f32[16,32], index: 4, kind: output, shape index: {0}]   ;;  %s8394_s5 = inlined_call_operand.vmem [shape: f32[2,8,8,8], index: 5, kind: output, shape index: {1}]   ;;  %s8395_s6 = inlined_call_operand.vmem [shape: f32[2,8,8,8], index: 6, kind: output, shape index: {2}]   ;;  %s8396_s7 = inlined_call_operand.vmem [shape: f32[2,8,8,8], index: 7, kind: output, shape index: {3}]  }
   0x1   :  { %v27_v0 = vld [vmem:[%s8391_s2 + $0x58] sm:$0xff]  ;;  %v26_v1 = vld [vmem:[%s8391_s2 + $0x50] sm:$0xff]  ;;  %v25_v2 = vld [vmem:[%s8391_s2 + $0x48] sm:$0xff] }
   0x2   :  { %49 = vmatpush.msra.mxu0 %v27_v0  ;;  %6120 = vmatpush.msra.mxu1 %v27_v0  ;;  %v24_v3 = vld [vmem:[%s8391_s2 + $0x40] sm:$0xff]  ;;  %v23_v5 = vld [vmem:[%s8391_s2 + $0x8] sm:$0xff]  ;;  %v63_v6 = vld [vmem:[%s8389_s0 + $0x18] sm:$0xff] }
   0x3   :  { %v22_v4 = vld [vmem:[%s8391_s2] sm:$0xff]  ;;  %v62_v7 = vld [vmem:[%s8389_s0 + $0x10] sm:$0xff] }
   0x4   :  { %50 = vmatpush.msra.mxu0 %v26_v1  ;;  %6121 = vmatpush.msra.mxu1 %v26_v1 }
   0x6   :  { %51 = vmatpush.msra.mxu0 %v25_v2  ;;  %6122 = vmatpush.msra.mxu1 %v25_v2 }
   0x8   :  { %52 = vmatpush.msra.mxu0 %v24_v3  ;;  %6123 = vmatpush.msra.mxu1 %v24_v3 }
   0x9   :  { %5866 = vmatmul.msk.f32.vlgmr.msra.gmra.mxu0 %vm30_vm0, %v22_v4  ;;  %5867 = vmatmul.msk.f32.vlgmr.msra.gmra.mxu1 %vm30_vm0, %v23_v5 }
   0xa   :  { %89 = vmatpush.msrb.mxu1 %v63_v6 }
   0xc   :  { %90 = vmatpush.msrb.mxu1 %v62_v7 }
   0xd   :  { %13 = vsyncpa [#allocation3], 0  ;;  %v61_v8 = vld [vmem:[%s8389_s0 + $0x8] sm:$0xff]  ;;  %v60_v9 = vld [vmem:[%s8389_s0] sm:$0xff]  ;;  %s6545_s27 = smov 104   ;;  %s6546_s28 = smov 112  }
   0xe   :  { %91 = vmatpush.msrb.mxu1 %v61_v8  ;;  %v28_v10 = vld [vmem:[%s8391_s2 + $0x20] sm:$0xff]  ;;  %v29_v13 = vld [vmem:[%s8391_s2 + $0x28] sm:$0xff]  ;;  %s6547_s29 = smov 120   ;;  %s6548_s30 = smov 96   ;;  %vm116_vm1 = vcmask 64512  }
   0xf   :  { %v6243_v16 = vld [vmem:[%s8389_s0 + $0x20] ss:$0 sm:$0xff]  ;;  %s6549_s8 = smov 64   ;;  %s5842_s13 = sshll.u32 %s8393_s4, 4  ;;  %s5843_s13 = int_to_ptr.hbm [resolvable:$true] %s5842_s13 }
  0x10   :  { %92 = vmatpush.msrb.mxu1 %v60_v9  ;;  %s6552_s14 = smov 128   ;;  %s6553_s15 = smov 8  }
  0x86   :  { %v54_v11 = vpop.f32.mrf.mxu0  ;;  %v57_v14 = vpop.f32.mrf.mxu1 }
  0x87   :  { %v6629_v12 = vadd.f32 %v54_v11, %v28_v10  ;;  %v6636_v15 = vadd.f32 %v57_v14, %v29_v13 }
  0x89   :  { %5868 = vmatmul.msk.f32.vlgmr.msrb.gmra.mxu1 %vm30_vm0, %v6629_v12 }
  0x91   :  { %5869 = vmatmul.msk.f32.gmra.mxu1 %vm30_vm0, %v6636_v15 }
 0x106   :  { %v94_v17 = vpop.f32.mrf.mxu1 }
 0x107   :  { %v6643_v18 = vadd.f32 %v6243_v16, %v94_v17 }
 0x109   :  { %110 = vrot.lane.b32.xlu2 %v6643_v18, %s6545_s27  ;;  %106 = vrot.lane.b32.xlu1 %v6643_v18, %s6546_s28 }
 0x10a   :  { %102 = vrot.lane.b32.xlu0 %v6643_v18, %s6547_s29 }
 0x10e   :  { %v97_v19 = vpop.f32.mrf.mxu1 }
 0x10f   :  { %v6651_v20 = vadd.f32 %v6243_v16, %v97_v19 }
 0x111   :  { %112 = vrot.lane.b32.xlu2 %v6651_v20, %s6545_s27  ;;  %108 = vrot.lane.b32.xlu1 %v6651_v20, %s6546_s28 }
 0x112   :  { %104 = vrot.lane.b32.xlu0 %v6651_v20, %s6547_s29 }
 0x119   :  { %141 = vrot.lane.b32.xlu1 %v6651_v20, %s6548_s30 }
 0x11a   :  { %114 = vrot.lane.b32.xlu0 %v6643_v18, %s6548_s30 }
 0x163   :  { %v6663_v21 = vpop.permute.xlu2 %110 }
 0x16b   :  { %v6673_v24 = vpop.permute.xlu2 %112 }
 0x17b   :  { %v6665_v22 = vpop.permute.xlu1 %106 }
 0x17c   :  { %v6667_v23 = vpop.permute.xlu0 %102  ;;  %219 = vrot.lane.b32.xlu1 %v6665_v22, %s6548_s30  ;;  %v6138_v62 = vpack.i.bf16 %v6665_v22, %v6651_v20 }
 0x17d   :  { %167 = vrot.lane.b32.xlu2 %v6667_v23, %s6548_s30  ;;  %v6133_v60 = vpack.i.bf16 %v6667_v23, %v6643_v18 }
 0x183   :  { %v6675_v25 = vpop.permute.xlu1 %108 }
 0x184   :  { %v6677_v26 = vpop.permute.xlu0 %104  ;;  %297 = vrot.lane.b32.xlu1 %v6673_v24, %s6548_s30 }
 0x185   :  { %245 = vrot.lane.b32.xlu2 %v6675_v25, %s6548_s30  ;;  %193 = vrot.lane.b32.xlu0 %v6677_v26, %s6548_s30 }
 0x18b   :  { %v142_v27 = vpop.permute.xlu1 %141 }
 0x18c   :  { %v115_v28 = vpop.permute.xlu0 %114  ;;  %5872 = vmatpush.xpose.msk.msra.mxu3 %vm116_vm1, %v142_v27 }
 0x18d   :  { %271 = vrot.lane.b32.xlu0 %v6663_v21, %s6548_s30  ;;  %5870 = vmatpush.xpose.msk.msra.mxu2 %vm116_vm1, %v115_v28 }
 0x18f   :  { %5873 = vmatmul.msk.f32.vlgmr.msra.gmra.mxu3 %vm116_vm1, %v6651_v20 }
 0x190   :  { %5871 = vmatmul.msk.f32.vlgmr.msra.gmra.mxu2 %vm116_vm1, %v6643_v18 }
 0x1d7   :  { %v168_v29 = vpop.permute.xlu2 %167 }
 0x1d8   :  { %5874 = vmatpush.xpose.msk.msrb.mxu2 %vm116_vm1, %v168_v29 }
 0x1db   :  { %5875 = vmatmul.msk.f32.vlgmr.msrb.gmra.mxu2 %vm116_vm1, %v6667_v23 }
 0x1df   :  { %v246_v33 = vpop.permute.xlu2 %245 }
 0x1ee   :  { %v220_v30 = vpop.permute.xlu1 %219 }
 0x1ef   :  { %5878 = vmatpush.xpose.msk.msra.mxu2 %vm116_vm1, %v220_v30 }
 0x1f2   :  { %5879 = vmatmul.msk.f32.vlgmr.msra.gmra.mxu2 %vm116_vm1, %v6665_v22 }
 0x1f6   :  { %v298_v31 = vpop.permute.xlu1 %297 }
 0x1f7   :  { %v194_v32 = vpop.permute.xlu0 %193  ;;  %5884 = vmatpush.xpose.msk.msra.mxu1 %vm116_vm1, %v298_v31 }
 0x1f8   :  { %5876 = vmatpush.xpose.msk.msrb.mxu3 %vm116_vm1, %v194_v32 }
 0x1fa   :  { %5885 = vmatmul.msk.f32.vlgmr.msra.gmra.mxu1 %vm116_vm1, %v6673_v24 }
 0x1fb   :  { %5877 = vmatmul.msk.f32.vlgmr.msrb.gmra.mxu3 %vm116_vm1, %v6677_v26 }
 0x1fc   :  { %5880 = vmatpush.xpose.msk.msra.mxu3 %vm116_vm1, %v246_v33 }
 0x1ff   :  { %v272_v34 = vpop.permute.xlu0 %271 }
 0x200   :  { %5882 = vmatpush.xpose.msk.msrb.mxu0 %vm116_vm1, %v272_v34 }
 0x203   :  { %5881 = vmatmul.msk.f32.vlgmr.msra.gmra.mxu3 %vm116_vm1, %v6675_v25  ;;  %5883 = vmatmul.msk.f32.vlgmr.msrb.gmra.mxu0 %vm116_vm1, %v6663_v21 }
 0x212   :  { %v164_v35 = vpop.f32.mrf.mxu3 }
 0x213   :  { %v138_v36 = vpop.f32.mrf.mxu2  ;;  %v326_v37 = vsel %vm116_vm1, %v164_v35, -inf }
 0x214   :  { %327 = vmax.xlane.f32.xlu1 %v326_v37  ;;  %v323_v38 = vsel %vm116_vm1, %v138_v36, -inf }
 0x215   :  { %324 = vmax.xlane.f32.xlu2 %v323_v38 }
 0x25e   :  { %v190_v39 = vpop.f32.mrf.mxu2 }
 0x25f   :  { %v329_v40 = vsel %vm116_vm1, %v190_v39, -inf }
 0x260   :  { %330 = vmax.xlane.f32.xlu0 %v329_v40 }
 0x275   :  { %v242_v41 = vpop.f32.mrf.mxu2 }
 0x276   :  { %v335_v42 = vsel %vm116_vm1, %v242_v41, -inf }
 0x277   :  { %336 = vmax.xlane.f32.xlu2 %v335_v42  ;;  %v320_v47 = vpop.f32.mrf.mxu1 }
 0x278   :  { %v344_v49 = vsel %vm116_vm1, %v320_v47, -inf }
 0x27e   :  { %v216_v43 = vpop.f32.mrf.mxu3 }
 0x27f   :  { %v332_v44 = vsel %vm116_vm1, %v216_v43, -inf }
 0x280   :  { %333 = vmax.xlane.f32.xlu2 %v332_v44  ;;  %v294_v45 = vpop.f32.mrf.mxu0 }
 0x281   :  { %v341_v46 = vsel %vm116_vm1, %v294_v45, -inf }
 0x282   :  { %342 = vmax.xlane.f32.xlu1 %v341_v46 }
 0x286   :  { %v6726_v59 = vpop.f32.mrf.mxu3 }
 0x287   :  { %v328_v48 = vpop.xlane.xlu1 %327  ;;  %v338_v61 = vsel %vm116_vm1, %v6726_v59, -inf }
 0x288   :  { %v348_v50 = vsub.f32 %v164_v35, %v328_v48  ;;  %v325_v51 = vpop.xlane.xlu2 %324  ;;  %345 = vmax.xlane.f32.xlu2 %v344_v49 }
 0x289   :  { %v347_v52 = vsub.f32 %v138_v36, %v325_v51 }
 0x28a   :  { %v357_v53 = vmul.f32 1.442695, %v348_v50 }
 0x28b   :  { %v355_v54 = vmul.f32 1.442695, %v347_v52 }
 0x28c   :  { %6283 = vpow2.f32 %v357_v53 }
 0x28d   :  { %6285 = vpow2.f32 %v355_v54 }
 0x292   :  { %v6718_v55 = vpop.eup %6283 }
 0x293   :  { %v6720_v56 = vpop.eup %6285  ;;  %v374_v57 = vsel %vm116_vm1, %v6718_v55, 0.0 }
 0x294   :  { %v371_v58 = vsel %vm116_vm1, %v6720_v56, 0.0  ;;  %375 = vadd.xlane.f32.xlu2 %v374_v57 }
 0x295   :  { %372 = vadd.xlane.f32.xlu0 %v371_v58 }
 0x29b   :  { %6134 = vrot.lane.b32.xlu1 %v6133_v60, %s6549_s8 }
 0x29d   :  { %339 = vmax.xlane.f32.xlu0 %v338_v61 }
 0x2b1   :  { %6139 = vrot.lane.b32.xlu0 %v6138_v62, %s6549_s8 }
 0x2d3   :  { %v331_v63 = vpop.xlane.xlu0 %330 }
 0x2d4   :  { %v349_v0 = vsub.f32 %v190_v39, %v331_v63 }
 0x2d6   :  { %v359_v1 = vmul.f32 1.442695, %v349_v0  ;;  %v6143_v0 = vpack.i.bf16 %v6675_v25, %v6677_v26 }
 0x2d8   :  { %6287 = vpow2.f32 %v359_v1 }
 0x2de   :  { %v6736_v2 = vpop.eup %6287 }
 0x2df   :  { %v377_v3 = vsel %vm116_vm1, %v6736_v2, 0.0 }
 0x2e0   :  { %378 = vadd.xlane.f32.xlu1 %v377_v3 }
 0x2ea   :  { %v337_v4 = vpop.xlane.xlu2 %336 }
 0x2eb   :  { %v351_v10 = vsub.f32 %v242_v41, %v337_v4 }
 0x2ed   :  { %v363_v13 = vmul.f32 1.442695, %v351_v10 }
 0x2f3   :  { %v334_v5 = vpop.xlane.xlu2 %333 }
 0x2f4   :  { %v350_v6 = vsub.f32 %v216_v43, %v334_v5 }
 0x2f5   :  { %v343_v7 = vpop.xlane.xlu1 %342 }
 0x2f6   :  { %v361_v8 = vmul.f32 1.442695, %v350_v6  ;;  %v353_v9 = vsub.f32 %v294_v45, %v343_v7 }
 0x2f8   :  { %6289 = vpow2.f32 %v361_v8  ;;  %v367_v11 = vmul.f32 1.442695, %v353_v9 }
 0x2fa   :  { %6291 = vpow2.f32 %v367_v11 }
 0x2fb   :  { %v346_v14 = vpop.xlane.xlu2 %345  ;;  %6293 = vpow2.f32 %v363_v13 }
 0x2fc   :  { %v354_v16 = vsub.f32 %v320_v47, %v346_v14 }
 0x2fe   :  { %v6740_v17 = vpop.eup %6289  ;;  %v369_v18 = vmul.f32 1.442695, %v354_v16 }
 0x2ff   :  { %v380_v19 = vsel %vm116_vm1, %v6740_v17, 0.0 }
 0x300   :  { %v6744_v20 = vpop.eup %6291  ;;  %6295 = vpow2.f32 %v369_v18  ;;  %381 = vadd.xlane.f32.xlu1 %v380_v19 }
 0x301   :  { %v389_v22 = vsel %vm116_vm1, %v6744_v20, 0.0  ;;  %v6748_v23 = vpop.eup %6293 }
 0x302   :  { %390 = vadd.xlane.f32.xlu0 %v389_v22  ;;  %v383_v31 = vsel %vm116_vm1, %v6748_v23, 0.0 }
 0x306   :  { %v6750_v27 = vpop.eup %6295 }
 0x307   :  { %v392_v28 = vsel %vm116_vm1, %v6750_v27, 0.0  ;;  %v376_v29 = vpop.xlane.xlu2 %375 }
 0x308   :  { %393 = vadd.xlane.f32.xlu2 %v392_v28  ;;  %6297 = vrcp.f32 %v376_v29  ;;  %v373_v30 = vpop.xlane.xlu0 %372  ;;  %v419_v42 = vand.u32 2147483647, %v376_v29  ;;  %v421_v43 = vand.u32 2147483648, %v376_v29  ;;  %vm415_vm4 = vweird.f32 %v376_v29 }
 0x309   :  { %6299 = vrcp.f32 %v373_v30  ;;  %v406_v46 = vand.u32 2147483648, %v373_v30  ;;  %v404_v49 = vand.u32 2147483647, %v373_v30  ;;  %vm400_vm6 = vweird.f32 %v373_v30 }
 0x30a   :  { %384 = vadd.xlane.f32.xlu0 %v383_v31  ;;  %v422_v51 = vor.u32 1.1754944e-38, %v421_v43  ;;  %vm420_vm7 = vcmp.eq.f32.partialorder %v419_v42, 8.507059e+37 }
 0x30b   :  { %v407_v54 = vor.u32 1.1754944e-38, %v406_v46  ;;  %vm405_vm9 = vcmp.eq.f32.partialorder %v404_v49, 8.507059e+37 }
 0x30d   :  { %v6135_v32 = vpop.permute.xlu1 %6134 }
 0x30e   :  { %v6298_v33 = vpop.eup %6297  ;;  %v6137_v34 = vunpack.i.h.bf16 %v6135_v32  ;;  %v6136_v35 = vunpack.i.l.bf16 %v6135_v32 }
 0x30f   :  { %v6300_v36 = vpop.eup %6299  ;;  %v411_v37 = vmul.f32 %v6298_v33, %v376_v29  ;;  %vm416_vm2 = vweird.f32 %v6298_v33 }
 0x310   :  { %v396_v38 = vmul.f32 %v6300_v36, %v373_v30  ;;  %544 = vmatpush.msrb.mxu2 %v6136_v35  ;;  %596 = vmatpush.msra.mxu0 %v6137_v34  ;;  %v340_v39 = vpop.xlane.xlu0 %339  ;;  %vm401_vm3 = vweird.f32 %v6300_v36  ;;  %vm417_vm5 = vmor %vm415_vm4, %vm416_vm2 }
 0x311   :  { %v412_v40 = vsub.f32 1.0, %v411_v37  ;;  %v352_v41 = vsub.f32 %v6726_v59, %v340_v39  ;;  %vm402_vm8 = vmor %vm400_vm6, %vm401_vm3 }
 0x312   :  { %v397_v44 = vsub.f32 1.0, %v396_v38 }
 0x313   :  { %v413_v45 = vmul.f32 %v6298_v33, %v412_v40  ;;  %v365_v47 = vmul.f32 1.442695, %v352_v41 }
 0x314   :  { %v398_v48 = vmul.f32 %v6300_v36, %v397_v44 }
 0x315   :  { %v414_v50 = vadd.f32 %v6298_v33, %v413_v45  ;;  %6301 = vpow2.f32 %v365_v47 }
 0x316   :  { %v399_v52 = vadd.f32 %v6300_v36, %v398_v48 }
 0x317   :  { %v418_v53 = vsel %vm417_vm5, %v6298_v33, %v414_v50 }
 0x318   :  { %v403_v57 = vsel %vm402_vm8, %v6300_v36, %v399_v52  ;;  %v423_v58 = vsel %vm420_vm7, %v422_v51, %v418_v53 }
 0x319   :  { %679 = vrot.lane.b32.xlu1 %v6663_v21, %s6549_s8  ;;  %v408_v59 = vsel %vm405_vm9, %v407_v54, %v403_v57  ;;  %v424_v60 = vmul.f32 %v6718_v55, %v423_v58 }
 0x31a   :  { %v409_v61 = vmul.f32 %v6720_v56, %v408_v59 }
 0x31b   :  { %v6761_v62 = vpop.eup %6301  ;;  %516 = vst.msk [vmem:[%s8394_s5 + $0x8] sm:$0xff] %vm116_vm1, %v424_v60 }
 0x31c   :  { %515 = vst.msk [vmem:[%s8394_s5] sm:$0xff] %vm116_vm1, %v409_v61  ;;  %5886 = vmatmul.msk.f32.vlgmr.msrb.gmra.mxu2 %vm116_vm1, %v409_v61  ;;  %v386_v21 = vsel %vm116_vm1, %v6761_v62, 0.0 }
 0x31d   :  { %387 = vadd.xlane.f32.xlu2 %v386_v21 }
 0x31e   :  { %705 = vrot.lane.b32.xlu0 %v6673_v24, %s6549_s8 }
 0x323   :  { %v6140_v55 = vpop.permute.xlu0 %6139 }
 0x324   :  { %v6142_v56 = vunpack.i.h.bf16 %v6140_v55  ;;  %v6141_v63 = vunpack.i.l.bf16 %v6140_v55 }
 0x326   :  { %570 = vmatpush.msrb.mxu3 %v6141_v63  ;;  %648 = vmatpush.msra.mxu2 %v6142_v56 }
 0x327   :  { %5887 = vmatmul.msk.f32.vlgmr.msrb.gmra.mxu3 %vm116_vm1, %v424_v60 }
 0x335   :  { %6144 = vrot.lane.b32.xlu2 %v6143_v0, %s6549_s8 }
 0x353   :  { %v379_v1 = vpop.xlane.xlu1 %378 }
 0x354   :  { %6303 = vrcp.f32 %v379_v1  ;;  %v436_v6 = vand.u32 2147483648, %v379_v1  ;;  %v434_v24 = vand.u32 2147483647, %v379_v1  ;;  %vm430_vm11 = vweird.f32 %v379_v1 }
 0x356   :  { %v437_v9 = vor.u32 1.1754944e-38, %v436_v6  ;;  %vm435_vm13 = vcmp.eq.f32.partialorder %v434_v24, 8.507059e+37 }
 0x35a   :  { %v6304_v3 = vpop.eup %6303 }
 0x35b   :  { %v426_v4 = vmul.f32 %v6304_v3, %v379_v1  ;;  %vm431_vm10 = vweird.f32 %v6304_v3 }
 0x35c   :  { %vm432_vm12 = vmor %vm430_vm11, %vm431_vm10 }
 0x35d   :  { %v427_v5 = vsub.f32 1.0, %v426_v4 }
 0x35f   :  { %v428_v7 = vmul.f32 %v6304_v3, %v427_v5 }
 0x361   :  { %v429_v8 = vadd.f32 %v6304_v3, %v428_v7 }
 0x363   :  { %v433_v10 = vsel %vm432_vm12, %v6304_v3, %v429_v8 }
 0x364   :  { %v438_v11 = vsel %vm435_vm13, %v437_v9, %v433_v10 }
 0x365   :  { %v439_v25 = vmul.f32 %v6736_v2, %v438_v11 }
 0x367   :  { %517 = vst.msk [vmem:[%s8394_s5 + $0x10] sm:$0xff] %vm116_vm1, %v439_v25  ;;  %5888 = vmatmul.msk.f32.vlgmr.msra.gmra.mxu0 %vm116_vm1, %v439_v25 }
 0x373   :  { %v382_v26 = vpop.xlane.xlu1 %381 }
 0x374   :  { %6305 = vrcp.f32 %v382_v26  ;;  %v449_v2 = vand.u32 2147483647, %v382_v26  ;;  %v451_v30 = vand.u32 2147483648, %v382_v26  ;;  %vm445_vm15 = vweird.f32 %v382_v26 }
 0x375   :  { %v391_v13 = vpop.xlane.xlu0 %390 }
 0x376   :  { %6307 = vrcp.f32 %v391_v13  ;;  %v496_v33 = vand.u32 2147483648, %v391_v13  ;;  %v494_v36 = vand.u32 2147483647, %v391_v13  ;;  %vm450_vm4 = vcmp.eq.f32.partialorder %v449_v2, 8.507059e+37  ;;  %v67_v2 = vld [vmem:[%s8391_s2 + $0xb0] sm:$0xff] }
 0x377   :  { %v452_v38 = vor.u32 1.1754944e-38, %v451_v30  ;;  %vm490_vm5 = vweird.f32 %v391_v13 }
 0x378   :  { %v497_v43 = vor.u32 1.1754944e-38, %v496_v33  ;;  %vm495_vm7 = vcmp.eq.f32.partialorder %v494_v36, 8.507059e+37 }
 0x37a   :  { %v6306_v14 = vpop.eup %6305 }
 0x37b   :  { %v441_v16 = vmul.f32 %v6306_v14, %v382_v26  ;;  %v394_v18 = vpop.xlane.xlu2 %393  ;;  %vm446_vm14 = vweird.f32 %v6306_v14 }
 0x37c   :  { %v6308_v19 = vpop.eup %6307  ;;  %6309 = vrcp.f32 %v394_v18  ;;  %vm447_vm3 = vmor %vm445_vm15, %vm446_vm14  ;;  %v509_v48 = vand.u32 2147483647, %v394_v18  ;;  %v511_v49 = vand.u32 2147483648, %v394_v18  ;;  %vm505_vm9 = vweird.f32 %v394_v18 }
 0x37d   :  { %v442_v22 = vsub.f32 1.0, %v441_v16  ;;  %v486_v28 = vmul.f32 %v6308_v19, %v391_v13  ;;  %v385_v29 = vpop.xlane.xlu0 %384  ;;  %vm491_vm2 = vweird.f32 %v6308_v19 }
 0x37e   :  { %6311 = vrcp.f32 %v385_v29  ;;  %vm492_vm6 = vmor %vm490_vm5, %vm491_vm2  ;;  %v466_v57 = vand.u32 2147483648, %v385_v29  ;;  %v464_v60 = vand.u32 2147483647, %v385_v29  ;;  %vm510_vm12 = vcmp.eq.f32.partialorder %v509_v48, 8.507059e+37 }
 0x37f   :  { %v443_v31 = vmul.f32 %v6306_v14, %v442_v22  ;;  %v487_v32 = vsub.f32 1.0, %v486_v28  ;;  %vm460_vm13 = vweird.f32 %v385_v29  ;;  %v66_v28 = vld [vmem:[%s8391_s2 + $0xa8] sm:$0xff] }
 0x380   :  { %v467_v55 = vor.u32 1.1754944e-38, %v466_v57  ;;  %vm465_vm15 = vcmp.eq.f32.partialorder %v464_v60, 8.507059e+37  ;;  %752 = vmatpush.msrb.mxu2 %v66_v28 }
 0x381   :  { %v444_v34 = vadd.f32 %v6306_v14, %v443_v31  ;;  %v488_v35 = vmul.f32 %v6308_v19, %v487_v32 }
 0x382   :  { %v6310_v37 = vpop.eup %6309 }
 0x383   :  { %v448_v39 = vsel %vm447_vm3, %v6306_v14, %v444_v34  ;;  %v489_v40 = vadd.f32 %v6308_v19, %v488_v35  ;;  %v501_v41 = vmul.f32 %v6310_v37, %v394_v18  ;;  %vm506_vm8 = vweird.f32 %v6310_v37 }
 0x384   :  { %v6312_v42 = vpop.eup %6311  ;;  %v453_v44 = vsel %vm450_vm4, %v452_v38, %v448_v39  ;;  %vm507_vm11 = vmor %vm505_vm9, %vm506_vm8 }
 0x385   :  { %v493_v45 = vsel %vm492_vm6, %v6308_v19, %v489_v40  ;;  %v502_v46 = vsub.f32 1.0, %v501_v41  ;;  %v456_v47 = vmul.f32 %v6312_v42, %v385_v29  ;;  %v454_v51 = vmul.f32 %v6740_v17, %v453_v44  ;;  %v68_v29 = vld [vmem:[%s8391_s2 + $0xb8] sm:$0xff]  ;;  %v6244_v40 = vld [vmem:[%s8391_s2 + $0xc0] ss:$0 sm:$0xff] }
 0x386   :  { %v498_v50 = vsel %vm495_vm7, %v497_v43, %v493_v45  ;;  %vm461_vm10 = vweird.f32 %v6312_v42  ;;  %v512_v17 = vor.u32 1.1754944e-38, %v511_v49 }
 0x387   :  { %v503_v52 = vmul.f32 %v6310_v37, %v502_v46  ;;  %v457_v53 = vsub.f32 1.0, %v456_v47  ;;  %v499_v54 = vmul.f32 %v6744_v20, %v498_v50  ;;  %518 = vst.msk [vmem:[%s8394_s5 + $0x18] sm:$0xff] %vm116_vm1, %v454_v51  ;;  %vm462_vm14 = vmor %vm460_vm13, %vm461_vm10  ;;  %vm962_vm13 = vcmask 523264  }
 0x389   :  { %v504_v58 = vadd.f32 %v6310_v37, %v503_v52  ;;  %v458_v59 = vmul.f32 %v6312_v42, %v457_v53  ;;  %521 = vst.msk [vmem:[%s8394_s5 + $0x30] sm:$0xff] %vm116_vm1, %v499_v54 }
 0x38b   :  { %v508_v61 = vsel %vm507_vm11, %v6310_v37, %v504_v58  ;;  %v459_v20 = vadd.f32 %v6312_v42, %v458_v59  ;;  %v680_v21 = vpop.permute.xlu1 %679  ;;  %v6550_v58 = vmov 32.0  }
 0x38c   :  { %700 = vmatpush.msrb.mxu0 %v680_v21  ;;  %v513_v56 = vsel %vm510_vm12, %v512_v17, %v508_v61 }
 0x38d   :  { %v463_v63 = vsel %vm462_vm14, %v6312_v42, %v459_v20  ;;  %5892 = vmatmul.msk.f32.vlgmr.msrb.gmra.mxu0 %vm116_vm1, %v499_v54  ;;  %v514_v0 = vmul.f32 %v6750_v27, %v513_v56 }
 0x38e   :  { %v468_v1 = vsel %vm465_vm15, %v467_v55, %v463_v63  ;;  %810 = vmatpush.msra.mxu0 %v67_v2 }
 0x38f   :  { %v469_v3 = vmul.f32 %v6748_v23, %v468_v1  ;;  %522 = vst.msk [vmem:[%s8394_s5 + $0x38] sm:$0xff] %vm116_vm1, %v514_v0  ;;  %v65_v23 = vld [vmem:[%s8391_s2 + $0xa0] sm:$0xff] }
 0x390   :  { %v388_v4 = vpop.xlane.xlu2 %387  ;;  %v706_v25 = vpop.permute.xlu0 %705 }
 0x391   :  { %6313 = vrcp.f32 %v388_v4  ;;  %519 = vst.msk [vmem:[%s8394_s5 + $0x20] sm:$0xff] %vm116_vm1, %v469_v3  ;;  %5890 = vmatmul.msk.f32.vlgmr.msra.gmra.mxu2 %vm116_vm1, %v469_v3  ;;  %v481_v9 = vand.u32 2147483648, %v388_v4  ;;  %v479_v11 = vand.u32 2147483647, %v388_v4  ;;  %vm475_vm3 = vweird.f32 %v388_v4 }
 0x392   :  { %6315 = vrcp.f32 %v6550_v58  ;;  %v6248_v58 = vld [vmem:[%s8391_s2 + $0x103] ss:$0 sm:$0xff] }
 0x393   :  { %v482_v13 = vor.u32 1.1754944e-38, %v481_v9  ;;  %vm480_vm5 = vcmp.eq.f32.partialorder %v479_v11, 8.507059e+37 }
 0x397   :  { %v6314_v5 = vpop.eup %6313 }
 0x398   :  { %v471_v6 = vmul.f32 %v6314_v5, %v388_v4  ;;  %v6145_v27 = vpop.permute.xlu2 %6144  ;;  %vm476_vm2 = vweird.f32 %v6314_v5  ;;  %v6316_v59 = vpop.eup %6315 }
 0x399   :  { %v6147_v7 = vunpack.i.h.bf16 %v6145_v27  ;;  %v6146_v24 = vunpack.i.l.bf16 %v6145_v27  ;;  %vm477_vm4 = vmor %vm475_vm3, %vm476_vm2  ;;  %vm869_vm6 = vweird.f32 %v6316_v59  ;;  %v917_v27 = vld [vmem:[%s8390_s1 + $0x10] sm:$0xff] }
 0x39a   :  { %v472_v8 = vsub.f32 1.0, %v471_v6  ;;  %v918_v6 = vld [vmem:[%s8390_s1 + $0x18] sm:$0xff] }
 0x39b   :  { %622 = vmatpush.msrb.mxu1 %v6146_v24  ;;  %674 = vmatpush.msra.mxu3 %v6147_v7  ;;  %v916_v7 = vld [vmem:[%s8390_s1 + $0x8] sm:$0xff]  ;;  %v915_v24 = vld [vmem:[%s8390_s1] sm:$0xff] }
 0x39c   :  { %v473_v10 = vmul.f32 %v6314_v5, %v472_v8  ;;  %5889 = vmatmul.msk.f32.vlgmr.msrb.gmra.mxu1 %vm116_vm1, %v454_v51  ;;  %939 = vmatpush.msra.mxu2 %v918_v6 }
 0x39d   :  { %781 = vmatpush.msrb.mxu3 %v65_v23  ;;  %726 = vmatpush.msra.mxu1 %v706_v25 }
 0x39e   :  { %v474_v26 = vadd.f32 %v6314_v5, %v473_v10  ;;  %940 = vmatpush.msra.mxu2 %v917_v27 }
 0x39f   :  { %v546_v19 = vpop.f32.mrf.mxu2  ;;  %841 = vmatpush.msrb.mxu1 %v68_v29  ;;  %v6245_v29 = vld [vmem:[%s8391_s2 + $0xc1] ss:$0 sm:$0xff] }
 0x3a0   :  { %v478_v14 = vsel %vm477_vm4, %v6314_v5, %v474_v26  ;;  %941 = vmatpush.msra.mxu2 %v916_v7 }
 0x3a1   :  { %v483_v16 = vsel %vm480_vm5, %v482_v13, %v478_v14  ;;  %v959_v13 = vld [vmem:[%s8391_s2 + $0xfb] sm:$0xff]  ;;  %v958_v14 = vld [vmem:[%s8391_s2 + $0xf3] sm:$0xff] }
 0x3a2   :  { %v484_v18 = vmul.f32 %v6761_v62, %v483_v16  ;;  %942 = vmatpush.msra.mxu2 %v915_v24  ;;  %v1049_v24 = vld [vmem:[%s8389_s0 + $0x39] sm:$0xff] }
 0x3a3   :  { %1075 = vmatpush.msrb.mxu0 %v1049_v24 }
 0x3a4   :  { %520 = vst.msk [vmem:[%s8394_s5 + $0x28] sm:$0xff] %vm116_vm1, %v484_v18  ;;  %5891 = vmatmul.msk.f32.vlgmr.msra.gmra.mxu3 %vm116_vm1, %v484_v18  ;;  %5893 = vmatmul.msk.f32.vlgmr.msra.gmra.mxu1 %vm116_vm1, %v514_v0  ;;  %v957_v18 = vld [vmem:[%s8391_s2 + $0xeb] sm:$0xff] }
 0x3a5   :  { %977 = vmatpush.msra.mxu3 %v959_v13 }
 0x3a7   :  { %978 = vmatpush.msra.mxu3 %v958_v14 }
 0x3a9   :  { %979 = vmatpush.msra.mxu3 %v957_v18 }
 0x3aa   :  { %v572_v22 = vpop.f32.mrf.mxu3 }
 0x3ac   :  { %5896 = vmatmul.msk.f32.vlgmr.msrb.gmra.mxu3 %vm116_vm1, %v546_v19 }
 0x3b4   :  { %5897 = vmatmul.msk.f32.gmra.mxu3 %vm116_vm1, %v572_v22 }
 0x3e4   :  { %v598_v62 = vpop.f32.mrf.mxu0 }
 0x3e5   :  { %5894 = vmatmul.msk.f32.vlgmr.msrb.gmra.mxu2 %vm116_vm1, %v598_v62  ;;  %v956_v62 = vld [vmem:[%s8391_s2 + $0xe3] sm:$0xff] }
 0x3e6   :  { %980 = vmatpush.msra.mxu3 %v956_v62  ;;  %v6249_v62 = vld [vmem:[%s8391_s2 + $0x104] ss:$0 sm:$0xff] }
 0x40a   :  { %v702_v30 = vpop.f32.mrf.mxu0 }
 0x40b   :  { %5900 = vmatmul.msk.f32.vlgmr.msrb.gmra.mxu1 %vm116_vm1, %v702_v30 }
 0x414   :  { %v650_v31 = vpop.f32.mrf.mxu2 }
 0x415   :  { %5898 = vmatmul.msk.f32.vlgmr.msra.gmra.mxu0 %vm116_vm1, %v650_v31  ;;  %v955_v31 = vld [vmem:[%s8391_s2 + $0xdb] sm:$0xff] }
 0x416   :  { %981 = vmatpush.msra.mxu3 %v955_v31  ;;  %v6250_v31 = vld [vmem:[%s8391_s2 + $0x105] ss:$0 sm:$0xff] }
 0x419   :  { %v624_v32 = vpop.f32.mrf.mxu1 }
 0x41a   :  { %5895 = vmatmul.msk.f32.gmra.mxu2 %vm116_vm1, %v624_v32 }
 0x421   :  { %v728_v33 = vpop.f32.mrf.mxu1 }
 0x422   :  { %5901 = vmatmul.msk.f32.gmra.mxu1 %vm116_vm1, %v728_v33  ;;  %v6246_v33 = vld [vmem:[%s8391_s2 + $0xc2] ss:$0 sm:$0xff] }
 0x427   :  { %v676_v34 = vpop.f32.mrf.mxu3 }
 0x428   :  { %5899 = vmatmul.msk.f32.gmra.mxu0 %vm116_vm1, %v676_v34 }
 0x42f   :  { %v783_v36 = vpop.f32.mrf.mxu3 }
 0x437   :  { %v786_v47 = vpop.f32.mrf.mxu3 }
 0x468   :  { %v754_v35 = vpop.f32.mrf.mxu2 }
 0x469   :  { %v784_v37 = vadd.f32 %v783_v36, %v754_v35 }
 0x488   :  { %v843_v41 = vpop.f32.mrf.mxu1 }
 0x492   :  { %v812_v38 = vpop.f32.mrf.mxu0 }
 0x493   :  { %v818_v39 = vadd.f32 %v812_v38, %v784_v37 }
 0x495   :  { %v849_v42 = vadd.f32 %v843_v41, %v818_v39 }
 0x497   :  { %v852_v43 = vadd.f32 %v6244_v40, %v849_v42 }
 0x499   :  { %v854_v44 = vadd.f32 %v852_v43, %v6629_v12  ;;  %v865_v12 = vmul.f32 32.0, %v6316_v59 }
 0x49b   :  { %v858_v45 = vsel %vm30_vm0, %v854_v44, 0.0  ;;  %v866_v60 = vsub.f32 1.0, %v865_v12 }
 0x49c   :  { %859 = vadd.xlane.f32.xlu1 %v858_v45 }
 0x49d   :  { %v757_v46 = vpop.f32.mrf.mxu2  ;;  %v867_v17 = vmul.f32 %v6316_v59, %v866_v60 }
 0x49e   :  { %v787_v48 = vadd.f32 %v786_v47, %v757_v46  ;;  %v954_v46 = vld [vmem:[%s8391_s2 + $0xd3] sm:$0xff]  ;;  %v953_v47 = vld [vmem:[%s8391_s2 + $0xcb] sm:$0xff] }
 0x49f   :  { %v846_v51 = vpop.f32.mrf.mxu1  ;;  %v868_v61 = vadd.f32 %v6316_v59, %v867_v17  ;;  %982 = vmatpush.msra.mxu3 %v954_v46 }
 0x4a1   :  { %v6843_v20 = vsel %vm869_vm6, %v6316_v59, %v868_v61  ;;  %983 = vmatpush.msra.mxu3 %v953_v47 }
 0x4a5   :  { %v815_v49 = vpop.f32.mrf.mxu0 }
 0x4a6   :  { %v819_v50 = vadd.f32 %v815_v49, %v787_v48  ;;  %v952_v48 = vld [vmem:[%s8391_s2 + $0xc3] sm:$0xff]  ;;  %v6247_v49 = vld [vmem:[%s8390_s1 + $0x20] ss:$0 sm:$0xff] }
 0x4a7   :  { %984 = vmatpush.msra.mxu3 %v952_v48 }
 0x4a8   :  { %v850_v52 = vadd.f32 %v846_v51, %v819_v50 }
 0x4aa   :  { %v853_v53 = vadd.f32 %v6244_v40, %v850_v52 }
 0x4ac   :  { %v855_v54 = vadd.f32 %v853_v53, %v6636_v15 }
 0x4ae   :  { %v861_v57 = vsel %vm30_vm0, %v855_v54, 0.0 }
 0x4af   :  { %862 = vadd.xlane.f32.xlu0 %v861_v57 }
 0x50f   :  { %v860_v21 = vpop.xlane.xlu1 %859 }
 0x510   :  { %v871_v55 = vmul.f32 %v6843_v20, %v860_v21 }
 0x512   :  { %v873_v56 = vsub.f32 %v854_v44, %v871_v55 }
 0x514   :  { %v875_v63 = vmul.f32 %v873_v56, %v873_v56 }
 0x516   :  { %v877_v15 = vsel %vm30_vm0, %v875_v63, 0.0 }
 0x517   :  { %878 = vadd.xlane.f32.xlu2 %v877_v15 }
 0x522   :  { %v863_v0 = vpop.xlane.xlu0 %862 }
 0x523   :  { %v872_v1 = vmul.f32 %v6843_v20, %v863_v0 }
 0x525   :  { %v874_v3 = vsub.f32 %v855_v54, %v872_v1 }
 0x527   :  { %v876_v4 = vmul.f32 %v874_v3, %v874_v3 }
 0x529   :  { %v880_v5 = vsel %vm30_vm0, %v876_v4, 0.0 }
 0x52a   :  { %881 = vadd.xlane.f32.xlu1 %v880_v5 }
 0x58a   :  { %v879_v23 = vpop.xlane.xlu2 %878 }
 0x58b   :  { %v883_v8 = vmul.f32 %v879_v23, %v6843_v20  ;;  %v1048_v23 = vld [vmem:[%s8389_s0 + $0x31] sm:$0xff] }
 0x58c   :  { %1076 = vmatpush.msrb.mxu0 %v1048_v23 }
 0x58d   :  { %v885_v9 = vadd.f32 1e-05, %v883_v8  ;;  %v1047_v8 = vld [vmem:[%s8389_s0 + $0x29] sm:$0xff] }
 0x58e   :  { %1077 = vmatpush.msrb.mxu0 %v1047_v8 }
 0x58f   :  { %6317 = vrsqrt.f32 %v885_v9  ;;  %vm893_vm8 = vweird.f32 %v885_v9 }
 0x595   :  { %v6318_v10 = vpop.eup %6317 }
 0x596   :  { %v888_v11 = vmul.f32 %v6318_v10, %v885_v9  ;;  %vm894_vm7 = vweird.f32 %v6318_v10  ;;  %v1046_v9 = vld [vmem:[%s8389_s0 + $0x21] sm:$0xff] }
 0x597   :  { %vm895_vm9 = vmor %vm893_vm8, %vm894_vm7  ;;  %1078 = vmatpush.msrb.mxu0 %v1046_v9 }
 0x598   :  { %v889_v25 = vmul.f32 %v6318_v10, %v888_v11 }
 0x59a   :  { %v890_v26 = vmul.f32 0.5, %v889_v25 }
 0x59c   :  { %v891_v16 = vsub.f32 1.5, %v890_v26 }
 0x59d   :  { %v882_v19 = vpop.xlane.xlu1 %881 }
 0x59e   :  { %v892_v22 = vmul.f32 %v6318_v10, %v891_v16  ;;  %v884_v28 = vmul.f32 %v882_v19, %v6843_v20 }
 0x5a0   :  { %v896_v2 = vsel %vm895_vm9, %v6318_v10, %v892_v22  ;;  %v886_v30 = vadd.f32 1e-05, %v884_v28 }
 0x5a1   :  { %v907_v32 = vmul.f32 %v896_v2, %v873_v56 }
 0x5a2   :  { %6319 = vrsqrt.f32 %v886_v30  ;;  %vm903_vm11 = vweird.f32 %v886_v30 }
 0x5a3   :  { %v910_v34 = vmul.f32 %v6245_v29, %v907_v32 }
 0x5a5   :  { %v913_v35 = vadd.f32 %v6246_v33, %v910_v34 }
 0x5a7   :  { %5902 = vmatmul.msk.f32.vlgmr.msra.gmra.mxu2 %vm30_vm0, %v913_v35 }
 0x5a8   :  { %v6320_v36 = vpop.eup %6319 }
 0x5a9   :  { %v898_v37 = vmul.f32 %v6320_v36, %v886_v30  ;;  %vm904_vm10 = vweird.f32 %v6320_v36 }
 0x5aa   :  { %vm905_vm12 = vmor %vm903_vm11, %vm904_vm10 }
 0x5ab   :  { %v899_v38 = vmul.f32 %v6320_v36, %v898_v37 }
 0x5ad   :  { %v900_v39 = vmul.f32 0.5, %v899_v38 }
 0x5af   :  { %v901_v40 = vsub.f32 1.5, %v900_v39 }
 0x5b1   :  { %v902_v41 = vmul.f32 %v6320_v36, %v901_v40 }
 0x5b3   :  { %v906_v42 = vsel %vm905_vm12, %v6320_v36, %v902_v41 }
 0x5b4   :  { %v908_v43 = vmul.f32 %v906_v42, %v874_v3 }
 0x5b6   :  { %v911_v44 = vmul.f32 %v6245_v29, %v908_v43 }
 0x5b8   :  { %v914_v45 = vadd.f32 %v6246_v33, %v911_v44  ;;  %v6251_v44 = vld [vmem:[%s8389_s0 + $0x41] ss:$0 sm:$0xff] }
 0x5ba   :  { %5903 = vmatmul.msk.f32.gmra.mxu2 %vm30_vm0, %v914_v45 }
 0x62a   :  { %v944_v50 = vpop.f32.mrf.mxu2 }
 0x62b   :  { %v945_v51 = vadd.f32 %v6247_v49, %v944_v50 }
 0x62d   :  { %v950_v52 = vmax.f32 %v945_v51, 0.0 }
 0x62f   :  { %5904 = vmatmul.msk.f32.vlgmr.msra.gmra.mxu3 %vm962_vm13, %v950_v52 }
 0x63d   :  { %v947_v53 = vpop.f32.mrf.mxu2 }
 0x63e   :  { %v948_v54 = vadd.f32 %v6247_v49, %v947_v53 }
 0x640   :  { %v951_v57 = vmax.f32 %v948_v54, 0.0 }
 0x642   :  { %5905 = vmatmul.msk.f32.gmra.mxu3 %vm962_vm13, %v951_v57 }
 0x6b2   :  { %v986_v59 = vpop.f32.mrf.mxu3 }
 0x6b3   :  { %v987_v12 = vadd.f32 %v6248_v58, %v986_v59 }
 0x6b5   :  { %v992_v60 = vadd.f32 %v987_v12, %v913_v35 }
 0x6b7   :  { %v996_v17 = vsel %vm30_vm0, %v992_v60, 0.0 }
 0x6b8   :  { %997 = vadd.xlane.f32.xlu0 %v996_v17 }
 0x6c5   :  { %v989_v61 = vpop.f32.mrf.mxu3 }
 0x6c6   :  { %v990_v21 = vadd.f32 %v6248_v58, %v989_v61 }
 0x6c8   :  { %v993_v55 = vadd.f32 %v990_v21, %v914_v45 }
 0x6ca   :  { %v999_v56 = vsel %vm30_vm0, %v993_v55, 0.0 }
 0x6cb   :  { %1000 = vadd.xlane.f32.xlu2 %v999_v56 }
 0x72b   :  { %v998_v63 = vpop.xlane.xlu0 %997 }
 0x72c   :  { %v1002_v15 = vmul.f32 %v998_v63, %v6843_v20 }
 0x72e   :  { %v1004_v0 = vsub.f32 %v992_v60, %v1002_v15 }
 0x730   :  { %v1006_v1 = vmul.f32 %v1004_v0, %v1004_v0 }
 0x732   :  { %v1008_v3 = vsel %vm30_vm0, %v1006_v1, 0.0 }
 0x733   :  { %1009 = vadd.xlane.f32.xlu1 %v1008_v3 }
 0x73e   :  { %v1001_v4 = vpop.xlane.xlu2 %1000 }
 0x73f   :  { %v1003_v5 = vmul.f32 %v1001_v4, %v6843_v20 }
 0x741   :  { %v1005_v6 = vsub.f32 %v993_v55, %v1003_v5 }
 0x743   :  { %v1007_v27 = vmul.f32 %v1005_v6, %v1005_v6 }
 0x745   :  { %v1011_v7 = vsel %vm30_vm0, %v1007_v27, 0.0 }
 0x746   :  { %1012 = vadd.xlane.f32.xlu0 %v1011_v7 }
 0x7a6   :  { %v1010_v10 = vpop.xlane.xlu1 %1009 }
 0x7a7   :  { %v1014_v11 = vmul.f32 %v1010_v10, %v6843_v20 }
 0x7a9   :  { %v1016_v25 = vadd.f32 1e-05, %v1014_v11 }
 0x7ab   :  { %6321 = vrsqrt.f32 %v1016_v25  ;;  %vm1024_vm15 = vweird.f32 %v1016_v25 }
 0x7b1   :  { %v6322_v26 = vpop.eup %6321 }
 0x7b2   :  { %v1019_v13 = vmul.f32 %v6322_v26, %v1016_v25  ;;  %vm1025_vm14 = vweird.f32 %v6322_v26 }
 0x7b3   :  { %vm1026_vm2 = vmor %vm1024_vm15, %vm1025_vm14 }
 0x7b4   :  { %v1020_v14 = vmul.f32 %v6322_v26, %v1019_v13 }
 0x7b6   :  { %v1021_v16 = vmul.f32 0.5, %v1020_v14 }
 0x7b8   :  { %v1022_v18 = vsub.f32 1.5, %v1021_v16 }
 0x7b9   :  { %v1013_v19 = vpop.xlane.xlu0 %1012 }
 0x7ba   :  { %v1023_v22 = vmul.f32 %v6322_v26, %v1022_v18  ;;  %v1015_v28 = vmul.f32 %v1013_v19, %v6843_v20 }
 0x7bc   :  { %v1027_v29 = vsel %vm1026_vm2, %v6322_v26, %v1023_v22  ;;  %v1017_v2 = vadd.f32 1e-05, %v1015_v28 }
 0x7bd   :  { %v1038_v30 = vmul.f32 %v1027_v29, %v1004_v0 }
 0x7be   :  { %6323 = vrsqrt.f32 %v1017_v2  ;;  %vm1034_vm4 = vweird.f32 %v1017_v2 }
 0x7bf   :  { %v1041_v32 = vmul.f32 %v6249_v62, %v1038_v30 }
 0x7c1   :  { %v6929_v33 = vadd.f32 %v6250_v31, %v1041_v32 }
 0x7c3   :  { %5906 = vmatmul.msk.f32.vlgmr.msrb.gmra.mxu0 %vm30_vm0, %v6929_v33 }
 0x7c4   :  { %v6324_v34 = vpop.eup %6323 }
 0x7c5   :  { %v1029_v35 = vmul.f32 %v6324_v34, %v1017_v2  ;;  %vm1035_vm3 = vweird.f32 %v6324_v34 }
 0x7c6   :  { %vm1036_vm5 = vmor %vm1034_vm4, %vm1035_vm3 }
 0x7c7   :  { %v1030_v36 = vmul.f32 %v6324_v34, %v1029_v35 }
 0x7c9   :  { %v1031_v37 = vmul.f32 0.5, %v1030_v36 }
 0x7cb   :  { %v1032_v38 = vsub.f32 1.5, %v1031_v37 }
 0x7cd   :  { %v1033_v39 = vmul.f32 %v6324_v34, %v1032_v38 }
 0x7cf   :  { %v1037_v40 = vsel %vm1036_vm5, %v6324_v34, %v1033_v39 }
 0x7d0   :  { %v1039_v41 = vmul.f32 %v1037_v40, %v1005_v6 }
 0x7d2   :  { %v1042_v42 = vmul.f32 %v6249_v62, %v1039_v41 }
 0x7d4   :  { %v6933_v43 = vadd.f32 %v6250_v31, %v1042_v42 }
 0x7d6   :  { %5907 = vmatmul.msk.f32.gmra.mxu0 %vm30_vm0, %v6933_v43 }
 0x840   :  { %v1080_v45 = vpop.f32.mrf.mxu0 }
 0x841   :  { %v6940_v46 = vadd.f32 %v6251_v44, %v1080_v45 }
 0x843   :  { %1096 = vrot.lane.b32.xlu0 %v6940_v46, %s6545_s27  ;;  %1088 = vrot.lane.b32.xlu2 %v6940_v46, %s6547_s29 }
 0x84b   :  { %1092 = vrot.lane.b32.xlu0 %v6940_v46, %s6546_s28 }
 0x853   :  { %v1083_v47 = vpop.f32.mrf.mxu0 }
 0x854   :  { %v6948_v48 = vadd.f32 %v6251_v44, %v1083_v47 }
 0x856   :  { %1090 = vrot.lane.b32.xlu1 %v6948_v48, %s6547_s29  ;;  %1098 = vrot.lane.b32.xlu2 %v6948_v48, %s6545_s27 }
 0x85e   :  { %1094 = vrot.lane.b32.xlu1 %v6948_v48, %s6546_s28 }
 0x89d   :  { %v6956_v49 = vpop.permute.xlu2 %1088 }
 0x89e   :  { %1152 = vrot.lane.b32.xlu2 %v6956_v49, %s6548_s30 }
 0x8a6   :  { %1100 = vrot.lane.b32.xlu2 %v6940_v46, %s6548_s30 }
 0x8b0   :  { %v6970_v53 = vpop.permute.xlu2 %1098 }
 0x8b5   :  { %v1097_v50 = vpop.permute.xlu0 %1096 }
 0x8b6   :  { %1256 = vrot.lane.b32.xlu1 %v1097_v50, %s6548_s30 }
 0x8bd   :  { %v6963_v51 = vpop.permute.xlu0 %1092 }
 0x8be   :  { %1126 = vrot.lane.b32.xlu1 %v6948_v48, %s6548_s30  ;;  %1204 = vrot.lane.b32.xlu2 %v6963_v51, %s6548_s30 }
 0x8c8   :  { %v1091_v52 = vpop.permute.xlu1 %1090 }
 0x8c9   :  { %1178 = vrot.lane.b32.xlu0 %v1091_v52, %s6548_s30  ;;  %v6153_v10 = vpack.i.bf16 %v1097_v50, %v1091_v52 }
 0x8d0   :  { %v6974_v54 = vpop.permute.xlu1 %1094 }
 0x8d1   :  { %1282 = vrot.lane.b32.xlu0 %v6970_v53, %s6548_s30 }
 0x8d9   :  { %1230 = vrot.lane.b32.xlu0 %v6974_v54, %s6548_s30 }
 0x8f8   :  { %v1153_v57 = vpop.permute.xlu2 %1152 }
 0x8f9   :  { %5912 = vmatpush.xpose.msk.msrb.mxu2 %vm116_vm1, %v1153_v57 }
 0x8fc   :  { %5913 = vmatmul.msk.f32.vlgmr.msrb.gmra.mxu2 %vm116_vm1, %v6956_v49 }
 0x900   :  { %v1101_v58 = vpop.permute.xlu2 %1100 }
 0x901   :  { %5908 = vmatpush.xpose.msk.msra.mxu1 %vm116_vm1, %v1101_v58 }
 0x904   :  { %5909 = vmatmul.msk.f32.vlgmr.msra.gmra.mxu1 %vm116_vm1, %v6940_v46 }
 0x918   :  { %v1205_v59 = vpop.permute.xlu2 %1204 }
 0x919   :  { %5916 = vmatpush.xpose.msk.msra.mxu0 %vm116_vm1, %v1205_v59 }
 0x91c   :  { %5917 = vmatmul.msk.f32.vlgmr.msra.gmra.mxu0 %vm116_vm1, %v6963_v51 }
 0x928   :  { %v1257_v12 = vpop.permute.xlu1 %1256 }
 0x929   :  { %5920 = vmatpush.xpose.msk.msra.mxu2 %vm116_vm1, %v1257_v12 }
 0x92c   :  { %5921 = vmatmul.msk.f32.vlgmr.msra.gmra.mxu2 %vm116_vm1, %v1097_v50 }
 0x930   :  { %v1127_v60 = vpop.permute.xlu1 %1126 }
 0x931   :  { %5910 = vmatpush.xpose.msk.msrb.mxu1 %vm116_vm1, %v1127_v60 }
 0x934   :  { %5911 = vmatmul.msk.f32.vlgmr.msrb.gmra.mxu1 %vm116_vm1, %v6948_v48 }
 0x93b   :  { %v1179_v17 = vpop.permute.xlu0 %1178 }
 0x93c   :  { %5914 = vmatpush.xpose.msk.msrb.mxu3 %vm116_vm1, %v1179_v17 }
 0x93f   :  { %5915 = vmatmul.msk.f32.vlgmr.msrb.gmra.mxu3 %vm116_vm1, %v1091_v52 }
 0x943   :  { %v1283_v61 = vpop.permute.xlu0 %1282 }
 0x944   :  { %5922 = vmatpush.xpose.msk.msra.mxu3 %vm116_vm1, %v1283_v61  ;;  %v6148_v61 = vpack.i.bf16 %v6940_v46, %v6956_v49  ;;  %v6158_v49 = vpack.i.bf16 %v6963_v51, %v6948_v48 }
 0x947   :  { %5923 = vmatmul.msk.f32.vlgmr.msra.gmra.mxu3 %vm116_vm1, %v6970_v53 }
 0x94b   :  { %v1231_v21 = vpop.permute.xlu0 %1230 }
 0x94c   :  { %5918 = vmatpush.xpose.msk.msra.mxu1 %vm116_vm1, %v1231_v21 }
 0x94f   :  { %5919 = vmatmul.msk.f32.vlgmr.msra.gmra.mxu1 %vm116_vm1, %v6974_v54 }
 0x97f   :  { %v1175_v55 = vpop.f32.mrf.mxu2 }
 0x980   :  { %v1314_v56 = vsel %vm116_vm1, %v1175_v55, -inf }
 0x981   :  { %1315 = vmax.xlane.f32.xlu1 %v1314_v56  ;;  %v1123_v63 = vpop.f32.mrf.mxu1 }
 0x982   :  { %v1308_v15 = vsel %vm116_vm1, %v1123_v63, -inf }
 0x983   :  { %1309 = vmax.xlane.f32.xlu2 %v1308_v15 }
 0x999   :  { %v1227_v0 = vpop.f32.mrf.mxu0 }
 0x99a   :  { %v1320_v1 = vsel %vm116_vm1, %v1227_v0, -inf }
 0x99b   :  { %1321 = vmax.xlane.f32.xlu0 %v1320_v1 }
 0x9af   :  { %v1279_v3 = vpop.f32.mrf.mxu2 }
 0x9b0   :  { %v1326_v4 = vsel %vm116_vm1, %v1279_v3, -inf }
 0x9b1   :  { %1327 = vmax.xlane.f32.xlu1 %v1326_v4  ;;  %v1149_v5 = vpop.f32.mrf.mxu1 }
 0x9b2   :  { %v1311_v6 = vsel %vm116_vm1, %v1149_v5, -inf }
 0x9b3   :  { %1312 = vmax.xlane.f32.xlu2 %v1311_v6 }
 0x9c2   :  { %v1201_v27 = vpop.f32.mrf.mxu3 }
 0x9c3   :  { %v1317_v7 = vsel %vm116_vm1, %v1201_v27, -inf }
 0x9c4   :  { %1318 = vmax.xlane.f32.xlu0 %v1317_v7 }
 0x9ca   :  { %v1305_v24 = vpop.f32.mrf.mxu3 }
 0x9cb   :  { %v1329_v23 = vsel %vm116_vm1, %v1305_v24, -inf }
 0x9cc   :  { %1330 = vmax.xlane.f32.xlu1 %v1329_v23  ;;  %v1253_v8 = vpop.f32.mrf.mxu1 }
 0x9cd   :  { %v1323_v9 = vsel %vm116_vm1, %v1253_v8, -inf }
 0x9ce   :  { %1324 = vmax.xlane.f32.xlu2 %v1323_v9 }
 0x9d8   :  { %6154 = vrot.lane.b32.xlu0 %v6153_v10, %s6549_s8 }
 0x9f4   :  { %v1316_v11 = vpop.xlane.xlu1 %1315 }
 0x9f5   :  { %v1334_v25 = vsub.f32 %v1175_v55, %v1316_v11 }
 0x9f6   :  { %v1310_v26 = vpop.xlane.xlu2 %1309 }
 0x9f7   :  { %v1344_v13 = vmul.f32 1.442695, %v1334_v25  ;;  %v1332_v14 = vsub.f32 %v1123_v63, %v1310_v26 }
 0x9f9   :  { %6325 = vpow2.f32 %v1344_v13  ;;  %v1340_v16 = vmul.f32 1.442695, %v1332_v14 }
 0x9fb   :  { %6327 = vpow2.f32 %v1340_v16 }
 0x9ff   :  { %v7009_v18 = vpop.eup %6325 }
 0xa00   :  { %v1362_v19 = vsel %vm116_vm1, %v7009_v18, 0.0 }
 0xa01   :  { %v7013_v22 = vpop.eup %6327 }
 0xa02   :  { %1363 = vadd.xlane.f32.xlu0 %v1362_v19  ;;  %v1356_v28 = vsel %vm116_vm1, %v7013_v22, 0.0 }
 0xa03   :  { %1357 = vadd.xlane.f32.xlu1 %v1356_v28 }
 0xa0e   :  { %v1322_v62 = vpop.xlane.xlu0 %1321 }
 0xa0f   :  { %v1336_v29 = vsub.f32 %v1227_v0, %v1322_v62 }
 0xa11   :  { %v1348_v2 = vmul.f32 1.442695, %v1336_v29 }
 0xa13   :  { %6329 = vpow2.f32 %v1348_v2 }
 0xa19   :  { %v7017_v30 = vpop.eup %6329 }
 0xa1a   :  { %v1368_v31 = vsel %vm116_vm1, %v7017_v30, 0.0 }
 0xa1b   :  { %1369 = vadd.xlane.f32.xlu2 %v1368_v31 }
 0xa24   :  { %v1328_v32 = vpop.xlane.xlu1 %1327 }
 0xa25   :  { %v1338_v34 = vsub.f32 %v1279_v3, %v1328_v32 }
 0xa26   :  { %v1313_v35 = vpop.xlane.xlu2 %1312 }
 0xa27   :  { %v1352_v36 = vmul.f32 1.442695, %v1338_v34  ;;  %v1333_v37 = vsub.f32 %v1149_v5, %v1313_v35 }
 0xa29   :  { %6331 = vpow2.f32 %v1352_v36  ;;  %v1342_v38 = vmul.f32 1.442695, %v1333_v37 }
 0xa2b   :  { %6333 = vpow2.f32 %v1342_v38 }
 0xa2f   :  { %v7021_v39 = vpop.eup %6331 }
 0xa30   :  { %v1374_v40 = vsel %vm116_vm1, %v7021_v39, 0.0 }
 0xa31   :  { %v7025_v41 = vpop.eup %6333  ;;  %1375 = vadd.xlane.f32.xlu0 %v1374_v40 }
 0xa32   :  { %v1359_v42 = vsel %vm116_vm1, %v7025_v41, 0.0 }
 0xa33   :  { %1360 = vadd.xlane.f32.xlu1 %v1359_v42 }
 0xa37   :  { %v1319_v47 = vpop.xlane.xlu0 %1318 }
 0xa38   :  { %v1335_v58 = vsub.f32 %v1201_v27, %v1319_v47 }
 0xa3a   :  { %v1346_v12 = vmul.f32 1.442695, %v1335_v58 }
 0xa3f   :  { %v1331_v44 = vpop.xlane.xlu1 %1330 }
 0xa40   :  { %v1339_v45 = vsub.f32 %v1305_v24, %v1331_v44 }
 0xa41   :  { %v1325_v50 = vpop.xlane.xlu2 %1324 }
 0xa42   :  { %v1354_v52 = vmul.f32 1.442695, %v1339_v45  ;;  %v1337_v57 = vsub.f32 %v1253_v8, %v1325_v50 }
 0xa44   :  { %6335 = vpow2.f32 %v1354_v52  ;;  %v1350_v59 = vmul.f32 1.442695, %v1337_v57 }
 0xa46   :  { %6337 = vpow2.f32 %v1350_v59 }
 0xa47   :  { %6339 = vpow2.f32 %v1346_v12 }
 0xa4a   :  { %v7029_v60 = vpop.eup %6335  ;;  %v7031_v17 = vpop.permute.xlu0 %6154 }
 0xa4b   :  { %v6156_v21 = vunpack.i.l.bf16 %v7031_v17  ;;  %v1377_v55 = vsel %vm116_vm1, %v7029_v60, 0.0 }
 0xa4c   :  { %v7038_v56 = vpop.eup %6337  ;;  %1378 = vadd.xlane.f32.xlu0 %v1377_v55  ;;  %6149 = vrot.lane.b32.xlu1 %v6148_v61, %s6549_s8 }
 0xa4d   :  { %1608 = vmatpush.msrb.mxu3 %v6156_v21  ;;  %v1371_v63 = vsel %vm116_vm1, %v7038_v56, 0.0  ;;  %v7043_v15 = vpop.eup %6339 }
 0xa4e   :  { %1372 = vadd.xlane.f32.xlu2 %v1371_v63  ;;  %v1365_v46 = vsel %vm116_vm1, %v7043_v15, 0.0 }
 0xa54   :  { %1691 = vrot.lane.b32.xlu1 %v6970_v53, %s6549_s8 }
 0xa56   :  { %1366 = vadd.xlane.f32.xlu2 %v1365_v46 }
 0xa60   :  { %1639 = vrot.lane.b32.xlu0 %v6974_v54, %s6549_s8 }
 0xa6e   :  { %6159 = vrot.lane.b32.xlu2 %v6158_v49, %s6549_s8 }
 0xa75   :  { %v1364_v0 = vpop.xlane.xlu0 %1363 }
 0xa76   :  { %6341 = vrcp.f32 %v1364_v0  ;;  %v1358_v1 = vpop.xlane.xlu1 %1357  ;;  %v1421_v27 = vand.u32 2147483648, %v1364_v0  ;;  %v1419_v23 = vand.u32 2147483647, %v1364_v0  ;;  %vm1415_vm8 = vweird.f32 %v1364_v0 }
 0xa77   :  { %6343 = vrcp.f32 %v1358_v1  ;;  %v1391_v54 = vand.u32 2147483648, %v1358_v1  ;;  %v1389_v48 = vand.u32 2147483647, %v1358_v1  ;;  %vm1385_vm10 = vweird.f32 %v1358_v1 }
 0xa78   :  { %v1422_v9 = vor.u32 1.1754944e-38, %v1421_v27  ;;  %vm1420_vm11 = vcmp.eq.f32.partialorder %v1419_v23, 8.507059e+37 }
 0xa79   :  { %v1392_v25 = vor.u32 1.1754944e-38, %v1391_v54  ;;  %vm1390_vm14 = vcmp.eq.f32.partialorder %v1389_v48, 8.507059e+37 }
 0xa7c   :  { %v6342_v3 = vpop.eup %6341 }
 0xa7d   :  { %v6344_v4 = vpop.eup %6343  ;;  %v1411_v5 = vmul.f32 %v6342_v3, %v1364_v0  ;;  %vm1416_vm6 = vweird.f32 %v6342_v3 }
 0xa7e   :  { %v1381_v53 = vmul.f32 %v6344_v4, %v1358_v1  ;;  %vm1386_vm7 = vweird.f32 %v6344_v4  ;;  %vm1417_vm9 = vmor %vm1415_vm8, %vm1416_vm6 }
 0xa7f   :  { %v1412_v6 = vsub.f32 1.0, %v1411_v5  ;;  %vm1387_vm12 = vmor %vm1385_vm10, %vm1386_vm7 }
 0xa80   :  { %v1382_v7 = vsub.f32 1.0, %v1381_v53 }
 0xa81   :  { %v1413_v24 = vmul.f32 %v6342_v3, %v1412_v6 }
 0xa82   :  { %v1383_v8 = vmul.f32 %v6344_v4, %v1382_v7 }
 0xa83   :  { %v1414_v51 = vadd.f32 %v6342_v3, %v1413_v24 }
 0xa84   :  { %v1384_v10 = vadd.f32 %v6344_v4, %v1383_v8 }
 0xa85   :  { %v1418_v11 = vsel %vm1417_vm9, %v6342_v3, %v1414_v51 }
 0xa86   :  { %v1388_v26 = vsel %vm1387_vm12, %v6344_v4, %v1384_v10  ;;  %v1423_v13 = vsel %vm1420_vm11, %v1422_v9, %v1418_v11 }
 0xa87   :  { %v1393_v14 = vsel %vm1390_vm14, %v1392_v25, %v1388_v26  ;;  %v7055_v16 = vmul.f32 %v7009_v18, %v1423_v13 }
 0xa88   :  { %v7058_v19 = vmul.f32 %v7013_v22, %v1393_v14 }
 0xa89   :  { %5926 = vst.msk [vmem:[%s8394_s5 + $0x50] sm:$0xff] %vm116_vm1, %v7055_v16 }
 0xa8a   :  { %5924 = vst.msk [vmem:[%s8394_s5 + $0x40] sm:$0xff] %vm116_vm1, %v7058_v19 }
 0xa8e   :  { %v1370_v28 = vpop.xlane.xlu2 %1369 }
 0xa8f   :  { %6345 = vrcp.f32 %v1370_v28  ;;  %v1451_v2 = vand.u32 2147483648, %v1370_v28  ;;  %v1449_v31 = vand.u32 2147483647, %v1370_v28  ;;  %vm1445_vm2 = vweird.f32 %v1370_v28 }
 0xa91   :  { %v1452_v34 = vor.u32 1.1754944e-38, %v1451_v2  ;;  %vm1450_vm4 = vcmp.eq.f32.partialorder %v1449_v31, 8.507059e+37 }
 0xa95   :  { %v6346_v62 = vpop.eup %6345 }
 0xa96   :  { %v1441_v18 = vmul.f32 %v6346_v62, %v1370_v28  ;;  %vm1446_vm15 = vweird.f32 %v6346_v62 }
 0xa97   :  { %vm1447_vm3 = vmor %vm1445_vm2, %vm1446_vm15 }
 0xa98   :  { %v1442_v29 = vsub.f32 1.0, %v1441_v18 }
 0xa9a   :  { %v1443_v22 = vmul.f32 %v6346_v62, %v1442_v29 }
 0xa9c   :  { %v1444_v32 = vadd.f32 %v6346_v62, %v1443_v22 }
 0xa9e   :  { %v1448_v35 = vsel %vm1447_vm3, %v6346_v62, %v1444_v32 }
 0xa9f   :  { %v1453_v36 = vsel %vm1450_vm4, %v1452_v34, %v1448_v35 }
 0xaa0   :  { %v7071_v37 = vmul.f32 %v7017_v30, %v1453_v36 }
 0xaa2   :  { %5928 = vst.msk [vmem:[%s8394_s5 + $0x60] sm:$0xff] %vm116_vm1, %v7071_v37 }
 0xaa4   :  { %v1376_v38 = vpop.xlane.xlu0 %1375 }
 0xaa5   :  { %6347 = vrcp.f32 %v1376_v38  ;;  %v1481_v52 = vand.u32 2147483648, %v1376_v38  ;;  %v1479_v30 = vand.u32 2147483647, %v1376_v38  ;;  %vm1475_vm6 = vweird.f32 %v1376_v38 }
 0xaa6   :  { %v1361_v40 = vpop.xlane.xlu1 %1360 }
 0xaa7   :  { %6349 = vrcp.f32 %v1361_v40  ;;  %v1406_v59 = vand.u32 2147483648, %v1361_v40  ;;  %v1404_v21 = vand.u32 2147483647, %v1361_v40  ;;  %v1482_v55 = vor.u32 1.1754944e-38, %v1481_v52 }
 0xaa8   :  { %vm1480_vm9 = vcmp.eq.f32.partialorder %v1479_v30, 8.507059e+37  ;;  %vm1400_vm10 = vweird.f32 %v1361_v40 }
 0xaa9   :  { %v1407_v49 = vor.u32 1.1754944e-38, %v1406_v59  ;;  %vm1405_vm12 = vcmp.eq.f32.partialorder %v1404_v21, 8.507059e+37  ;;  %v1053_v59 = vld [vmem:[%s8391_s2 + $0x116] sm:$0xff] }
 0xaab   :  { %v6348_v42 = vpop.eup %6347 }
 0xaac   :  { %v1471_v44 = vmul.f32 %v6348_v42, %v1376_v38  ;;  %vm1476_vm5 = vweird.f32 %v6348_v42 }
 0xaad   :  { %v6350_v45 = vpop.eup %6349  ;;  %vm1477_vm8 = vmor %vm1475_vm6, %vm1476_vm5 }
 0xaae   :  { %v1472_v47 = vsub.f32 1.0, %v1471_v44  ;;  %v1396_v50 = vmul.f32 %v6350_v45, %v1361_v40  ;;  %vm1401_vm7 = vweird.f32 %v6350_v45 }
 0xaaf   :  { %vm1402_vm11 = vmor %vm1400_vm10, %vm1401_vm7 }
 0xab0   :  { %v1473_v57 = vmul.f32 %v6348_v42, %v1472_v47  ;;  %v1397_v58 = vsub.f32 1.0, %v1396_v50 }
 0xab2   :  { %v1474_v12 = vadd.f32 %v6348_v42, %v1473_v57  ;;  %v1398_v61 = vmul.f32 %v6350_v45, %v1397_v58  ;;  %v1054_v58 = vld [vmem:[%s8391_s2 + $0x11e] sm:$0xff] }
 0xab4   :  { %v1478_v63 = vsel %vm1477_vm8, %v6348_v42, %v1474_v12  ;;  %v1399_v46 = vadd.f32 %v6350_v45, %v1398_v61  ;;  %v2031_v12 = vld [vmem:[%s8391_s2 + $0x78] sm:$0xff]  ;;  %v2030_v61 = vld [vmem:[%s8391_s2 + $0x70] sm:$0xff] }
 0xab5   :  { %v1483_v0 = vsel %vm1480_vm9, %v1482_v55, %v1478_v63  ;;  %v2029_v55 = vld [vmem:[%s8391_s2 + $0x68] sm:$0xff]  ;;  %v2028_v63 = vld [vmem:[%s8391_s2 + $0x60] sm:$0xff] }
 0xab6   :  { %v1403_v1 = vsel %vm1402_vm11, %v6350_v45, %v1399_v46  ;;  %v1484_v3 = vmul.f32 %v7021_v39, %v1483_v0  ;;  %v6157_v39 = vunpack.i.h.bf16 %v7031_v17 }
 0xab7   :  { %v1408_v4 = vsel %vm1405_vm12, %v1407_v49, %v1403_v1 }
 0xab8   :  { %5930 = vst.msk [vmem:[%s8394_s5 + $0x70] sm:$0xff] %vm116_vm1, %v1484_v3  ;;  %v7084_v5 = vmul.f32 %v7025_v41, %v1408_v4 }
 0xaba   :  { %5925 = vst.msk [vmem:[%s8394_s5 + $0x48] sm:$0xff] %vm116_vm1, %v7084_v5 }
 0xabe   :  { %v6150_v53 = vpop.permute.xlu1 %6149 }
 0xabf   :  { %v6152_v6 = vunpack.i.h.bf16 %v6150_v53  ;;  %v6151_v27 = vunpack.i.l.bf16 %v6150_v53  ;;  %v1379_v7 = vpop.xlane.xlu0 %1378 }
 0xac0   :  { %6351 = vrcp.f32 %v1379_v7  ;;  %v1496_v17 = vand.u32 2147483648, %v1379_v7  ;;  %v1494_v11 = vand.u32 2147483647, %v1379_v7  ;;  %vm1490_vm15 = vweird.f32 %v1379_v7 }
 0xac1   :  { %1530 = vmatpush.msrb.mxu0 %v6152_v6  ;;  %1582 = vmatpush.msrb.mxu2 %v6151_v27  ;;  %v1373_v24 = vpop.xlane.xlu2 %1372  ;;  %v2027_v6 = vld [vmem:[%s8391_s2 + $0x18] sm:$0xff] }
 0xac2   :  { %6353 = vrcp.f32 %v1373_v24  ;;  %5932 = vmatmul.msk.f32.vlgmr.msrb.gmra.mxu0 %vm116_vm1, %v7058_v19  ;;  %5934 = vmatmul.msk.f32.vlgmr.msrb.gmra.mxu2 %vm116_vm1, %v7055_v16  ;;  %v1466_v26 = vand.u32 2147483648, %v1373_v24  ;;  %v1464_v16 = vand.u32 2147483647, %v1373_v24  ;;  %v1497_v19 = vor.u32 1.1754944e-38, %v1496_v17  ;;  %v2066_v27 = vld [vmem:[%s8389_s0 + $0x5a] sm:$0xff] }
 0xac3   :  { %1686 = vmatpush.msra.mxu2 %v6157_v39  ;;  %vm1495_vm4 = vcmp.eq.f32.partialorder %v1494_v11, 8.507059e+37  ;;  %vm1460_vm5 = vweird.f32 %v1373_v24  ;;  %v2064_v39 = vld [vmem:[%s8389_s0 + $0x4a] sm:$0xff] }
 0xac4   :  { %v1467_v29 = vor.u32 1.1754944e-38, %v1466_v26  ;;  %vm1465_vm7 = vcmp.eq.f32.partialorder %v1464_v16, 8.507059e+37 }
 0xac5   :  { %1796 = vmatpush.msrb.mxu2 %v1053_v59  ;;  %v1895_v59 = vld [vmem:[%s8390_s1 + $0x29] sm:$0xff] }
 0xac6   :  { %v6352_v41 = vpop.eup %6351  ;;  %v1692_v23 = vpop.permute.xlu1 %1691 }
 0xac7   :  { %v1486_v54 = vmul.f32 %v6352_v41, %v1379_v7  ;;  %1712 = vmatpush.msra.mxu3 %v1692_v23  ;;  %vm1491_vm14 = vweird.f32 %v6352_v41  ;;  %v2065_v7 = vld [vmem:[%s8389_s0 + $0x52] sm:$0xff] }
 0xac8   :  { %v6354_v8 = vpop.eup %6353  ;;  %vm1492_vm3 = vmor %vm1490_vm15, %vm1491_vm14 }
 0xac9   :  { %v1487_v48 = vsub.f32 1.0, %v1486_v54  ;;  %v1456_v51 = vmul.f32 %v6354_v8, %v1373_v24  ;;  %v1367_v9 = vpop.xlane.xlu2 %1366  ;;  %vm1461_vm2 = vweird.f32 %v6354_v8  ;;  %v2063_v24 = vld [vmem:[%s8389_s0 + $0x42] sm:$0xff] }
 0xaca   :  { %6355 = vrcp.f32 %v1367_v9  ;;  %5938 = vmatmul.msk.f32.vlgmr.msra.gmra.mxu2 %vm116_vm1, %v1484_v3  ;;  %vm1462_vm6 = vmor %vm1460_vm5, %vm1461_vm2  ;;  %v1436_v44 = vand.u32 2147483648, %v1367_v9  ;;  %v1434_v47 = vand.u32 2147483647, %v1367_v9  ;;  %vm1430_vm9 = vweird.f32 %v1367_v9 }
 0xacb   :  { %v1488_v10 = vmul.f32 %v6352_v41, %v1487_v48  ;;  %v1457_v25 = vsub.f32 1.0, %v1456_v51  ;;  %2052 = vmatpush.msra.mxu2 %v2031_v12  ;;  %v6252_v51 = vld [vmem:[%s8391_s2 + $0x126] ss:$0 sm:$0xff] }
 0xacc   :  { %vm1435_vm11 = vcmp.eq.f32.partialorder %v1434_v47, 8.507059e+37  ;;  %v1894_v12 = vld [vmem:[%s8390_s1 + $0x21] sm:$0xff] }
 0xacd   :  { %v1489_v13 = vadd.f32 %v6352_v41, %v1488_v10  ;;  %v1458_v14 = vmul.f32 %v6354_v8, %v1457_v25  ;;  %2053 = vmatpush.msra.mxu2 %v2030_v61 }
 0xacf   :  { %v1493_v28 = vsel %vm1492_vm3, %v6352_v41, %v1489_v13  ;;  %v1459_v62 = vadd.f32 %v6354_v8, %v1458_v14  ;;  %2054 = vmatpush.msra.mxu2 %v2029_v55  ;;  %v2032_v14 = vld [vmem:[%s8391_s2 + $0x30] sm:$0xff] }
 0xad0   :  { %v6356_v18 = vpop.eup %6355  ;;  %v1498_v2 = vsel %vm1495_vm4, %v1497_v19, %v1493_v28 }
 0xad1   :  { %v1463_v22 = vsel %vm1462_vm6, %v6354_v8, %v1459_v62  ;;  %v1426_v31 = vmul.f32 %v6356_v18, %v1367_v9  ;;  %v6160_v32 = vpop.permute.xlu2 %6159  ;;  %v1499_v34 = vmul.f32 %v7029_v60, %v1498_v2  ;;  %vm1431_vm8 = vweird.f32 %v6356_v18  ;;  %2055 = vmatpush.msra.mxu2 %v2028_v63 }
 0xad2   :  { %v6162_v35 = vunpack.i.h.bf16 %v6160_v32  ;;  %v6161_v36 = vunpack.i.l.bf16 %v6160_v32  ;;  %v1468_v38 = vsel %vm1465_vm7, %v1467_v29, %v1463_v22  ;;  %v1640_v50 = vpop.permute.xlu0 %1639  ;;  %vm1432_vm10 = vmor %vm1430_vm9, %vm1431_vm8 }
 0xad3   :  { %v1427_v40 = vsub.f32 1.0, %v1426_v31  ;;  %v1469_v42 = vmul.f32 %v7038_v56, %v1468_v38  ;;  %5931 = vst.msk [vmem:[%s8394_s5 + $0x78] sm:$0xff] %vm116_vm1, %v1499_v34  ;;  %v1437_v56 = vor.u32 1.1754944e-38, %v1436_v44 }
 0xad4   :  { %1556 = vmatpush.msrb.mxu1 %v6161_v36  ;;  %1634 = vmatpush.msra.mxu0 %v6162_v35 }
 0xad5   :  { %v1428_v45 = vmul.f32 %v6356_v18, %v1427_v40  ;;  %5933 = vmatmul.msk.f32.vlgmr.msrb.gmra.mxu1 %vm116_vm1, %v7084_v5  ;;  %5936 = vmatmul.msk.f32.vlgmr.msra.gmra.mxu0 %vm116_vm1, %v7071_v37  ;;  %5929 = vst.msk [vmem:[%s8394_s5 + $0x68] sm:$0xff] %vm116_vm1, %v1469_v42  ;;  %v1051_v37 = vld [vmem:[%s8391_s2 + $0x106] sm:$0xff]  ;;  %v2026_v5 = vld [vmem:[%s8391_s2 + $0x10] sm:$0xff] }
 0xad6   :  { %1660 = vmatpush.msra.mxu1 %v1640_v50  ;;  %v6253_v50 = vld [vmem:[%s8389_s0 + $0x62] ss:$0 sm:$0xff] }
 0xad7   :  { %v1429_v60 = vadd.f32 %v6356_v18, %v1428_v45 }
 0xad8   :  { %1767 = vmatpush.msrb.mxu1 %v1051_v37 }
 0xad9   :  { %v1433_v52 = vsel %vm1432_vm10, %v6356_v18, %v1429_v60 }
 0xada   :  { %v1438_v57 = vsel %vm1435_vm11, %v1437_v56, %v1433_v52 }
 0xadb   :  { %v1439_v30 = vmul.f32 %v7043_v15, %v1438_v57  ;;  %v1052_v15 = vld [vmem:[%s8391_s2 + $0x10e] sm:$0xff] }
 0xadc   :  { %1738 = vmatpush.msrb.mxu0 %v1052_v15  ;;  %v1897_v15 = vld [vmem:[%s8390_s1 + $0x39] sm:$0xff] }
 0xadd   :  { %5927 = vst.msk [vmem:[%s8394_s5 + $0x58] sm:$0xff] %vm116_vm1, %v1439_v30  ;;  %5935 = vmatmul.msk.f32.vlgmr.msrb.gmra.mxu3 %vm116_vm1, %v1439_v30  ;;  %5937 = vmatmul.msk.f32.vlgmr.msra.gmra.mxu1 %vm116_vm1, %v1469_v42 }
 0xade   :  { %1827 = vmatpush.msrb.mxu3 %v1054_v58  ;;  %1918 = vmatpush.msra.mxu0 %v1897_v15  ;;  %v1896_v58 = vld [vmem:[%s8390_s1 + $0x31] sm:$0xff] }
 0xae0   :  { %1919 = vmatpush.msra.mxu0 %v1896_v58 }
 0xae2   :  { %1920 = vmatpush.msra.mxu0 %v1895_v59  ;;  %v2025_v59 = vld [vmem:[%s8392_s3 + $0x8] sm:$0xff] }
 0xae4   :  { %1921 = vmatpush.msra.mxu0 %v1894_v12 }
 0xae5   :  { %5939 = vmatmul.msk.f32.vlgmr.msra.gmra.mxu3 %vm116_vm1, %v1499_v34 }
 0xae6   :  { %2092 = vmatpush.msra.mxu3 %v2066_v27 }
 0xae8   :  { %2093 = vmatpush.msra.mxu3 %v2065_v7 }
 0xaea   :  { %2094 = vmatpush.msra.mxu3 %v2064_v39 }
 0xaec   :  { %2095 = vmatpush.msra.mxu3 %v2063_v24 }
 0xb3f   :  { %v1532_v21 = vpop.f32.mrf.mxu0 }
 0xb40   :  { %5942 = vmatmul.msk.f32.vlgmr.msrb.gmra.mxu1 %vm116_vm1, %v1532_v21 }
 0xb45   :  { %v1584_v46 = vpop.f32.mrf.mxu2 }
 0xb46   :  { %5940 = vmatmul.msk.f32.vlgmr.msrb.gmra.mxu0 %vm116_vm1, %v1584_v46 }
 0xb4d   :  { %v1688_v49 = vpop.f32.mrf.mxu2 }
 0xb4e   :  { %5946 = vmatmul.msk.f32.vlgmr.msrb.gmra.mxu3 %vm116_vm1, %v1688_v49 }
 0xb52   :  { %v1558_v0 = vpop.f32.mrf.mxu1  ;;  %v1636_v1 = vpop.f32.mrf.mxu0 }
 0xb53   :  { %5943 = vmatmul.msk.f32.gmra.mxu1 %vm116_vm1, %v1558_v0  ;;  %5944 = vmatmul.msk.f32.vlgmr.msrb.gmra.mxu2 %vm116_vm1, %v1636_v1 }
 0xb5a   :  { %v1662_v3 = vpop.f32.mrf.mxu1 }
 0xb5b   :  { %5945 = vmatmul.msk.f32.gmra.mxu2 %vm116_vm1, %v1662_v3 }
 0xb60   :  { %v1610_v4 = vpop.f32.mrf.mxu3 }
 0xb61   :  { %5941 = vmatmul.msk.f32.gmra.mxu0 %vm116_vm1, %v1610_v4 }
 0xb63   :  { %5952 = vmatmul.msk.f32.vlgmr.msra.gmra.mxu2 %vm30_vm0, %v2026_v5 }
 0xb68   :  { %v1714_v53 = vpop.f32.mrf.mxu3 }
 0xb69   :  { %5947 = vmatmul.msk.f32.gmra.mxu3 %vm116_vm1, %v1714_v53 }
 0xb6b   :  { %5953 = vmatmul.msk.f32.gmra.mxu2 %vm30_vm0, %v2027_v6  ;;  %v6254_v6 = vld [vmem:[%s8391_s2 + $0x127] ss:$0 sm:$0xff] }
 0xbbd   :  { %v1769_v23 = vpop.f32.mrf.mxu1 }
 0xbc3   :  { %v1740_v41 = vpop.f32.mrf.mxu0 }
 0xbc4   :  { %v1770_v54 = vadd.f32 %v1769_v23, %v1740_v41  ;;  %v6255_v41 = vld [vmem:[%s8391_s2 + $0x128] ss:$0 sm:$0xff] }
 0xbd0   :  { %v1772_v16 = vpop.f32.mrf.mxu1 }
 0xbd1   :  { %v1829_v9 = vpop.f32.mrf.mxu3 }
 0xbd6   :  { %v1798_v8 = vpop.f32.mrf.mxu2 }
 0xbd7   :  { %v1804_v48 = vadd.f32 %v1798_v8, %v1770_v54 }
 0xbd9   :  { %v1835_v17 = vadd.f32 %v1829_v9, %v1804_v48 }
 0xbdb   :  { %v1838_v10 = vadd.f32 %v6252_v51, %v1835_v17 }
 0xbdd   :  { %v1840_v11 = vadd.f32 %v1838_v10, %v6929_v33  ;;  %v2033_v33 = vld [vmem:[%s8391_s2 + $0x38] sm:$0xff] }
 0xbde   :  { %v1801_v25 = vpop.f32.mrf.mxu2  ;;  %v1743_v13 = vpop.f32.mrf.mxu0 }
 0xbdf   :  { %v1844_v26 = vsel %vm30_vm0, %v1840_v11, 0.0  ;;  %v1773_v28 = vadd.f32 %v1772_v16, %v1743_v13 }
 0xbe0   :  { %1845 = vadd.xlane.f32.xlu1 %v1844_v26 }
 0xbe1   :  { %v1805_v18 = vadd.f32 %v1801_v25, %v1773_v28 }
 0xbe6   :  { %v2057_v19 = vpop.f32.mrf.mxu2 }
 0xbe7   :  { %v7179_v62 = vadd.f32 %v2057_v19, %v2032_v14 }
 0xbe9   :  { %5954 = vmatmul.msk.f32.vlgmr.msra.gmra.mxu3 %vm30_vm0, %v7179_v62 }
 0xbec   :  { %v1832_v29 = vpop.f32.mrf.mxu3 }
 0xbed   :  { %v1836_v2 = vadd.f32 %v1832_v29, %v1805_v18  ;;  %v1938_v29 = vld [vmem:[%s8391_s2 + $0x161] sm:$0xff] }
 0xbee   :  { %v2060_v22 = vpop.f32.mrf.mxu2  ;;  %1955 = vmatpush.msra.mxu1 %v1938_v29 }
 0xbef   :  { %v1839_v31 = vadd.f32 %v6252_v51, %v1836_v2  ;;  %v7186_v32 = vadd.f32 %v2060_v22, %v2033_v33  ;;  %v1937_v33 = vld [vmem:[%s8391_s2 + $0x159] sm:$0xff]  ;;  %v1936_v2 = vld [vmem:[%s8391_s2 + $0x151] sm:$0xff]  ;;  %v1935_v22 = vld [vmem:[%s8391_s2 + $0x149] sm:$0xff] }
 0xbf0   :  { %1956 = vmatpush.msra.mxu1 %v1937_v33 }
 0xbf1   :  { %5955 = vmatmul.msk.f32.gmra.mxu3 %vm30_vm0, %v7186_v32  ;;  %v1841_v34 = vadd.f32 %v1839_v31, %v6933_v43 }
 0xbf2   :  { %1957 = vmatpush.msra.mxu1 %v1936_v2 }
 0xbf3   :  { %v1847_v35 = vsel %vm30_vm0, %v1841_v34, 0.0 }
 0xbf4   :  { %1848 = vadd.xlane.f32.xlu0 %v1847_v35  ;;  %1958 = vmatpush.msra.mxu1 %v1935_v22  ;;  %v1933_v35 = vld [vmem:[%s8391_s2 + $0x139] sm:$0xff] }
 0xc53   :  { %v1846_v36 = vpop.xlane.xlu1 %1845 }
 0xc54   :  { %v1850_v38 = vmul.f32 %v1846_v36, %v6843_v20  ;;  %v1932_v36 = vld [vmem:[%s8391_s2 + $0x131] sm:$0xff] }
 0xc56   :  { %v1852_v40 = vsub.f32 %v1840_v11, %v1850_v38  ;;  %v1931_v38 = vld [vmem:[%s8391_s2 + $0x129] sm:$0xff] }
 0xc58   :  { %v1854_v42 = vmul.f32 %v1852_v40, %v1852_v40 }
 0xc5a   :  { %v1856_v44 = vsel %vm30_vm0, %v1854_v42, 0.0 }
 0xc5b   :  { %1857 = vadd.xlane.f32.xlu2 %v1856_v44 }
 0xc67   :  { %v1849_v45 = vpop.xlane.xlu0 %1848 }
 0xc68   :  { %v1851_v47 = vmul.f32 %v1849_v45, %v6843_v20  ;;  %v6256_v45 = vld [vmem:[%s8390_s1 + $0x41] ss:$0 sm:$0xff] }
 0xc6a   :  { %v7198_v60 = vsub.f32 %v1841_v34, %v1851_v47  ;;  %v1934_v34 = vld [vmem:[%s8391_s2 + $0x141] sm:$0xff] }
 0xc6b   :  { %1959 = vmatpush.msra.mxu1 %v1934_v34 }
 0xc6c   :  { %v2097_v43 = vpop.f32.mrf.mxu3  ;;  %v1855_v56 = vmul.f32 %v7198_v60, %v7198_v60 }
 0xc6d   :  { %v7202_v52 = vadd.f32 %v6253_v50, %v2097_v43  ;;  %1960 = vmatpush.msra.mxu1 %v1933_v35 }
 0xc6e   :  { %v1859_v57 = vsel %vm30_vm0, %v1855_v56, 0.0 }
 0xc6f   :  { %2105 = vrot.lane.b32.xlu0 %v7202_v52, %s6547_s29  ;;  %1860 = vadd.xlane.f32.xlu1 %v1859_v57 }
 0xc70   :  { %1961 = vmatpush.msra.mxu1 %v1932_v36 }
 0xc72   :  { %1962 = vmatpush.msra.mxu1 %v1931_v38 }
 0xc74   :  { %v2100_v30 = vpop.f32.mrf.mxu3 }
 0xc75   :  { %v7207_v37 = vadd.f32 %v6253_v50, %v2100_v30 }
 0xc77   :  { %2115 = vrot.lane.b32.xlu0 %v7207_v37, %s6545_s27  ;;  %2107 = vrot.lane.b32.xlu2 %v7207_v37, %s6547_s29 }
 0xc7f   :  { %2109 = vrot.lane.b32.xlu2 %v7202_v52, %s6546_s28  ;;  %2111 = vrot.lane.b32.xlu0 %v7207_v37, %s6546_s28 }
 0xc88   :  { %2113 = vrot.lane.b32.xlu1 %v7202_v52, %s6545_s27 }
 0xcce   :  { %v1858_v61 = vpop.xlane.xlu2 %1857 }
 0xccf   :  { %v1862_v21 = vmul.f32 %v1858_v61, %v6843_v20 }
 0xcd1   :  { %v1864_v55 = vadd.f32 1e-05, %v1862_v21 }
 0xcd3   :  { %6357 = vrsqrt.f32 %v1864_v55  ;;  %vm1872_vm14 = vweird.f32 %v1864_v55 }
 0xcd6   :  { %v7232_v63 = vpop.permute.xlu2 %2107 }
 0xcd7   :  { %2195 = vrot.lane.b32.xlu2 %v7232_v63, %s6548_s30 }
 0xcd9   :  { %v6358_v46 = vpop.eup %6357 }
 0xcda   :  { %v1867_v49 = vmul.f32 %v6358_v46, %v1864_v55  ;;  %vm1873_vm12 = vweird.f32 %v6358_v46  ;;  %v2024_v55 = vld [vmem:[%s8392_s3] sm:$0xff] }
 0xcdb   :  { %vm1874_vm15 = vmor %vm1872_vm14, %vm1873_vm12 }
 0xcdc   :  { %v1868_v0 = vmul.f32 %v6358_v46, %v1867_v49 }
 0xcde   :  { %v1869_v1 = vmul.f32 0.5, %v1868_v0  ;;  %v7257_v17 = vpop.permute.xlu2 %2109 }
 0xce0   :  { %v1870_v3 = vsub.f32 1.5, %v1869_v1 }
 0xce1   :  { %v7236_v4 = vpop.permute.xlu0 %2105 }
 0xce2   :  { %v1871_v5 = vmul.f32 %v6358_v46, %v1870_v3  ;;  %2169 = vrot.lane.b32.xlu1 %v7236_v4, %s6548_s30  ;;  %v1861_v53 = vpop.xlane.xlu1 %1860 }
 0xce3   :  { %v1863_v27 = vmul.f32 %v1861_v53, %v6843_v20 }
 0xce4   :  { %v1875_v7 = vsel %vm1874_vm15, %v6358_v46, %v1871_v5 }
 0xce5   :  { %v1886_v39 = vmul.f32 %v1875_v7, %v1852_v40  ;;  %v1865_v24 = vadd.f32 1e-05, %v1863_v27 }
 0xce7   :  { %v1889_v23 = vmul.f32 %v6254_v6, %v1886_v39  ;;  %6359 = vrsqrt.f32 %v1865_v24  ;;  %vm1882_vm3 = vweird.f32 %v1865_v24 }
 0xce9   :  { %v7247_v54 = vpop.permute.xlu0 %2115  ;;  %v7249_v8 = vadd.f32 %v6255_v41, %v1889_v23 }
 0xcea   :  { %2117 = vrot.lane.b32.xlu1 %v7202_v52, %s6548_s30  ;;  %2299 = vrot.lane.b32.xlu2 %v7247_v54, %s6548_s30 }
 0xceb   :  { %5948 = vmatmul.msk.f32.vlgmr.msra.gmra.mxu0 %vm30_vm0, %v7249_v8 }
 0xced   :  { %v6360_v48 = vpop.eup %6359 }
 0xcee   :  { %v1877_v51 = vmul.f32 %v6360_v48, %v1865_v24  ;;  %vm1883_vm2 = vweird.f32 %v6360_v48 }
 0xcef   :  { %vm1884_vm4 = vmor %vm1882_vm3, %vm1883_vm2 }
 0xcf0   :  { %v1878_v9 = vmul.f32 %v6360_v48, %v1877_v51 }
 0xcf1   :  { %v7259_v10 = vpop.permute.xlu0 %2111 }
 0xcf2   :  { %v1879_v11 = vmul.f32 0.5, %v1878_v9  ;;  %2221 = vrot.lane.b32.xlu1 %v7257_v17, %s6548_s30  ;;  %2247 = vrot.lane.b32.xlu2 %v7259_v10, %s6548_s30 }
 0xcf4   :  { %v1880_v25 = vsub.f32 1.5, %v1879_v11 }
 0xcf6   :  { %v1881_v26 = vmul.f32 %v6360_v48, %v1880_v25 }
 0xcf8   :  { %v1885_v13 = vsel %vm1884_vm4, %v6360_v48, %v1881_v26 }
 0xcf9   :  { %v1887_v14 = vmul.f32 %v1885_v13, %v7198_v60 }
 0xcfa   :  { %v7266_v16 = vpop.permute.xlu1 %2113 }
 0xcfb   :  { %2273 = vrot.lane.b32.xlu0 %v7266_v16, %s6548_s30  ;;  %v1890_v19 = vmul.f32 %v6254_v6, %v1887_v14 }
 0xcfd   :  { %v7270_v28 = vadd.f32 %v6255_v41, %v1890_v19 }
 0xcff   :  { %5949 = vmatmul.msk.f32.gmra.mxu0 %vm30_vm0, %v7270_v28 }
 0xd03   :  { %2143 = vrot.lane.b32.xlu0 %v7207_v37, %s6548_s30 }
 0xd31   :  { %v2196_v18 = vpop.permute.xlu2 %2195 }
 0xd32   :  { %5962 = vmatpush.xpose.msk.msrb.mxu3 %vm116_vm1, %v2196_v18  ;;  %v6163_v18 = vpack.i.bf16 %v7202_v52, %v7236_v4 }
 0xd35   :  { %5963 = vmatmul.msk.f32.vlgmr.msrb.gmra.mxu3 %vm116_vm1, %v7232_v63 }
 0xd44   :  { %v2300_v31 = vpop.permute.xlu2 %2299 }
 0xd45   :  { %5970 = vmatpush.xpose.msk.msra.mxu3 %vm116_vm1, %v2300_v31 }
 0xd48   :  { %5971 = vmatmul.msk.f32.vlgmr.msra.gmra.mxu3 %vm116_vm1, %v7247_v54 }
 0xd4c   :  { %v2248_v56 = vpop.permute.xlu2 %2247 }
 0xd54   :  { %v2170_v40 = vpop.permute.xlu1 %2169 }
 0xd55   :  { %5960 = vmatpush.xpose.msk.msrb.mxu2 %vm116_vm1, %v2170_v40 }
 0xd58   :  { %5961 = vmatmul.msk.f32.vlgmr.msrb.gmra.mxu2 %vm116_vm1, %v7236_v4 }
 0xd5c   :  { %v2118_v42 = vpop.permute.xlu1 %2117 }
 0xd5d   :  { %5956 = vmatpush.xpose.msk.msrb.mxu0 %vm116_vm1, %v2118_v42 }
 0xd60   :  { %5957 = vmatmul.msk.f32.vlgmr.msrb.gmra.mxu0 %vm116_vm1, %v7202_v52 }
 0xd64   :  { %v2222_v44 = vpop.permute.xlu1 %2221 }
 0xd65   :  { %5964 = vmatpush.xpose.msk.msra.mxu0 %vm116_vm1, %v2222_v44 }
 0xd68   :  { %v1923_v47 = vpop.f32.mrf.mxu0  ;;  %5965 = vmatmul.msk.f32.vlgmr.msra.gmra.mxu0 %vm116_vm1, %v7257_v17 }
 0xd69   :  { %v1924_v50 = vadd.f32 %v6256_v45, %v1923_v47 }
 0xd6b   :  { %v1929_v60 = vmax.f32 %v1924_v50, 0.0 }
 0xd6d   :  { %5950 = vmatmul.msk.f32.vlgmr.msra.gmra.mxu1 %vm962_vm13, %v1929_v60  ;;  %v2274_v43 = vpop.permute.xlu0 %2273 }
 0xd6e   :  { %5968 = vmatpush.xpose.msk.msra.mxu2 %vm116_vm1, %v2274_v43 }
 0xd71   :  { %5969 = vmatmul.msk.f32.vlgmr.msra.gmra.mxu2 %vm116_vm1, %v7266_v16 }
 0xd75   :  { %v2144_v57 = vpop.permute.xlu0 %2143 }
 0xd76   :  { %5958 = vmatpush.xpose.msk.msrb.mxu1 %vm116_vm1, %v2144_v57 }
 0xd7a   :  { %5966 = vmatpush.xpose.msk.msra.mxu1 %vm116_vm1, %v2248_v56 }
 0xd7c   :  { %v1926_v30 = vpop.f32.mrf.mxu0 }
 0xd7d   :  { %v1927_v15 = vadd.f32 %v6256_v45, %v1926_v30 }
 0xd7f   :  { %v1930_v58 = vmax.f32 %v1927_v15, 0.0 }
 0xd81   :  { %5951 = vmatmul.msk.f32.gmra.mxu1 %vm962_vm13, %v1930_v58 }
 0xd89   :  { %5959 = vmatmul.msk.f32.vlgmr.msrb.gmra.mxu1 %vm116_vm1, %v7207_v37 }
 0xd91   :  { %5967 = vmatmul.msk.f32.vlgmr.msra.gmra.mxu1 %vm116_vm1, %v7259_v10 }
 0xdb8   :  { %v2218_v12 = vpop.f32.mrf.mxu3 }
 0xdb9   :  { %v2219_v61 = vadd.f32 %v2218_v12, %v2025_v59 }
 0xdbb   :  { %v2334_v21 = vsel %vm116_vm1, %v2219_v61, -inf }
 0xdbc   :  { %2335 = vmax.xlane.f32.xlu2 %v2334_v21 }
 0xdcb   :  { %v2322_v23 = vpop.f32.mrf.mxu3 }
 0xdcc   :  { %v2323_v48 = vadd.f32 %v2322_v23, %v2025_v59 }
 0xdce   :  { %v2346_v9 = vsel %vm116_vm1, %v2323_v48, -inf }
 0xddb   :  { %v2192_v46 = vpop.f32.mrf.mxu2 }
 0xddc   :  { %v2193_v49 = vadd.f32 %v2192_v46, %v2024_v55 }
 0xddd   :  { %v2140_v0 = vpop.f32.mrf.mxu0 }
 0xdde   :  { %v2141_v1 = vadd.f32 %v2140_v0, %v2024_v55  ;;  %v2331_v3 = vsel %vm116_vm1, %v2193_v49, -inf }
 0xddf   :  { %2332 = vmax.xlane.f32.xlu0 %v2331_v3 }
 0xde0   :  { %v2325_v5 = vsel %vm116_vm1, %v2141_v1, -inf }
 0xde1   :  { %2326 = vmax.xlane.f32.xlu1 %v2325_v5 }
 0xde5   :  { %v2244_v53 = vpop.f32.mrf.mxu0 }
 0xde6   :  { %v2245_v6 = vadd.f32 %v2244_v53, %v2024_v55 }
 0xde8   :  { %v2337_v27 = vsel %vm116_vm1, %v2245_v6, -inf }
 0xde9   :  { %2338 = vmax.xlane.f32.xlu1 %v2337_v27 }
 0xdea   :  { %v7339_v24 = vpop.f32.mrf.mxu1 }
 0xdf4   :  { %v2296_v7 = vpop.f32.mrf.mxu2 }
 0xdf5   :  { %v2297_v39 = vadd.f32 %v2296_v7, %v2024_v55 }
 0xdf7   :  { %v2343_v41 = vsel %vm116_vm1, %v2297_v39, -inf }
 0xdf8   :  { %2344 = vmax.xlane.f32.xlu0 %v2343_v41 }
 0xdfe   :  { %v7342_v51 = vpop.f32.mrf.mxu1 }
 0xe00   :  { %2347 = vmax.xlane.f32.xlu0 %v2346_v9  ;;  %v6168_v9 = vpack.i.bf16 %v7266_v16, %v7232_v63 }
 0xe06   :  { %v2166_v11 = vpop.f32.mrf.mxu1 }
 0xe07   :  { %v2167_v25 = vadd.f32 %v2166_v11, %v2025_v59  ;;  %v6173_v11 = vpack.i.bf16 %v7257_v17, %v7207_v37 }
 0xe09   :  { %v2328_v26 = vsel %vm116_vm1, %v2167_v25, -inf }
 0xe0a   :  { %2329 = vmax.xlane.f32.xlu2 %v2328_v26 }
 0xe0e   :  { %v2270_v13 = vpop.f32.mrf.mxu1 }
 0xe0f   :  { %v2271_v14 = vadd.f32 %v2270_v13, %v2025_v59 }
 0xe11   :  { %v2340_v19 = vsel %vm116_vm1, %v2271_v14, -inf }
 0xe12   :  { %2341 = vmax.xlane.f32.xlu2 %v2340_v19 }
 0xe14   :  { %6164 = vrot.lane.b32.xlu0 %v6163_v18, %s6549_s8 }
 0xe2f   :  { %v2336_v35 = vpop.xlane.xlu2 %2335 }
 0xe30   :  { %v2352_v52 = vsub.f32 %v2219_v61, %v2336_v35 }
 0xe32   :  { %v2363_v47 = vmul.f32 1.442695, %v2352_v52 }
 0xe52   :  { %v2333_v29 = vpop.xlane.xlu0 %2332 }
 0xe53   :  { %v2351_v33 = vsub.f32 %v2193_v49, %v2333_v29 }
 0xe54   :  { %v2327_v2 = vpop.xlane.xlu1 %2326 }
 0xe55   :  { %v2361_v22 = vmul.f32 1.442695, %v2351_v33  ;;  %v2349_v31 = vsub.f32 %v2141_v1, %v2327_v2 }
 0xe57   :  { %6361 = vpow2.f32 %v2361_v22  ;;  %v2357_v34 = vmul.f32 1.442695, %v2349_v31 }
 0xe59   :  { %6363 = vpow2.f32 %v2357_v34 }
 0xe5c   :  { %v2339_v36 = vpop.xlane.xlu1 %2338 }
 0xe5d   :  { %v7350_v38 = vpop.eup %6361  ;;  %v2353_v40 = vsub.f32 %v2245_v6, %v2339_v36 }
 0xe5e   :  { %v2379_v42 = vsel %vm116_vm1, %v7350_v38, 0.0 }
 0xe5f   :  { %v7354_v44 = vpop.eup %6363  ;;  %v2365_v4 = vmul.f32 1.442695, %v2353_v40  ;;  %2380 = vadd.xlane.f32.xlu1 %v2379_v42 }
 0xe60   :  { %v2373_v45 = vsel %vm116_vm1, %v7354_v44, 0.0 }
 0xe61   :  { %6365 = vpow2.f32 %v2365_v4  ;;  %2374 = vadd.xlane.f32.xlu0 %v2373_v45 }
 0xe62   :  { %6367 = vpow2.f32 %v2363_v47 }
 0xe67   :  { %v7358_v50 = vpop.eup %6365 }
 0xe68   :  { %v2385_v60 = vsel %vm116_vm1, %v7358_v50, 0.0  ;;  %v7362_v57 = vpop.eup %6367 }
 0xe69   :  { %2386 = vadd.xlane.f32.xlu2 %v2385_v60  ;;  %v2382_v15 = vsel %vm116_vm1, %v7362_v57, 0.0 }
 0xe6b   :  { %v2345_v43 = vpop.xlane.xlu0 %2344 }
 0xe6c   :  { %v2355_v56 = vsub.f32 %v2297_v39, %v2345_v43 }
 0xe6e   :  { %v2369_v30 = vmul.f32 1.442695, %v2355_v56 }
 0xe70   :  { %6369 = vpow2.f32 %v2369_v30 }
 0xe71   :  { %2383 = vadd.xlane.f32.xlu2 %v2382_v15 }
 0xe73   :  { %v2348_v58 = vpop.xlane.xlu0 %2347 }
 0xe74   :  { %v2356_v59 = vsub.f32 %v2323_v48, %v2348_v58 }
 0xe76   :  { %v7366_v12 = vpop.eup %6369  ;;  %v2371_v61 = vmul.f32 1.442695, %v2356_v59 }
 0xe77   :  { %v2391_v21 = vsel %vm116_vm1, %v7366_v12, 0.0 }
 0xe78   :  { %6371 = vpow2.f32 %v2371_v61  ;;  %2392 = vadd.xlane.f32.xlu1 %v2391_v21 }
 0xe7d   :  { %v2330_v55 = vpop.xlane.xlu2 %2329 }
 0xe7e   :  { %v7370_v46 = vpop.eup %6371  ;;  %v2350_v49 = vsub.f32 %v2167_v25, %v2330_v55  ;;  %v6257_v25 = vld [vmem:[%s8391_s2 + $0x169] ss:$0 sm:$0xff] }
 0xe7f   :  { %v2394_v0 = vsel %vm116_vm1, %v7370_v46, 0.0  ;;  %v1965_v26 = vadd.f32 %v6257_v25, %v7339_v24 }
 0xe80   :  { %v2359_v1 = vmul.f32 1.442695, %v2350_v49  ;;  %2395 = vadd.xlane.f32.xlu1 %v2394_v0 }
 0xe81   :  { %v7397_v63 = vadd.f32 %v1965_v26, %v7249_v8 }
 0xe82   :  { %6373 = vpow2.f32 %v2359_v1 }
 0xe85   :  { %v2342_v3 = vpop.xlane.xlu2 %2341 }
 0xe86   :  { %v2354_v5 = vsub.f32 %v2271_v14, %v2342_v3  ;;  %v6165_v53 = vpop.permute.xlu0 %6164 }
 0xe87   :  { %v6167_v6 = vunpack.i.h.bf16 %v6165_v53  ;;  %v6166_v27 = vunpack.i.l.bf16 %v6165_v53 }
 0xe88   :  { %v7374_v7 = vpop.eup %6373  ;;  %v2367_v39 = vmul.f32 1.442695, %v2354_v5 }
 0xe89   :  { %2546 = vmatpush.msrb.mxu0 %v6167_v6  ;;  %2598 = vmatpush.msrb.mxu2 %v6166_v27  ;;  %v2376_v41 = vsel %vm116_vm1, %v7374_v7, 0.0 }
 0xe8a   :  { %6375 = vpow2.f32 %v2367_v39  ;;  %2377 = vadd.xlane.f32.xlu0 %v2376_v41 }
 0xe90   :  { %v7378_v23 = vpop.eup %6375 }
 0xe91   :  { %v2388_v48 = vsel %vm116_vm1, %v7378_v23, 0.0 }
 0xe92   :  { %2389 = vadd.xlane.f32.xlu2 %v2388_v48 }
 0xe99   :  { %6169 = vrot.lane.b32.xlu1 %v6168_v9, %s6549_s8 }
 0xe9e   :  { %2707 = vrot.lane.b32.xlu0 %v7247_v54, %s6549_s8  ;;  %v1974_v54 = vsel %vm30_vm0, %v7397_v63, 0.0 }
 0xea6   :  { %2655 = vrot.lane.b32.xlu0 %v7259_v10, %s6549_s8  ;;  %v1968_v10 = vadd.f32 %v6257_v25, %v7342_v51 }
 0xea8   :  { %v7403_v16 = vadd.f32 %v1968_v10, %v7270_v28 }
 0xeaa   :  { %6174 = vrot.lane.b32.xlu2 %v6173_v11, %s6549_s8  ;;  %v1977_v37 = vsel %vm30_vm0, %v7403_v16, 0.0 }
 0xec3   :  { %1975 = vadd.xlane.f32.xlu1 %v1974_v54 }
 0xed0   :  { %1978 = vadd.xlane.f32.xlu0 %v1977_v37 }
 0xed2   :  { %v2381_v17 = vpop.xlane.xlu1 %2380 }
 0xed3   :  { %6377 = vrcp.f32 %v2381_v17  ;;  %v2438_v33 = vand.u32 2147483648, %v2381_v17  ;;  %v2436_v28 = vand.u32 2147483647, %v2381_v17  ;;  %vm2432_vm6 = vweird.f32 %v2381_v17 }
 0xed4   :  { %v2375_v13 = vpop.xlane.xlu0 %2374 }
 0xed5   :  { %6379 = vrcp.f32 %v2375_v13  ;;  %v2408_v34 = vand.u32 2147483648, %v2375_v13  ;;  %v2439_v35 = vor.u32 1.1754944e-38, %v2438_v33  ;;  %v2406_v36 = vand.u32 2147483647, %v2375_v13 }
 0xed6   :  { %vm2437_vm9 = vcmp.eq.f32.partialorder %v2436_v28, 8.507059e+37  ;;  %vm2402_vm10 = vweird.f32 %v2375_v13 }
 0xed7   :  { %v2409_v47 = vor.u32 1.1754944e-38, %v2408_v34  ;;  %vm2407_vm12 = vcmp.eq.f32.partialorder %v2406_v36, 8.507059e+37 }
 0xed9   :  { %v6378_v24 = vpop.eup %6377 }
 0xeda   :  { %v2428_v8 = vmul.f32 %v6378_v24, %v2381_v17  ;;  %vm2433_vm5 = vweird.f32 %v6378_v24 }
 0xedb   :  { %v6380_v14 = vpop.eup %6379  ;;  %vm2434_vm8 = vmor %vm2432_vm6, %vm2433_vm5 }
 0xedc   :  { %v2429_v19 = vsub.f32 1.0, %v2428_v8  ;;  %v2398_v18 = vmul.f32 %v6380_v14, %v2375_v13  ;;  %v2387_v29 = vpop.xlane.xlu2 %2386  ;;  %vm2403_vm7 = vweird.f32 %v6380_v14 }
 0xedd   :  { %6381 = vrcp.f32 %v2387_v29  ;;  %vm2404_vm11 = vmor %vm2402_vm10, %vm2403_vm7  ;;  %v2468_v58 = vand.u32 2147483648, %v2387_v29  ;;  %v2466_v21 = vand.u32 2147483647, %v2387_v29  ;;  %vm2462_vm15 = vweird.f32 %v2387_v29 }
 0xede   :  { %v2430_v51 = vmul.f32 %v6378_v24, %v2429_v19  ;;  %v2399_v2 = vsub.f32 1.0, %v2398_v18 }
 0xedf   :  { %v2469_v49 = vor.u32 1.1754944e-38, %v2468_v58  ;;  %vm2467_vm3 = vcmp.eq.f32.partialorder %v2466_v21, 8.507059e+37 }
 0xee0   :  { %v2431_v22 = vadd.f32 %v6378_v24, %v2430_v51  ;;  %v2400_v31 = vmul.f32 %v6380_v14, %v2399_v2 }
 0xee2   :  { %v2435_v40 = vsel %vm2434_vm8, %v6378_v24, %v2431_v22  ;;  %v2401_v42 = vadd.f32 %v6380_v14, %v2400_v31 }
 0xee3   :  { %v6382_v52 = vpop.eup %6381  ;;  %v2440_v4 = vsel %vm2437_vm9, %v2439_v35, %v2435_v40 }
 0xee4   :  { %v2405_v45 = vsel %vm2404_vm11, %v6380_v14, %v2401_v42  ;;  %v2458_v60 = vmul.f32 %v6382_v52, %v2387_v29  ;;  %v2384_v43 = vpop.xlane.xlu2 %2383  ;;  %v2441_v56 = vmul.f32 %v7350_v38, %v2440_v4  ;;  %vm2463_vm14 = vweird.f32 %v6382_v52 }
 0xee5   :  { %6383 = vrcp.f32 %v2384_v43  ;;  %v2410_v15 = vsel %vm2407_vm12, %v2409_v47, %v2405_v45  ;;  %vm2464_vm2 = vmor %vm2462_vm15, %vm2463_vm14  ;;  %v2453_v6 = vand.u32 2147483648, %v2384_v43  ;;  %v2451_v39 = vand.u32 2147483647, %v2384_v43 }
 0xee6   :  { %v2459_v30 = vsub.f32 1.0, %v2458_v60  ;;  %2519 = vst.msk [vmem:[%s8395_s6 + $0x10] sm:$0xff] %vm116_vm1, %v2441_v56  ;;  %5974 = vmatmul.msk.f32.vlgmr.msrb.gmra.mxu2 %vm116_vm1, %v2441_v56  ;;  %v2411_v59 = vmul.f32 %v7354_v44, %v2410_v15  ;;  %vm2447_vm5 = vweird.f32 %v2384_v43 }
 0xee7   :  { %v2454_v9 = vor.u32 1.1754944e-38, %v2453_v6  ;;  %vm2452_vm7 = vcmp.eq.f32.partialorder %v2451_v39, 8.507059e+37 }
 0xee8   :  { %v2460_v61 = vmul.f32 %v6382_v52, %v2459_v30  ;;  %2517 = vst.msk [vmem:[%s8395_s6] sm:$0xff] %vm116_vm1, %v2411_v59  ;;  %5972 = vmatmul.msk.f32.vlgmr.msrb.gmra.mxu0 %vm116_vm1, %v2411_v59 }
 0xeea   :  { %v2461_v38 = vadd.f32 %v6382_v52, %v2460_v61 }
 0xeeb   :  { %v6384_v55 = vpop.eup %6383  ;;  %v2393_v0 = vpop.xlane.xlu1 %2392 }
 0xeec   :  { %v2465_v1 = vsel %vm2464_vm2, %v6382_v52, %v2461_v38  ;;  %v2443_v3 = vmul.f32 %v6384_v55, %v2384_v43  ;;  %6385 = vrcp.f32 %v2393_v0  ;;  %vm2448_vm4 = vweird.f32 %v6384_v55 }
 0xeed   :  { %v2470_v44 = vsel %vm2467_vm3, %v2469_v49, %v2465_v1  ;;  %vm2449_vm6 = vmor %vm2447_vm5, %vm2448_vm4  ;;  %v2498_v10 = vand.u32 2147483648, %v2393_v0  ;;  %v2496_v13 = vand.u32 2147483647, %v2393_v0  ;;  %vm2492_vm9 = vweird.f32 %v2393_v0 }
 0xeee   :  { %v2444_v5 = vsub.f32 1.0, %v2443_v3  ;;  %v7420_v53 = vmul.f32 %v7358_v50, %v2470_v44 }
 0xeef   :  { %v2499_v14 = vor.u32 1.1754944e-38, %v2498_v10  ;;  %vm2497_vm11 = vcmp.eq.f32.partialorder %v2496_v13, 8.507059e+37 }
 0xef0   :  { %v2445_v27 = vmul.f32 %v6384_v55, %v2444_v5  ;;  %2521 = vst.msk [vmem:[%s8395_s6 + $0x20] sm:$0xff] %vm116_vm1, %v7420_v53 }
 0xef2   :  { %v6386_v41 = vpop.eup %6385  ;;  %v2446_v48 = vadd.f32 %v6384_v55, %v2445_v27 }
 0xef3   :  { %v2488_v11 = vmul.f32 %v6386_v41, %v2393_v0  ;;  %v2396_v25 = vpop.xlane.xlu1 %2395  ;;  %vm2493_vm8 = vweird.f32 %v6386_v41 }
 0xef4   :  { %v2450_v26 = vsel %vm2449_vm6, %v6384_v55, %v2446_v48  ;;  %6387 = vrcp.f32 %v2396_v25  ;;  %vm2494_vm10 = vmor %vm2492_vm9, %vm2493_vm8  ;;  %v2513_v28 = vand.u32 2147483648, %v2396_v25  ;;  %v2511_v22 = vand.u32 2147483647, %v2396_v25 }
 0xef5   :  { %v2455_v50 = vsel %vm2452_vm7, %v2454_v9, %v2450_v26  ;;  %v2489_v54 = vsub.f32 1.0, %v2488_v11  ;;  %vm2507_vm14 = vweird.f32 %v2396_v25  ;;  %v2069_v11 = vld [vmem:[%s8391_s2 + $0x174] sm:$0xff]  ;;  %v2070_v26 = vld [vmem:[%s8391_s2 + $0x17c] sm:$0xff] }
 0xef6   :  { %v2456_v37 = vmul.f32 %v7362_v57, %v2455_v50  ;;  %v2514_v34 = vor.u32 1.1754944e-38, %v2513_v28  ;;  %vm2512_vm2 = vcmp.eq.f32.partialorder %v2511_v22, 8.507059e+37  ;;  %v2071_v50 = vld [vmem:[%s8391_s2 + $0x184] sm:$0xff] }
 0xef7   :  { %v2490_v17 = vmul.f32 %v6386_v41, %v2489_v54 }
 0xef8   :  { %2520 = vst.msk [vmem:[%s8395_s6 + $0x18] sm:$0xff] %vm116_vm1, %v2456_v37 }
 0xef9   :  { %v2491_v24 = vadd.f32 %v6386_v41, %v2490_v17 }
 0xefa   :  { %v6388_v8 = vpop.eup %6387 }
 0xefb   :  { %v2495_v19 = vsel %vm2494_vm10, %v6386_v41, %v2491_v24  ;;  %v2503_v18 = vmul.f32 %v6388_v8, %v2396_v25  ;;  %vm2508_vm12 = vweird.f32 %v6388_v8 }
 0xefc   :  { %v2500_v29 = vsel %vm2497_vm11, %v2499_v14, %v2495_v19  ;;  %vm2509_vm15 = vmor %vm2507_vm14, %vm2508_vm12 }
 0xefd   :  { %v2504_v33 = vsub.f32 1.0, %v2503_v18  ;;  %v2378_v51 = vpop.xlane.xlu0 %2377  ;;  %v2501_v57 = vmul.f32 %v7366_v12, %v2500_v29 }
 0xefe   :  { %6389 = vrcp.f32 %v2378_v51  ;;  %v2423_v45 = vand.u32 2147483648, %v2378_v51  ;;  %v2421_v60 = vand.u32 2147483647, %v2378_v51  ;;  %vm2417_vm4 = vweird.f32 %v2378_v51 }
 0xeff   :  { %v2505_v2 = vmul.f32 %v6388_v8, %v2504_v33  ;;  %2523 = vst.msk [vmem:[%s8395_s6 + $0x30] sm:$0xff] %vm116_vm1, %v2501_v57  ;;  %v6258_v33 = vld [vmem:[%s8391_s2 + $0x18c] ss:$0 sm:$0xff] }
 0xf00   :  { %v2424_v15 = vor.u32 1.1754944e-38, %v2423_v45  ;;  %vm2422_vm6 = vcmp.eq.f32.partialorder %v2421_v60, 8.507059e+37 }
 0xf01   :  { %v2506_v31 = vadd.f32 %v6388_v8, %v2505_v2 }
 0xf03   :  { %v2510_v35 = vsel %vm2509_vm15, %v6388_v8, %v2506_v31 }
 0xf04   :  { %v6390_v36 = vpop.eup %6389  ;;  %v2515_v40 = vsel %vm2512_vm2, %v2514_v34, %v2510_v35 }
 0xf05   :  { %v2413_v42 = vmul.f32 %v6390_v36, %v2378_v51  ;;  %v2390_v12 = vpop.xlane.xlu2 %2389  ;;  %v2516_v52 = vmul.f32 %v7370_v46, %v2515_v40  ;;  %vm2418_vm3 = vweird.f32 %v6390_v36 }
 0xf06   :  { %6391 = vrcp.f32 %v2390_v12  ;;  %vm2419_vm5 = vmor %vm2417_vm4, %vm2418_vm3  ;;  %v2483_v3 = vand.u32 2147483648, %v2390_v12  ;;  %v2481_v6 = vand.u32 2147483647, %v2390_v12  ;;  %vm2477_vm8 = vweird.f32 %v2390_v12 }
 0xf07   :  { %v2414_v4 = vsub.f32 1.0, %v2413_v42  ;;  %2524 = vst.msk [vmem:[%s8395_s6 + $0x38] sm:$0xff] %vm116_vm1, %v2516_v52 }
 0xf08   :  { %vm2482_vm10 = vcmp.eq.f32.partialorder %v2481_v6, 8.507059e+37 }
 0xf09   :  { %v2415_v47 = vmul.f32 %v6390_v36, %v2414_v4 }
 0xf0b   :  { %v2416_v43 = vadd.f32 %v6390_v36, %v2415_v47  ;;  %v6170_v56 = vpop.permute.xlu1 %6169 }
 0xf0c   :  { %v6392_v30 = vpop.eup %6391  ;;  %v6172_v58 = vunpack.i.h.bf16 %v6170_v56  ;;  %v6171_v59 = vunpack.i.l.bf16 %v6170_v56 }
 0xf0d   :  { %v2420_v46 = vsel %vm2419_vm5, %v6390_v36, %v2416_v43  ;;  %v2473_v61 = vmul.f32 %v6392_v30, %v2390_v12  ;;  %v6175_v21 = vpop.permute.xlu2 %6174  ;;  %vm2478_vm7 = vweird.f32 %v6392_v30 }
 0xf0e   :  { %v6177_v38 = vunpack.i.h.bf16 %v6175_v21  ;;  %v6176_v55 = vunpack.i.l.bf16 %v6175_v21  ;;  %2624 = vmatpush.msrb.mxu3 %v6171_v59  ;;  %2702 = vmatpush.msra.mxu2 %v6172_v58  ;;  %v2425_v49 = vsel %vm2422_vm6, %v2424_v15, %v2420_v46  ;;  %vm2479_vm9 = vmor %vm2477_vm8, %vm2478_vm7  ;;  %v2913_v46 = vld [vmem:[%s8389_s0 + $0x7b] sm:$0xff] }
 0xf0f   :  { %v2474_v0 = vsub.f32 1.0, %v2473_v61  ;;  %5975 = vmatmul.msk.f32.vlgmr.msrb.gmra.mxu3 %vm116_vm1, %v2456_v37  ;;  %5978 = vmatmul.msk.f32.vlgmr.msra.gmra.mxu2 %vm116_vm1, %v2501_v57  ;;  %v2426_v1 = vmul.f32 %v7374_v7, %v2425_v49  ;;  %v2484_v7 = vor.u32 1.1754944e-38, %v2483_v3  ;;  %v2911_v61 = vld [vmem:[%s8389_s0 + $0x6b] sm:$0xff] }
 0xf10   :  { %v2708_v44 = vpop.permute.xlu0 %2707  ;;  %2572 = vmatpush.msrb.mxu1 %v6176_v55  ;;  %2650 = vmatpush.msra.mxu0 %v6177_v38 }
 0xf11   :  { %v2475_v5 = vmul.f32 %v6392_v30, %v2474_v0  ;;  %2518 = vst.msk [vmem:[%s8395_s6 + $0x8] sm:$0xff] %vm116_vm1, %v2426_v1  ;;  %5973 = vmatmul.msk.f32.vlgmr.msrb.gmra.mxu1 %vm116_vm1, %v2426_v1  ;;  %5976 = vmatmul.msk.f32.vlgmr.msra.gmra.mxu0 %vm116_vm1, %v7420_v53  ;;  %v2068_v53 = vld [vmem:[%s8391_s2 + $0x16c] sm:$0xff] }
 0xf12   :  { %2728 = vmatpush.msra.mxu3 %v2708_v44  ;;  %2754 = vmatpush.msrb.mxu0 %v2069_v11 }
 0xf13   :  { %v2476_v27 = vadd.f32 %v6392_v30, %v2475_v5  ;;  %2812 = vmatpush.msrb.mxu2 %v2070_v26 }
 0xf14   :  { %2843 = vmatpush.msrb.mxu3 %v2071_v50  ;;  %2939 = vmatpush.msra.mxu0 %v2913_v46 }
 0xf15   :  { %v2480_v39 = vsel %vm2479_vm9, %v6392_v30, %v2476_v27 }
 0xf16   :  { %v2485_v41 = vsel %vm2482_vm10, %v2484_v7, %v2480_v39 }
 0xf17   :  { %5979 = vmatmul.msk.f32.vlgmr.msra.gmra.mxu3 %vm116_vm1, %v2516_v52  ;;  %v2486_v48 = vmul.f32 %v7378_v23, %v2485_v41 }
 0xf18   :  { %v2656_v9 = vpop.permute.xlu0 %2655 }
 0xf19   :  { %2676 = vmatpush.msra.mxu1 %v2656_v9  ;;  %2522 = vst.msk [vmem:[%s8395_s6 + $0x28] sm:$0xff] %vm116_vm1, %v2486_v48 }
 0xf1a   :  { %5977 = vmatmul.msk.f32.vlgmr.msra.gmra.mxu1 %vm116_vm1, %v2486_v48 }
 0xf1b   :  { %2783 = vmatpush.msrb.mxu1 %v2068_v53 }
 0xf36   :  { %v1976_v51 = vpop.xlane.xlu1 %1975 }
 0xf37   :  { %v1980_v22 = vmul.f32 %v1976_v51, %v6843_v20 }
 0xf39   :  { %v7485_v12 = vsub.f32 %v7397_v63, %v1980_v22 }
 0xf3b   :  { %v1984_v56 = vmul.f32 %v7485_v12, %v7485_v12 }
 0xf3d   :  { %v1986_v63 = vsel %vm30_vm0, %v1984_v56, 0.0 }
 0xf43   :  { %v1979_v4 = vpop.xlane.xlu0 %1978 }
 0xf44   :  { %v1981_v60 = vmul.f32 %v1979_v4, %v6843_v20 }
 0xf65   :  { %v2548_v23 = vpop.f32.mrf.mxu0 }
 0xf66   :  { %5982 = vmatmul.msk.f32.vlgmr.msrb.gmra.mxu1 %vm116_vm1, %v2548_v23 }
 0xf69   :  { %v2600_v25 = vpop.f32.mrf.mxu2 }
 0xf6a   :  { %5980 = vmatmul.msk.f32.vlgmr.msrb.gmra.mxu0 %vm116_vm1, %v2600_v25 }
 0xf8e   :  { %v2574_v54 = vpop.f32.mrf.mxu1  ;;  %v2652_v10 = vpop.f32.mrf.mxu0 }
 0xf8f   :  { %5983 = vmatmul.msk.f32.gmra.mxu1 %vm116_vm1, %v2574_v54  ;;  %5984 = vmatmul.msk.f32.vlgmr.msrb.gmra.mxu2 %vm116_vm1, %v2652_v10 }
 0xf92   :  { %v2626_v37 = vpop.f32.mrf.mxu3  ;;  %v2704_v17 = vpop.f32.mrf.mxu2 }
 0xf93   :  { %5981 = vmatmul.msk.f32.gmra.mxu0 %vm116_vm1, %v2626_v37  ;;  %5986 = vmatmul.msk.f32.vlgmr.msrb.gmra.mxu3 %vm116_vm1, %v2704_v17 }
 0xf97   :  { %v2678_v13 = vpop.f32.mrf.mxu1 }
 0xf98   :  { %5985 = vmatmul.msk.f32.gmra.mxu2 %vm116_vm1, %v2678_v13 }
 0xf9a   :  { %v2730_v24 = vpop.f32.mrf.mxu3 }
 0xf9b   :  { %5987 = vmatmul.msk.f32.gmra.mxu3 %vm116_vm1, %v2730_v24  ;;  %v7532_v24 = vld [vmem:[%s8389_s0 + $0x83] ss:$0 sm:$0xff] }
 0xfe3   :  { %v2785_v14 = vpop.f32.mrf.mxu1 }
 0xfe7   :  { %v2756_v8 = vpop.f32.mrf.mxu0 }
 0xfe8   :  { %v2786_v18 = vadd.f32 %v2785_v14, %v2756_v8 }
0x100c   :  { %v2788_v31 = vpop.f32.mrf.mxu1 }
0x1010   :  { %v2759_v28 = vpop.f32.mrf.mxu0 }
0x1011   :  { %v2789_v35 = vadd.f32 %v2788_v31, %v2759_v28 }
0x1012   :  { %v2814_v19 = vpop.f32.mrf.mxu2 }
0x1013   :  { %v2820_v29 = vadd.f32 %v2814_v19, %v2786_v18 }
0x1016   :  { %v2845_v57 = vpop.f32.mrf.mxu3 }
0x1017   :  { %v2851_v2 = vadd.f32 %v2845_v57, %v2820_v29 }
0x1019   :  { %v2854_v34 = vadd.f32 %v6258_v33, %v2851_v2 }
0x101b   :  { %v2817_v36 = vpop.f32.mrf.mxu2  ;;  %v2856_v40 = vadd.f32 %v2854_v34, %v7179_v62  ;;  %v7493_v62 = vsub.f32 %v7403_v16, %v1981_v60  ;;  %v2910_v16 = vld [vmem:[%s8389_s0 + $0x63] sm:$0xff] }
0x101c   :  { %v2821_v42 = vadd.f32 %v2817_v36, %v2789_v35  ;;  %v6183_v21 = vpack.i.bf16 %v2910_v16, %v2911_v61 }
0x101d   :  { %v2860_v52 = vsel %vm30_vm0, %v2856_v40, 0.0  ;;  %v1985_v58 = vmul.f32 %v7493_v62, %v7493_v62 }
0x101e   :  { %2861 = vadd.xlane.f32.xlu2 %v2860_v52  ;;  %v2848_v45 = vpop.f32.mrf.mxu3 }
0x101f   :  { %v2852_v47 = vadd.f32 %v2848_v45, %v2821_v42  ;;  %v1989_v59 = vsel %vm30_vm0, %v1985_v58, 0.0  ;;  %v6259_v42 = vld [vmem:[%s8391_s2 + $0x16a] ss:$0 sm:$0xff] }
0x1021   :  { %v2855_v43 = vadd.f32 %v6258_v33, %v2852_v47 }
0x1023   :  { %v2857_v30 = vadd.f32 %v2855_v43, %v7186_v32  ;;  %v2912_v32 = vld [vmem:[%s8389_s0 + $0x73] sm:$0xff]  ;;  %v6260_v43 = vld [vmem:[%s8391_s2 + $0x18d] ss:$0 sm:$0xff] }
0x1024   :  { %2940 = vmatpush.msra.mxu0 %v2912_v32  ;;  %v6178_v7 = vpack.i.bf16 %v2912_v32, %v2913_v46 }
0x1025   :  { %v2863_v15 = vsel %vm30_vm0, %v2857_v30, 0.0 }
0x1026   :  { %1987 = vadd.xlane.f32.xlu2 %v1986_v63  ;;  %2864 = vadd.xlane.f32.xlu1 %v2863_v15 }
0x1027   :  { %2941 = vmatpush.msra.mxu0 %v2911_v61 }
0x1029   :  { %2942 = vmatpush.msra.mxu0 %v2910_v16  ;;  %v6262_v16 = vld [vmem:[%s8391_s2 + $0x16b] ss:$0 sm:$0xff] }
0x102e   :  { %1990 = vadd.xlane.f32.xlu1 %v1989_v59  ;;  %v6261_v59 = vld [vmem:[%s8391_s2 + $0x18e] ss:$0 sm:$0xff] }
0x1047   :  { %6184 = vrot.lane.b32.xlu1 %v6183_v21, %s6548_s30 }
0x1091   :  { %v2862_v38 = vpop.xlane.xlu2 %2861 }
0x1092   :  { %v2866_v55 = vmul.f32 %v2862_v38, %v6843_v20 }
0x1094   :  { %v7514_v49 = vsub.f32 %v2856_v40, %v2866_v55 }
0x1096   :  { %v2870_v0 = vmul.f32 %v7514_v49, %v7514_v49 }
0x1098   :  { %v2872_v1 = vsel %vm30_vm0, %v2870_v0, 0.0 }
0x1099   :  { %2873 = vadd.xlane.f32.xlu0 %v2872_v1  ;;  %v2865_v3 = vpop.xlane.xlu1 %2864  ;;  %v1988_v39 = vpop.xlane.xlu2 %1987 }
0x109a   :  { %v2867_v44 = vmul.f32 %v2865_v3, %v6843_v20  ;;  %v1992_v41 = vmul.f32 %v1988_v39, %v6843_v20 }
0x109c   :  { %v7520_v5 = vsub.f32 %v2857_v30, %v2867_v44  ;;  %v1994_v48 = vadd.f32 1e-05, %v1992_v41 }
0x109e   :  { %v2871_v6 = vmul.f32 %v7520_v5, %v7520_v5  ;;  %6393 = vrsqrt.f32 %v1994_v48  ;;  %vm2002_vm12 = vweird.f32 %v1994_v48 }
0x10a0   :  { %v2875_v27 = vsel %vm30_vm0, %v2871_v6, 0.0 }
0x10a1   :  { %2876 = vadd.xlane.f32.xlu2 %v2875_v27  ;;  %v1991_v9 = vpop.xlane.xlu1 %1990 }
0x10a2   :  { %v1993_v53 = vmul.f32 %v1991_v9, %v6843_v20 }
0x10a4   :  { %v1995_v11 = vadd.f32 1e-05, %v1993_v53  ;;  %v6394_v23 = vpop.eup %6393 }
0x10a5   :  { %v1997_v25 = vmul.f32 %v6394_v23, %v1994_v48  ;;  %vm2003_vm11 = vweird.f32 %v6394_v23 }
0x10a6   :  { %6395 = vrsqrt.f32 %v1995_v11  ;;  %vm2004_vm14 = vmor %vm2002_vm12, %vm2003_vm11  ;;  %vm2012_vm5 = vweird.f32 %v1995_v11 }
0x10a7   :  { %v1998_v50 = vmul.f32 %v6394_v23, %v1997_v25 }
0x10a9   :  { %v1999_v17 = vmul.f32 0.5, %v1998_v50 }
0x10ab   :  { %v2000_v14 = vsub.f32 1.5, %v1999_v17 }
0x10ac   :  { %v6396_v10 = vpop.eup %6395 }
0x10ad   :  { %6179 = vrot.lane.b32.xlu0 %v6178_v7, %s6548_s30  ;;  %v2007_v13 = vmul.f32 %v6396_v10, %v1995_v11  ;;  %v2001_v57 = vmul.f32 %v6394_v23, %v2000_v14  ;;  %vm2013_vm3 = vweird.f32 %v6396_v10 }
0x10ae   :  { %vm2014_vm6 = vmor %vm2012_vm5, %vm2013_vm3 }
0x10af   :  { %v2008_v19 = vmul.f32 %v6396_v10, %v2007_v13  ;;  %v2005_v31 = vsel %vm2004_vm14, %v6394_v23, %v2001_v57 }
0x10b0   :  { %v2016_v52 = vmul.f32 %v2005_v31, %v7485_v12 }
0x10b1   :  { %v2009_v28 = vmul.f32 0.5, %v2008_v19 }
0x10b2   :  { %v2019_v46 = vmul.f32 %v6259_v42, %v2016_v52 }
0x10b3   :  { %v2010_v34 = vsub.f32 1.5, %v2009_v28 }
0x10b4   :  { %v7554_v3 = vadd.f32 %v6262_v16, %v2019_v46 }
0x10b5   :  { %v2011_v60 = vmul.f32 %v6396_v10, %v2010_v34 }
0x10b7   :  { %v2015_v61 = vsel %vm2014_vm6, %v6396_v10, %v2011_v60 }
0x10b8   :  { %v2017_v0 = vmul.f32 %v2015_v61, %v7493_v62 }
0x10b9   :  { %2967 = vrot.lane.b32.xlu2 %v7532_v24, %s6548_s30  ;;  %v6185_v47 = vpop.permute.xlu1 %6184 }
0x10ba   :  { %v6186_v12 = vunpack.i.l.bf16 %v6185_v47  ;;  %v6187_v55 = vunpack.i.h.bf16 %v6185_v47  ;;  %v2020_v27 = vmul.f32 %v6259_v42, %v2017_v0 }
0x10bc   :  { %v7563_v62 = vadd.f32 %v6262_v16, %v2020_v27 }
0x110c   :  { %v2874_v26 = vpop.xlane.xlu0 %2873 }
0x110d   :  { %v2878_v54 = vmul.f32 %v2874_v26, %v6843_v20 }
0x110f   :  { %v2880_v37 = vadd.f32 1e-05, %v2878_v54 }
0x1111   :  { %6397 = vrsqrt.f32 %v2880_v37  ;;  %vm2888_vm2 = vweird.f32 %v2880_v37 }
0x1114   :  { %v2877_v8 = vpop.xlane.xlu2 %2876 }
0x1115   :  { %v2879_v18 = vmul.f32 %v2877_v8, %v6843_v20 }
0x1117   :  { %v6398_v29 = vpop.eup %6397  ;;  %v2881_v33 = vadd.f32 1e-05, %v2879_v18 }
0x1118   :  { %v2883_v51 = vmul.f32 %v6398_v29, %v2880_v37  ;;  %vm2889_vm15 = vweird.f32 %v6398_v29 }
0x1119   :  { %6399 = vrsqrt.f32 %v2881_v33  ;;  %vm2890_vm4 = vmor %vm2888_vm2, %vm2889_vm15  ;;  %vm2898_vm8 = vweird.f32 %v2881_v33 }
0x111a   :  { %v2884_v2 = vmul.f32 %v6398_v29, %v2883_v51 }
0x111c   :  { %v2885_v22 = vmul.f32 0.5, %v2884_v2  ;;  %v2968_v41 = vpop.permute.xlu2 %2967 }
0x111e   :  { %v2886_v35 = vsub.f32 1.5, %v2885_v22 }
0x111f   :  { %v6400_v36 = vpop.eup %6399  ;;  %v6180_v40 = vpop.permute.xlu0 %6179 }
0x1120   :  { %v2887_v4 = vmul.f32 %v6398_v29, %v2886_v35  ;;  %v2893_v45 = vmul.f32 %v6400_v36, %v2881_v33  ;;  %v6181_v56 = vunpack.i.l.bf16 %v6180_v40  ;;  %v6182_v58 = vunpack.i.h.bf16 %v6180_v40 }
0x1121   :  { %vm2899_vm7 = vweird.f32 %v6400_v36 }
0x1122   :  { %v2891_v30 = vsel %vm2890_vm4, %v6398_v29, %v2887_v4  ;;  %v2894_v63 = vmul.f32 %v6400_v36, %v2893_v45  ;;  %2988 = vmatpush.msra.mxu1 %v6181_v56  ;;  %vm2900_vm9 = vmor %vm2898_vm8, %vm2899_vm7 }
0x1123   :  { %v2902_v15 = vmul.f32 %v2891_v30, %v7514_v49 }
0x1124   :  { %v2895_v32 = vmul.f32 0.5, %v2894_v63  ;;  %2989 = vmatpush.msra.mxu1 %v6182_v58 }
0x1125   :  { %v2905_v21 = vmul.f32 %v6260_v43, %v2902_v15 }
0x1126   :  { %v2896_v38 = vsub.f32 1.5, %v2895_v32  ;;  %2990 = vmatpush.msra.mxu1 %v6186_v12 }
0x1127   :  { %v7551_v49 = vadd.f32 %v6261_v59, %v2905_v21 }
0x1128   :  { %v2897_v1 = vmul.f32 %v6400_v36, %v2896_v38  ;;  %2991 = vmatpush.msra.mxu1 %v6187_v55 }
0x1129   :  { %5988 = vmatmul.msk.f32.vlgmr.msra.gmra.mxu0 %vm30_vm0, %v7551_v49  ;;  %5990 = vmatmul.msk.f32.vlgmr.msra.gmra.mxu1 %vm30_vm0, %v7554_v3 }
0x112a   :  { %v2901_v44 = vsel %vm2900_vm9, %v6400_v36, %v2897_v1 }
0x112b   :  { %v2903_v6 = vmul.f32 %v2901_v44, %v7520_v5 }
0x112d   :  { %v2906_v7 = vmul.f32 %v6260_v43, %v2903_v6 }
0x112f   :  { %v7561_v39 = vadd.f32 %v6261_v59, %v2906_v7 }
0x1131   :  { %5989 = vmatmul.msk.f32.gmra.mxu0 %vm30_vm0, %v7561_v39  ;;  %5991 = vmatmul.msk.f32.gmra.mxu1 %vm30_vm0, %v7563_v62 }
0x11a6   :  { %v2944_v48 = vpop.f32.mrf.mxu0  ;;  %v2993_v53 = vpop.f32.mrf.mxu1 }
0x11a7   :  { %v2945_v9 = vadd.f32 %v7532_v24, %v2944_v48  ;;  %v7570_v11 = vadd.f32 %v2993_v53, %v2968_v41 }
0x11a9   :  { %3001 = vrot.lane.b32.xlu1 %v2945_v9, %s6547_s29  ;;  %3023 = vrot.lane.b32.xlu2 %v7570_v11, %s6545_s27 }
0x11aa   :  { %3015 = vrot.lane.b32.xlu0 %v7570_v11, %s6547_s29  ;;  %5992 = vmatpush.xpose.msk.msra.mxu2 %vm116_vm1, %v7570_v11 }
0x11ad   :  { %5993 = vmatmul.msk.f32.vlgmr.msra.gmra.mxu2 %vm116_vm1, %v2945_v9 }
0x11ae   :  { %v2947_v5 = vpop.f32.mrf.mxu0  ;;  %v2996_v25 = vpop.f32.mrf.mxu1 }
0x11af   :  { %v2948_v23 = vadd.f32 %v7532_v24, %v2947_v5  ;;  %v7581_v26 = vadd.f32 %v2996_v25, %v2968_v41 }
0x11b1   :  { %3003 = vrot.lane.b32.xlu1 %v2948_v23, %s6547_s29  ;;  %5994 = vmatpush.xpose.msk.msra.mxu3 %vm116_vm1, %v7581_v26 }
0x11b2   :  { %3025 = vrot.lane.b32.xlu2 %v7581_v26, %s6545_s27  ;;  %3017 = vrot.lane.b32.xlu0 %v7581_v26, %s6547_s29 }
0x11b4   :  { %5995 = vmatmul.msk.f32.vlgmr.msra.gmra.mxu3 %vm116_vm1, %v2948_v23 }
0x11b9   :  { %3019 = vrot.lane.b32.xlu1 %v7570_v11, %s6546_s28 }
0x11ba   :  { %3005 = vrot.lane.b32.xlu2 %v2945_v9, %s6546_s28  ;;  %3009 = vrot.lane.b32.xlu0 %v2945_v9, %s6545_s27 }
0x11c1   :  { %3021 = vrot.lane.b32.xlu1 %v7581_v26, %s6546_s28 }
0x11c2   :  { %3011 = vrot.lane.b32.xlu0 %v2948_v23, %s6545_s27 }
0x11ca   :  { %3007 = vrot.lane.b32.xlu0 %v2948_v23, %s6546_s28 }
0x1203   :  { %v3024_v50 = vpop.permute.xlu2 %3023 }
0x120c   :  { %v3026_v17 = vpop.permute.xlu2 %3025 }
0x1214   :  { %v3006_v19 = vpop.permute.xlu2 %3005 }
0x121b   :  { %v3002_v54 = vpop.permute.xlu1 %3001 }
0x121c   :  { %v3016_v10 = vpop.permute.xlu0 %3015 }
0x121d   :  { %5996 = vmatpush.xpose.msk.msrb.mxu2 %vm116_vm1, %v3016_v10  ;;  %v6188_v58 = vpack.i.bf16 %v7570_v11, %v3016_v10 }
0x1220   :  { %5997 = vmatmul.msk.f32.vlgmr.msrb.gmra.mxu2 %vm116_vm1, %v3002_v54 }
0x1221   :  { %6004 = vmatpush.xpose.msk.msra.mxu2 %vm116_vm1, %v3024_v50 }
0x1223   :  { %v3004_v37 = vpop.permute.xlu1 %3003 }
0x1224   :  { %v3018_v13 = vpop.permute.xlu0 %3017 }
0x1225   :  { %v6193_v24 = vpack.i.bf16 %v3024_v50, %v3018_v13  ;;  %5998 = vmatpush.xpose.msk.msrb.mxu3 %vm116_vm1, %v3018_v13 }
0x1228   :  { %5999 = vmatmul.msk.f32.vlgmr.msrb.gmra.mxu3 %vm116_vm1, %v3004_v37 }
0x1229   :  { %6006 = vmatpush.xpose.msk.msra.mxu3 %vm116_vm1, %v3026_v17 }
0x122b   :  { %v7605_v8 = vpop.permute.xlu1 %3019 }
0x122c   :  { %6000 = vmatpush.xpose.msk.msrb.mxu0 %vm116_vm1, %v7605_v8  ;;  %v3010_v14 = vpop.permute.xlu0 %3009 }
0x122d   :  { %6005 = vmatmul.msk.f32.vlgmr.msra.gmra.mxu2 %vm116_vm1, %v3010_v14 }
0x122f   :  { %6001 = vmatmul.msk.f32.vlgmr.msrb.gmra.mxu0 %vm116_vm1, %v3006_v19 }
0x1230   :  { %v3048_v18 = vpop.f32.mrf.mxu2 }
0x1231   :  { %v3219_v29 = vsel %vm116_vm1, %v3048_v18, -inf }
0x1232   :  { %3220 = vmax.xlane.f32.xlu1 %v3219_v29 }
0x1233   :  { %v7612_v33 = vpop.permute.xlu1 %3021 }
0x1234   :  { %6002 = vmatpush.xpose.msk.msrb.mxu1 %vm116_vm1, %v7612_v33  ;;  %v3012_v51 = vpop.permute.xlu0 %3011 }
0x1235   :  { %6007 = vmatmul.msk.f32.vlgmr.msra.gmra.mxu3 %vm116_vm1, %v3012_v51 }
0x1237   :  { %v3072_v57 = vpop.f32.mrf.mxu3 }
0x1238   :  { %v3222_v28 = vsel %vm116_vm1, %v3072_v57, -inf }
0x123a   :  { %3223 = vmax.xlane.f32.xlu1 %v3222_v28 }
0x123c   :  { %v3008_v2 = vpop.permute.xlu0 %3007 }
0x123d   :  { %6003 = vmatmul.msk.f32.vlgmr.msrb.gmra.mxu1 %vm116_vm1, %v3008_v2 }
0x12a3   :  { %v3096_v22 = vpop.f32.mrf.mxu2 }
0x12a4   :  { %v3225_v31 = vsel %vm116_vm1, %v3096_v22, -inf }
0x12a5   :  { %3226 = vmax.xlane.f32.xlu2 %v3225_v31  ;;  %v3221_v34 = vpop.xlane.xlu1 %3220 }
0x12a6   :  { %v3243_v35 = vsub.f32 %v3048_v18, %v3221_v34 }
0x12a8   :  { %v3251_v40 = vmul.f32 1.442695, %v3243_v35 }
0x12aa   :  { %6401 = vpow2.f32 %v3251_v40 }
0x12ab   :  { %v3120_v4 = vpop.f32.mrf.mxu3 }
0x12ac   :  { %v3144_v36 = vpop.f32.mrf.mxu0  ;;  %v3228_v47 = vsel %vm116_vm1, %v3120_v4, -inf }
0x12ad   :  { %v3231_v42 = vsel %vm116_vm1, %v3144_v36, -inf  ;;  %v3224_v12 = vpop.xlane.xlu1 %3223 }
0x12ae   :  { %3232 = vmax.xlane.f32.xlu0 %v3231_v42  ;;  %v3244_v59 = vsub.f32 %v3072_v57, %v3224_v12 }
0x12b0   :  { %v3192_v52 = vpop.f32.mrf.mxu2  ;;  %v7623_v60 = vpop.eup %6401  ;;  %v3253_v46 = vmul.f32 1.442695, %v3244_v59 }
0x12b1   :  { %v3237_v45 = vsel %vm116_vm1, %v3192_v52, -inf  ;;  %v3267_v43 = vsel %vm116_vm1, %v7623_v60, 0.0 }
0x12b2   :  { %3238 = vmax.xlane.f32.xlu2 %v3237_v45  ;;  %6403 = vpow2.f32 %v3253_v46 }
0x12b6   :  { %3229 = vmax.xlane.f32.xlu0 %v3228_v47 }
0x12b8   :  { %v3216_v63 = vpop.f32.mrf.mxu3  ;;  %v7632_v32 = vpop.eup %6403 }
0x12b9   :  { %v3240_v15 = vsel %vm116_vm1, %v3216_v63, -inf  ;;  %v3270_v16 = vsel %vm116_vm1, %v7632_v32, 0.0 }
0x12ba   :  { %v3168_v56 = vpop.f32.mrf.mxu1  ;;  %3268 = vadd.xlane.f32.xlu2 %v3267_v43 }
0x12bb   :  { %v3234_v30 = vsel %vm116_vm1, %v3168_v56, -inf }
0x12bc   :  { %3235 = vmax.xlane.f32.xlu1 %v3234_v30 }
0x12c2   :  { %3241 = vmax.xlane.f32.xlu2 %v3240_v15 }
0x12ca   :  { %6194 = vrot.lane.b32.xlu0 %v6193_v24, %s6548_s30 }
0x12da   :  { %6189 = vrot.lane.b32.xlu2 %v6188_v58, %s6548_s30 }
0x1303   :  { %3271 = vadd.xlane.f32.xlu2 %v3270_v16 }
0x1318   :  { %v3227_v61 = vpop.xlane.xlu2 %3226 }
0x1319   :  { %v3245_v21 = vsub.f32 %v3096_v22, %v3227_v61 }
0x131b   :  { %v3255_v38 = vmul.f32 1.442695, %v3245_v21  ;;  %3601 = vrot.lane.b32.xlu2 %v3026_v17, %s6548_s30 }
0x131d   :  { %6405 = vpow2.f32 %v3255_v38 }
0x1321   :  { %v3233_v55 = vpop.xlane.xlu0 %3232 }
0x1322   :  { %v3247_v0 = vsub.f32 %v3144_v36, %v3233_v55 }
0x1323   :  { %v7637_v1 = vpop.eup %6405 }
0x1324   :  { %v3259_v44 = vmul.f32 1.442695, %v3247_v0  ;;  %v3273_v6 = vsel %vm116_vm1, %v7637_v1, 0.0 }
0x1325   :  { %3274 = vadd.xlane.f32.xlu0 %v3273_v6  ;;  %v3239_v27 = vpop.xlane.xlu2 %3238 }
0x1326   :  { %6407 = vpow2.f32 %v3259_v44  ;;  %v3249_v7 = vsub.f32 %v3192_v52, %v3239_v27 }
0x1328   :  { %v3263_v41 = vmul.f32 1.442695, %v3249_v7 }
0x1329   :  { %v3230_v11 = vpop.xlane.xlu0 %3229 }
0x132a   :  { %6409 = vpow2.f32 %v3263_v41  ;;  %v3246_v50 = vsub.f32 %v3120_v4, %v3230_v11 }
0x132c   :  { %v7641_v48 = vpop.eup %6407  ;;  %v3257_v17 = vmul.f32 1.442695, %v3246_v50 }
0x132d   :  { %v3279_v9 = vsel %vm116_vm1, %v7641_v48, 0.0  ;;  %v3269_v53 = vpop.xlane.xlu2 %3268 }
0x132e   :  { %3280 = vadd.xlane.f32.xlu1 %v3279_v9  ;;  %6411 = vrcp.f32 %v3269_v53  ;;  %v3302_v18 = vand.u32 2147483648, %v3269_v53  ;;  %v3300_v57 = vand.u32 2147483647, %v3269_v53  ;;  %vm3296_vm11 = vweird.f32 %v3269_v53 }
0x132f   :  { %v3236_v5 = vpop.xlane.xlu1 %3235 }
0x1330   :  { %v7645_v23 = vpop.eup %6409  ;;  %v3248_v25 = vsub.f32 %v3168_v56, %v3236_v5  ;;  %v3303_v34 = vor.u32 1.1754944e-38, %v3302_v18  ;;  %vm3301_vm14 = vcmp.eq.f32.partialorder %v3300_v57, 8.507059e+37 }
0x1331   :  { %v3285_v54 = vsel %vm116_vm1, %v7645_v23, 0.0 }
0x1332   :  { %v3261_v10 = vmul.f32 1.442695, %v3248_v25  ;;  %3286 = vadd.xlane.f32.xlu0 %v3285_v54 }
0x1334   :  { %v6412_v37 = vpop.eup %6411  ;;  %6413 = vpow2.f32 %v3261_v10 }
0x1335   :  { %v3292_v13 = vmul.f32 %v6412_v37, %v3269_v53  ;;  %v3242_v24 = vpop.xlane.xlu2 %3241  ;;  %6415 = vpow2.f32 %v3257_v17  ;;  %vm3297_vm10 = vweird.f32 %v6412_v37 }
0x1336   :  { %v3250_v14 = vsub.f32 %v3216_v63, %v3242_v24  ;;  %vm3298_vm12 = vmor %vm3296_vm11, %vm3297_vm10 }
0x1337   :  { %v3293_v19 = vsub.f32 1.0, %v3292_v13 }
0x1338   :  { %v3265_v29 = vmul.f32 1.442695, %v3250_v14 }
0x1339   :  { %v3294_v51 = vmul.f32 %v6412_v37, %v3293_v19 }
0x133a   :  { %v7649_v28 = vpop.eup %6413  ;;  %6417 = vpow2.f32 %v3265_v29 }
0x133b   :  { %v3295_v2 = vadd.f32 %v6412_v37, %v3294_v51  ;;  %v3282_v22 = vsel %vm116_vm1, %v7649_v28, 0.0  ;;  %v7653_v47 = vpop.eup %6415 }
0x133c   :  { %v6195_v31 = vpop.permute.xlu0 %6194  ;;  %3283 = vadd.xlane.f32.xlu1 %v3282_v22  ;;  %v3276_v63 = vsel %vm116_vm1, %v7653_v47, 0.0 }
0x133d   :  { %v6196_v35 = vunpack.i.l.bf16 %v6195_v31  ;;  %v3299_v36 = vsel %vm3298_vm12, %v6412_v37, %v3295_v2  ;;  %v6197_v40 = vunpack.i.h.bf16 %v6195_v31  ;;  %v6190_v42 = vpop.permute.xlu2 %6189 }
0x133e   :  { %v3304_v52 = vsel %vm3301_vm14, %v3303_v34, %v3299_v36  ;;  %v6192_v4 = vunpack.i.h.bf16 %v6190_v42  ;;  %v6191_v45 = vunpack.i.l.bf16 %v6190_v42 }
0x133f   :  { %3518 = vmatpush.msrb.mxu3 %v6196_v35  ;;  %v3305_v43 = vmul.f32 %v7623_v60, %v3304_v52  ;;  %v6198_v60 = vpack.i.bf16 %v7605_v8, %v7581_v26 }
0x1340   :  { %v7656_v56 = vpop.eup %6417  ;;  %3440 = vmatpush.msra.mxu0 %v6192_v4  ;;  %3492 = vmatpush.msrb.mxu2 %v6191_v45 }
0x1341   :  { %3411 = vst.msk [vmem:[%s8396_s7] sm:$0xff] %vm116_vm1, %v3305_v43  ;;  %6008 = vmatmul.msk.f32.vlgmr.msra.gmra.mxu0 %vm116_vm1, %v3305_v43  ;;  %v3288_v30 = vsel %vm116_vm1, %v7656_v56, 0.0 }
0x1342   :  { %3596 = vmatpush.msra.mxu2 %v6197_v40  ;;  %3289 = vadd.xlane.f32.xlu0 %v3288_v30 }
0x1344   :  { %3277 = vadd.xlane.f32.xlu1 %v3276_v63 }
0x1356   :  { %3549 = vrot.lane.b32.xlu0 %v7612_v33, %s6548_s30 }
0x135d   :  { %6199 = vrot.lane.b32.xlu1 %v6198_v60, %s6548_s30 }
0x1376   :  { %v3272_v15 = vpop.xlane.xlu2 %3271 }
0x1377   :  { %6419 = vrcp.f32 %v3272_v15  ;;  %v3317_v16 = vand.u32 2147483648, %v3272_v15  ;;  %v3315_v21 = vand.u32 2147483647, %v3272_v15  ;;  %vm3311_vm2 = vweird.f32 %v3272_v15 }
0x1379   :  { %v3318_v33 = vor.u32 1.1754944e-38, %v3317_v16  ;;  %vm3316_vm4 = vcmp.eq.f32.partialorder %v3315_v21, 8.507059e+37 }
0x137d   :  { %v6420_v58 = vpop.eup %6419 }
0x137e   :  { %v3307_v12 = vmul.f32 %v6420_v58, %v3272_v15  ;;  %v3602_v59 = vpop.permute.xlu2 %3601  ;;  %vm3312_vm15 = vweird.f32 %v6420_v58 }
0x137f   :  { %3622 = vmatpush.msra.mxu3 %v3602_v59  ;;  %vm3313_vm3 = vmor %vm3311_vm2, %vm3312_vm15 }
0x1380   :  { %v3308_v46 = vsub.f32 1.0, %v3307_v12 }
0x1382   :  { %v3309_v61 = vmul.f32 %v6420_v58, %v3308_v46 }
0x1384   :  { %v3310_v38 = vadd.f32 %v6420_v58, %v3309_v61 }
0x1386   :  { %v3314_v55 = vsel %vm3313_vm3, %v6420_v58, %v3310_v38 }
0x1387   :  { %v3319_v26 = vsel %vm3316_vm4, %v3318_v33, %v3314_v55 }
0x1388   :  { %v7673_v8 = vmul.f32 %v7632_v32, %v3319_v26 }
0x138a   :  { %3412 = vst.msk [vmem:[%s8396_s7 + $0x8] sm:$0xff] %vm116_vm1, %v7673_v8 }
0x1398   :  { %v3275_v0 = vpop.xlane.xlu0 %3274 }
0x1399   :  { %6421 = vrcp.f32 %v3275_v0  ;;  %v3332_v41 = vand.u32 2147483648, %v3275_v0  ;;  %v3330_v53 = vand.u32 2147483647, %v3275_v0  ;;  %vm3326_vm6 = vweird.f32 %v3275_v0 }
0x139b   :  { %v3333_v5 = vor.u32 1.1754944e-38, %v3332_v41  ;;  %vm3331_vm8 = vcmp.eq.f32.partialorder %v3330_v53, 8.507059e+37 }
0x139f   :  { %v6422_v44 = vpop.eup %6421 }
0x13a0   :  { %v3322_v6 = vmul.f32 %v6422_v44, %v3275_v0  ;;  %vm3327_vm5 = vweird.f32 %v6422_v44 }
0x13a1   :  { %v3281_v27 = vpop.xlane.xlu1 %3280  ;;  %vm3328_vm7 = vmor %vm3326_vm6, %vm3327_vm5 }
0x13a2   :  { %v3323_v7 = vsub.f32 1.0, %v3322_v6  ;;  %6423 = vrcp.f32 %v3281_v27  ;;  %v3362_v13 = vand.u32 2147483648, %v3281_v27  ;;  %v3360_v19 = vand.u32 2147483647, %v3281_v27 }
0x13a3   :  { %vm3356_vm10 = vweird.f32 %v3281_v27 }
0x13a4   :  { %v3324_v9 = vmul.f32 %v6422_v44, %v3323_v7  ;;  %v3363_v51 = vor.u32 1.1754944e-38, %v3362_v13  ;;  %vm3361_vm12 = vcmp.eq.f32.partialorder %v3360_v19, 8.507059e+37  ;;  %v2916_v19 = vld [vmem:[%s8391_s2 + $0x197] sm:$0xff] }
0x13a5   :  { %v3287_v32 = vpop.xlane.xlu0 %3286 }
0x13a6   :  { %v3325_v11 = vadd.f32 %v6422_v44, %v3324_v9  ;;  %6425 = vrcp.f32 %v3287_v32  ;;  %v3392_v22 = vand.u32 2147483648, %v3287_v32  ;;  %v3390_v35 = vand.u32 2147483647, %v3287_v32 }
0x13a7   :  { %vm3386_vm15 = vweird.f32 %v3287_v32 }
0x13a8   :  { %v6424_v25 = vpop.eup %6423  ;;  %v3329_v50 = vsel %vm3328_vm7, %v6422_v44, %v3325_v11  ;;  %v3393_v42 = vor.u32 1.1754944e-38, %v3392_v22  ;;  %vm3391_vm3 = vcmp.eq.f32.partialorder %v3390_v35, 8.507059e+37 }
0x13a9   :  { %v3334_v54 = vsel %vm3331_vm8, %v3333_v5, %v3329_v50  ;;  %v3352_v10 = vmul.f32 %v6424_v25, %v3281_v27  ;;  %vm3357_vm9 = vweird.f32 %v6424_v25 }
0x13aa   :  { %v3335_v37 = vmul.f32 %v7637_v1, %v3334_v54  ;;  %vm3358_vm11 = vmor %vm3356_vm10, %vm3357_vm9 }
0x13ab   :  { %v3353_v17 = vsub.f32 1.0, %v3352_v10 }
0x13ac   :  { %3413 = vst.msk [vmem:[%s8396_s7 + $0x10] sm:$0xff] %vm116_vm1, %v3335_v37  ;;  %6010 = vmatmul.msk.f32.vlgmr.msrb.gmra.mxu2 %vm116_vm1, %v3335_v37  ;;  %v6426_v24 = vpop.eup %6425 }
0x13ad   :  { %v3354_v14 = vmul.f32 %v6424_v25, %v3353_v17  ;;  %v3382_v18 = vmul.f32 %v6426_v24, %v3287_v32  ;;  %vm3387_vm14 = vweird.f32 %v6426_v24 }
0x13ae   :  { %vm3388_vm2 = vmor %vm3386_vm15, %vm3387_vm14 }
0x13af   :  { %v3355_v29 = vadd.f32 %v6424_v25, %v3354_v14  ;;  %v3383_v57 = vsub.f32 1.0, %v3382_v18  ;;  %v3284_v1 = vpop.xlane.xlu1 %3283 }
0x13b0   :  { %6427 = vrcp.f32 %v3284_v1  ;;  %v3377_v15 = vand.u32 2147483648, %v3284_v1  ;;  %v3375_v12 = vand.u32 2147483647, %v3284_v1  ;;  %vm3371_vm5 = vweird.f32 %v3284_v1 }
0x13b1   :  { %v3359_v2 = vsel %vm3358_vm11, %v6424_v25, %v3355_v29  ;;  %v3384_v34 = vmul.f32 %v6426_v24, %v3383_v57  ;;  %v2917_v29 = vld [vmem:[%s8391_s2 + $0x19f] sm:$0xff] }
0x13b2   :  { %v3364_v31 = vsel %vm3361_vm12, %v3363_v51, %v3359_v2  ;;  %v3378_v61 = vor.u32 1.1754944e-38, %v3377_v15  ;;  %vm3376_vm7 = vcmp.eq.f32.partialorder %v3375_v12, 8.507059e+37  ;;  %3706 = vmatpush.msrb.mxu2 %v2917_v29  ;;  %v6265_v29 = vld [vmem:[%s8391_s2 + $0x1b0] ss:$0 sm:$0xff] }
0x13b3   :  { %v7687_v36 = vmul.f32 %v7641_v48, %v3364_v31  ;;  %v3385_v40 = vadd.f32 %v6426_v24, %v3384_v34 }
0x13b5   :  { %3415 = vst.msk [vmem:[%s8396_s7 + $0x20] sm:$0xff] %vm116_vm1, %v7687_v36  ;;  %v3389_v52 = vsel %vm3388_vm2, %v6426_v24, %v3385_v40  ;;  %v3290_v4 = vpop.xlane.xlu0 %3289  ;;  %v2915_v24 = vld [vmem:[%s8391_s2 + $0x18f] sm:$0xff] }
0x13b6   :  { %v6428_v45 = vpop.eup %6427  ;;  %v3394_v43 = vsel %vm3391_vm3, %v3393_v42, %v3389_v52  ;;  %6429 = vrcp.f32 %v3290_v4  ;;  %v3405_v26 = vand.u32 2147483647, %v3290_v4  ;;  %v3407_v0 = vand.u32 2147483648, %v3290_v4  ;;  %v6264_v52 = vld [vmem:[%s8391_s2 + $0x1af] ss:$0 sm:$0xff] }
0x13b7   :  { %v3395_v30 = vmul.f32 %v7645_v23, %v3394_v43  ;;  %v3367_v48 = vmul.f32 %v6428_v45, %v3284_v1  ;;  %v3278_v63 = vpop.xlane.xlu1 %3277  ;;  %vm3372_vm4 = vweird.f32 %v6428_v45  ;;  %vm3401_vm9 = vweird.f32 %v3290_v4 }
0x13b8   :  { %6431 = vrcp.f32 %v3278_v63  ;;  %vm3373_vm6 = vmor %vm3371_vm5, %vm3372_vm4  ;;  %v3347_v7 = vand.u32 2147483648, %v3278_v63  ;;  %v3345_v53 = vand.u32 2147483647, %v3278_v63  ;;  %v3408_v11 = vor.u32 1.1754944e-38, %v3407_v0 }
0x13b9   :  { %3417 = vst.msk [vmem:[%s8396_s7 + $0x30] sm:$0xff] %vm116_vm1, %v3395_v30  ;;  %v3368_v60 = vsub.f32 1.0, %v3367_v48  ;;  %6014 = vmatmul.msk.f32.vlgmr.msra.gmra.mxu2 %vm116_vm1, %v3395_v30  ;;  %vm3406_vm12 = vcmp.eq.f32.partialorder %v3405_v26, 8.507059e+37  ;;  %vm3341_vm14 = vweird.f32 %v3278_v63 }
0x13ba   :  { %v3348_v25 = vor.u32 1.1754944e-38, %v3347_v7  ;;  %vm3346_vm2 = vcmp.eq.f32.partialorder %v3345_v53, 8.507059e+37  ;;  %v3806_v7 = vld [vmem:[%s8390_s1 + $0x52] sm:$0xff] }
0x13bb   :  { %v3369_v58 = vmul.f32 %v6428_v45, %v3368_v60 }
0x13bc   :  { %v6430_v59 = vpop.eup %6429 }
0x13bd   :  { %v3370_v46 = vadd.f32 %v6428_v45, %v3369_v58  ;;  %v3397_v16 = vmul.f32 %v6430_v59, %v3290_v4  ;;  %vm3402_vm8 = vweird.f32 %v6430_v59 }
0x13be   :  { %v6432_v23 = vpop.eup %6431  ;;  %vm3403_vm11 = vmor %vm3401_vm9, %vm3402_vm8 }
0x13bf   :  { %v3374_v21 = vsel %vm3373_vm6, %v6428_v45, %v3370_v46  ;;  %v3398_v38 = vsub.f32 1.0, %v3397_v16  ;;  %v3337_v33 = vmul.f32 %v6432_v23, %v3278_v63  ;;  %vm3342_vm10 = vweird.f32 %v6432_v23 }
0x13c0   :  { %v3379_v55 = vsel %vm3376_vm7, %v3378_v61, %v3374_v21  ;;  %vm3343_vm15 = vmor %vm3341_vm14, %vm3342_vm10 }
0x13c1   :  { %v3380_v44 = vmul.f32 %v7649_v28, %v3379_v55  ;;  %v3399_v6 = vmul.f32 %v6430_v59, %v3398_v38  ;;  %v3338_v27 = vsub.f32 1.0, %v3337_v33 }
0x13c3   :  { %3416 = vst.msk [vmem:[%s8396_s7 + $0x28] sm:$0xff] %vm116_vm1, %v3380_v44  ;;  %v3400_v41 = vadd.f32 %v6430_v59, %v3399_v6  ;;  %v3339_v9 = vmul.f32 %v6432_v23, %v3338_v27 }
0x13c5   :  { %v3404_v32 = vsel %vm3403_vm11, %v6430_v59, %v3400_v41  ;;  %v3340_v5 = vadd.f32 %v6432_v23, %v3339_v9  ;;  %v3805_v41 = vld [vmem:[%s8390_s1 + $0x4a] sm:$0xff]  ;;  %v3804_v9 = vld [vmem:[%s8390_s1 + $0x42] sm:$0xff] }
0x13c6   :  { %v3409_v28 = vsel %vm3406_vm12, %v3408_v11, %v3404_v32 }
0x13c7   :  { %v3410_v50 = vmul.f32 %v7656_v56, %v3409_v28  ;;  %v3344_v54 = vsel %vm3343_vm15, %v6432_v23, %v3340_v5  ;;  %v3848_v5 = vld [vmem:[%s8391_s2 + $0x1ea] sm:$0xff]  ;;  %v3847_v28 = vld [vmem:[%s8391_s2 + $0x1e2] sm:$0xff] }
0x13c8   :  { %v3349_v10 = vsel %vm3346_vm2, %v3348_v25, %v3344_v54  ;;  %v3550_v14 = vpop.permute.xlu0 %3549  ;;  %v3846_v25 = vld [vmem:[%s8391_s2 + $0x1da] sm:$0xff] }
0x13c9   :  { %3418 = vst.msk [vmem:[%s8396_s7 + $0x38] sm:$0xff] %vm116_vm1, %v3410_v50  ;;  %v3350_v37 = vmul.f32 %v7653_v47, %v3349_v10  ;;  %v3442_v47 = vpop.f32.mrf.mxu0  ;;  %v3845_v10 = vld [vmem:[%s8391_s2 + $0x1d2] sm:$0xff] }
0x13cb   :  { %3414 = vst.msk [vmem:[%s8396_s7 + $0x18] sm:$0xff] %vm116_vm1, %v3350_v37  ;;  %6011 = vmatmul.msk.f32.vlgmr.msrb.gmra.mxu3 %vm116_vm1, %v3350_v37 }
0x13cf   :  { %v6200_v17 = vpop.permute.xlu1 %6199 }
0x13d0   :  { %v6202_v13 = vunpack.i.h.bf16 %v6200_v17  ;;  %v6201_v56 = vunpack.i.l.bf16 %v6200_v17 }
0x13d2   :  { %3466 = vmatpush.msra.mxu1 %v6201_v56  ;;  %3544 = vmatpush.msrb.mxu0 %v6202_v13  ;;  %v3844_v13 = vld [vmem:[%s8391_s2 + $0x1ca] sm:$0xff] }
0x13d3   :  { %6009 = vmatmul.msk.f32.vlgmr.msra.gmra.mxu1 %vm116_vm1, %v7673_v8  ;;  %6012 = vmatmul.msk.f32.vlgmr.msrb.gmra.mxu0 %vm116_vm1, %v7687_v36  ;;  %v2918_v8 = vld [vmem:[%s8391_s2 + $0x1a7] sm:$0xff] }
0x13d4   :  { %3570 = vmatpush.msrb.mxu1 %v3550_v14  ;;  %6015 = vmatmul.msk.f32.vlgmr.msra.gmra.mxu3 %vm116_vm1, %v3410_v50 }
0x13d5   :  { %3648 = vmatpush.msra.mxu0 %v2916_v19  ;;  %3737 = vmatpush.msrb.mxu3 %v2918_v8 }
0x13d6   :  { %3677 = vmatpush.msra.mxu1 %v2915_v24 }
0x13db   :  { %6013 = vmatmul.msk.f32.vlgmr.msrb.gmra.mxu1 %vm116_vm1, %v3380_v44 }
0x13dc   :  { %3865 = vmatpush.msrb.mxu1 %v3848_v5  ;;  %v3935_v5 = vld [vmem:[%s8389_s0 + $0x8c] sm:$0xff] }
0x13de   :  { %3866 = vmatpush.msrb.mxu1 %v3847_v28  ;;  %v3934_v28 = vld [vmem:[%s8389_s0 + $0x84] sm:$0xff] }
0x13e0   :  { %3867 = vmatpush.msrb.mxu1 %v3846_v25 }
0x13e2   :  { %3868 = vmatpush.msrb.mxu1 %v3845_v10 }
0x13e3   :  { %6018 = vmatmul.msk.f32.vlgmr.msra.gmra.mxu1 %vm116_vm1, %v3442_v47 }
0x13e4   :  { %3869 = vmatpush.msrb.mxu1 %v3844_v13 }
0x142f   :  { %v3494_v18 = vpop.f32.mrf.mxu2 }
0x1430   :  { %6016 = vmatmul.msk.f32.vlgmr.msra.gmra.mxu0 %vm116_vm1, %v3494_v18 }
0x143c   :  { %v3598_v51 = vpop.f32.mrf.mxu2 }
0x143d   :  { %6022 = vmatmul.msk.f32.vlgmr.msrb.gmra.mxu3 %vm116_vm1, %v3598_v51 }
0x144e   :  { %v3520_v57 = vpop.f32.mrf.mxu3 }
0x144f   :  { %6017 = vmatmul.msk.f32.gmra.mxu0 %vm116_vm1, %v3520_v57 }
0x1450   :  { %v3468_v1 = vpop.f32.mrf.mxu1  ;;  %v3546_v2 = vpop.f32.mrf.mxu0 }
0x1451   :  { %6019 = vmatmul.msk.f32.gmra.mxu1 %vm116_vm1, %v3468_v1  ;;  %6020 = vmatmul.msk.f32.vlgmr.msrb.gmra.mxu2 %vm116_vm1, %v3546_v2  ;;  %v6266_v1 = vld [vmem:[%s8391_s2 + $0x1b1] ss:$0 sm:$0xff] }
0x1457   :  { %v3624_v22 = vpop.f32.mrf.mxu3 }
0x1458   :  { %6023 = vmatmul.msk.f32.gmra.mxu3 %vm116_vm1, %v3624_v22  ;;  %v3572_v31 = vpop.f32.mrf.mxu1 }
0x1459   :  { %6021 = vmatmul.msk.f32.gmra.mxu2 %vm116_vm1, %v3572_v31 }
0x1460   :  { %v3679_v34 = vpop.f32.mrf.mxu1 }
0x14ad   :  { %v3650_v35 = vpop.f32.mrf.mxu0 }
0x14ae   :  { %v3680_v36 = vadd.f32 %v3679_v34, %v3650_v35 }
0x14c0   :  { %v3739_v4 = vpop.f32.mrf.mxu3 }
0x14cc   :  { %v3653_v48 = vpop.f32.mrf.mxu0 }
0x14ce   :  { %v3682_v43 = vpop.f32.mrf.mxu1 }
0x14cf   :  { %v3683_v63 = vadd.f32 %v3682_v43, %v3653_v48  ;;  %v3842_v43 = vld [vmem:[%s8391_s2 + $0x1ba] sm:$0xff]  ;;  %v6267_v48 = vld [vmem:[%s8390_s1 + $0x62] ss:$0 sm:$0xff] }
0x14d4   :  { %v3708_v40 = vpop.f32.mrf.mxu2 }
0x14d5   :  { %v3714_v42 = vadd.f32 %v3708_v40, %v3680_v36 }
0x14d7   :  { %v3745_v45 = vadd.f32 %v3739_v4, %v3714_v42 }
0x14d9   :  { %v3748_v30 = vadd.f32 %v6264_v52, %v3745_v45  ;;  %v3843_v45 = vld [vmem:[%s8391_s2 + $0x1c2] sm:$0xff] }
0x14da   :  { %3870 = vmatpush.msrb.mxu1 %v3843_v45  ;;  %v6271_v45 = vld [vmem:[%s8389_s0 + $0xa4] ss:$0 sm:$0xff] }
0x14db   :  { %v3750_v60 = vadd.f32 %v3748_v30, %v7551_v49  ;;  %v3742_v59 = vpop.f32.mrf.mxu3  ;;  %v3841_v30 = vld [vmem:[%s8391_s2 + $0x1b2] sm:$0xff] }
0x14dc   :  { %v3711_v15 = vpop.f32.mrf.mxu2  ;;  %3871 = vmatpush.msrb.mxu1 %v3842_v43 }
0x14dd   :  { %v3715_v58 = vadd.f32 %v3711_v15, %v3683_v63  ;;  %v3754_v12 = vsel %vm30_vm0, %v3750_v60, 0.0 }
0x14de   :  { %3755 = vadd.xlane.f32.xlu2 %v3754_v12  ;;  %3872 = vmatpush.msrb.mxu1 %v3841_v30 }
0x14df   :  { %v3746_v46 = vadd.f32 %v3742_v59, %v3715_v58 }
0x14e1   :  { %v3749_v16 = vadd.f32 %v6264_v52, %v3746_v46  ;;  %v6268_v46 = vld [vmem:[%s8391_s2 + $0x1f2] ss:$0 sm:$0xff] }
0x14e3   :  { %v3751_v23 = vadd.f32 %v3749_v16, %v7561_v39  ;;  %v3807_v39 = vld [vmem:[%s8390_s1 + $0x5a] sm:$0xff] }
0x14e4   :  { %3828 = vmatpush.msrb.mxu0 %v3807_v39 }
0x14e5   :  { %v3757_v61 = vsel %vm30_vm0, %v3751_v23, 0.0 }
0x14e6   :  { %3758 = vadd.xlane.f32.xlu0 %v3757_v61  ;;  %3829 = vmatpush.msrb.mxu0 %v3806_v7 }
0x14e8   :  { %3830 = vmatpush.msrb.mxu0 %v3805_v41 }
0x14ea   :  { %3831 = vmatpush.msrb.mxu0 %v3804_v9 }
0x1551   :  { %v3756_v21 = vpop.xlane.xlu2 %3755 }
0x1552   :  { %v3760_v38 = vmul.f32 %v3756_v21, %v6843_v20 }
0x1554   :  { %v3762_v33 = vsub.f32 %v3750_v60, %v3760_v38 }
0x1556   :  { %v3764_v55 = vmul.f32 %v3762_v33, %v3762_v33 }
0x1558   :  { %v3766_v49 = vsel %vm30_vm0, %v3764_v55, 0.0 }
0x1559   :  { %3767 = vadd.xlane.f32.xlu1 %v3766_v49  ;;  %v3759_v26 = vpop.xlane.xlu0 %3758 }
0x155a   :  { %v3761_v0 = vmul.f32 %v3759_v26, %v6843_v20 }
0x155c   :  { %v3763_v44 = vsub.f32 %v3751_v23, %v3761_v0 }
0x155e   :  { %v3765_v6 = vmul.f32 %v3763_v44, %v3763_v44 }
0x1560   :  { %v3769_v27 = vsel %vm30_vm0, %v3765_v6, 0.0 }
0x1561   :  { %3770 = vadd.xlane.f32.xlu2 %v3769_v27 }
0x15cc   :  { %v3768_v53 = vpop.xlane.xlu1 %3767 }
0x15cd   :  { %v3772_v11 = vmul.f32 %v3768_v53, %v6843_v20 }
0x15cf   :  { %v3774_v32 = vadd.f32 1e-05, %v3772_v11  ;;  %v3937_v11 = vld [vmem:[%s8389_s0 + $0x9c] sm:$0xff] }
0x15d0   :  { %3963 = vmatpush.msra.mxu2 %v3937_v11 }
0x15d1   :  { %6433 = vrsqrt.f32 %v3774_v32  ;;  %vm3782_vm4 = vweird.f32 %v3774_v32 }
0x15d4   :  { %v3771_v50 = vpop.xlane.xlu2 %3770 }
0x15d5   :  { %v3773_v54 = vmul.f32 %v3771_v50, %v6843_v20 }
0x15d7   :  { %v6434_v37 = vpop.eup %6433  ;;  %v3775_v17 = vadd.f32 1e-05, %v3773_v54 }
0x15d8   :  { %v3777_v56 = vmul.f32 %v6434_v37, %v3774_v32  ;;  %vm3783_vm3 = vweird.f32 %v6434_v37  ;;  %v3936_v32 = vld [vmem:[%s8389_s0 + $0x94] sm:$0xff] }
0x15d9   :  { %6435 = vrsqrt.f32 %v3775_v17  ;;  %vm3784_vm5 = vmor %vm3782_vm4, %vm3783_vm3  ;;  %vm3792_vm7 = vweird.f32 %v3775_v17  ;;  %3964 = vmatpush.msra.mxu2 %v3936_v32 }
0x15da   :  { %v3778_v24 = vmul.f32 %v6434_v37, %v3777_v56 }
0x15db   :  { %3965 = vmatpush.msra.mxu2 %v3935_v5 }
0x15dc   :  { %v3779_v14 = vmul.f32 0.5, %v3778_v24 }
0x15dd   :  { %3966 = vmatpush.msra.mxu2 %v3934_v28 }
0x15de   :  { %v3780_v47 = vsub.f32 1.5, %v3779_v14 }
0x15df   :  { %v6436_v19 = vpop.eup %6435 }
0x15e0   :  { %v3781_v8 = vmul.f32 %v6434_v37, %v3780_v47  ;;  %v3787_v18 = vmul.f32 %v6436_v19, %v3775_v17  ;;  %vm3793_vm6 = vweird.f32 %v6436_v19 }
0x15e1   :  { %vm3794_vm8 = vmor %vm3792_vm7, %vm3793_vm6 }
0x15e2   :  { %v3785_v51 = vsel %vm3784_vm5, %v6434_v37, %v3781_v8  ;;  %v3788_v57 = vmul.f32 %v6436_v19, %v3787_v18 }
0x15e3   :  { %v3796_v2 = vmul.f32 %v3785_v51, %v3762_v33 }
0x15e4   :  { %v3789_v22 = vmul.f32 0.5, %v3788_v57 }
0x15e5   :  { %v3799_v31 = vmul.f32 %v6265_v29, %v3796_v2 }
0x15e6   :  { %v3790_v34 = vsub.f32 1.5, %v3789_v22 }
0x15e7   :  { %v3802_v35 = vadd.f32 %v6266_v1, %v3799_v31 }
0x15e8   :  { %v3791_v36 = vmul.f32 %v6436_v19, %v3790_v34 }
0x15e9   :  { %6024 = vmatmul.msk.f32.vlgmr.msrb.gmra.mxu0 %vm30_vm0, %v3802_v35 }
0x15ea   :  { %v3795_v40 = vsel %vm3794_vm8, %v6436_v19, %v3791_v36 }
0x15eb   :  { %v3797_v42 = vmul.f32 %v3795_v40, %v3763_v44 }
0x15ed   :  { %v3800_v52 = vmul.f32 %v6265_v29, %v3797_v42  ;;  %v6269_v29 = vld [vmem:[%s8391_s2 + $0x1f3] ss:$0 sm:$0xff] }
0x15ef   :  { %v3803_v4 = vadd.f32 %v6266_v1, %v3800_v52  ;;  %v6270_v1 = vld [vmem:[%s8391_s2 + $0x1f4] ss:$0 sm:$0xff] }
0x15f1   :  { %6025 = vmatmul.msk.f32.gmra.mxu0 %vm30_vm0, %v3803_v4 }
0x1666   :  { %v3833_v63 = vpop.f32.mrf.mxu0 }
0x1667   :  { %v3834_v60 = vadd.f32 %v6267_v48, %v3833_v63 }
0x1669   :  { %v3839_v15 = vmax.f32 %v3834_v60, 0.0 }
0x166b   :  { %6026 = vmatmul.msk.f32.vlgmr.msrb.gmra.mxu1 %vm962_vm13, %v3839_v15 }
0x166e   :  { %v3836_v58 = vpop.f32.mrf.mxu0 }
0x166f   :  { %v3837_v12 = vadd.f32 %v6267_v48, %v3836_v58 }
0x1671   :  { %v3840_v59 = vmax.f32 %v3837_v12, 0.0 }
0x1673   :  { %6027 = vmatmul.msk.f32.gmra.mxu1 %vm962_vm13, %v3840_v59 }
0x16e8   :  { %v3874_v16 = vpop.f32.mrf.mxu1 }
0x16e9   :  { %v3875_v23 = vadd.f32 %v6268_v46, %v3874_v16 }
0x16eb   :  { %v3880_v61 = vadd.f32 %v3875_v23, %v3802_v35 }
0x16ed   :  { %v3884_v21 = vsel %vm30_vm0, %v3880_v61, 0.0 }
0x16ee   :  { %3885 = vadd.xlane.f32.xlu0 %v3884_v21 }
0x16f0   :  { %v3877_v38 = vpop.f32.mrf.mxu1 }
0x16f1   :  { %v3878_v33 = vadd.f32 %v6268_v46, %v3877_v38 }
0x16f3   :  { %v3881_v55 = vadd.f32 %v3878_v33, %v3803_v4 }
0x16f5   :  { %v3887_v49 = vsel %vm30_vm0, %v3881_v55, 0.0 }
0x16f6   :  { %3888 = vadd.xlane.f32.xlu1 %v3887_v49 }
0x1761   :  { %v3886_v26 = vpop.xlane.xlu0 %3885 }
0x1762   :  { %v3890_v0 = vmul.f32 %v3886_v26, %v6843_v20 }
0x1764   :  { %v3892_v44 = vsub.f32 %v3880_v61, %v3890_v0  ;;  %v6517_v0 = vld [vmem:[%s8392_s3] sm:$0xff] }
0x1766   :  { %v3894_v6 = vmul.f32 %v3892_v44, %v3892_v44 }
0x1768   :  { %v3896_v27 = vsel %vm30_vm0, %v3894_v6, 0.0 }
0x1769   :  { %v3889_v39 = vpop.xlane.xlu1 %3888  ;;  %3897 = vadd.xlane.f32.xlu2 %v3896_v27 }
0x176a   :  { %v3891_v7 = vmul.f32 %v3889_v39, %v6843_v20  ;;  %v6518_v39 = vld [vmem:[%s8392_s3 + $0x8] sm:$0xff] }
0x176c   :  { %v3893_v41 = vsub.f32 %v3881_v55, %v3891_v7 }
0x176e   :  { %v3895_v9 = vmul.f32 %v3893_v41, %v3893_v41 }
0x1770   :  { %v3899_v53 = vsel %vm30_vm0, %v3895_v9, 0.0 }
0x1771   :  { %3900 = vadd.xlane.f32.xlu0 %v3899_v53 }
0x17dc   :  { %v3898_v25 = vpop.xlane.xlu2 %3897 }
0x17dd   :  { %v3902_v50 = vmul.f32 %v3898_v25, %v6843_v20 }
0x17df   :  { %v3904_v54 = vadd.f32 1e-05, %v3902_v50 }
0x17e1   :  { %6437 = vrsqrt.f32 %v3904_v54  ;;  %vm3912_vm10 = vweird.f32 %v3904_v54 }
0x17e4   :  { %v3901_v10 = vpop.xlane.xlu0 %3900 }
0x17e5   :  { %v3903_v37 = vmul.f32 %v3901_v10, %v6843_v20 }
0x17e7   :  { %v6438_v17 = vpop.eup %6437  ;;  %v3905_v13 = vadd.f32 1e-05, %v3903_v37 }
0x17e8   :  { %v3907_v56 = vmul.f32 %v6438_v17, %v3904_v54  ;;  %vm3913_vm9 = vweird.f32 %v6438_v17 }
0x17e9   :  { %6439 = vrsqrt.f32 %v3905_v13  ;;  %vm3914_vm11 = vmor %vm3912_vm10, %vm3913_vm9  ;;  %vm3922_vm14 = vweird.f32 %v3905_v13 }
0x17ea   :  { %v3908_v24 = vmul.f32 %v6438_v17, %v3907_v56 }
0x17ec   :  { %v3909_v14 = vmul.f32 0.5, %v3908_v24 }
0x17ee   :  { %v3910_v47 = vsub.f32 1.5, %v3909_v14 }
0x17ef   :  { %v6440_v19 = vpop.eup %6439 }
0x17f0   :  { %v3911_v8 = vmul.f32 %v6438_v17, %v3910_v47  ;;  %v3917_v18 = vmul.f32 %v6440_v19, %v3905_v13  ;;  %vm3923_vm12 = vweird.f32 %v6440_v19 }
0x17f1   :  { %vm3924_vm15 = vmor %vm3922_vm14, %vm3923_vm12 }
0x17f2   :  { %v3915_v51 = vsel %vm3914_vm11, %v6438_v17, %v3911_v8  ;;  %v3918_v57 = vmul.f32 %v6440_v19, %v3917_v18 }
0x17f3   :  { %v3926_v2 = vmul.f32 %v3915_v51, %v3892_v44 }
0x17f4   :  { %v3919_v22 = vmul.f32 0.5, %v3918_v57 }
0x17f5   :  { %v3929_v31 = vmul.f32 %v6269_v29, %v3926_v2 }
0x17f6   :  { %v3920_v34 = vsub.f32 1.5, %v3919_v22 }
0x17f7   :  { %v7833_v35 = vadd.f32 %v6270_v1, %v3929_v31 }
0x17f8   :  { %v3921_v36 = vmul.f32 %v6440_v19, %v3920_v34 }
0x17f9   :  { %6028 = vmatmul.msk.f32.vlgmr.msra.gmra.mxu2 %vm30_vm0, %v7833_v35 }
0x17fa   :  { %v3925_v40 = vsel %vm3924_vm15, %v6440_v19, %v3921_v36 }
0x17fb   :  { %v3927_v42 = vmul.f32 %v3925_v40, %v3893_v41 }
0x17fd   :  { %v3930_v52 = vmul.f32 %v6269_v29, %v3927_v42 }
0x17ff   :  { %v7837_v4 = vadd.f32 %v6270_v1, %v3930_v52 }
0x1801   :  { %6029 = vmatmul.msk.f32.gmra.mxu2 %vm30_vm0, %v7837_v4 }
0x187c   :  { %v3968_v43 = vpop.f32.mrf.mxu2 }
0x187d   :  { %v7844_v30 = vadd.f32 %v6271_v45, %v3968_v43 }
0x187f   :  { %3976 = vrot.lane.b32.xlu2 %v7844_v30, %s6547_s29  ;;  %3980 = vrot.lane.b32.xlu1 %v7844_v30, %s6546_s28 }
0x1884   :  { %v3971_v48 = vpop.f32.mrf.mxu2 }
0x1885   :  { %v7850_v63 = vadd.f32 %v6271_v45, %v3971_v48 }
0x1887   :  { %3984 = vrot.lane.b32.xlu1 %v7844_v30, %s6545_s27  ;;  %3986 = vrot.lane.b32.xlu2 %v7850_v63, %s6545_s27 }
0x1888   :  { %3982 = vrot.lane.b32.xlu0 %v7850_v63, %s6546_s28 }
0x188f   :  { %4014 = vrot.lane.b32.xlu1 %v7850_v63, %s6548_s30 }
0x1890   :  { %3978 = vrot.lane.b32.xlu0 %v7850_v63, %s6547_s29 }
0x1898   :  { %3988 = vrot.lane.b32.xlu0 %v7844_v30, %s6548_s30 }
0x18d9   :  { %v7864_v60 = vpop.permute.xlu2 %3976 }
0x18da   :  { %4040 = vrot.lane.b32.xlu0 %v7864_v60, %s6548_s30  ;;  %v6203_v14 = vpack.i.bf16 %v7864_v60, %v7844_v30 }
0x18e1   :  { %v7880_v59 = vpop.permute.xlu2 %3986 }
0x18f1   :  { %v7868_v15 = vpop.permute.xlu1 %3980 }
0x18f2   :  { %4092 = vrot.lane.b32.xlu2 %v7868_v15, %s6548_s30  ;;  %v6208_v40 = vpack.i.bf16 %v7868_v15, %v7850_v63 }
0x18f9   :  { %v7872_v58 = vpop.permute.xlu1 %3984 }
0x18fa   :  { %v7874_v12 = vpop.permute.xlu0 %3982  ;;  %4144 = vrot.lane.b32.xlu0 %v7872_v58, %s6548_s30 }
0x18fb   :  { %4118 = vrot.lane.b32.xlu1 %v7874_v12, %s6548_s30 }
0x1901   :  { %v4015_v23 = vpop.permute.xlu1 %4014 }
0x1902   :  { %v7882_v46 = vpop.permute.xlu0 %3978 }
0x1903   :  { %4170 = vrot.lane.b32.xlu1 %v7880_v59, %s6548_s30  ;;  %4066 = vrot.lane.b32.xlu2 %v7882_v46, %s6548_s30 }
0x190a   :  { %v3989_v16 = vpop.permute.xlu0 %3988 }
0x190b   :  { %6030 = vmatpush.xpose.msk.msra.mxu3 %vm116_vm1, %v3989_v16 }
0x190e   :  { %6031 = vmatmul.msk.f32.vlgmr.msra.gmra.mxu3 %vm116_vm1, %v7844_v30 }
0x190f   :  { %6032 = vmatpush.xpose.msk.msrb.mxu3 %vm116_vm1, %v4015_v23 }
0x1916   :  { %6033 = vmatmul.msk.f32.vlgmr.msrb.gmra.mxu3 %vm116_vm1, %v7850_v63 }
0x194c   :  { %v4093_v61 = vpop.permute.xlu2 %4092  ;;  %v4041_v21 = vpop.permute.xlu0 %4040 }
0x194d   :  { %6034 = vmatpush.xpose.msk.msra.mxu0 %vm116_vm1, %v4041_v21  ;;  %6038 = vmatpush.xpose.msk.msrb.mxu2 %vm116_vm1, %v4093_v61 }
0x1950   :  { %6035 = vmatmul.msk.f32.vlgmr.msra.gmra.mxu0 %vm116_vm1, %v7864_v60  ;;  %6039 = vmatmul.msk.f32.vlgmr.msrb.gmra.mxu2 %vm116_vm1, %v7868_v15 }
0x195d   :  { %v4067_v38 = vpop.permute.xlu2 %4066 }
0x195e   :  { %6036 = vmatpush.xpose.msk.msra.mxu1 %vm116_vm1, %v4067_v38 }
0x1961   :  { %6037 = vmatmul.msk.f32.vlgmr.msra.gmra.mxu1 %vm116_vm1, %v7882_v46 }
0x196c   :  { %v4145_v33 = vpop.permute.xlu0 %4144 }
0x196d   :  { %v4119_v55 = vpop.permute.xlu1 %4118  ;;  %6042 = vmatpush.xpose.msk.msrb.mxu0 %vm116_vm1, %v4145_v33 }
0x196e   :  { %6040 = vmatpush.xpose.msk.msra.mxu3 %vm116_vm1, %v4119_v55 }
0x1970   :  { %6043 = vmatmul.msk.f32.vlgmr.msrb.gmra.mxu0 %vm116_vm1, %v7872_v58 }
0x1971   :  { %6041 = vmatmul.msk.f32.vlgmr.msra.gmra.mxu3 %vm116_vm1, %v7874_v12 }
0x1975   :  { %v4171_v49 = vpop.permute.xlu1 %4170 }
0x1976   :  { %6044 = vmatpush.xpose.msk.msrb.mxu1 %vm116_vm1, %v4171_v49 }
0x1979   :  { %6045 = vmatmul.msk.f32.vlgmr.msrb.gmra.mxu1 %vm116_vm1, %v7880_v59 }
0x1991   :  { %v4011_v26 = vpop.f32.mrf.mxu3 }
0x1992   :  { %v4012_v44 = vadd.f32 %v6517_v0, %v4011_v26 }
0x1994   :  { %v4196_v6 = vsel %vm116_vm1, %v4012_v44, -inf }
0x1995   :  { %4197 = vmax.xlane.f32.xlu2 %v4196_v6 }
0x1999   :  { %v4037_v27 = vpop.f32.mrf.mxu3 }
0x199a   :  { %v4038_v7 = vadd.f32 %v6518_v39, %v4037_v27 }
0x199c   :  { %v4199_v41 = vsel %vm116_vm1, %v4038_v7, -inf }
0x199d   :  { %4200 = vmax.xlane.f32.xlu1 %v4199_v41 }
0x19cd   :  { %v4063_v9 = vpop.f32.mrf.mxu0 }
0x19ce   :  { %v4064_v53 = vadd.f32 %v6517_v0, %v4063_v9 }
0x19d0   :  { %v4202_v11 = vsel %vm116_vm1, %v4064_v53, -inf }
0x19d1   :  { %4203 = vmax.xlane.f32.xlu0 %v4202_v11 }
0x19d3   :  { %v4115_v32 = vpop.f32.mrf.mxu2 }
0x19d4   :  { %v4116_v5 = vadd.f32 %v6517_v0, %v4115_v32 }
0x19d6   :  { %v4208_v28 = vsel %vm116_vm1, %v4116_v5, -inf }
0x19d7   :  { %4209 = vmax.xlane.f32.xlu2 %v4208_v28 }
0x19de   :  { %v4089_v25 = vpop.f32.mrf.mxu1 }
0x19df   :  { %v4090_v50 = vadd.f32 %v6518_v39, %v4089_v25 }
0x19e1   :  { %v4205_v54 = vsel %vm116_vm1, %v4090_v50, -inf }
0x19e2   :  { %4206 = vmax.xlane.f32.xlu2 %v4205_v54 }
0x19ed   :  { %v4167_v10 = vpop.f32.mrf.mxu0 }
0x19ee   :  { %v4168_v37 = vadd.f32 %v6517_v0, %v4167_v10 }
0x19f0   :  { %v4214_v17 = vsel %vm116_vm1, %v4168_v37, -inf }
0x19f1   :  { %4215 = vmax.xlane.f32.xlu1 %v4214_v17 }
0x19f4   :  { %v4141_v2 = vpop.f32.mrf.mxu3 }
0x19f5   :  { %v4142_v22 = vadd.f32 %v6518_v39, %v4141_v2 }
0x19f6   :  { %v4193_v13 = vpop.f32.mrf.mxu1 }
0x19f7   :  { %v7924_v56 = vadd.f32 %v6518_v39, %v4193_v13  ;;  %v4211_v36 = vsel %vm116_vm1, %v4142_v22, -inf }
0x19f9   :  { %v4217_v24 = vsel %vm116_vm1, %v7924_v56, -inf }
0x19fa   :  { %4218 = vmax.xlane.f32.xlu2 %v4217_v24 }
0x1a08   :  { %v4198_v47 = vpop.xlane.xlu2 %4197 }
0x1a09   :  { %v4220_v19 = vsub.f32 %v4012_v44, %v4198_v47 }
0x1a0a   :  { %6204 = vrot.lane.b32.xlu1 %v6203_v14, %s6549_s8 }
0x1a0b   :  { %v4228_v8 = vmul.f32 1.442695, %v4220_v19 }
0x1a0d   :  { %6441 = vpow2.f32 %v4228_v8 }
0x1a10   :  { %v4201_v18 = vpop.xlane.xlu1 %4200 }
0x1a11   :  { %v4221_v29 = vsub.f32 %v4038_v7, %v4201_v18 }
0x1a13   :  { %v7931_v51 = vpop.eup %6441  ;;  %v4230_v57 = vmul.f32 1.442695, %v4221_v29 }
0x1a14   :  { %v4244_v1 = vsel %vm116_vm1, %v7931_v51, 0.0 }
0x1a15   :  { %6443 = vpow2.f32 %v4230_v57  ;;  %4245 = vadd.xlane.f32.xlu0 %v4244_v1 }
0x1a1b   :  { %v7935_v31 = vpop.eup %6443 }
0x1a1c   :  { %v4247_v34 = vsel %vm116_vm1, %v7935_v31, 0.0 }
0x1a1d   :  { %4248 = vadd.xlane.f32.xlu2 %v4247_v34  ;;  %4212 = vmax.xlane.f32.xlu0 %v4211_v36 }
0x1a31   :  { %6209 = vrot.lane.b32.xlu0 %v6208_v40, %s6549_s8 }
0x1a44   :  { %v4204_v42 = vpop.xlane.xlu0 %4203 }
0x1a45   :  { %v4222_v52 = vsub.f32 %v4064_v53, %v4204_v42 }
0x1a47   :  { %v4232_v45 = vmul.f32 1.442695, %v4222_v52 }
0x1a49   :  { %6445 = vpow2.f32 %v4232_v45 }
0x1a4a   :  { %v4210_v43 = vpop.xlane.xlu2 %4209 }
0x1a4b   :  { %v4224_v30 = vsub.f32 %v4116_v5, %v4210_v43 }
0x1a4d   :  { %v4236_v48 = vmul.f32 1.442695, %v4224_v30  ;;  %v6213_v30 = vpack.i.bf16 %v7874_v12, %v7882_v46 }
0x1a4f   :  { %v7943_v60 = vpop.eup %6445  ;;  %6447 = vpow2.f32 %v4236_v48 }
0x1a50   :  { %v4250_v16 = vsel %vm116_vm1, %v7943_v60, 0.0 }
0x1a51   :  { %4251 = vadd.xlane.f32.xlu1 %v4250_v16 }
0x1a55   :  { %v4207_v23 = vpop.xlane.xlu2 %4206  ;;  %v7947_v21 = vpop.eup %6447 }
0x1a56   :  { %v4223_v61 = vsub.f32 %v4090_v50, %v4207_v23  ;;  %v4256_v15 = vsel %vm116_vm1, %v7947_v21, 0.0 }
0x1a58   :  { %v4234_v63 = vmul.f32 1.442695, %v4223_v61 }
0x1a5a   :  { %6449 = vpow2.f32 %v4234_v63 }
0x1a5b   :  { %4257 = vadd.xlane.f32.xlu0 %v4256_v15 }
0x1a60   :  { %v7951_v38 = vpop.eup %6449 }
0x1a61   :  { %v4253_v33 = vsel %vm116_vm1, %v7951_v38, 0.0 }
0x1a62   :  { %4254 = vadd.xlane.f32.xlu1 %v4253_v33 }
0x1a64   :  { %v4216_v55 = vpop.xlane.xlu1 %4215 }
0x1a65   :  { %v4226_v49 = vsub.f32 %v4168_v37, %v4216_v55 }
0x1a67   :  { %v4240_v26 = vmul.f32 1.442695, %v4226_v49 }
0x1a69   :  { %6451 = vpow2.f32 %v4240_v26 }
0x1a6d   :  { %v4219_v7 = vpop.xlane.xlu2 %4218 }
0x1a6f   :  { %v7955_v0 = vpop.eup %6451 }
0x1a70   :  { %v4262_v44 = vsel %vm116_vm1, %v7955_v0, 0.0 }
0x1a71   :  { %4263 = vadd.xlane.f32.xlu0 %v4262_v44 }
0x1a7b   :  { %4553 = vrot.lane.b32.xlu1 %v7872_v58, %s6549_s8  ;;  %v4227_v58 = vsub.f32 %v7924_v56, %v4219_v7 }
0x1a7c   :  { %v6205_v6 = vpop.permute.xlu1 %6204 }
0x1a7d   :  { %v6207_v27 = vunpack.i.h.bf16 %v6205_v6  ;;  %v6206_v39 = vunpack.i.l.bf16 %v6205_v6  ;;  %v4242_v13 = vmul.f32 1.442695, %v4227_v58 }
0x1a7f   :  { %4418 = vmatpush.msra.mxu2 %v6206_v39  ;;  %4470 = vmatpush.msra.mxu0 %v6207_v27 }
0x1a85   :  { %4579 = vrot.lane.b32.xlu0 %v7880_v59, %s6549_s8 }
0x1a88   :  { %v4246_v41 = vpop.xlane.xlu0 %4245 }
0x1a89   :  { %6453 = vrcp.f32 %v4246_v41  ;;  %v4279_v25 = vand.u32 2147483648, %v4246_v41  ;;  %v4277_v54 = vand.u32 2147483647, %v4246_v41  ;;  %vm4273_vm3 = vweird.f32 %v4246_v41 }
0x1a8b   :  { %v4280_v17 = vor.u32 1.1754944e-38, %v4279_v25  ;;  %vm4278_vm5 = vcmp.eq.f32.partialorder %v4277_v54, 8.507059e+37 }
0x1a8f   :  { %v6454_v9 = vpop.eup %6453 }
0x1a90   :  { %v4269_v53 = vmul.f32 %v6454_v9, %v4246_v41  ;;  %v4249_v11 = vpop.xlane.xlu2 %4248  ;;  %v4213_v32 = vpop.xlane.xlu0 %4212  ;;  %vm4274_vm2 = vweird.f32 %v6454_v9 }
0x1a91   :  { %6455 = vrcp.f32 %v4249_v11  ;;  %v4225_v28 = vsub.f32 %v4142_v22, %v4213_v32  ;;  %vm4275_vm4 = vmor %vm4273_vm3, %vm4274_vm2  ;;  %v4294_v56 = vand.u32 2147483648, %v4249_v11  ;;  %v4292_v57 = vand.u32 2147483647, %v4249_v11 }
0x1a92   :  { %v4270_v5 = vsub.f32 1.0, %v4269_v53  ;;  %vm4288_vm7 = vweird.f32 %v4249_v11 }
0x1a93   :  { %v4238_v10 = vmul.f32 1.442695, %v4225_v28  ;;  %vm4293_vm9 = vcmp.eq.f32.partialorder %v4292_v57, 8.507059e+37 }
0x1a94   :  { %v4271_v50 = vmul.f32 %v6454_v9, %v4270_v5 }
0x1a95   :  { %6457 = vpow2.f32 %v4238_v10 }
0x1a96   :  { %v4272_v37 = vadd.f32 %v6454_v9, %v4271_v50  ;;  %6459 = vpow2.f32 %v4242_v13 }
0x1a97   :  { %v6456_v59 = vpop.eup %6455 }
0x1a98   :  { %v4276_v24 = vsel %vm4275_vm4, %v6454_v9, %v4272_v37  ;;  %v4284_v14 = vmul.f32 %v6456_v59, %v4249_v11  ;;  %vm4289_vm6 = vweird.f32 %v6456_v59 }
0x1a99   :  { %v4281_v47 = vsel %vm4278_vm5, %v4280_v17, %v4276_v24  ;;  %vm4290_vm8 = vmor %vm4288_vm7, %vm4289_vm6 }
0x1a9a   :  { %v4282_v19 = vmul.f32 %v7931_v51, %v4281_v47  ;;  %v4285_v8 = vsub.f32 1.0, %v4284_v14  ;;  %v4295_v51 = vor.u32 1.1754944e-38, %v4294_v56 }
0x1a9b   :  { %v7965_v18 = vpop.eup %6457 }
0x1a9c   :  { %6046 = vst.msk [vmem:[%s8395_s6 + $0x40] sm:$0xff] %vm116_vm1, %v4282_v19  ;;  %v4286_v29 = vmul.f32 %v6456_v59, %v4285_v8  ;;  %6054 = vmatmul.msk.f32.vlgmr.msra.gmra.mxu2 %vm116_vm1, %v4282_v19  ;;  %v4259_v1 = vsel %vm116_vm1, %v7965_v18, 0.0  ;;  %v7974_v36 = vpop.eup %6459 }
0x1a9d   :  { %4260 = vadd.xlane.f32.xlu2 %v4259_v1  ;;  %v4265_v43 = vsel %vm116_vm1, %v7974_v36, 0.0 }
0x1a9e   :  { %v4287_v2 = vadd.f32 %v6456_v59, %v4286_v29 }
0x1aa0   :  { %v4291_v22 = vsel %vm4290_vm8, %v6456_v59, %v4287_v2 }
0x1aa1   :  { %v4296_v34 = vsel %vm4293_vm9, %v4295_v51, %v4291_v22 }
0x1aa2   :  { %v4297_v40 = vmul.f32 %v7935_v31, %v4296_v34 }
0x1aa3   :  { %v6210_v42 = vpop.permute.xlu0 %6209 }
0x1aa4   :  { %6047 = vst.msk [vmem:[%s8395_s6 + $0x48] sm:$0xff] %vm116_vm1, %v4297_v40  ;;  %v6212_v52 = vunpack.i.h.bf16 %v6210_v42  ;;  %v6211_v45 = vunpack.i.l.bf16 %v6210_v42 }
0x1aa5   :  { %4266 = vadd.xlane.f32.xlu2 %v4265_v43 }
0x1aa6   :  { %4444 = vmatpush.msrb.mxu3 %v6211_v45  ;;  %4522 = vmatpush.msrb.mxu2 %v6212_v52 }
0x1aa7   :  { %6055 = vmatmul.msk.f32.vlgmr.msrb.gmra.mxu3 %vm116_vm1, %v4297_v40 }
0x1abd   :  { %6214 = vrot.lane.b32.xlu2 %v6213_v30, %s6549_s8 }
0x1ac4   :  { %v4252_v31 = vpop.xlane.xlu1 %4251 }
0x1ac5   :  { %6461 = vrcp.f32 %v4252_v31  ;;  %v4309_v63 = vand.u32 2147483648, %v4252_v31  ;;  %v4307_v33 = vand.u32 2147483647, %v4252_v31  ;;  %vm4303_vm11 = vweird.f32 %v4252_v31 }
0x1ac7   :  { %v4310_v49 = vor.u32 1.1754944e-38, %v4309_v63  ;;  %vm4308_vm14 = vcmp.eq.f32.partialorder %v4307_v33, 8.507059e+37 }
0x1acb   :  { %v6462_v48 = vpop.eup %6461 }
0x1acc   :  { %v4299_v16 = vmul.f32 %v6462_v48, %v4252_v31  ;;  %vm4304_vm10 = vweird.f32 %v6462_v48 }
0x1acd   :  { %vm4305_vm12 = vmor %vm4303_vm11, %vm4304_vm10 }
0x1ace   :  { %v4300_v23 = vsub.f32 1.0, %v4299_v16  ;;  %v4258_v61 = vpop.xlane.xlu0 %4257 }
0x1acf   :  { %6463 = vrcp.f32 %v4258_v61  ;;  %v4339_v7 = vand.u32 2147483648, %v4258_v61  ;;  %v4337_v9 = vand.u32 2147483647, %v4258_v61  ;;  %vm4333_vm2 = vweird.f32 %v4258_v61 }
0x1ad0   :  { %v4301_v15 = vmul.f32 %v6462_v48, %v4300_v23 }
0x1ad1   :  { %v4340_v32 = vor.u32 1.1754944e-38, %v4339_v7  ;;  %vm4338_vm4 = vcmp.eq.f32.partialorder %v4337_v9, 8.507059e+37 }
0x1ad2   :  { %v4302_v55 = vadd.f32 %v6462_v48, %v4301_v15 }
0x1ad4   :  { %v4306_v26 = vsel %vm4305_vm12, %v6462_v48, %v4302_v55 }
0x1ad5   :  { %v6464_v12 = vpop.eup %6463  ;;  %v4311_v46 = vsel %vm4308_vm14, %v4310_v49, %v4306_v26  ;;  %v4255_v44 = vpop.xlane.xlu1 %4254 }
0x1ad6   :  { %v4312_v6 = vmul.f32 %v7943_v60, %v4311_v46  ;;  %v4329_v27 = vmul.f32 %v6464_v12, %v4258_v61  ;;  %6465 = vrcp.f32 %v4255_v44  ;;  %vm4334_vm15 = vweird.f32 %v6464_v12 }
0x1ad7   :  { %vm4335_vm3 = vmor %vm4333_vm2, %vm4334_vm15  ;;  %v4324_v50 = vand.u32 2147483648, %v4255_v44  ;;  %v4322_v10 = vand.u32 2147483647, %v4255_v44  ;;  %vm4318_vm6 = vweird.f32 %v4255_v44 }
0x1ad8   :  { %6048 = vst.msk [vmem:[%s8395_s6 + $0x50] sm:$0xff] %vm116_vm1, %v4312_v6  ;;  %v4330_v39 = vsub.f32 1.0, %v4329_v27  ;;  %6056 = vmatmul.msk.f32.vlgmr.msra.gmra.mxu0 %vm116_vm1, %v4312_v6 }
0x1ad9   :  { %v4325_v59 = vor.u32 1.1754944e-38, %v4324_v50  ;;  %vm4323_vm8 = vcmp.eq.f32.partialorder %v4322_v10, 8.507059e+37 }
0x1ada   :  { %v4331_v41 = vmul.f32 %v6464_v12, %v4330_v39 }
0x1adc   :  { %v6466_v53 = vpop.eup %6465  ;;  %v4332_v11 = vadd.f32 %v6464_v12, %v4331_v41 }
0x1add   :  { %v4314_v60 = vmul.f32 %v6466_v53, %v4255_v44  ;;  %vm4319_vm5 = vweird.f32 %v6466_v53 }
0x1ade   :  { %v4336_v5 = vsel %vm4335_vm3, %v6464_v12, %v4332_v11  ;;  %vm4320_vm7 = vmor %vm4318_vm6, %vm4319_vm5  ;;  %v3939_v12 = vld [vmem:[%s8391_s2 + $0x1f5] sm:$0xff] }
0x1adf   :  { %v4341_v28 = vsel %vm4338_vm4, %v4340_v32, %v4336_v5  ;;  %v4315_v58 = vsub.f32 1.0, %v4314_v60  ;;  %v3940_v32 = vld [vmem:[%s8391_s2 + $0x1fd] sm:$0xff]  ;;  %v3942_v5 = vld [vmem:[%s8391_s2 + $0x20d] sm:$0xff] }
0x1ae0   :  { %v4342_v25 = vmul.f32 %v7947_v21, %v4341_v28  ;;  %4626 = vmatpush.msra.mxu2 %v3940_v32 }
0x1ae1   :  { %v4316_v54 = vmul.f32 %v6466_v53, %v4315_v58 }
0x1ae2   :  { %6050 = vst.msk [vmem:[%s8395_s6 + $0x60] sm:$0xff] %vm116_vm1, %v4342_v25  ;;  %6058 = vmatmul.msk.f32.vlgmr.msrb.gmra.mxu2 %vm116_vm1, %v4342_v25 }
0x1ae3   :  { %v4317_v37 = vadd.f32 %v6466_v53, %v4316_v54 }
0x1ae4   :  { %v4264_v17 = vpop.xlane.xlu0 %4263 }
0x1ae5   :  { %v4321_v13 = vsel %vm4320_vm7, %v6466_v53, %v4317_v37  ;;  %6467 = vrcp.f32 %v4264_v17  ;;  %v4369_v56 = vand.u32 2147483648, %v4264_v17  ;;  %v4367_v57 = vand.u32 2147483647, %v4264_v17 }
0x1ae6   :  { %v4326_v21 = vsel %vm4323_vm8, %v4325_v59, %v4321_v13  ;;  %vm4363_vm10 = vweird.f32 %v4264_v17 }
0x1ae7   :  { %v4327_v24 = vmul.f32 %v7951_v38, %v4326_v21  ;;  %v4370_v2 = vor.u32 1.1754944e-38, %v4369_v56  ;;  %vm4368_vm12 = vcmp.eq.f32.partialorder %v4367_v57, 8.507059e+37  ;;  %v6272_v21 = vld [vmem:[%s8391_s2 + $0x215] ss:$0 sm:$0xff] }
0x1ae9   :  { %6049 = vst.msk [vmem:[%s8395_s6 + $0x58] sm:$0xff] %vm116_vm1, %v4327_v24 }
0x1aeb   :  { %v6468_v14 = vpop.eup %6467 }
0x1aec   :  { %v4359_v47 = vmul.f32 %v6468_v14, %v4264_v17  ;;  %vm4364_vm9 = vweird.f32 %v6468_v14 }
0x1aed   :  { %v4554_v19 = vpop.permute.xlu1 %4553  ;;  %vm4365_vm11 = vmor %vm4363_vm10, %vm4364_vm9 }
0x1aee   :  { %v4360_v8 = vsub.f32 1.0, %v4359_v47  ;;  %4574 = vmatpush.msrb.mxu0 %v4554_v19 }
0x1af0   :  { %v4361_v29 = vmul.f32 %v6468_v14, %v4360_v8 }
0x1af2   :  { %v4362_v1 = vadd.f32 %v6468_v14, %v4361_v29 }
0x1af4   :  { %v4366_v51 = vsel %vm4365_vm11, %v6468_v14, %v4362_v1 }
0x1af5   :  { %v4371_v38 = vsel %vm4368_vm12, %v4370_v2, %v4366_v51 }
0x1af6   :  { %v4372_v22 = vmul.f32 %v7955_v0, %v4371_v38 }
0x1af7   :  { %v4580_v44 = vpop.permute.xlu0 %4579 }
0x1af8   :  { %6052 = vst.msk [vmem:[%s8395_s6 + $0x70] sm:$0xff] %vm116_vm1, %v4372_v22  ;;  %6060 = vmatmul.msk.f32.vlgmr.msrb.gmra.mxu0 %vm116_vm1, %v4372_v22 }
0x1b10   :  { %v4261_v34 = vpop.xlane.xlu2 %4260 }
0x1b11   :  { %6469 = vrcp.f32 %v4261_v34  ;;  %v4354_v43 = vand.u32 2147483648, %v4261_v34  ;;  %v4352_v31 = vand.u32 2147483647, %v4261_v34  ;;  %vm4348_vm15 = vweird.f32 %v4261_v34 }
0x1b13   :  { %v4355_v16 = vor.u32 1.1754944e-38, %v4354_v43  ;;  %vm4353_vm3 = vcmp.eq.f32.partialorder %v4352_v31, 8.507059e+37 }
0x1b17   :  { %v6470_v40 = vpop.eup %6469 }
0x1b18   :  { %v4344_v42 = vmul.f32 %v6470_v40, %v4261_v34  ;;  %v4267_v52 = vpop.xlane.xlu2 %4266  ;;  %vm4349_vm14 = vweird.f32 %v6470_v40 }
0x1b19   :  { %6471 = vrcp.f32 %v4267_v52  ;;  %vm4350_vm2 = vmor %vm4348_vm15, %vm4349_vm14  ;;  %v4384_v46 = vand.u32 2147483648, %v4267_v52  ;;  %v4382_v27 = vand.u32 2147483647, %v4267_v52  ;;  %vm4378_vm5 = vweird.f32 %v4267_v52 }
0x1b1a   :  { %v4345_v45 = vsub.f32 1.0, %v4344_v42  ;;  %v4785_v42 = vld [vmem:[%s8389_s0 + $0xbd] sm:$0xff] }
0x1b1b   :  { %v4385_v39 = vor.u32 1.1754944e-38, %v4384_v46  ;;  %vm4383_vm7 = vcmp.eq.f32.partialorder %v4382_v27, 8.507059e+37  ;;  %4811 = vmatpush.msrb.mxu2 %v4785_v42 }
0x1b1c   :  { %v4346_v30 = vmul.f32 %v6470_v40, %v4345_v45  ;;  %v4782_v45 = vld [vmem:[%s8389_s0 + $0xa5] sm:$0xff] }
0x1b1e   :  { %v4347_v48 = vadd.f32 %v6470_v40, %v4346_v30 }
0x1b1f   :  { %v6472_v0 = vpop.eup %6471  ;;  %v4420_v53 = vpop.f32.mrf.mxu2 }
0x1b20   :  { %v4351_v23 = vsel %vm4350_vm2, %v6470_v40, %v4347_v48  ;;  %v4374_v61 = vmul.f32 %v6472_v0, %v4267_v52  ;;  %v6215_v63 = vpop.permute.xlu2 %6214  ;;  %vm4379_vm4 = vweird.f32 %v6472_v0 }
0x1b21   :  { %v4356_v15 = vsel %vm4353_vm3, %v4355_v16, %v4351_v23  ;;  %v6217_v33 = vunpack.i.h.bf16 %v6215_v63  ;;  %v6216_v55 = vunpack.i.l.bf16 %v6215_v63  ;;  %vm4380_vm6 = vmor %vm4378_vm5, %vm4379_vm4 }
0x1b22   :  { %v4357_v49 = vmul.f32 %v7965_v18, %v4356_v15  ;;  %v4375_v26 = vsub.f32 1.0, %v4374_v61 }
0x1b23   :  { %4496 = vmatpush.msra.mxu1 %v6216_v55  ;;  %4548 = vmatpush.msra.mxu3 %v6217_v33 }
0x1b24   :  { %6051 = vst.msk [vmem:[%s8395_s6 + $0x68] sm:$0xff] %vm116_vm1, %v4357_v49  ;;  %v4376_v6 = vmul.f32 %v6472_v0, %v4375_v26  ;;  %6057 = vmatmul.msk.f32.vlgmr.msra.gmra.mxu1 %vm116_vm1, %v4327_v24  ;;  %6059 = vmatmul.msk.f32.vlgmr.msra.gmra.mxu3 %vm116_vm1, %v4357_v49 }
0x1b25   :  { %4600 = vmatpush.msrb.mxu1 %v4580_v44  ;;  %4655 = vmatpush.msrb.mxu3 %v3939_v12  ;;  %v8071_v12 = vld [vmem:[%s8389_s0 + $0xc5] ss:$0 sm:$0xff] }
0x1b26   :  { %v4377_v18 = vadd.f32 %v6472_v0, %v4376_v6 }
0x1b27   :  { %4715 = vmatpush.msra.mxu1 %v3942_v5  ;;  %v6274_v5 = vld [vmem:[%s8391_s2 + $0x217] ss:$0 sm:$0xff] }
0x1b28   :  { %v4381_v7 = vsel %vm4380_vm6, %v6472_v0, %v4377_v18 }
0x1b29   :  { %v4386_v41 = vsel %vm4383_vm7, %v4385_v39, %v4381_v7 }
0x1b2a   :  { %v4387_v9 = vmul.f32 %v7974_v36, %v4386_v41  ;;  %v4446_v11 = vpop.f32.mrf.mxu3  ;;  %v3941_v36 = vld [vmem:[%s8391_s2 + $0x205] sm:$0xff] }
0x1b2b   :  { %4684 = vmatpush.msra.mxu0 %v3941_v36  ;;  %v6273_v36 = vld [vmem:[%s8391_s2 + $0x216] ss:$0 sm:$0xff] }
0x1b2c   :  { %6053 = vst.msk [vmem:[%s8395_s6 + $0x78] sm:$0xff] %vm116_vm1, %v4387_v9  ;;  %6061 = vmatmul.msk.f32.vlgmr.msrb.gmra.mxu1 %vm116_vm1, %v4387_v9  ;;  %6064 = vmatmul.msk.f32.vlgmr.msrb.gmra.mxu3 %vm116_vm1, %v4420_v53 }
0x1b34   :  { %6065 = vmatmul.msk.f32.gmra.mxu3 %vm116_vm1, %v4446_v11 }
0x1b55   :  { %v4472_v60 = vpop.f32.mrf.mxu0 }
0x1b56   :  { %6062 = vmatmul.msk.f32.vlgmr.msra.gmra.mxu2 %vm116_vm1, %v4472_v60 }
0x1b65   :  { %v4524_v28 = vpop.f32.mrf.mxu2 }
0x1b66   :  { %6066 = vmatmul.msk.f32.vlgmr.msra.gmra.mxu0 %vm116_vm1, %v4524_v28 }
0x1b75   :  { %v4576_v58 = vpop.f32.mrf.mxu0 }
0x1b76   :  { %6068 = vmatmul.msk.f32.vlgmr.msra.gmra.mxu1 %vm116_vm1, %v4576_v58 }
0x1ba1   :  { %v4498_v25 = vpop.f32.mrf.mxu1 }
0x1ba2   :  { %6063 = vmatmul.msk.f32.gmra.mxu2 %vm116_vm1, %v4498_v25 }
0x1ba7   :  { %v4550_v50 = vpop.f32.mrf.mxu3 }
0x1ba8   :  { %6067 = vmatmul.msk.f32.gmra.mxu0 %vm116_vm1, %v4550_v50 }
0x1ba9   :  { %v4602_v54 = vpop.f32.mrf.mxu1 }
0x1baa   :  { %6069 = vmatmul.msk.f32.gmra.mxu1 %vm116_vm1, %v4602_v54 }
0x1baf   :  { %v4657_v37 = vpop.f32.mrf.mxu3 }
0x1bb7   :  { %v4660_v56 = vpop.f32.mrf.mxu3 }
0x1bd9   :  { %v4628_v10 = vpop.f32.mrf.mxu2 }
0x1bda   :  { %v4658_v17 = vadd.f32 %v4657_v37, %v4628_v10 }
0x1be3   :  { %v4686_v59 = vpop.f32.mrf.mxu0 }
0x1be4   :  { %v4692_v13 = vadd.f32 %v4686_v59, %v4658_v17 }
0x1bf3   :  { %v4717_v24 = vpop.f32.mrf.mxu1 }
0x1bf4   :  { %v4723_v14 = vadd.f32 %v4717_v24, %v4692_v13 }
0x1bf6   :  { %v4726_v47 = vadd.f32 %v6272_v21, %v4723_v14 }
0x1bf8   :  { %v4728_v19 = vadd.f32 %v4726_v47, %v7833_v35  ;;  %v4784_v35 = vld [vmem:[%s8389_s0 + $0xb5] sm:$0xff] }
0x1bf9   :  { %v6218_v52 = vpack.i.bf16 %v4784_v35, %v4785_v42  ;;  %4812 = vmatpush.msrb.mxu2 %v4784_v35 }
0x1bfa   :  { %v4732_v8 = vsel %vm30_vm0, %v4728_v19, 0.0 }
0x1bfb   :  { %4733 = vadd.xlane.f32.xlu1 %v4732_v8 }
0x1c25   :  { %v4631_v29 = vpop.f32.mrf.mxu2  ;;  %v4689_v1 = vpop.f32.mrf.mxu0 }
0x1c26   :  { %v4661_v57 = vadd.f32 %v4660_v56, %v4631_v29 }
0x1c27   :  { %v4720_v51 = vpop.f32.mrf.mxu1 }
0x1c28   :  { %v4693_v2 = vadd.f32 %v4689_v1, %v4661_v57 }
0x1c2a   :  { %v4724_v38 = vadd.f32 %v4720_v51, %v4693_v2 }
0x1c2c   :  { %v4727_v22 = vadd.f32 %v6272_v21, %v4724_v38 }
0x1c2e   :  { %v4729_v34 = vadd.f32 %v4727_v22, %v7837_v4  ;;  %v4783_v4 = vld [vmem:[%s8389_s0 + $0xad] sm:$0xff] }
0x1c2f   :  { %4813 = vmatpush.msrb.mxu2 %v4783_v4  ;;  %v6223_v16 = vpack.i.bf16 %v4782_v45, %v4783_v4 }
0x1c30   :  { %v4735_v40 = vsel %vm30_vm0, %v4729_v34, 0.0 }
0x1c31   :  { %4736 = vadd.xlane.f32.xlu0 %v4735_v40  ;;  %4814 = vmatpush.msrb.mxu2 %v4782_v45 }
0x1c45   :  { %6219 = vrot.lane.b32.xlu0 %v6218_v52, %s6548_s30 }
0x1c6e   :  { %v4734_v43 = vpop.xlane.xlu1 %4733 }
0x1c6f   :  { %v4738_v30 = vmul.f32 %v4734_v43, %v6843_v20 }
0x1c71   :  { %v4740_v31 = vsub.f32 %v4728_v19, %v4738_v30 }
0x1c73   :  { %v4742_v48 = vmul.f32 %v4740_v31, %v4740_v31 }
0x1c75   :  { %v4744_v0 = vsel %vm30_vm0, %v4742_v48, 0.0 }
0x1c76   :  { %4745 = vadd.xlane.f32.xlu2 %v4744_v0 }
0x1c8e   :  { %6224 = vrot.lane.b32.xlu2 %v6223_v16, %s6548_s30 }
0x1ca4   :  { %v4737_v23 = vpop.xlane.xlu0 %4736 }
0x1ca5   :  { %v4739_v61 = vmul.f32 %v4737_v23, %v6843_v20 }
0x1ca7   :  { %v4741_v63 = vsub.f32 %v4729_v34, %v4739_v61 }
0x1ca9   :  { %v4743_v15 = vmul.f32 %v4741_v63, %v4741_v63 }
0x1cab   :  { %v4747_v33 = vsel %vm30_vm0, %v4743_v15, 0.0 }
0x1cac   :  { %4748 = vadd.xlane.f32.xlu1 %v4747_v33 }
0x1cb7   :  { %v6220_v55 = vpop.permute.xlu0 %6219 }
0x1cb8   :  { %v6221_v49 = vunpack.i.l.bf16 %v6220_v55  ;;  %v6222_v26 = vunpack.i.h.bf16 %v6220_v55 }
0x1cba   :  { %4854 = vmatpush.msra.mxu3 %v6221_v49 }
0x1cbc   :  { %4855 = vmatpush.msra.mxu3 %v6222_v26 }
0x1cc5   :  { %4839 = vrot.lane.b32.xlu1 %v8071_v12, %s6548_s30 }
0x1ce9   :  { %v4746_v46 = vpop.xlane.xlu2 %4745 }
0x1cea   :  { %v4750_v44 = vmul.f32 %v4746_v46, %v6843_v20 }
0x1cec   :  { %v4752_v6 = vadd.f32 1e-05, %v4750_v44 }
0x1cee   :  { %6473 = vrsqrt.f32 %v4752_v6  ;;  %vm4760_vm9 = vweird.f32 %v4752_v6 }
0x1cf1   :  { %v6225_v27 = vpop.permute.xlu2 %6224 }
0x1cf2   :  { %v6227_v18 = vunpack.i.h.bf16 %v6225_v27  ;;  %v6226_v39 = vunpack.i.l.bf16 %v6225_v27 }
0x1cf4   :  { %v6474_v7 = vpop.eup %6473  ;;  %4856 = vmatpush.msra.mxu3 %v6226_v39 }
0x1cf5   :  { %v4755_v41 = vmul.f32 %v6474_v7, %v4752_v6  ;;  %vm4761_vm8 = vweird.f32 %v6474_v7 }
0x1cf6   :  { %4857 = vmatpush.msra.mxu3 %v6227_v18  ;;  %vm4762_vm10 = vmor %vm4760_vm9, %vm4761_vm8 }
0x1cf7   :  { %v4756_v9 = vmul.f32 %v6474_v7, %v4755_v41  ;;  %6072 = vmatmul.msk.f32.vlgmr.msra.gmra.mxu3 %vm30_vm0, %v7554_v3 }
0x1cf9   :  { %v4757_v53 = vmul.f32 0.5, %v4756_v9 }
0x1cfb   :  { %v4758_v11 = vsub.f32 1.5, %v4757_v53 }
0x1cfd   :  { %v4759_v32 = vmul.f32 %v6474_v7, %v4758_v11 }
0x1cff   :  { %v4763_v60 = vsel %vm4762_vm10, %v6474_v7, %v4759_v32  ;;  %6073 = vmatmul.msk.f32.gmra.mxu3 %vm30_vm0, %v7563_v62 }
0x1d00   :  { %v4774_v28 = vmul.f32 %v4763_v60, %v4740_v31 }
0x1d02   :  { %v4777_v3 = vmul.f32 %v6273_v36, %v4774_v28 }
0x1d04   :  { %v8086_v58 = vadd.f32 %v6274_v5, %v4777_v3 }
0x1d06   :  { %6070 = vmatmul.msk.f32.vlgmr.msrb.gmra.mxu2 %vm30_vm0, %v8086_v58 }
0x1d1f   :  { %v4749_v25 = vpop.xlane.xlu1 %4748 }
0x1d20   :  { %v4751_v50 = vmul.f32 %v4749_v25, %v6843_v20 }
0x1d22   :  { %v4753_v54 = vadd.f32 1e-05, %v4751_v50 }
0x1d24   :  { %6475 = vrsqrt.f32 %v4753_v54  ;;  %vm4770_vm12 = vweird.f32 %v4753_v54 }
0x1d2a   :  { %v6476_v10 = vpop.eup %6475 }
0x1d2b   :  { %v4765_v37 = vmul.f32 %v6476_v10, %v4753_v54  ;;  %vm4771_vm11 = vweird.f32 %v6476_v10 }
0x1d2c   :  { %vm4772_vm14 = vmor %vm4770_vm12, %vm4771_vm11 }
0x1d2d   :  { %v4766_v59 = vmul.f32 %v6476_v10, %v4765_v37 }
0x1d2f   :  { %v4767_v62 = vmul.f32 0.5, %v4766_v59 }
0x1d31   :  { %v4768_v17 = vsub.f32 1.5, %v4767_v62 }
0x1d33   :  { %v4769_v13 = vmul.f32 %v6476_v10, %v4768_v17 }
0x1d35   :  { %v4773_v21 = vsel %vm4772_vm14, %v6476_v10, %v4769_v13 }
0x1d36   :  { %v4775_v24 = vmul.f32 %v4773_v21, %v4741_v63 }
0x1d37   :  { %v4840_v19 = vpop.permute.xlu1 %4839 }
0x1d38   :  { %v4778_v14 = vmul.f32 %v6273_v36, %v4775_v24 }
0x1d3a   :  { %v8091_v47 = vadd.f32 %v6274_v5, %v4778_v14 }
0x1d3c   :  { %6071 = vmatmul.msk.f32.gmra.mxu2 %vm30_vm0, %v8091_v47 }
0x1d7a   :  { %v4859_v8 = vpop.f32.mrf.mxu3 }
0x1d7b   :  { %v8095_v56 = vadd.f32 %v4859_v8, %v4840_v19 }
0x1d7d   :  { %4885 = vrot.lane.b32.xlu0 %v8095_v56, %s6546_s28  ;;  %6074 = vmatpush.xpose.msk.msrb.mxu0 %vm116_vm1, %v8095_v56 }
0x1d82   :  { %v4862_v29 = vpop.f32.mrf.mxu3 }
0x1d83   :  { %v8101_v57 = vadd.f32 %v4862_v29, %v4840_v19 }
0x1d85   :  { %6076 = vmatpush.xpose.msk.msrb.mxu1 %vm116_vm1, %v8101_v57  ;;  %4881 = vrot.lane.b32.xlu0 %v8095_v56, %s6547_s29 }
0x1d89   :  { %v4816_v1 = vpop.f32.mrf.mxu2 }
0x1d8a   :  { %v4817_v2 = vadd.f32 %v8071_v12, %v4816_v1 }
0x1d8c   :  { %4867 = vrot.lane.b32.xlu1 %v4817_v2, %s6547_s29  ;;  %4871 = vrot.lane.b32.xlu2 %v4817_v2, %s6546_s28 }
0x1d8d   :  { %6075 = vmatmul.msk.f32.vlgmr.msrb.gmra.mxu0 %vm116_vm1, %v4817_v2 }
0x1d94   :  { %4883 = vrot.lane.b32.xlu1 %v8101_v57, %s6547_s29  ;;  %4887 = vrot.lane.b32.xlu2 %v8101_v57, %s6546_s28 }
0x1d9c   :  { %4875 = vrot.lane.b32.xlu1 %v4817_v2, %s6545_s27  ;;  %4889 = vrot.lane.b32.xlu2 %v8095_v56, %s6545_s27 }
0x1da4   :  { %4891 = vrot.lane.b32.xlu2 %v8101_v57, %s6545_s27 }
0x1dbf   :  { %v4819_v51 = vpop.f32.mrf.mxu2 }
0x1dc0   :  { %v4820_v38 = vadd.f32 %v8071_v12, %v4819_v51 }
0x1dc2   :  { %6077 = vmatmul.msk.f32.vlgmr.msrb.gmra.mxu1 %vm116_vm1, %v4820_v38  ;;  %4873 = vrot.lane.b32.xlu0 %v4820_v38, %s6546_s28 }
0x1dca   :  { %4869 = vrot.lane.b32.xlu0 %v4820_v38, %s6547_s29 }
0x1dd2   :  { %4877 = vrot.lane.b32.xlu0 %v4820_v38, %s6545_s27 }
0x1de6   :  { %v4872_v22 = vpop.permute.xlu2 %4871 }
0x1dee   :  { %v8125_v34 = vpop.permute.xlu2 %4887 }
0x1def   :  { %6084 = vmatpush.xpose.msk.msrb.mxu3 %vm116_vm1, %v8125_v34  ;;  %v8129_v40 = vpop.permute.xlu0 %4885 }
0x1df0   :  { %6082 = vmatpush.xpose.msk.msra.mxu2 %vm116_vm1, %v8129_v40  ;;  %v6233_v25 = vpack.i.bf16 %v8129_v40, %v8101_v57 }
0x1df3   :  { %6083 = vmatmul.msk.f32.vlgmr.msra.gmra.mxu2 %vm116_vm1, %v4872_v22 }
0x1df6   :  { %v8134_v42 = vpop.permute.xlu2 %4889 }
0x1df7   :  { %v4882_v35 = vpop.permute.xlu0 %4881 }
0x1df8   :  { %6078 = vmatpush.xpose.msk.msra.mxu0 %vm116_vm1, %v4882_v35  ;;  %v6228_v39 = vpack.i.bf16 %v4882_v35, %v8095_v56 }
0x1dfc   :  { %6086 = vmatpush.xpose.msk.msrb.mxu0 %vm116_vm1, %v8134_v42 }
0x1dfe   :  { %v4868_v52 = vpop.permute.xlu1 %4867  ;;  %v8142_v45 = vpop.permute.xlu2 %4891 }
0x1dff   :  { %6079 = vmatmul.msk.f32.vlgmr.msra.gmra.mxu0 %vm116_vm1, %v4868_v52 }
0x1e06   :  { %v8140_v4 = vpop.permute.xlu1 %4883 }
0x1e07   :  { %v6238_v43 = vpack.i.bf16 %v8125_v34, %v8140_v4  ;;  %6080 = vmatpush.xpose.msk.msra.mxu1 %vm116_vm1, %v8140_v4 }
0x1e0a   :  { %v4914_v30 = vpop.f32.mrf.mxu0 }
0x1e0b   :  { %6088 = vmatpush.xpose.msk.msrb.mxu1 %vm116_vm1, %v8142_v45  ;;  %v5085_v31 = vsel %vm116_vm1, %v4914_v30, -inf }
0x1e0c   :  { %5086 = vmax.xlane.f32.xlu1 %v5085_v31 }
0x1e0e   :  { %v4876_v48 = vpop.permute.xlu1 %4875 }
0x1e0f   :  { %6087 = vmatmul.msk.f32.vlgmr.msrb.gmra.mxu0 %vm116_vm1, %v4876_v48 }
0x1e34   :  { %v4874_v0 = vpop.permute.xlu0 %4873 }
0x1e35   :  { %6085 = vmatmul.msk.f32.vlgmr.msrb.gmra.mxu3 %vm116_vm1, %v4874_v0 }
0x1e3c   :  { %v4870_v16 = vpop.permute.xlu0 %4869 }
0x1e3d   :  { %6081 = vmatmul.msk.f32.vlgmr.msra.gmra.mxu1 %vm116_vm1, %v4870_v16 }
0x1e3f   :  { %v4938_v23 = vpop.f32.mrf.mxu1 }
0x1e40   :  { %v5088_v61 = vsel %vm116_vm1, %v4938_v23, -inf }
0x1e41   :  { %5089 = vmax.xlane.f32.xlu0 %v5088_v61 }
0x1e44   :  { %v4878_v63 = vpop.permute.xlu0 %4877 }
0x1e45   :  { %6089 = vmatmul.msk.f32.vlgmr.msrb.gmra.mxu1 %vm116_vm1, %v4878_v63 }
0x1e76   :  { %v5010_v15 = vpop.f32.mrf.mxu2 }
0x1e77   :  { %v5097_v33 = vsel %vm116_vm1, %v5010_v15, -inf }
0x1e78   :  { %5098 = vmax.xlane.f32.xlu1 %v5097_v33 }
0x1e7c   :  { %v4962_v55 = vpop.f32.mrf.mxu0 }
0x1e7d   :  { %v5091_v49 = vsel %vm116_vm1, %v4962_v55, -inf }
0x1e7e   :  { %5092 = vmax.xlane.f32.xlu2 %v5091_v49 }
0x1e7f   :  { %v5087_v26 = vpop.xlane.xlu1 %5086 }
0x1e80   :  { %v5109_v12 = vsub.f32 %v4914_v30, %v5087_v26 }
0x1e82   :  { %v5117_v46 = vmul.f32 1.442695, %v5109_v12 }
0x1e84   :  { %6477 = vpow2.f32 %v5117_v46 }
0x1e8a   :  { %v8158_v44 = vpop.eup %6477 }
0x1e8b   :  { %v5133_v6 = vsel %vm116_vm1, %v8158_v44, 0.0 }
0x1e8c   :  { %5134 = vadd.xlane.f32.xlu0 %v5133_v6  ;;  %v5058_v27 = vpop.f32.mrf.mxu0 }
0x1e8d   :  { %v5103_v18 = vsel %vm116_vm1, %v5058_v27, -inf }
0x1e8e   :  { %5104 = vmax.xlane.f32.xlu1 %v5103_v18 }
0x1ea7   :  { %6229 = vrot.lane.b32.xlu1 %v6228_v39, %s6548_s30 }
0x1eb4   :  { %v5090_v7 = vpop.xlane.xlu0 %5089 }
0x1eb5   :  { %v5110_v53 = vsub.f32 %v4938_v23, %v5090_v7 }
0x1eb7   :  { %v5119_v36 = vmul.f32 1.442695, %v5110_v53 }
0x1eb8   :  { %v8165_v41 = vpop.f32.mrf.mxu3 }
0x1eb9   :  { %v5100_v9 = vsel %vm116_vm1, %v8165_v41, -inf  ;;  %6479 = vpow2.f32 %v5119_v36 }
0x1eba   :  { %v8169_v11 = vpop.f32.mrf.mxu1  ;;  %5101 = vmax.xlane.f32.xlu0 %v5100_v9 }
0x1ebb   :  { %v5094_v32 = vsel %vm116_vm1, %v8169_v11, -inf }
0x1ebc   :  { %5095 = vmax.xlane.f32.xlu2 %v5094_v32 }
0x1ebf   :  { %v8177_v28 = vpop.eup %6479 }
0x1ec0   :  { %v5136_v3 = vsel %vm116_vm1, %v8177_v28, 0.0 }
0x1ec2   :  { %v8173_v60 = vpop.f32.mrf.mxu1 }
0x1ec3   :  { %v5106_v5 = vsel %vm116_vm1, %v8173_v60, -inf }
0x1ec4   :  { %5107 = vmax.xlane.f32.xlu2 %v5106_v5 }
0x1ecc   :  { %5137 = vadd.xlane.f32.xlu2 %v5136_v3 }
0x1ece   :  { %6234 = vrot.lane.b32.xlu0 %v6233_v25, %s6548_s30 }
0x1eeb   :  { %v5099_v50 = vpop.xlane.xlu1 %5098 }
0x1eec   :  { %v5113_v54 = vsub.f32 %v5010_v15, %v5099_v50 }
0x1eee   :  { %v5125_v10 = vmul.f32 1.442695, %v5113_v54 }
0x1ef0   :  { %6481 = vpow2.f32 %v5125_v10 }
0x1ef1   :  { %v5093_v37 = vpop.xlane.xlu2 %5092 }
0x1ef2   :  { %v5111_v59 = vsub.f32 %v4962_v55, %v5093_v37 }
0x1ef4   :  { %v5121_v62 = vmul.f32 1.442695, %v5111_v59 }
0x1ef6   :  { %v8184_v17 = vpop.eup %6481  ;;  %6483 = vpow2.f32 %v5121_v62 }
0x1ef7   :  { %v5145_v13 = vsel %vm116_vm1, %v8184_v17, 0.0 }
0x1ef8   :  { %5146 = vadd.xlane.f32.xlu0 %v5145_v13 }
0x1efc   :  { %v8188_v21 = vpop.eup %6483 }
0x1efd   :  { %v5139_v24 = vsel %vm116_vm1, %v8188_v21, 0.0 }
0x1efe   :  { %5140 = vadd.xlane.f32.xlu1 %v5139_v24 }
0x1eff   :  { %v5135_v14 = vpop.xlane.xlu0 %5134 }
0x1f00   :  { %6485 = vrcp.f32 %v5135_v14  ;;  %v5168_v2 = vand.u32 2147483648, %v5135_v14  ;;  %v5166_v38 = vand.u32 2147483647, %v5135_v14  ;;  %vm5162_vm2 = vweird.f32 %v5135_v14 }
0x1f01   :  { %v5105_v19 = vpop.xlane.xlu1 %5104 }
0x1f02   :  { %v5115_v8 = vsub.f32 %v5058_v27, %v5105_v19  ;;  %v5169_v52 = vor.u32 1.1754944e-38, %v5168_v2  ;;  %vm5167_vm4 = vcmp.eq.f32.partialorder %v5166_v38, 8.507059e+37 }
0x1f04   :  { %v5129_v56 = vmul.f32 1.442695, %v5115_v8 }
0x1f06   :  { %v6486_v29 = vpop.eup %6485  ;;  %6487 = vpow2.f32 %v5129_v56 }
0x1f07   :  { %v5158_v57 = vmul.f32 %v6486_v29, %v5135_v14  ;;  %vm5163_vm15 = vweird.f32 %v6486_v29 }
0x1f08   :  { %vm5164_vm3 = vmor %vm5162_vm2, %vm5163_vm15 }
0x1f09   :  { %v5159_v1 = vsub.f32 1.0, %v5158_v57 }
0x1f0b   :  { %v5160_v51 = vmul.f32 %v6486_v29, %v5159_v1 }
0x1f0c   :  { %v8192_v22 = vpop.eup %6487 }
0x1f0d   :  { %v5161_v40 = vadd.f32 %v6486_v29, %v5160_v51  ;;  %v5151_v35 = vsel %vm116_vm1, %v8192_v22, 0.0 }
0x1f0e   :  { %5152 = vadd.xlane.f32.xlu0 %v5151_v35 }
0x1f0f   :  { %v5165_v30 = vsel %vm5164_vm3, %v6486_v29, %v5161_v40 }
0x1f10   :  { %v5170_v31 = vsel %vm5167_vm4, %v5169_v52, %v5165_v30 }
0x1f11   :  { %v5171_v48 = vmul.f32 %v8158_v44, %v5170_v31 }
0x1f13   :  { %6090 = vst.msk [vmem:[%s8396_s7 + $0x40] sm:$0xff] %vm116_vm1, %v5171_v48 }
0x1f19   :  { %v6230_v0 = vpop.permute.xlu1 %6229 }
0x1f1a   :  { %v6232_v16 = vunpack.i.h.bf16 %v6230_v0  ;;  %v6231_v23 = vunpack.i.l.bf16 %v6230_v0 }
0x1f1c   :  { %5307 = vmatpush.msrb.mxu2 %v6231_v23  ;;  %5359 = vmatpush.msra.mxu0 %v6232_v16 }
0x1f1d   :  { %6098 = vmatmul.msk.f32.vlgmr.msrb.gmra.mxu2 %vm116_vm1, %v5171_v48 }
0x1f22   :  { %5468 = vrot.lane.b32.xlu0 %v8142_v45, %s6548_s30 }
0x1f2d   :  { %v5102_v61 = vpop.xlane.xlu0 %5101 }
0x1f2e   :  { %v5114_v63 = vsub.f32 %v8165_v41, %v5102_v61 }
0x1f2f   :  { %v5096_v15 = vpop.xlane.xlu2 %5095 }
0x1f30   :  { %v5127_v33 = vmul.f32 1.442695, %v5114_v63  ;;  %v5112_v55 = vsub.f32 %v8169_v11, %v5096_v15 }
0x1f32   :  { %6489 = vpow2.f32 %v5127_v33  ;;  %v5123_v49 = vmul.f32 1.442695, %v5112_v55 }
0x1f34   :  { %6491 = vpow2.f32 %v5123_v49 }
0x1f37   :  { %v5108_v26 = vpop.xlane.xlu2 %5107 }
0x1f38   :  { %v8206_v12 = vpop.eup %6489  ;;  %v5116_v46 = vsub.f32 %v8173_v60, %v5108_v26 }
0x1f39   :  { %v5148_v44 = vsel %vm116_vm1, %v8206_v12, 0.0 }
0x1f3a   :  { %v8211_v6 = vpop.eup %6491  ;;  %v5131_v45 = vmul.f32 1.442695, %v5116_v46  ;;  %5149 = vadd.xlane.f32.xlu2 %v5148_v44 }
0x1f3b   :  { %v5142_v27 = vsel %vm116_vm1, %v8211_v6, 0.0 }
0x1f3c   :  { %6493 = vpow2.f32 %v5131_v45  ;;  %5143 = vadd.xlane.f32.xlu1 %v5142_v27 }
0x1f3f   :  { %v5138_v18 = vpop.xlane.xlu2 %5137 }
0x1f40   :  { %6495 = vrcp.f32 %v5138_v18  ;;  %v6235_v39 = vpop.permute.xlu0 %6234  ;;  %v5183_v60 = vand.u32 2147483648, %v5138_v18  ;;  %v5181_v3 = vand.u32 2147483647, %v5138_v18  ;;  %vm5177_vm6 = vweird.f32 %v5138_v18 }
0x1f41   :  { %v6237_v7 = vunpack.i.h.bf16 %v6235_v39  ;;  %v6236_v41 = vunpack.i.l.bf16 %v6235_v39 }
0x1f42   :  { %v8215_v9 = vpop.eup %6493  ;;  %v5184_v50 = vor.u32 1.1754944e-38, %v5183_v60  ;;  %vm5182_vm8 = vcmp.eq.f32.partialorder %v5181_v3, 8.507059e+37 }
0x1f43   :  { %5333 = vmatpush.msra.mxu3 %v6236_v41  ;;  %5411 = vmatpush.msra.mxu2 %v6237_v7  ;;  %v5154_v53 = vsel %vm116_vm1, %v8215_v9, 0.0 }
0x1f44   :  { %5155 = vadd.xlane.f32.xlu2 %v5154_v53 }
0x1f46   :  { %v6496_v11 = vpop.eup %6495 }
0x1f47   :  { %v5173_v32 = vmul.f32 %v6496_v11, %v5138_v18  ;;  %vm5178_vm5 = vweird.f32 %v6496_v11 }
0x1f48   :  { %vm5179_vm7 = vmor %vm5177_vm6, %vm5178_vm5 }
0x1f49   :  { %v5174_v36 = vsub.f32 1.0, %v5173_v32 }
0x1f4b   :  { %v5175_v5 = vmul.f32 %v6496_v11, %v5174_v36 }
0x1f4d   :  { %v5176_v25 = vadd.f32 %v6496_v11, %v5175_v5 }
0x1f4f   :  { %v5180_v54 = vsel %vm5179_vm7, %v6496_v11, %v5176_v25 }
0x1f50   :  { %v5185_v10 = vsel %vm5182_vm8, %v5184_v50, %v5180_v54 }
0x1f51   :  { %v5186_v37 = vmul.f32 %v8177_v28, %v5185_v10 }
0x1f53   :  { %6091 = vst.msk [vmem:[%s8396_s7 + $0x48] sm:$0xff] %vm116_vm1, %v5186_v37  ;;  %6099 = vmatmul.msk.f32.vlgmr.msra.gmra.mxu3 %vm116_vm1, %v5186_v37 }
0x1f55   :  { %5442 = vrot.lane.b32.xlu1 %v8134_v42, %s6548_s30 }
0x1f5c   :  { %6239 = vrot.lane.b32.xlu2 %v6238_v43, %s6548_s30 }
0x1f6b   :  { %v5147_v59 = vpop.xlane.xlu0 %5146 }
0x1f6c   :  { %6497 = vrcp.f32 %v5147_v59  ;;  %v5228_v14 = vand.u32 2147483648, %v5147_v59  ;;  %v5226_v56 = vand.u32 2147483647, %v5147_v59  ;;  %vm5222_vm10 = vweird.f32 %v5147_v59 }
0x1f6e   :  { %v5229_v42 = vor.u32 1.1754944e-38, %v5228_v14  ;;  %vm5227_vm12 = vcmp.eq.f32.partialorder %v5226_v56, 8.507059e+37 }
0x1f71   :  { %v5141_v62 = vpop.xlane.xlu1 %5140 }
0x1f72   :  { %6499 = vrcp.f32 %v5141_v62  ;;  %v6498_v28 = vpop.eup %6497  ;;  %v5198_v4 = vand.u32 2147483648, %v5141_v62  ;;  %v5196_v51 = vand.u32 2147483647, %v5141_v62  ;;  %vm5192_vm15 = vweird.f32 %v5141_v62 }
0x1f73   :  { %v5218_v13 = vmul.f32 %v6498_v28, %v5147_v59  ;;  %vm5223_vm9 = vweird.f32 %v6498_v28 }
0x1f74   :  { %vm5224_vm11 = vmor %vm5222_vm10, %vm5223_vm9  ;;  %v5199_v35 = vor.u32 1.1754944e-38, %v5198_v4  ;;  %vm5197_vm3 = vcmp.eq.f32.partialorder %v5196_v51, 8.507059e+37 }
0x1f75   :  { %v5219_v24 = vsub.f32 1.0, %v5218_v13 }
0x1f77   :  { %v5220_v8 = vmul.f32 %v6498_v28, %v5219_v24 }
0x1f78   :  { %v6500_v19 = vpop.eup %6499 }
0x1f79   :  { %v5188_v29 = vmul.f32 %v6500_v19, %v5141_v62  ;;  %v5221_v57 = vadd.f32 %v6498_v28, %v5220_v8  ;;  %vm5193_vm14 = vweird.f32 %v6500_v19 }
0x1f7a   :  { %vm5194_vm2 = vmor %vm5192_vm15, %vm5193_vm14 }
0x1f7b   :  { %v5189_v1 = vsub.f32 1.0, %v5188_v29  ;;  %v5225_v34 = vsel %vm5224_vm11, %v6498_v28, %v5221_v57  ;;  %v4787_v29 = vld [vmem:[%s8391_s2 + $0x218] sm:$0xff] }
0x1f7c   :  { %v5230_v43 = vsel %vm5227_vm12, %v5229_v42, %v5225_v34 }
0x1f7d   :  { %v5190_v2 = vmul.f32 %v6500_v19, %v5189_v1  ;;  %v5231_v38 = vmul.f32 %v8184_v17, %v5230_v43 }
0x1f7f   :  { %v5191_v40 = vadd.f32 %v6500_v19, %v5190_v2  ;;  %6094 = vst.msk [vmem:[%s8396_s7 + $0x60] sm:$0xff] %vm116_vm1, %v5231_v38  ;;  %6102 = vmatmul.msk.f32.vlgmr.msra.gmra.mxu2 %vm116_vm1, %v5231_v38 }
0x1f81   :  { %v5195_v52 = vsel %vm5194_vm2, %v6500_v19, %v5191_v40  ;;  %v5153_v30 = vpop.xlane.xlu0 %5152 }
0x1f82   :  { %v5200_v31 = vsel %vm5197_vm3, %v5199_v35, %v5195_v52  ;;  %6501 = vrcp.f32 %v5153_v30  ;;  %v5258_v23 = vand.u32 2147483648, %v5153_v30  ;;  %v5256_v63 = vand.u32 2147483647, %v5153_v30  ;;  %v4789_v35 = vld [vmem:[%s8391_s2 + $0x228] sm:$0xff] }
0x1f83   :  { %v5201_v48 = vmul.f32 %v8188_v21, %v5200_v31  ;;  %vm5252_vm5 = vweird.f32 %v5153_v30  ;;  %v4790_v31 = vld [vmem:[%s8391_s2 + $0x230] sm:$0xff] }
0x1f84   :  { %v5259_v33 = vor.u32 1.1754944e-38, %v5258_v23  ;;  %vm5257_vm7 = vcmp.eq.f32.partialorder %v5256_v63, 8.507059e+37 }
0x1f85   :  { %6092 = vst.msk [vmem:[%s8396_s7 + $0x50] sm:$0xff] %vm116_vm1, %v5201_v48  ;;  %6100 = vmatmul.msk.f32.vlgmr.msra.gmra.mxu0 %vm116_vm1, %v5201_v48 }
0x1f88   :  { %v6502_v17 = vpop.eup %6501 }
0x1f89   :  { %v5248_v0 = vmul.f32 %v6502_v17, %v5153_v30  ;;  %vm5253_vm4 = vweird.f32 %v6502_v17 }
0x1f8a   :  { %vm5254_vm6 = vmor %vm5252_vm5, %vm5253_vm4 }
0x1f8b   :  { %v5249_v16 = vsub.f32 1.0, %v5248_v0 }
0x1f8d   :  { %v5250_v61 = vmul.f32 %v6502_v17, %v5249_v16 }
0x1f8f   :  { %v5251_v15 = vadd.f32 %v6502_v17, %v5250_v61 }
0x1f91   :  { %v5255_v55 = vsel %vm5254_vm6, %v6502_v17, %v5251_v15 }
0x1f92   :  { %v5260_v21 = vsel %vm5257_vm7, %v5259_v33, %v5255_v55  ;;  %v6276_v55 = vld [vmem:[%s8391_s2 + $0x238] ss:$0 sm:$0xff] }
0x1f93   :  { %v8244_v49 = vmul.f32 %v8192_v22, %v5260_v21 }
0x1f94   :  { %v5469_v57 = vpop.permute.xlu0 %5468 }
0x1f95   :  { %6096 = vst.msk [vmem:[%s8396_s7 + $0x70] sm:$0xff] %vm116_vm1, %v8244_v49 }
0x1fa0   :  { %v5309_v38 = vpop.f32.mrf.mxu2 }
0x1fad   :  { %v5150_v26 = vpop.xlane.xlu2 %5149 }
0x1fae   :  { %6503 = vrcp.f32 %v5150_v26  ;;  %v5243_v41 = vand.u32 2147483648, %v5150_v26  ;;  %v5241_v53 = vand.u32 2147483647, %v5150_v26  ;;  %vm5237_vm9 = vweird.f32 %v5150_v26 }
0x1faf   :  { %v5144_v46 = vpop.xlane.xlu1 %5143 }
0x1fb0   :  { %6505 = vrcp.f32 %v5144_v46  ;;  %v5213_v32 = vand.u32 2147483648, %v5144_v46  ;;  %v5211_v5 = vand.u32 2147483647, %v5144_v46  ;;  %v5244_v3 = vor.u32 1.1754944e-38, %v5243_v41 }
0x1fb1   :  { %vm5242_vm12 = vcmp.eq.f32.partialorder %v5241_v53, 8.507059e+37  ;;  %vm5207_vm14 = vweird.f32 %v5144_v46 }
0x1fb2   :  { %v5214_v37 = vor.u32 1.1754944e-38, %v5213_v32  ;;  %vm5212_vm2 = vcmp.eq.f32.partialorder %v5211_v5, 8.507059e+37 }
0x1fb4   :  { %v6504_v44 = vpop.eup %6503 }
0x1fb5   :  { %v5233_v45 = vmul.f32 %v6504_v44, %v5150_v26  ;;  %vm5238_vm8 = vweird.f32 %v6504_v44 }
0x1fb6   :  { %v6506_v27 = vpop.eup %6505  ;;  %vm5239_vm11 = vmor %vm5237_vm9, %vm5238_vm8 }
0x1fb7   :  { %v5234_v18 = vsub.f32 1.0, %v5233_v45  ;;  %v5203_v39 = vmul.f32 %v6506_v27, %v5144_v46  ;;  %v5156_v7 = vpop.xlane.xlu2 %5155  ;;  %vm5208_vm10 = vweird.f32 %v6506_v27 }
0x1fb8   :  { %6507 = vrcp.f32 %v5156_v7  ;;  %vm5209_vm15 = vmor %vm5207_vm14, %vm5208_vm10  ;;  %v5271_v1 = vand.u32 2147483647, %v5156_v7  ;;  %vm5267_vm4 = vweird.f32 %v5156_v7 }
0x1fb9   :  { %v5235_v22 = vmul.f32 %v6504_v44, %v5234_v18  ;;  %v5204_v11 = vsub.f32 1.0, %v5203_v39 }
0x1fba   :  { %vm5272_vm6 = vcmp.eq.f32.partialorder %v5271_v1, 8.507059e+37 }
0x1fbb   :  { %v5236_v36 = vadd.f32 %v6504_v44, %v5235_v22  ;;  %v5205_v60 = vmul.f32 %v6506_v27, %v5204_v11 }
0x1fbd   :  { %v5240_v25 = vsel %vm5239_vm11, %v6504_v44, %v5236_v36  ;;  %v5206_v50 = vadd.f32 %v6506_v27, %v5205_v60 }
0x1fbe   :  { %v6508_v54 = vpop.eup %6507  ;;  %v5245_v10 = vsel %vm5242_vm12, %v5244_v3, %v5240_v25 }
0x1fbf   :  { %v5246_v59 = vmul.f32 %v8206_v12, %v5245_v10  ;;  %v5210_v62 = vsel %vm5209_vm15, %v6506_v27, %v5206_v50  ;;  %v5263_v28 = vmul.f32 %v6508_v54, %v5156_v7  ;;  %v6240_v13 = vpop.permute.xlu2 %6239  ;;  %v5273_v12 = vand.u32 2147483648, %v5156_v7 }
0x1fc0   :  { %v5215_v24 = vsel %vm5212_vm2, %v5214_v37, %v5210_v62  ;;  %v6242_v14 = vunpack.i.h.bf16 %v6240_v13  ;;  %v6241_v19 = vunpack.i.l.bf16 %v6240_v13  ;;  %vm5268_vm3 = vweird.f32 %v6508_v54  ;;  %v5672_v62 = vld [vmem:[%s8390_s1 + $0x6b] sm:$0xff] }
0x1fc1   :  { %6095 = vst.msk [vmem:[%s8396_s7 + $0x68] sm:$0xff] %vm116_vm1, %v5246_v59  ;;  %v5216_v8 = vmul.f32 %v8211_v6, %v5215_v24  ;;  %v5264_v56 = vsub.f32 1.0, %v5263_v28  ;;  %vm5269_vm5 = vmor %vm5267_vm4, %vm5268_vm3  ;;  %v5274_v34 = vor.u32 1.1754944e-38, %v5273_v12  ;;  %v5671_v28 = vld [vmem:[%s8390_s1 + $0x63] sm:$0xff] }
0x1fc2   :  { %5385 = vmatpush.msra.mxu1 %v6241_v19  ;;  %5437 = vmatpush.msrb.mxu3 %v6242_v14  ;;  %v5715_v19 = vld [vmem:[%s8391_s2 + $0x273] sm:$0xff] }
0x1fc3   :  { %6093 = vst.msk [vmem:[%s8396_s7 + $0x58] sm:$0xff] %vm116_vm1, %v5216_v8  ;;  %v5265_v42 = vmul.f32 %v6508_v54, %v5264_v56  ;;  %6101 = vmatmul.msk.f32.vlgmr.msra.gmra.mxu1 %vm116_vm1, %v5216_v8  ;;  %6103 = vmatmul.msk.f32.vlgmr.msrb.gmra.mxu3 %vm116_vm1, %v5246_v59  ;;  %v5673_v59 = vld [vmem:[%s8390_s1 + $0x73] sm:$0xff]  ;;  %v5714_v8 = vld [vmem:[%s8391_s2 + $0x26b] sm:$0xff]  ;;  %v5713_v56 = vld [vmem:[%s8391_s2 + $0x263] sm:$0xff] }
0x1fc4   :  { %5489 = vmatpush.msrb.mxu1 %v5469_v57  ;;  %5544 = vmatpush.msra.mxu3 %v4787_v29  ;;  %v5712_v57 = vld [vmem:[%s8391_s2 + $0x25b] sm:$0xff] }
0x1fc5   :  { %v5266_v6 = vadd.f32 %v6508_v54, %v5265_v42 }
0x1fc6   :  { %5604 = vmatpush.msra.mxu1 %v4790_v31  ;;  %5732 = vmatpush.msrb.mxu3 %v5715_v19 }
0x1fc7   :  { %v5270_v4 = vsel %vm5269_vm5, %v6508_v54, %v5266_v6  ;;  %v5443_v43 = vpop.permute.xlu1 %5442  ;;  %v5711_v6 = vld [vmem:[%s8391_s2 + $0x253] sm:$0xff] }
0x1fc8   :  { %v5275_v2 = vsel %vm5272_vm6, %v5274_v34, %v5270_v4  ;;  %5463 = vmatpush.msrb.mxu0 %v5443_v43  ;;  %5733 = vmatpush.msrb.mxu3 %v5714_v8 }
0x1fc9   :  { %v5276_v51 = vmul.f32 %v8215_v9, %v5275_v2  ;;  %6104 = vmatmul.msk.f32.vlgmr.msrb.gmra.mxu0 %vm116_vm1, %v8244_v49  ;;  %v4788_v9 = vld [vmem:[%s8391_s2 + $0x220] sm:$0xff] }
0x1fca   :  { %5515 = vmatpush.msrb.mxu2 %v4788_v9  ;;  %5573 = vmatpush.msra.mxu0 %v4789_v35  ;;  %v6277_v9 = vld [vmem:[%s8391_s2 + $0x239] ss:$0 sm:$0xff] }
0x1fcb   :  { %6097 = vst.msk [vmem:[%s8396_s7 + $0x78] sm:$0xff] %vm116_vm1, %v5276_v51  ;;  %6105 = vmatmul.msk.f32.vlgmr.msrb.gmra.mxu1 %vm116_vm1, %v5276_v51  ;;  %6108 = vmatmul.msk.f32.vlgmr.msra.gmra.mxu3 %vm116_vm1, %v5309_v38 }
0x1fcc   :  { %5734 = vmatpush.msrb.mxu3 %v5713_v56 }
0x1fce   :  { %5735 = vmatpush.msrb.mxu3 %v5712_v57 }
0x1fd0   :  { %5736 = vmatpush.msrb.mxu3 %v5711_v6 }
0x1fd6   :  { %v5335_v40 = vpop.f32.mrf.mxu3 }
0x1fd7   :  { %6109 = vmatmul.msk.f32.gmra.mxu3 %vm116_vm1, %v5335_v40 }
0x2002   :  { %v5361_v52 = vpop.f32.mrf.mxu0  ;;  %v5413_v30 = vpop.f32.mrf.mxu2 }
0x2003   :  { %6106 = vmatmul.msk.f32.vlgmr.msrb.gmra.mxu2 %vm116_vm1, %v5361_v52  ;;  %6110 = vmatmul.msk.f32.vlgmr.msra.gmra.mxu0 %vm116_vm1, %v5413_v30  ;;  %v6278_v30 = vld [vmem:[%s8391_s2 + $0x23a] ss:$0 sm:$0xff] }
0x2040   :  { %v5387_v48 = vpop.f32.mrf.mxu1 }
0x2041   :  { %6107 = vmatmul.msk.f32.gmra.mxu2 %vm116_vm1, %v5387_v48 }
0x2046   :  { %v5439_v17 = vpop.f32.mrf.mxu3  ;;  %v5465_v0 = vpop.f32.mrf.mxu0 }
0x2047   :  { %6111 = vmatmul.msk.f32.gmra.mxu0 %vm116_vm1, %v5439_v17  ;;  %6112 = vmatmul.msk.f32.vlgmr.msra.gmra.mxu1 %vm116_vm1, %v5465_v0 }
0x2048   :  { %v5491_v16 = vpop.f32.mrf.mxu1 }
0x204e   :  { %v5546_v61 = vpop.f32.mrf.mxu3 }
0x204f   :  { %6113 = vmatmul.msk.f32.gmra.mxu1 %vm116_vm1, %v5491_v16 }
0x205a   :  { %v5549_v46 = vpop.f32.mrf.mxu3 }
0x2080   :  { %v5575_v15 = vpop.f32.mrf.mxu0 }
0x2086   :  { %v5517_v23 = vpop.f32.mrf.mxu2 }
0x2087   :  { %v5547_v63 = vadd.f32 %v5546_v61, %v5517_v23 }
0x2089   :  { %v5581_v33 = vadd.f32 %v5575_v15, %v5547_v63 }
0x20c4   :  { %v5520_v21 = vpop.f32.mrf.mxu2  ;;  %v5606_v49 = vpop.f32.mrf.mxu1 }
0x20c5   :  { %v5612_v26 = vadd.f32 %v5606_v49, %v5581_v33  ;;  %v5550_v44 = vadd.f32 %v5549_v46, %v5520_v21  ;;  %v5578_v18 = vpop.f32.mrf.mxu0  ;;  %v5709_v21 = vld [vmem:[%s8391_s2 + $0x243] sm:$0xff]  ;;  %v5708_v49 = vld [vmem:[%s8391_s2 + $0x23b] sm:$0xff] }
0x20c7   :  { %v5615_v45 = vadd.f32 %v6276_v55, %v5612_v26  ;;  %v5582_v39 = vadd.f32 %v5578_v18, %v5550_v44  ;;  %v6279_v26 = vld [vmem:[%s8390_s1 + $0x83] ss:$0 sm:$0xff] }
0x20c9   :  { %v5617_v27 = vadd.f32 %v5615_v45, %v8086_v58 }
0x20cb   :  { %v5621_v7 = vsel %vm30_vm0, %v5617_v27, 0.0 }
0x20cc   :  { %v5609_v41 = vpop.f32.mrf.mxu1  ;;  %5622 = vadd.xlane.f32.xlu1 %v5621_v7  ;;  %v6280_v7 = vld [vmem:[%s8391_s2 + $0x27b] ss:$0 sm:$0xff] }
0x20cd   :  { %v5613_v22 = vadd.f32 %v5609_v41, %v5582_v39 }
0x20cf   :  { %v5616_v53 = vadd.f32 %v6276_v55, %v5613_v22  ;;  %v5710_v55 = vld [vmem:[%s8391_s2 + $0x24b] sm:$0xff] }
0x20d0   :  { %5737 = vmatpush.msrb.mxu3 %v5710_v55 }
0x20d1   :  { %v5618_v11 = vadd.f32 %v5616_v53, %v8091_v47  ;;  %v5674_v47 = vld [vmem:[%s8390_s1 + $0x7b] sm:$0xff] }
0x20d2   :  { %5695 = vmatpush.msra.mxu2 %v5674_v47  ;;  %5738 = vmatpush.msrb.mxu3 %v5709_v21 }
0x20d3   :  { %v5624_v32 = vsel %vm30_vm0, %v5618_v11, 0.0 }
0x20d4   :  { %5625 = vadd.xlane.f32.xlu0 %v5624_v32  ;;  %5696 = vmatpush.msra.mxu2 %v5673_v59 }
0x20d5   :  { %5739 = vmatpush.msrb.mxu3 %v5708_v49 }
0x20d6   :  { %5697 = vmatpush.msra.mxu2 %v5672_v62 }
0x20d8   :  { %5698 = vmatpush.msra.mxu2 %v5671_v28  ;;  %v5804_v28 = vld [vmem:[%s8391_s2 + $0x98] sm:$0xff] }
0x20d9   :  { %5823 = vmatpush.msrb.mxu0 %v5804_v28 }
0x213f   :  { %v5623_v36 = vpop.xlane.xlu1 %5622 }
0x2140   :  { %v5627_v60 = vmul.f32 %v5623_v36, %v6843_v20 }
0x2142   :  { %v5629_v5 = vsub.f32 %v5617_v27, %v5627_v60 }
0x2144   :  { %v5631_v3 = vmul.f32 %v5629_v5, %v5629_v5 }
0x2146   :  { %v5633_v58 = vsel %vm30_vm0, %v5631_v3, 0.0 }
0x2147   :  { %5634 = vadd.xlane.f32.xlu2 %v5633_v58  ;;  %v5626_v25 = vpop.xlane.xlu0 %5625 }
0x2148   :  { %v5628_v50 = vmul.f32 %v5626_v25, %v6843_v20 }
0x214a   :  { %v5630_v54 = vsub.f32 %v5618_v11, %v5628_v50 }
0x214c   :  { %v5632_v10 = vmul.f32 %v5630_v54, %v5630_v54 }
0x214e   :  { %v5636_v37 = vsel %vm30_vm0, %v5632_v10, 0.0 }
0x214f   :  { %5637 = vadd.xlane.f32.xlu1 %v5636_v37 }
0x21ba   :  { %v5635_v13 = vpop.xlane.xlu2 %5634 }
0x21bb   :  { %v5639_v24 = vmul.f32 %v5635_v13, %v6843_v20  ;;  %v5803_v13 = vld [vmem:[%s8391_s2 + $0x90] sm:$0xff] }
0x21bc   :  { %5824 = vmatpush.msrb.mxu0 %v5803_v13 }
0x21bd   :  { %v5641_v14 = vadd.f32 1e-05, %v5639_v24  ;;  %v5802_v24 = vld [vmem:[%s8391_s2 + $0x88] sm:$0xff] }
0x21be   :  { %5825 = vmatpush.msrb.mxu0 %v5802_v24 }
0x21bf   :  { %6509 = vrsqrt.f32 %v5641_v14  ;;  %vm5649_vm7 = vweird.f32 %v5641_v14 }
0x21c2   :  { %v5638_v29 = vpop.xlane.xlu1 %5637 }
0x21c3   :  { %v5640_v12 = vmul.f32 %v5638_v29, %v6843_v20 }
0x21c5   :  { %v6510_v42 = vpop.eup %6509  ;;  %v5642_v1 = vadd.f32 1e-05, %v5640_v12 }
0x21c6   :  { %v5644_v34 = vmul.f32 %v6510_v42, %v5641_v14  ;;  %vm5650_vm1 = vweird.f32 %v6510_v42  ;;  %v5801_v14 = vld [vmem:[%s8391_s2 + $0x80] sm:$0xff] }
0x21c7   :  { %6511 = vrsqrt.f32 %v5642_v1  ;;  %vm5651_vm8 = vmor %vm5649_vm7, %vm5650_vm1  ;;  %vm5659_vm10 = vweird.f32 %v5642_v1  ;;  %5826 = vmatpush.msrb.mxu0 %v5801_v14 }
0x21c8   :  { %v5645_v4 = vmul.f32 %v6510_v42, %v5644_v34 }
0x21ca   :  { %v5646_v43 = vmul.f32 0.5, %v5645_v4 }
0x21cc   :  { %v5647_v2 = vsub.f32 1.5, %v5646_v43 }
0x21cd   :  { %v6512_v51 = vpop.eup %6511 }
0x21ce   :  { %v5648_v38 = vmul.f32 %v6510_v42, %v5647_v2  ;;  %v5654_v40 = vmul.f32 %v6512_v51, %v5642_v1  ;;  %vm5660_vm9 = vweird.f32 %v6512_v51 }
0x21cf   :  { %vm5661_vm11 = vmor %vm5659_vm10, %vm5660_vm9 }
0x21d0   :  { %v5652_v35 = vsel %vm5651_vm8, %v6510_v42, %v5648_v38  ;;  %v5655_v52 = vmul.f32 %v6512_v51, %v5654_v40  ;;  %v6281_v38 = vld [vmem:[%s8391_s2 + $0x27c] ss:$0 sm:$0xff] }
0x21d1   :  { %v5663_v31 = vmul.f32 %v5652_v35, %v5629_v5 }
0x21d2   :  { %v5656_v48 = vmul.f32 0.5, %v5655_v52 }
0x21d3   :  { %v5666_v17 = vmul.f32 %v6277_v9, %v5663_v31 }
0x21d4   :  { %v5657_v0 = vsub.f32 1.5, %v5656_v48 }
0x21d5   :  { %v5669_v16 = vadd.f32 %v6278_v30, %v5666_v17 }
0x21d6   :  { %v5658_v23 = vmul.f32 %v6512_v51, %v5657_v0 }
0x21d7   :  { %6114 = vmatmul.msk.f32.vlgmr.msra.gmra.mxu2 %vm30_vm0, %v5669_v16 }
0x21d8   :  { %v5662_v61 = vsel %vm5661_vm11, %v6512_v51, %v5658_v23 }
0x21d9   :  { %v5664_v63 = vmul.f32 %v5662_v61, %v5630_v54 }
0x21db   :  { %v5667_v15 = vmul.f32 %v6277_v9, %v5664_v63 }
0x21dd   :  { %v5670_v33 = vadd.f32 %v6278_v30, %v5667_v15 }
0x21df   :  { %6115 = vmatmul.msk.f32.gmra.mxu2 %vm30_vm0, %v5670_v33 }
0x225a   :  { %v5700_v46 = vpop.f32.mrf.mxu2 }
0x225b   :  { %v5701_v44 = vadd.f32 %v6279_v26, %v5700_v46 }
0x225d   :  { %v5706_v45 = vmax.f32 %v5701_v44, 0.0 }
0x225f   :  { %6116 = vmatmul.msk.f32.vlgmr.msrb.gmra.mxu3 %vm962_vm13, %v5706_v45 }
0x2262   :  { %v5703_v27 = vpop.f32.mrf.mxu2 }
0x2263   :  { %v5704_v18 = vadd.f32 %v6279_v26, %v5703_v27 }
0x2265   :  { %v5707_v39 = vmax.f32 %v5704_v18, 0.0 }
0x2267   :  { %6117 = vmatmul.msk.f32.gmra.mxu3 %vm962_vm13, %v5707_v39 }
0x22e2   :  { %v5741_v41 = vpop.f32.mrf.mxu3 }
0x22e3   :  { %v5742_v22 = vadd.f32 %v6280_v7, %v5741_v41 }
0x22e5   :  { %v5747_v53 = vadd.f32 %v5742_v22, %v5669_v16 }
0x22e7   :  { %v5751_v11 = vsel %vm30_vm0, %v5747_v53, 0.0 }
0x22e8   :  { %5752 = vadd.xlane.f32.xlu0 %v5751_v11 }
0x22ea   :  { %v5744_v32 = vpop.f32.mrf.mxu3 }
0x22eb   :  { %v5745_v36 = vadd.f32 %v6280_v7, %v5744_v32 }
0x22ed   :  { %v5748_v60 = vadd.f32 %v5745_v36, %v5670_v33 }
0x22ef   :  { %v5754_v5 = vsel %vm30_vm0, %v5748_v60, 0.0 }
0x22f0   :  { %5755 = vadd.xlane.f32.xlu2 %v5754_v5 }
0x235b   :  { %v5753_v3 = vpop.xlane.xlu0 %5752 }
0x235c   :  { %v5757_v58 = vmul.f32 %v5753_v3, %v6843_v20 }
0x235e   :  { %v5759_v25 = vsub.f32 %v5747_v53, %v5757_v58 }
0x2360   :  { %v5761_v50 = vmul.f32 %v5759_v25, %v5759_v25 }
0x2362   :  { %v5763_v54 = vsel %vm30_vm0, %v5761_v50, 0.0 }
0x2363   :  { %v5756_v10 = vpop.xlane.xlu2 %5755  ;;  %5764 = vadd.xlane.f32.xlu1 %v5763_v54 }
0x2364   :  { %v5758_v37 = vmul.f32 %v5756_v10, %v6843_v20 }
0x2366   :  { %v5760_v47 = vsub.f32 %v5748_v60, %v5758_v37 }
0x2368   :  { %v5762_v59 = vmul.f32 %v5760_v47, %v5760_v47 }
0x236a   :  { %v5766_v62 = vsel %vm30_vm0, %v5762_v59, 0.0 }
0x236b   :  { %5767 = vadd.xlane.f32.xlu0 %v5766_v62 }
0x23d6   :  { %v5765_v19 = vpop.xlane.xlu1 %5764 }
0x23d7   :  { %v5769_v8 = vmul.f32 %v5765_v19, %v6843_v20 }
0x23d9   :  { %v5771_v56 = vadd.f32 1e-05, %v5769_v8 }
0x23db   :  { %6513 = vrsqrt.f32 %v5771_v56  ;;  %vm5779_vm12 = vweird.f32 %v5771_v56 }
0x23de   :  { %v5768_v29 = vpop.xlane.xlu0 %5767 }
0x23df   :  { %v5770_v12 = vmul.f32 %v5768_v29, %v6843_v20  ;;  %v6282_v20 = vld [vmem:[%s8391_s2 + $0x27d] ss:$0 sm:$0xff]  ;;  %s6551_s2 = smov [#allocation2]  }
0x23e0   :  { %s5840_s8 = sshll.u32 %s6551_s2, 4  ;;  %s5841_s8 = int_to_ptr.vmem [resolvable:$true] %s5840_s8 }
0x23e1   :  { %v6514_v57 = vpop.eup %6513  ;;  %v5772_v42 = vadd.f32 1e-05, %v5770_v12 }
0x23e2   :  { %v5774_v1 = vmul.f32 %v6514_v57, %v5771_v56  ;;  %vm5780_vm13 = vweird.f32 %v6514_v57 }
0x23e3   :  { %6515 = vrsqrt.f32 %v5772_v42  ;;  %vm5781_vm14 = vmor %vm5779_vm12, %vm5780_vm13  ;;  %vm5789_vm2 = vweird.f32 %v5772_v42 }
0x23e4   :  { %v5775_v6 = vmul.f32 %v6514_v57, %v5774_v1 }
0x23e6   :  { %v5776_v34 = vmul.f32 0.5, %v5775_v6 }
0x23e8   :  { %v5777_v4 = vsub.f32 1.5, %v5776_v34 }
0x23e9   :  { %v6516_v43 = vpop.eup %6515 }
0x23ea   :  { %v5778_v2 = vmul.f32 %v6514_v57, %v5777_v4  ;;  %v5784_v51 = vmul.f32 %v6516_v43, %v5772_v42  ;;  %vm5790_vm15 = vweird.f32 %v6516_v43 }
0x23eb   :  { %vm5791_vm3 = vmor %vm5789_vm2, %vm5790_vm15 }
0x23ec   :  { %v5782_v40 = vsel %vm5781_vm14, %v6514_v57, %v5778_v2  ;;  %v5785_v9 = vmul.f32 %v6516_v43, %v5784_v51 }
0x23ed   :  { %v5793_v35 = vmul.f32 %v5782_v40, %v5759_v25 }
0x23ee   :  { %v5786_v52 = vmul.f32 0.5, %v5785_v9 }
0x23ef   :  { %v5796_v30 = vmul.f32 %v6281_v38, %v5793_v35 }
0x23f0   :  { %v5787_v31 = vsub.f32 1.5, %v5786_v52 }
0x23f1   :  { %v5799_v48 = vadd.f32 %v6282_v20, %v5796_v30 }
0x23f2   :  { %v5788_v17 = vmul.f32 %v6516_v43, %v5787_v31 }
0x23f3   :  { %6118 = vmatmul.msk.f32.vlgmr.msrb.gmra.mxu0 %vm30_vm0, %v5799_v48 }
0x23f4   :  { %v5792_v0 = vsel %vm5791_vm3, %v6516_v43, %v5788_v17 }
0x23f5   :  { %v5794_v16 = vmul.f32 %v5792_v0, %v5760_v47 }
0x23f7   :  { %v5797_v23 = vmul.f32 %v6281_v38, %v5794_v16 }
0x23f9   :  { %v5800_v61 = vadd.f32 %v6282_v20, %v5797_v23 }
0x23fb   :  { %6119 = vmatmul.msk.f32.gmra.mxu0 %vm30_vm0, %v5800_v61 }
0x2470   :  { %v5828_v63 = vpop.f32.mrf.mxu0 }
0x2471   :  { %5834 = vst.msk [vmem:[#allocation2] sm:$0xff] %vm30_vm0, %v5828_v63 }
0x2478   :  { %v5831_v15 = vpop.f32.mrf.mxu0 }
0x2479   :  { %5835 = vst.msk [vmem:[#allocation2 + $0x8] sm:$0xff] %vm30_vm0, %v5831_v15 }
0x247a   :  { %5848 = dma.vmem_to_hbm [thread:$0]  %s5841_s8, 256, %s5843_s13, [#allocation3], %s6552_s14, %s6552_s14, %s6553_s15  }
0x247b   :  { %6543 = dma.done.wait [#allocation3], 256  }
0x247c   :  { %6544 = vsyncadd [#allocation3], 4294967040 }
0x247d   :  { %5865 = vsyncpa [#allocation3], 1 }

</bundles_post_ra>
